<compile_context>
chip_gen: v7x
topology: tpu7x:2x2x1
jax: 0.10.0
libtpu: 0.0.40
codegen_flags: <defaults>
</compile_context>

<pallas_src>
import math

import numpy as np
import jax
import jax.numpy as jnp
from jax.experimental import pallas as pl
from jax.experimental.pallas import tpu as pltpu

_NEG_SLOPE = 0.2
_VMEM_LIMIT = 48 * 1024 * 1024           # fits v5e/v6e (128 MiB) and v7x (64 MiB)
_FUSED_CONV_FOOT_LIMIT = 12 * 1024 * 1024  # per-step budget for the fused conv path


def _pick_tile(total, target):
    """Largest divisor of `total` <= target, preferring multiples of 8 (sublane).
    Falls back to the full extent (block == full dim is always legal)."""
    if total <= target:
        return total
    for t in range(int(target), 0, -1):
        if total % t == 0 and t % 8 == 0:
            return t
    return total


# -----------------------------------------------------------------------------
# Pallas kernels
# -----------------------------------------------------------------------------
def _make_conv_fused_kernel(kh, kw, ho, wo):
    """Per-image conv: build (Ho*Wo, KH*KW*Cin) patches in VMEM from static
    slices of the padded image block, one MXU dot, EqLR scale + LeakyReLU."""

    def kernel(x_ref, w_ref, scale_ref, o_ref):
        xp = x_ref[0]                                          # (Hp, Wp, Cin) bf16
        cin = xp.shape[-1]
        taps = [xp[ky:ky + ho, kx:kx + wo, :].reshape(ho * wo, cin)
                for ky in range(kh) for kx in range(kw)]
        xcol = jnp.concatenate(taps, axis=-1)                  # (Ho*Wo, KH*KW*Cin)
        acc = jnp.dot(xcol, w_ref[...], preferred_element_type=jnp.float32)
        y = acc * scale_ref[0]                                 # EqualizedLearningRateLayer
        y = jnp.where(y >= 0.0, y, _NEG_SLOPE * y)             # LeakyReLU(0.2)
        o_ref[...] = y[None].astype(o_ref.dtype)

    return kernel


def _make_matmul_eqlr_kernel(activation):
    """(TM, K) @ (K, TC) matmul + EqualizedLR scale + activation epilogue
    (fallback path for resolutions too large for the per-image fused kernel)."""
    assert activation in ("lrelu", "none", "sigmoid")

    def kernel(x_ref, w_ref, scale_ref, o_ref):
        acc = jnp.dot(x_ref[...], w_ref[...], preferred_element_type=jnp.float32)
        y = acc * scale_ref[0]
        if activation == "lrelu":
            y = jnp.where(y >= 0.0, y, _NEG_SLOPE * y)
        elif activation == "sigmoid":
            y = 1.0 / (1.0 + jnp.exp(-y))
        o_ref[...] = y.astype(o_ref.dtype)

    return kernel


def _rgb_kernel(x_ref, w_ref, scale_ref, o_ref):
    # FromRGB with a single input channel is an outer product -> VPU broadcast
    # multiply, no MXU pass.
    y = x_ref[...] * w_ref[...]                      # (tm,1)*(1,cout) -> (tm,cout)
    y = y * scale_ref[0]
    o_ref[...] = jnp.where(y >= 0.0, y, _NEG_SLOPE * y).astype(o_ref.dtype)


def _avgpool_kernel(x_ref, o_ref):
    # Input block (tb, 2, wo, 2*c): axis 1 holds the H pair, the lane halves
    # hold the W pair (arranged by a free host-side reshape).
    c = o_ref.shape[-1]
    x = x_ref[...]
    s = x[:, 0] + x[:, 1]                            # sum the two H rows
    o_ref[...] = (s[:, :, :c] + s[:, :, c:]) * 0.25  # sum the two W columns


def _mbstd_kernel(x_ref, o_ref):
    # Minibatch-stddev statistic: per-element std over batch, averaged over
    # all features / spatial locations -> single scalar.
    x = x_ref[...]                                   # (N, H*W*C)
    mean = jnp.mean(x, axis=0, keepdims=True)
    var = jnp.mean((x - mean) ** 2, axis=0, keepdims=True)
    std = jnp.sqrt(var + 1e-8)
    o_ref[...] = jnp.mean(std, keepdims=True)        # (1, 1)


def _make_head_kernel(is_sigmoid):
    """Fused: 4x4 valid conv (as (N, 16C)@(16C, C)) + EqLR + LReLU, then the
    final 1x1 conv (Cout=1) as a lane reduction + EqLR [+ sigmoid]."""

    def kernel(x_ref, w2_ref, w3_ref, s2_ref, s3_ref, o_ref):
        h = jnp.dot(x_ref[...], w2_ref[...], preferred_element_type=jnp.float32)
        h = h * s2_ref[0]
        h = jnp.where(h >= 0.0, h, _NEG_SLOPE * h)
        y = jnp.sum(h * w3_ref[...], axis=-1, keepdims=True) * s3_ref[0]
        if is_sigmoid:
            y = 1.0 / (1.0 + jnp.exp(-y))
        o_ref[...] = y.astype(o_ref.dtype)

    return kernel


# -----------------------------------------------------------------------------
# Layer wrappers (glue + pallas_call)
# -----------------------------------------------------------------------------
def conv2d_eqlr_im2col(x, w, scale, *, padding, activation):
    """Fallback conv path: host-side im2col -> tiled (M, K)@(K, Cout) matmul."""
    n, h, wdt, cin = x.shape
    kh, kw, _, cout = w.shape
    ho = h + 2 * padding - kh + 1
    wo = wdt + 2 * padding - kw + 1
    m = n * ho * wo
    k = kh * kw * cin

    xb = x.astype(jnp.bfloat16)
    if padding:
        xb = jnp.pad(xb, ((0, 0), (padding, padding), (padding, padding), (0, 0)))
    if kh == 1 and kw == 1:
        xcol = xb.reshape(m, cin)
    else:
        taps = [xb[:, ky:ky + ho, kx:kx + wo, :].reshape(m, cin)
                for ky in range(kh) for kx in range(kw)]
        xcol = jnp.concatenate(taps, axis=-1)            # (m, k), (ky,kx,cin) order
    wcol = w.reshape(k, cout).astype(jnp.bfloat16)       # same (ky,kx,cin) order

    tm = _pick_tile(m, max(256, min(2048, (4 << 20) // (2 * k))))
    tc = 256 if (cout > 256 and cout % 256 == 0) else cout
    grid = (m // tm, cout // tc)

    cost = pl.CostEstimate(
        flops=2 * m * k * cout,
        transcendentals=m * cout if activation == "sigmoid" else 0,
        bytes_accessed=xcol.size * 2 + wcol.size * 2 * grid[0] + m * cout * 4)

    out = pl.pallas_call(
        _make_matmul_eqlr_kernel(activation),
        out_shape=jax.ShapeDtypeStruct((m, cout), jnp.float32),
        grid=grid,
        in_specs=[
            pl.BlockSpec((tm, k), lambda i, j: (i, 0)),
            pl.BlockSpec((k, tc), lambda i, j: (0, j)),
            pl.BlockSpec(memory_space=pltpu.MemorySpace.SMEM),   # EqLR scale
        ],
        out_specs=pl.BlockSpec((tm, tc), lambda i, j: (i, j)),
        compiler_params=pltpu.CompilerParams(
            dimension_semantics=("parallel", "parallel"),
            vmem_limit_bytes=_VMEM_LIMIT),
        cost_estimate=cost,
    )(xcol, wcol, scale)
    return out.reshape(n, ho, wo, cout)


def conv3x3_eqlr_lrelu(x, w, scale):
    """Conv2d(3x3, stride 1, pad 1, bias=False) -> EqLR -> LeakyReLU.

    Preferred path: per-image fused kernel that builds the patch matrix in
    VMEM (no HBM im2col).  Falls back to the im2col matmul when one image's
    working set would not fit comfortably in VMEM."""
    n, h, wdt, cin = x.shape
    kh, kw, _, cout = w.shape
    assert (kh, kw) == (3, 3)
    ho, wo = h, wdt
    k = kh * kw * cin
    tc = 256 if (cout > 256 and cout % 256 == 0) else cout

    # rough per-grid-step VMEM footprint (double-buffered blocks + intermediates)
    foot = (2 * (h + 2) * (wdt + 2) * cin * 2     # padded image block
            + ho * wo * k * 2                     # in-VMEM patch matrix (bf16)
            + 2 * k * tc * 2                      # weight tile
            + 3 * ho * wo * tc * 4)               # f32 acc + output block
    if foot > _FUSED_CONV_FOOT_LIMIT:
        return conv2d_eqlr_im2col(x, w, scale, padding=1, activation="lrelu")

    xp = jnp.pad(x.astype(jnp.bfloat16), ((0, 0), (1, 1), (1, 1), (0, 0)))
    wcol = w.reshape(k, cout).astype(jnp.bfloat16)       # (ky,kx,cin) order
    grid = (n, cout // tc)

    cost = pl.CostEstimate(
        flops=2 * n * ho * wo * k * cout,
        transcendentals=0,
        bytes_accessed=xp.size * 2 * grid[1] + wcol.size * 2 * n + n * ho * wo * cout * 4)

    out = pl.pallas_call(
        _make_conv_fused_kernel(kh, kw, ho, wo),
        out_shape=jax.ShapeDtypeStruct((n, ho * wo, cout), jnp.float32),
        grid=grid,
        in_specs=[
            pl.BlockSpec((1, h + 2, wdt + 2, cin), lambda b, j: (b, 0, 0, 0)),
            pl.BlockSpec((k, tc), lambda b, j: (0, j)),
            pl.BlockSpec(memory_space=pltpu.MemorySpace.SMEM),   # EqLR scale
        ],
        out_specs=pl.BlockSpec((1, ho * wo, tc), lambda b, j: (b, 0, j)),
        compiler_params=pltpu.CompilerParams(
            dimension_semantics=("parallel", "parallel"),
            vmem_limit_bytes=_VMEM_LIMIT),
        cost_estimate=cost,
    )(xp, wcol, scale)
    return out.reshape(n, ho, wo, cout)


def from_rgb_eqlr(x, w, scale):
    """FromRGB: 1x1 conv with Cin=1 -> EqLR -> LeakyReLU, as a VPU kernel."""
    n, h, wdt, cin = x.shape
    assert cin == 1
    cout = w.shape[-1]
    m = n * h * wdt
    xf = x.reshape(m, 1).astype(jnp.float32)
    wf = w.reshape(1, cout).astype(jnp.float32)
    tm = _pick_tile(m, 1024)
    out = pl.pallas_call(
        _rgb_kernel,
        out_shape=jax.ShapeDtypeStruct((m, cout), jnp.float32),
        grid=(m // tm,),
        in_specs=[
            pl.BlockSpec((tm, 1), lambda i: (i, 0)),
            pl.BlockSpec((1, cout), lambda i: (0, 0)),
            pl.BlockSpec(memory_space=pltpu.MemorySpace.SMEM),
        ],
        out_specs=pl.BlockSpec((tm, cout), lambda i: (i, 0)),
        compiler_params=pltpu.CompilerParams(
            dimension_semantics=("parallel",),
            vmem_limit_bytes=_VMEM_LIMIT),
    )(xf, wf, scale)
    return out.reshape(n, h, wdt, cout)


def avg_pool_2x2(x):
    """nn.AvgPool2d(kernel_size=2, stride=2) on NHWC (exact division), tiled."""
    n, h, w, c = x.shape
    ho, wo = h // 2, w // 2
    xr = x.reshape(n * ho, 2, wo, 2 * c)                 # contiguous -> free reshape
    rows = n * ho
    tb = _pick_tile(rows, max(8, (4 << 20) // (16 * wo * c)))
    out = pl.pallas_call(
        _avgpool_kernel,
        out_shape=jax.ShapeDtypeStruct((rows, wo, c), jnp.float32),
        grid=(rows // tb,),
        in_specs=[pl.BlockSpec((tb, 2, wo, 2 * c), lambda i: (i, 0, 0, 0))],
        out_specs=pl.BlockSpec((tb, wo, c), lambda i: (i, 0, 0)),
        compiler_params=pltpu.CompilerParams(
            dimension_semantics=("parallel",),
            vmem_limit_bytes=_VMEM_LIMIT),
    )(xr)
    return out.reshape(n, ho, wo, c)


def minibatch_average_concat(x):
    """MiniBatchAverageLayer: append one channel holding the minibatch-stddev
    statistic (single scalar = mean over features/locations of the per-element
    std over the batch, per the PGGAN paper)."""
    # TODO(synk): MiniBatchAverageLayer source was not provided; biased variance
    # and the all-features reduction follow the common PGGAN implementation.
    n, h, w, c = x.shape
    stat = pl.pallas_call(
        _mbstd_kernel,
        out_shape=jax.ShapeDtypeStruct((1, 1), jnp.float32),
        in_specs=[pl.BlockSpec(memory_space=pltpu.MemorySpace.VMEM)],
        out_specs=pl.BlockSpec(memory_space=pltpu.MemorySpace.VMEM),
    )(x.reshape(n, h * w * c).astype(jnp.float32))
    inject = jnp.broadcast_to(stat[0, 0], (n, h, w, 1)).astype(x.dtype)
    return jnp.concatenate([x, inject], axis=-1)


def minibatch_head(x, p2, p3, *, is_sigmoid):
    """Fused Minibatch-block head: 4x4 valid conv + EqLR + LReLU + 1x1 conv
    (Cout=1) + EqLR [+ sigmoid] -> (N, 1, 1, 1)."""
    n, h, w, c = x.shape
    kh, kw, _, cout = p2["w"].shape
    assert (kh, kw) == (h, w)                            # 4x4 valid conv on 4x4 input
    xcol = x.reshape(n, h * w * c).astype(jnp.bfloat16)  # the whole image is the patch
    w2 = p2["w"].reshape(h * w * c, cout).astype(jnp.bfloat16)
    w3 = p3["w"].reshape(1, cout).astype(jnp.float32)
    cost = pl.CostEstimate(flops=2 * n * (h * w * c) * cout + 2 * n * cout,
                           transcendentals=n if is_sigmoid else 0,
                           bytes_accessed=xcol.size * 2 + w2.size * 2 + n * 4)
    out = pl.pallas_call(
        _make_head_kernel(is_sigmoid),
        out_shape=jax.ShapeDtypeStruct((n, 1), jnp.float32),
        in_specs=[
            pl.BlockSpec(memory_space=pltpu.MemorySpace.VMEM),
            pl.BlockSpec(memory_space=pltpu.MemorySpace.VMEM),
            pl.BlockSpec(memory_space=pltpu.MemorySpace.VMEM),
            pl.BlockSpec(memory_space=pltpu.MemorySpace.SMEM),
            pl.BlockSpec(memory_space=pltpu.MemorySpace.SMEM),
        ],
        out_specs=pl.BlockSpec(memory_space=pltpu.MemorySpace.VMEM),
        compiler_params=pltpu.CompilerParams(vmem_limit_bytes=_VMEM_LIMIT),
        cost_estimate=cost,
    )(xcol, w2, w3, p2["scale"], p3["scale"])
    return out.reshape(n, 1, 1, 1)


def _process_transition_nhwc(a, b):
    """HelpFunc.process_transition (glue, NHWC)."""
    an, ah, aw, ac = a.shape
    bn, bh, bw, bc = b.shape
    if ac > bc:
        a = a[..., :bc]
    if ah > bh:
        assert ah % bh == 0 and aw % bw == 0 and ah // bh == aw // bw
        ks = ah // bh
        a = a.reshape(an, bh, ks, bw, ks, a.shape[-1]).mean(axis=(2, 4))
    if ah < bh:
        assert bh % ah == 0 and bw % aw == 0 and bh // ah == bw // aw
        sf = bh // ah
        a = jnp.repeat(jnp.repeat(a, sf, axis=1), sf, axis=2)
    if a.shape[-1] < bc:
        z = jnp.zeros((an, bh, bw, bc - a.shape[-1]), a.dtype)
        a = jnp.concatenate([a, z], axis=-1)
    return a


# -----------------------------------------------------------------------------
# Parameter construction (deterministic, synthetic)
# -----------------------------------------------------------------------------
def _init_eqlr_conv(key, kh, kw, cin, cout):
    fan_in = kh * kw * cin
    raw = jax.random.normal(key, (kh, kw, cin, cout), jnp.float32) * math.sqrt(2.0 / fan_in)
    c = jnp.sqrt(jnp.mean(raw ** 2))
    # EqualizedLearningRateLayer: conv runs with w / c; activation rescaled by c.
    return {"w": (raw / c).astype(jnp.float32),
            "scale": jnp.reshape(c, (1,)).astype(jnp.float32)}


class DiscriminatorPallas:
    """PGGAN Discriminator, forward pass built from Pallas kernels."""

    def __init__(self, resolution, input_channel=3, fmap_base=2 ** 13,
                 fmap_decay=1.0, fmap_max=2 ** 9, is_sigmoid=False, *, key):
        self.input_channel = input_channel  # FromRGB hardcodes 1 input channel (as in the PyTorch code)
        self.is_sigmoid = is_sigmoid
        self.fmap_base = fmap_base
        self.fmap_decay = fmap_decay
        self.fmap_max = fmap_max
        pyramid = int(np.log2(resolution))
        self.resolution = 2 ** pyramid
        self.net_level_max = pyramid - 1

        self.lod_blocks = []
        self.rgb_blocks = []
        keys = iter(jax.random.split(key, 4 * self.net_level_max + 4))
        for level in range(self.net_level_max, 0, -1):
            in_ch = self._channels(level)
            out_ch = self._channels(level - 1)
            if level == 1:  # Minibatch block
                blk = {"type": "minibatch",
                       "conv1": _init_eqlr_conv(next(keys), 3, 3, in_ch + 1, out_ch),
                       "conv2": _init_eqlr_conv(next(keys), 4, 4, out_ch, out_ch),
                       "conv3": _init_eqlr_conv(next(keys), 1, 1, out_ch, 1)}
            else:           # DownSample block
                blk = {"type": "downsample",
                       "conv1": _init_eqlr_conv(next(keys), 3, 3, in_ch, out_ch),
                       "conv2": _init_eqlr_conv(next(keys), 3, 3, out_ch, out_ch)}
            self.lod_blocks.append(blk)
            self.rgb_blocks.append({"conv": _init_eqlr_conv(next(keys), 1, 1, 1, in_ch)})

        # net_config = (net_level_, net_status_, net_alpha_)
        self.net_level = self.net_level_max
        self.net_status = "stable"
        self.net_alpha = 1.0

    def _channels(self, level):
        return min(int(self.fmap_base / 2.0 ** (level * self.fmap_decay)), self.fmap_max)

    def _rgb(self, idx, x):
        p = self.rgb_blocks[idx]["conv"]
        return from_rgb_eqlr(x, p["w"], p["scale"])

    def _lod(self, idx, x):
        blk = self.lod_blocks[idx]
        if blk["type"] == "downsample":
            x = conv3x3_eqlr_lrelu(x, blk["conv1"]["w"], blk["conv1"]["scale"])
            x = conv3x3_eqlr_lrelu(x, blk["conv2"]["w"], blk["conv2"]["scale"])
            x = avg_pool_2x2(x)
        else:  # minibatch block
            x = minibatch_average_concat(x)
            x = conv3x3_eqlr_lrelu(x, blk["conv1"]["w"], blk["conv1"]["scale"])
            x = minibatch_head(x, blk["conv2"], blk["conv3"], is_sigmoid=self.is_sigmoid)
        return x

    def __call__(self, x_nchw):
        x = jnp.transpose(x_nchw.astype(jnp.float32), (0, 2, 3, 1))  # NCHW -> NHWC
        if self.net_status == "stable":
            cur = self.net_level_max - self.net_level - 1
            x = self._rgb(cur, x)
            for cursor in range(cur, self.net_level_max):
                x = self._lod(cursor, x)
        elif self.net_status == "fadein":
            pre = self.net_level_max - self.net_level
            cur = pre - 1
            pre_w, cur_w = self.net_alpha, 1.0 - self.net_alpha   # matches the PyTorch reference
            x_pre = self._rgb(pre, x)
            x_cur = self._rgb(cur, x)
            x_cur = self._lod(cur, x_cur)
            x = _process_transition_nhwc(x_pre, x_cur) * pre_w + x_cur * cur_w
            for cursor in range(cur + 1, self.net_level_max):
                x = self._lod(cursor, x)
        else:
            raise AttributeError("Please set the net_status: ['stable', 'fadein']")
        return jnp.transpose(x, (0, 3, 1, 2))  # back to NCHW


# -----------------------------------------------------------------------------
# Demo
# -----------------------------------------------------------------------------
if __name__ == "__main__":
    key = jax.random.PRNGKey(0)
    wkey, xkey = jax.random.split(key)

    # Small synthetic config: resolution 16 -> 3 LOD levels.
    # Channels per level: min(32 / 2**level, 16) -> [4, 8, 16].
    disc = DiscriminatorPallas(resolution=16, input_channel=3,
                               fmap_base=2 ** 5, fmap_decay=1.0, fmap_max=2 ** 4,
                               is_sigmoid=False, key=wkey)
    # Full-resolution stable configuration (net_config setter equivalent).
    disc.net_level = disc.net_level_max - 1
    disc.net_status = "stable"
    disc.net_alpha = 1.0

    # NCHW input; FromRGB blocks take a single input channel (per the module).
    x = jax.random.normal(xkey, (2, 1, 16, 16), dtype=jnp.float32)

    fwd = jax.jit(lambda inp: disc(inp))
    out = jax.block_until_ready(fwd(x))
    assert out.shape == (2, 1, 1, 1), out.shape
    assert bool(jnp.all(jnp.isfinite(out)))
    print("KERNEL_OK")
</pallas_src>

<mosaic_0001>
module attributes {stable_mosaic.version = 11 : i64} {
  func.func @_rgb_kernel(%arg0: i32, %arg1: memref<512x1xf32, #tpu.memory_space<vmem>>, %arg2: memref<1x4xf32, #tpu.memory_space<vmem>>, %arg3: memref<1xf32, #tpu.memory_space<smem>>, %arg4: memref<512x4xf32, #tpu.memory_space<vmem>>) attributes {dimension_semantics = [#tpu.dimension_semantics<parallel>], iteration_bounds = array<i64: 1>, scalar_prefetch = 0 : i64, scratch_operands = 0 : i64, tpu.core_type = #tpu.core_type<tc>, window_params = [{transform_indices = @transform_0, window_bounds = array<i64: 512, 1>}, {pipeline_mode = #tpu.pipeline_mode<synchronous>, transform_indices = @transform_1, window_bounds = array<i64: 1, 4>}, {transform_indices = @transform_2, window_bounds = array<i64: 1>}, {transform_indices = @transform_3, window_bounds = array<i64: 512, 4>}]} {
    %c0 = arith.constant 0 : index
    %c0_0 = arith.constant 0 : index
    %0 = vector.load %arg1[%c0, %c0_0] : memref<512x1xf32, #tpu.memory_space<vmem>>, vector<512x1xf32>
    %c0_1 = arith.constant 0 : index
    %c0_2 = arith.constant 0 : index
    %1 = vector.load %arg2[%c0_1, %c0_2] : memref<1x4xf32, #tpu.memory_space<vmem>>, vector<1x4xf32>
    %2 = vector.broadcast %0 : vector<512x1xf32> to vector<512x4xf32>
    %3 = vector.broadcast %1 : vector<1x4xf32> to vector<512x4xf32>
    %4 = arith.mulf %2, %3 : vector<512x4xf32>
    %c0_3 = arith.constant 0 : index
    %5 = memref.load %arg3[%c0_3] : memref<1xf32, #tpu.memory_space<smem>>
    %6 = vector.broadcast %5 : f32 to vector<512x4xf32>
    %7 = arith.mulf %4, %6 : vector<512x4xf32>
    %cst = arith.constant 0.000000e+00 : f32
    %8 = vector.broadcast %cst : f32 to vector<512x4xf32>
    %9 = arith.cmpf oge, %7, %8 : vector<512x4xf32>
    %cst_4 = arith.constant 2.000000e-01 : f32
    %10 = vector.broadcast %cst_4 : f32 to vector<512x4xf32>
    %11 = arith.mulf %10, %7 : vector<512x4xf32>
    %12 = arith.select %9, %7, %11 : vector<512x4xi1>, vector<512x4xf32>
    %c0_5 = arith.constant 0 : index
    %c0_6 = arith.constant 0 : index
    %13 = vector.load %arg4[%c0_5, %c0_6] : memref<512x4xf32, #tpu.memory_space<vmem>>, vector<512x4xf32>
    tpu.vector_store %arg4[%c0_5, %c0_6], %12 {strides = array<i32>} : memref<512x4xf32, #tpu.memory_space<vmem>>, vector<512x4xf32>,
    return
  }
  func.func @transform_0(%arg0: i32) -> (i32, i32) {
    %c0_i32 = arith.constant 0 : i32
    %c0_i32_0 = arith.constant 0 : i32
    return %arg0, %c0_i32 : i32, i32
  }
  func.func @transform_1(%arg0: i32) -> (i32, i32) {
    %c0_i32 = arith.constant 0 : i32
    %c0_i32_0 = arith.constant 0 : i32
    %c0_i32_1 = arith.constant 0 : i32
    return %c0_i32, %c0_i32_0 : i32, i32
  }
  func.func @transform_2(%arg0: i32) -> i32 {
    %c0_i32 = arith.constant 0 : i32
    %c0_i32_0 = arith.constant 0 : i32
    return %c0_i32 : i32
  }
  func.func @transform_3(%arg0: i32) -> (i32, i32) {
    %c0_i32 = arith.constant 0 : i32
    %c0_i32_0 = arith.constant 0 : i32
    return %arg0, %c0_i32 : i32, i32
  }
}

module attributes {stable_mosaic.version = 11 : i64} {
  func.func @kernel(%arg0: i32, %arg1: i32, %arg2: memref<1x18x18x4xbf16, #tpu.memory_space<vmem>>, %arg3: memref<36x8xbf16, #tpu.memory_space<vmem>>, %arg4: memref<1xf32, #tpu.memory_space<smem>>, %arg5: memref<1x256x8xf32, #tpu.memory_space<vmem>>) attributes {dimension_semantics = [#tpu.dimension_semantics<parallel>, #tpu.dimension_semantics<parallel>], iteration_bounds = array<i64: 2, 1>, scalar_prefetch = 0 : i64, scratch_operands = 0 : i64, tpu.core_type = #tpu.core_type<tc>, window_params = [{transform_indices = @transform_0, window_bounds = array<i64: 1, 18, 18, 4>}, {transform_indices = @transform_1, window_bounds = array<i64: 36, 8>}, {transform_indices = @transform_2, window_bounds = array<i64: 1>}, {transform_indices = @transform_3, window_bounds = array<i64: 1, 256, 8>}]} {
    %c0 = arith.constant 0 : index
    %c0_0 = arith.constant 0 : index
    %c0_1 = arith.constant 0 : index
    %c0_2 = arith.constant 0 : index
    %0 = vector.load %arg2[%c0, %c0_0, %c0_1, %c0_2] : memref<1x18x18x4xbf16, #tpu.memory_space<vmem>>, vector<1x18x18x4xbf16>
    %1 = vector.shape_cast %0 : vector<1x18x18x4xbf16> to vector<18x18x4xbf16>
    %2 = vector.extract_strided_slice %1 {offsets = [0, 0, 0], sizes = [16, 16, 4], strides = [1, 1, 1]} : vector<18x18x4xbf16> to vector<16x16x4xbf16>
    %3 = vector.shape_cast %2 : vector<16x16x4xbf16> to vector<256x4xbf16>
    %4 = vector.extract_strided_slice %1 {offsets = [0, 1, 0], sizes = [16, 16, 4], strides = [1, 1, 1]} : vector<18x18x4xbf16> to vector<16x16x4xbf16>
    %5 = vector.shape_cast %4 : vector<16x16x4xbf16> to vector<256x4xbf16>
    %6 = vector.extract_strided_slice %1 {offsets = [0, 2, 0], sizes = [16, 16, 4], strides = [1, 1, 1]} : vector<18x18x4xbf16> to vector<16x16x4xbf16>
    %7 = vector.shape_cast %6 : vector<16x16x4xbf16> to vector<256x4xbf16>
    %8 = vector.extract_strided_slice %1 {offsets = [1, 0, 0], sizes = [16, 16, 4], strides = [1, 1, 1]} : vector<18x18x4xbf16> to vector<16x16x4xbf16>
    %9 = vector.shape_cast %8 : vector<16x16x4xbf16> to vector<256x4xbf16>
    %10 = vector.extract_strided_slice %1 {offsets = [1, 1, 0], sizes = [16, 16, 4], strides = [1, 1, 1]} : vector<18x18x4xbf16> to vector<16x16x4xbf16>
    %11 = vector.shape_cast %10 : vector<16x16x4xbf16> to vector<256x4xbf16>
    %12 = vector.extract_strided_slice %1 {offsets = [1, 2, 0], sizes = [16, 16, 4], strides = [1, 1, 1]} : vector<18x18x4xbf16> to vector<16x16x4xbf16>
    %13 = vector.shape_cast %12 : vector<16x16x4xbf16> to vector<256x4xbf16>
    %14 = vector.extract_strided_slice %1 {offsets = [2, 0, 0], sizes = [16, 16, 4], strides = [1, 1, 1]} : vector<18x18x4xbf16> to vector<16x16x4xbf16>
    %15 = vector.shape_cast %14 : vector<16x16x4xbf16> to vector<256x4xbf16>
    %16 = vector.extract_strided_slice %1 {offsets = [2, 1, 0], sizes = [16, 16, 4], strides = [1, 1, 1]} : vector<18x18x4xbf16> to vector<16x16x4xbf16>
    %17 = vector.shape_cast %16 : vector<16x16x4xbf16> to vector<256x4xbf16>
    %18 = vector.extract_strided_slice %1 {offsets = [2, 2, 0], sizes = [16, 16, 4], strides = [1, 1, 1]} : vector<18x18x4xbf16> to vector<16x16x4xbf16>
    %19 = vector.shape_cast %18 : vector<16x16x4xbf16> to vector<256x4xbf16>
    %20 = tpu.concatenate %3, %5, %7, %9, %11, %13, %15, %17, %19 in 1 : vector<256x4xbf16>, vector<256x4xbf16>, vector<256x4xbf16>, vector<256x4xbf16>, vector<256x4xbf16>, vector<256x4xbf16>, vector<256x4xbf16>, vector<256x4xbf16>, vector<256x4xbf16> -> vector<256x36xbf16>
    %c0_3 = arith.constant 0 : index
    %c0_4 = arith.constant 0 : index
    %21 = vector.load %arg3[%c0_3, %c0_4] : memref<36x8xbf16, #tpu.memory_space<vmem>>, vector<36x8xbf16>
    %cst = arith.constant dense<0.000000e+00> : vector<256x8xf32>
    %22 = tpu.matmul %20, %21, %cst {dimension_numbers = #tpu.dot_dimension_numbers<[1], [0], [0], [1], [0, 0, 1, 1], [], []>} : vector<256x36xbf16>, vector<36x8xbf16>, vector<256x8xf32> -> vector<256x8xf32>
    %c0_5 = arith.constant 0 : index
    %23 = memref.load %arg4[%c0_5] : memref<1xf32, #tpu.memory_space<smem>>
    %24 = vector.broadcast %23 : f32 to vector<256x8xf32>
    %25 = arith.mulf %22, %24 : vector<256x8xf32>
    %cst_6 = arith.constant 0.000000e+00 : f32
    %26 = vector.broadcast %cst_6 : f32 to vector<256x8xf32>
    %27 = arith.cmpf oge, %25, %26 : vector<256x8xf32>
    %cst_7 = arith.constant 2.000000e-01 : f32
    %28 = vector.broadcast %cst_7 : f32 to vector<256x8xf32>
    %29 = arith.mulf %28, %25 : vector<256x8xf32>
    %30 = arith.select %27, %25, %29 : vector<256x8xi1>, vector<256x8xf32>
    %31 = vector.shape_cast %30 : vector<256x8xf32> to vector<1x256x8xf32>
    %c0_8 = arith.constant 0 : index
    %c0_9 = arith.constant 0 : index
    %c0_10 = arith.constant 0 : index
    %32 = vector.load %arg5[%c0_8, %c0_9, %c0_10] : memref<1x256x8xf32, #tpu.memory_space<vmem>>, vector<1x256x8xf32>
    tpu.vector_store %arg5[%c0_8, %c0_9, %c0_10], %31 {strides = array<i32>} : memref<1x256x8xf32, #tpu.memory_space<vmem>>, vector<1x256x8xf32>,
    return
  }
  func.func @transform_0(%arg0: i32, %arg1: i32) -> (i32, i32, i32, i32) {
    %c0_i32 = arith.constant 0 : i32
    %c0_i32_0 = arith.constant 0 : i32
    %c0_i32_1 = arith.constant 0 : i32
    %c0_i32_2 = arith.constant 0 : i32
    return %arg0, %c0_i32, %c0_i32_0, %c0_i32_1 : i32, i32, i32, i32
  }
  func.func @transform_1(%arg0: i32, %arg1: i32) -> (i32, i32) {
    %c0_i32 = arith.constant 0 : i32
    %c0_i32_0 = arith.constant 0 : i32
    return %c0_i32, %arg1 : i32, i32
  }
  func.func @transform_2(%arg0: i32, %arg1: i32) -> i32 {
    %c0_i32 = arith.constant 0 : i32
    %c0_i32_0 = arith.constant 0 : i32
    return %c0_i32 : i32
  }
  func.func @transform_3(%arg0: i32, %arg1: i32) -> (i32, i32, i32) {
    %c0_i32 = arith.constant 0 : i32
    %c0_i32_0 = arith.constant 0 : i32
    return %arg0, %c0_i32, %arg1 : i32, i32, i32
  }
}

module attributes {stable_mosaic.version = 11 : i64} {
  func.func @kernel(%arg0: i32, %arg1: i32, %arg2: memref<1x18x18x8xbf16, #tpu.memory_space<vmem>>, %arg3: memref<72x8xbf16, #tpu.memory_space<vmem>>, %arg4: memref<1xf32, #tpu.memory_space<smem>>, %arg5: memref<1x256x8xf32, #tpu.memory_space<vmem>>) attributes {dimension_semantics = [#tpu.dimension_semantics<parallel>, #tpu.dimension_semantics<parallel>], iteration_bounds = array<i64: 2, 1>, scalar_prefetch = 0 : i64, scratch_operands = 0 : i64, tpu.core_type = #tpu.core_type<tc>, window_params = [{transform_indices = @transform_0, window_bounds = array<i64: 1, 18, 18, 8>}, {transform_indices = @transform_1, window_bounds = array<i64: 72, 8>}, {transform_indices = @transform_2, window_bounds = array<i64: 1>}, {transform_indices = @transform_3, window_bounds = array<i64: 1, 256, 8>}]} {
    %c0 = arith.constant 0 : index
    %c0_0 = arith.constant 0 : index
    %c0_1 = arith.constant 0 : index
    %c0_2 = arith.constant 0 : index
    %0 = vector.load %arg2[%c0, %c0_0, %c0_1, %c0_2] : memref<1x18x18x8xbf16, #tpu.memory_space<vmem>>, vector<1x18x18x8xbf16>
    %1 = vector.shape_cast %0 : vector<1x18x18x8xbf16> to vector<18x18x8xbf16>
    %2 = vector.extract_strided_slice %1 {offsets = [0, 0, 0], sizes = [16, 16, 8], strides = [1, 1, 1]} : vector<18x18x8xbf16> to vector<16x16x8xbf16>
    %3 = vector.shape_cast %2 : vector<16x16x8xbf16> to vector<256x8xbf16>
    %4 = vector.extract_strided_slice %1 {offsets = [0, 1, 0], sizes = [16, 16, 8], strides = [1, 1, 1]} : vector<18x18x8xbf16> to vector<16x16x8xbf16>
    %5 = vector.shape_cast %4 : vector<16x16x8xbf16> to vector<256x8xbf16>
    %6 = vector.extract_strided_slice %1 {offsets = [0, 2, 0], sizes = [16, 16, 8], strides = [1, 1, 1]} : vector<18x18x8xbf16> to vector<16x16x8xbf16>
    %7 = vector.shape_cast %6 : vector<16x16x8xbf16> to vector<256x8xbf16>
    %8 = vector.extract_strided_slice %1 {offsets = [1, 0, 0], sizes = [16, 16, 8], strides = [1, 1, 1]} : vector<18x18x8xbf16> to vector<16x16x8xbf16>
    %9 = vector.shape_cast %8 : vector<16x16x8xbf16> to vector<256x8xbf16>
    %10 = vector.extract_strided_slice %1 {offsets = [1, 1, 0], sizes = [16, 16, 8], strides = [1, 1, 1]} : vector<18x18x8xbf16> to vector<16x16x8xbf16>
    %11 = vector.shape_cast %10 : vector<16x16x8xbf16> to vector<256x8xbf16>
    %12 = vector.extract_strided_slice %1 {offsets = [1, 2, 0], sizes = [16, 16, 8], strides = [1, 1, 1]} : vector<18x18x8xbf16> to vector<16x16x8xbf16>
    %13 = vector.shape_cast %12 : vector<16x16x8xbf16> to vector<256x8xbf16>
    %14 = vector.extract_strided_slice %1 {offsets = [2, 0, 0], sizes = [16, 16, 8], strides = [1, 1, 1]} : vector<18x18x8xbf16> to vector<16x16x8xbf16>
    %15 = vector.shape_cast %14 : vector<16x16x8xbf16> to vector<256x8xbf16>
    %16 = vector.extract_strided_slice %1 {offsets = [2, 1, 0], sizes = [16, 16, 8], strides = [1, 1, 1]} : vector<18x18x8xbf16> to vector<16x16x8xbf16>
    %17 = vector.shape_cast %16 : vector<16x16x8xbf16> to vector<256x8xbf16>
    %18 = vector.extract_strided_slice %1 {offsets = [2, 2, 0], sizes = [16, 16, 8], strides = [1, 1, 1]} : vector<18x18x8xbf16> to vector<16x16x8xbf16>
    %19 = vector.shape_cast %18 : vector<16x16x8xbf16> to vector<256x8xbf16>
    %20 = tpu.concatenate %3, %5, %7, %9, %11, %13, %15, %17, %19 in 1 : vector<256x8xbf16>, vector<256x8xbf16>, vector<256x8xbf16>, vector<256x8xbf16>, vector<256x8xbf16>, vector<256x8xbf16>, vector<256x8xbf16>, vector<256x8xbf16>, vector<256x8xbf16> -> vector<256x72xbf16>
    %c0_3 = arith.constant 0 : index
    %c0_4 = arith.constant 0 : index
    %21 = vector.load %arg3[%c0_3, %c0_4] : memref<72x8xbf16, #tpu.memory_space<vmem>>, vector<72x8xbf16>
    %cst = arith.constant dense<0.000000e+00> : vector<256x8xf32>
    %22 = tpu.matmul %20, %21, %cst {dimension_numbers = #tpu.dot_dimension_numbers<[1], [0], [0], [1], [0, 0, 1, 1], [], []>} : vector<256x72xbf16>, vector<72x8xbf16>, vector<256x8xf32> -> vector<256x8xf32>
    %c0_5 = arith.constant 0 : index
    %23 = memref.load %arg4[%c0_5] : memref<1xf32, #tpu.memory_space<smem>>
    %24 = vector.broadcast %23 : f32 to vector<256x8xf32>
    %25 = arith.mulf %22, %24 : vector<256x8xf32>
    %cst_6 = arith.constant 0.000000e+00 : f32
    %26 = vector.broadcast %cst_6 : f32 to vector<256x8xf32>
    %27 = arith.cmpf oge, %25, %26 : vector<256x8xf32>
    %cst_7 = arith.constant 2.000000e-01 : f32
    %28 = vector.broadcast %cst_7 : f32 to vector<256x8xf32>
    %29 = arith.mulf %28, %25 : vector<256x8xf32>
    %30 = arith.select %27, %25, %29 : vector<256x8xi1>, vector<256x8xf32>
    %31 = vector.shape_cast %30 : vector<256x8xf32> to vector<1x256x8xf32>
    %c0_8 = arith.constant 0 : index
    %c0_9 = arith.constant 0 : index
    %c0_10 = arith.constant 0 : index
    %32 = vector.load %arg5[%c0_8, %c0_9, %c0_10] : memref<1x256x8xf32, #tpu.memory_space<vmem>>, vector<1x256x8xf32>
    tpu.vector_store %arg5[%c0_8, %c0_9, %c0_10], %31 {strides = array<i32>} : memref<1x256x8xf32, #tpu.memory_space<vmem>>, vector<1x256x8xf32>,
    return
  }
  func.func @transform_0(%arg0: i32, %arg1: i32) -> (i32, i32, i32, i32) {
    %c0_i32 = arith.constant 0 : i32
    %c0_i32_0 = arith.constant 0 : i32
    %c0_i32_1 = arith.constant 0 : i32
    %c0_i32_2 = arith.constant 0 : i32
    return %arg0, %c0_i32, %c0_i32_0, %c0_i32_1 : i32, i32, i32, i32
  }
  func.func @transform_1(%arg0: i32, %arg1: i32) -> (i32, i32) {
    %c0_i32 = arith.constant 0 : i32
    %c0_i32_0 = arith.constant 0 : i32
    return %c0_i32, %arg1 : i32, i32
  }
  func.func @transform_2(%arg0: i32, %arg1: i32) -> i32 {
    %c0_i32 = arith.constant 0 : i32
    %c0_i32_0 = arith.constant 0 : i32
    return %c0_i32 : i32
  }
  func.func @transform_3(%arg0: i32, %arg1: i32) -> (i32, i32, i32) {
    %c0_i32 = arith.constant 0 : i32
    %c0_i32_0 = arith.constant 0 : i32
    return %arg0, %c0_i32, %arg1 : i32, i32, i32
  }
}

module attributes {stable_mosaic.version = 11 : i64} {
  func.func @_avgpool_kernel(%arg0: i32, %arg1: memref<16x2x8x16xf32, #tpu.memory_space<vmem>>, %arg2: memref<16x8x8xf32, #tpu.memory_space<vmem>>) attributes {dimension_semantics = [#tpu.dimension_semantics<parallel>], iteration_bounds = array<i64: 1>, scalar_prefetch = 0 : i64, scratch_operands = 0 : i64, tpu.core_type = #tpu.core_type<tc>, window_params = [{transform_indices = @transform_0, window_bounds = array<i64: 16, 2, 8, 16>}, {transform_indices = @transform_1, window_bounds = array<i64: 16, 8, 8>}]} {
    %c0 = arith.constant 0 : index
    %c0_0 = arith.constant 0 : index
    %c0_1 = arith.constant 0 : index
    %c0_2 = arith.constant 0 : index
    %0 = vector.load %arg1[%c0, %c0_0, %c0_1, %c0_2] : memref<16x2x8x16xf32, #tpu.memory_space<vmem>>, vector<16x2x8x16xf32>
    %1 = vector.extract_strided_slice %0 {offsets = [0, 0, 0, 0], sizes = [16, 1, 8, 16], strides = [1, 1, 1, 1]} : vector<16x2x8x16xf32> to vector<16x1x8x16xf32>
    %2 = vector.shape_cast %1 : vector<16x1x8x16xf32> to vector<16x8x16xf32>
    %3 = vector.extract_strided_slice %0 {offsets = [0, 1, 0, 0], sizes = [16, 1, 8, 16], strides = [1, 1, 1, 1]} : vector<16x2x8x16xf32> to vector<16x1x8x16xf32>
    %4 = vector.shape_cast %3 : vector<16x1x8x16xf32> to vector<16x8x16xf32>
    %5 = arith.addf %2, %4 : vector<16x8x16xf32>
    %6 = vector.extract_strided_slice %5 {offsets = [0, 0, 0], sizes = [16, 8, 8], strides = [1, 1, 1]} : vector<16x8x16xf32> to vector<16x8x8xf32>
    %7 = vector.extract_strided_slice %5 {offsets = [0, 0, 8], sizes = [16, 8, 8], strides = [1, 1, 1]} : vector<16x8x16xf32> to vector<16x8x8xf32>
    %8 = arith.addf %6, %7 : vector<16x8x8xf32>
    %cst = arith.constant 2.500000e-01 : f32
    %9 = vector.broadcast %cst : f32 to vector<16x8x8xf32>
    %10 = arith.mulf %8, %9 : vector<16x8x8xf32>
    %c0_3 = arith.constant 0 : index
    %c0_4 = arith.constant 0 : index
    %c0_5 = arith.constant 0 : index
    %11 = vector.load %arg2[%c0_3, %c0_4, %c0_5] : memref<16x8x8xf32, #tpu.memory_space<vmem>>, vector<16x8x8xf32>
    tpu.vector_store %arg2[%c0_3, %c0_4, %c0_5], %10 {strides = array<i32>} : memref<16x8x8xf32, #tpu.memory_space<vmem>>, vector<16x8x8xf32>,
    return
  }
  func.func @transform_0(%arg0: i32) -> (i32, i32, i32, i32) {
    %c0_i32 = arith.constant 0 : i32
    %c0_i32_0 = arith.constant 0 : i32
    %c0_i32_1 = arith.constant 0 : i32
    %c0_i32_2 = arith.constant 0 : i32
    return %arg0, %c0_i32, %c0_i32_0, %c0_i32_1 : i32, i32, i32, i32
  }
  func.func @transform_1(%arg0: i32) -> (i32, i32, i32) {
    %c0_i32 = arith.constant 0 : i32
    %c0_i32_0 = arith.constant 0 : i32
    %c0_i32_1 = arith.constant 0 : i32
    return %arg0, %c0_i32, %c0_i32_0 : i32, i32, i32
  }
}

module attributes {stable_mosaic.version = 11 : i64} {
  func.func @kernel(%arg0: i32, %arg1: i32, %arg2: memref<1x10x10x8xbf16, #tpu.memory_space<vmem>>, %arg3: memref<72x16xbf16, #tpu.memory_space<vmem>>, %arg4: memref<1xf32, #tpu.memory_space<smem>>, %arg5: memref<1x64x16xf32, #tpu.memory_space<vmem>>) attributes {dimension_semantics = [#tpu.dimension_semantics<parallel>, #tpu.dimension_semantics<parallel>], iteration_bounds = array<i64: 2, 1>, scalar_prefetch = 0 : i64, scratch_operands = 0 : i64, tpu.core_type = #tpu.core_type<tc>, window_params = [{transform_indices = @transform_0, window_bounds = array<i64: 1, 10, 10, 8>}, {transform_indices = @transform_1, window_bounds = array<i64: 72, 16>}, {transform_indices = @transform_2, window_bounds = array<i64: 1>}, {transform_indices = @transform_3, window_bounds = array<i64: 1, 64, 16>}]} {
    %c0 = arith.constant 0 : index
    %c0_0 = arith.constant 0 : index
    %c0_1 = arith.constant 0 : index
    %c0_2 = arith.constant 0 : index
    %0 = vector.load %arg2[%c0, %c0_0, %c0_1, %c0_2] : memref<1x10x10x8xbf16, #tpu.memory_space<vmem>>, vector<1x10x10x8xbf16>
    %1 = vector.shape_cast %0 : vector<1x10x10x8xbf16> to vector<10x10x8xbf16>
    %2 = vector.extract_strided_slice %1 {offsets = [0, 0, 0], sizes = [8, 8, 8], strides = [1, 1, 1]} : vector<10x10x8xbf16> to vector<8x8x8xbf16>
    %3 = vector.shape_cast %2 : vector<8x8x8xbf16> to vector<64x8xbf16>
    %4 = vector.extract_strided_slice %1 {offsets = [0, 1, 0], sizes = [8, 8, 8], strides = [1, 1, 1]} : vector<10x10x8xbf16> to vector<8x8x8xbf16>
    %5 = vector.shape_cast %4 : vector<8x8x8xbf16> to vector<64x8xbf16>
    %6 = vector.extract_strided_slice %1 {offsets = [0, 2, 0], sizes = [8, 8, 8], strides = [1, 1, 1]} : vector<10x10x8xbf16> to vector<8x8x8xbf16>
    %7 = vector.shape_cast %6 : vector<8x8x8xbf16> to vector<64x8xbf16>
    %8 = vector.extract_strided_slice %1 {offsets = [1, 0, 0], sizes = [8, 8, 8], strides = [1, 1, 1]} : vector<10x10x8xbf16> to vector<8x8x8xbf16>
    %9 = vector.shape_cast %8 : vector<8x8x8xbf16> to vector<64x8xbf16>
    %10 = vector.extract_strided_slice %1 {offsets = [1, 1, 0], sizes = [8, 8, 8], strides = [1, 1, 1]} : vector<10x10x8xbf16> to vector<8x8x8xbf16>
    %11 = vector.shape_cast %10 : vector<8x8x8xbf16> to vector<64x8xbf16>
    %12 = vector.extract_strided_slice %1 {offsets = [1, 2, 0], sizes = [8, 8, 8], strides = [1, 1, 1]} : vector<10x10x8xbf16> to vector<8x8x8xbf16>
    %13 = vector.shape_cast %12 : vector<8x8x8xbf16> to vector<64x8xbf16>
    %14 = vector.extract_strided_slice %1 {offsets = [2, 0, 0], sizes = [8, 8, 8], strides = [1, 1, 1]} : vector<10x10x8xbf16> to vector<8x8x8xbf16>
    %15 = vector.shape_cast %14 : vector<8x8x8xbf16> to vector<64x8xbf16>
    %16 = vector.extract_strided_slice %1 {offsets = [2, 1, 0], sizes = [8, 8, 8], strides = [1, 1, 1]} : vector<10x10x8xbf16> to vector<8x8x8xbf16>
    %17 = vector.shape_cast %16 : vector<8x8x8xbf16> to vector<64x8xbf16>
    %18 = vector.extract_strided_slice %1 {offsets = [2, 2, 0], sizes = [8, 8, 8], strides = [1, 1, 1]} : vector<10x10x8xbf16> to vector<8x8x8xbf16>
    %19 = vector.shape_cast %18 : vector<8x8x8xbf16> to vector<64x8xbf16>
    %20 = tpu.concatenate %3, %5, %7, %9, %11, %13, %15, %17, %19 in 1 : vector<64x8xbf16>, vector<64x8xbf16>, vector<64x8xbf16>, vector<64x8xbf16>, vector<64x8xbf16>, vector<64x8xbf16>, vector<64x8xbf16>, vector<64x8xbf16>, vector<64x8xbf16> -> vector<64x72xbf16>
    %c0_3 = arith.constant 0 : index
    %c0_4 = arith.constant 0 : index
    %21 = vector.load %arg3[%c0_3, %c0_4] : memref<72x16xbf16, #tpu.memory_space<vmem>>, vector<72x16xbf16>
    %cst = arith.constant dense<0.000000e+00> : vector<64x16xf32>
    %22 = tpu.matmul %20, %21, %cst {dimension_numbers = #tpu.dot_dimension_numbers<[1], [0], [0], [1], [0, 0, 1, 1], [], []>} : vector<64x72xbf16>, vector<72x16xbf16>, vector<64x16xf32> -> vector<64x16xf32>
    %c0_5 = arith.constant 0 : index
    %23 = memref.load %arg4[%c0_5] : memref<1xf32, #tpu.memory_space<smem>>
    %24 = vector.broadcast %23 : f32 to vector<64x16xf32>
    %25 = arith.mulf %22, %24 : vector<64x16xf32>
    %cst_6 = arith.constant 0.000000e+00 : f32
    %26 = vector.broadcast %cst_6 : f32 to vector<64x16xf32>
    %27 = arith.cmpf oge, %25, %26 : vector<64x16xf32>
    %cst_7 = arith.constant 2.000000e-01 : f32
    %28 = vector.broadcast %cst_7 : f32 to vector<64x16xf32>
    %29 = arith.mulf %28, %25 : vector<64x16xf32>
    %30 = arith.select %27, %25, %29 : vector<64x16xi1>, vector<64x16xf32>
    %31 = vector.shape_cast %30 : vector<64x16xf32> to vector<1x64x16xf32>
    %c0_8 = arith.constant 0 : index
    %c0_9 = arith.constant 0 : index
    %c0_10 = arith.constant 0 : index
    %32 = vector.load %arg5[%c0_8, %c0_9, %c0_10] : memref<1x64x16xf32, #tpu.memory_space<vmem>>, vector<1x64x16xf32>
    tpu.vector_store %arg5[%c0_8, %c0_9, %c0_10], %31 {strides = array<i32>} : memref<1x64x16xf32, #tpu.memory_space<vmem>>, vector<1x64x16xf32>,
    return
  }
  func.func @transform_0(%arg0: i32, %arg1: i32) -> (i32, i32, i32, i32) {
    %c0_i32 = arith.constant 0 : i32
    %c0_i32_0 = arith.constant 0 : i32
    %c0_i32_1 = arith.constant 0 : i32
    %c0_i32_2 = arith.constant 0 : i32
    return %arg0, %c0_i32, %c0_i32_0, %c0_i32_1 : i32, i32, i32, i32
  }
  func.func @transform_1(%arg0: i32, %arg1: i32) -> (i32, i32) {
    %c0_i32 = arith.constant 0 : i32
    %c0_i32_0 = arith.constant 0 : i32
    return %c0_i32, %arg1 : i32, i32
  }
  func.func @transform_2(%arg0: i32, %arg1: i32) -> i32 {
    %c0_i32 = arith.constant 0 : i32
    %c0_i32_0 = arith.constant 0 : i32
    return %c0_i32 : i32
  }
  func.func @transform_3(%arg0: i32, %arg1: i32) -> (i32, i32, i32) {
    %c0_i32 = arith.constant 0 : i32
    %c0_i32_0 = arith.constant 0 : i32
    return %arg0, %c0_i32, %arg1 : i32, i32, i32
  }
}

module attributes {stable_mosaic.version = 11 : i64} {
  func.func @kernel(%arg0: i32, %arg1: i32, %arg2: memref<1x10x10x16xbf16, #tpu.memory_space<vmem>>, %arg3: memref<144x16xbf16, #tpu.memory_space<vmem>>, %arg4: memref<1xf32, #tpu.memory_space<smem>>, %arg5: memref<1x64x16xf32, #tpu.memory_space<vmem>>) attributes {dimension_semantics = [#tpu.dimension_semantics<parallel>, #tpu.dimension_semantics<parallel>], iteration_bounds = array<i64: 2, 1>, scalar_prefetch = 0 : i64, scratch_operands = 0 : i64, tpu.core_type = #tpu.core_type<tc>, window_params = [{transform_indices = @transform_0, window_bounds = array<i64: 1, 10, 10, 16>}, {transform_indices = @transform_1, window_bounds = array<i64: 144, 16>}, {transform_indices = @transform_2, window_bounds = array<i64: 1>}, {transform_indices = @transform_3, window_bounds = array<i64: 1, 64, 16>}]} {
    %c0 = arith.constant 0 : index
    %c0_0 = arith.constant 0 : index
    %c0_1 = arith.constant 0 : index
    %c0_2 = arith.constant 0 : index
    %0 = vector.load %arg2[%c0, %c0_0, %c0_1, %c0_2] : memref<1x10x10x16xbf16, #tpu.memory_space<vmem>>, vector<1x10x10x16xbf16>
    %1 = vector.shape_cast %0 : vector<1x10x10x16xbf16> to vector<10x10x16xbf16>
    %2 = vector.extract_strided_slice %1 {offsets = [0, 0, 0], sizes = [8, 8, 16], strides = [1, 1, 1]} : vector<10x10x16xbf16> to vector<8x8x16xbf16>
    %3 = vector.shape_cast %2 : vector<8x8x16xbf16> to vector<64x16xbf16>
    %4 = vector.extract_strided_slice %1 {offsets = [0, 1, 0], sizes = [8, 8, 16], strides = [1, 1, 1]} : vector<10x10x16xbf16> to vector<8x8x16xbf16>
    %5 = vector.shape_cast %4 : vector<8x8x16xbf16> to vector<64x16xbf16>
    %6 = vector.extract_strided_slice %1 {offsets = [0, 2, 0], sizes = [8, 8, 16], strides = [1, 1, 1]} : vector<10x10x16xbf16> to vector<8x8x16xbf16>
    %7 = vector.shape_cast %6 : vector<8x8x16xbf16> to vector<64x16xbf16>
    %8 = vector.extract_strided_slice %1 {offsets = [1, 0, 0], sizes = [8, 8, 16], strides = [1, 1, 1]} : vector<10x10x16xbf16> to vector<8x8x16xbf16>
    %9 = vector.shape_cast %8 : vector<8x8x16xbf16> to vector<64x16xbf16>
    %10 = vector.extract_strided_slice %1 {offsets = [1, 1, 0], sizes = [8, 8, 16], strides = [1, 1, 1]} : vector<10x10x16xbf16> to vector<8x8x16xbf16>
    %11 = vector.shape_cast %10 : vector<8x8x16xbf16> to vector<64x16xbf16>
    %12 = vector.extract_strided_slice %1 {offsets = [1, 2, 0], sizes = [8, 8, 16], strides = [1, 1, 1]} : vector<10x10x16xbf16> to vector<8x8x16xbf16>
    %13 = vector.shape_cast %12 : vector<8x8x16xbf16> to vector<64x16xbf16>
    %14 = vector.extract_strided_slice %1 {offsets = [2, 0, 0], sizes = [8, 8, 16], strides = [1, 1, 1]} : vector<10x10x16xbf16> to vector<8x8x16xbf16>
    %15 = vector.shape_cast %14 : vector<8x8x16xbf16> to vector<64x16xbf16>
    %16 = vector.extract_strided_slice %1 {offsets = [2, 1, 0], sizes = [8, 8, 16], strides = [1, 1, 1]} : vector<10x10x16xbf16> to vector<8x8x16xbf16>
    %17 = vector.shape_cast %16 : vector<8x8x16xbf16> to vector<64x16xbf16>
    %18 = vector.extract_strided_slice %1 {offsets = [2, 2, 0], sizes = [8, 8, 16], strides = [1, 1, 1]} : vector<10x10x16xbf16> to vector<8x8x16xbf16>
    %19 = vector.shape_cast %18 : vector<8x8x16xbf16> to vector<64x16xbf16>
    %20 = tpu.concatenate %3, %5, %7, %9, %11, %13, %15, %17, %19 in 1 : vector<64x16xbf16>, vector<64x16xbf16>, vector<64x16xbf16>, vector<64x16xbf16>, vector<64x16xbf16>, vector<64x16xbf16>, vector<64x16xbf16>, vector<64x16xbf16>, vector<64x16xbf16> -> vector<64x144xbf16>
    %c0_3 = arith.constant 0 : index
    %c0_4 = arith.constant 0 : index
    %21 = vector.load %arg3[%c0_3, %c0_4] : memref<144x16xbf16, #tpu.memory_space<vmem>>, vector<144x16xbf16>
    %cst = arith.constant dense<0.000000e+00> : vector<64x16xf32>
    %22 = tpu.matmul %20, %21, %cst {dimension_numbers = #tpu.dot_dimension_numbers<[1], [0], [0], [1], [0, 0, 1, 1], [], []>} : vector<64x144xbf16>, vector<144x16xbf16>, vector<64x16xf32> -> vector<64x16xf32>
    %c0_5 = arith.constant 0 : index
    %23 = memref.load %arg4[%c0_5] : memref<1xf32, #tpu.memory_space<smem>>
    %24 = vector.broadcast %23 : f32 to vector<64x16xf32>
    %25 = arith.mulf %22, %24 : vector<64x16xf32>
    %cst_6 = arith.constant 0.000000e+00 : f32
    %26 = vector.broadcast %cst_6 : f32 to vector<64x16xf32>
    %27 = arith.cmpf oge, %25, %26 : vector<64x16xf32>
    %cst_7 = arith.constant 2.000000e-01 : f32
    %28 = vector.broadcast %cst_7 : f32 to vector<64x16xf32>
    %29 = arith.mulf %28, %25 : vector<64x16xf32>
    %30 = arith.select %27, %25, %29 : vector<64x16xi1>, vector<64x16xf32>
    %31 = vector.shape_cast %30 : vector<64x16xf32> to vector<1x64x16xf32>
    %c0_8 = arith.constant 0 : index
    %c0_9 = arith.constant 0 : index
    %c0_10 = arith.constant 0 : index
    %32 = vector.load %arg5[%c0_8, %c0_9, %c0_10] : memref<1x64x16xf32, #tpu.memory_space<vmem>>, vector<1x64x16xf32>
    tpu.vector_store %arg5[%c0_8, %c0_9, %c0_10], %31 {strides = array<i32>} : memref<1x64x16xf32, #tpu.memory_space<vmem>>, vector<1x64x16xf32>,
    return
  }
  func.func @transform_0(%arg0: i32, %arg1: i32) -> (i32, i32, i32, i32) {
    %c0_i32 = arith.constant 0 : i32
    %c0_i32_0 = arith.constant 0 : i32
    %c0_i32_1 = arith.constant 0 : i32
    %c0_i32_2 = arith.constant 0 : i32
    return %arg0, %c0_i32, %c0_i32_0, %c0_i32_1 : i32, i32, i32, i32
  }
  func.func @transform_1(%arg0: i32, %arg1: i32) -> (i32, i32) {
    %c0_i32 = arith.constant 0 : i32
    %c0_i32_0 = arith.constant 0 : i32
    return %c0_i32, %arg1 : i32, i32
  }
  func.func @transform_2(%arg0: i32, %arg1: i32) -> i32 {
    %c0_i32 = arith.constant 0 : i32
    %c0_i32_0 = arith.constant 0 : i32
    return %c0_i32 : i32
  }
  func.func @transform_3(%arg0: i32, %arg1: i32) -> (i32, i32, i32) {
    %c0_i32 = arith.constant 0 : i32
    %c0_i32_0 = arith.constant 0 : i32
    return %arg0, %c0_i32, %arg1 : i32, i32, i32
  }
}

module attributes {stable_mosaic.version = 11 : i64} {
  func.func @_avgpool_kernel(%arg0: i32, %arg1: memref<8x2x4x32xf32, #tpu.memory_space<vmem>>, %arg2: memref<8x4x16xf32, #tpu.memory_space<vmem>>) attributes {dimension_semantics = [#tpu.dimension_semantics<parallel>], iteration_bounds = array<i64: 1>, scalar_prefetch = 0 : i64, scratch_operands = 0 : i64, tpu.core_type = #tpu.core_type<tc>, window_params = [{transform_indices = @transform_0, window_bounds = array<i64: 8, 2, 4, 32>}, {transform_indices = @transform_1, window_bounds = array<i64: 8, 4, 16>}]} {
    %c0 = arith.constant 0 : index
    %c0_0 = arith.constant 0 : index
    %c0_1 = arith.constant 0 : index
    %c0_2 = arith.constant 0 : index
    %0 = vector.load %arg1[%c0, %c0_0, %c0_1, %c0_2] : memref<8x2x4x32xf32, #tpu.memory_space<vmem>>, vector<8x2x4x32xf32>
    %1 = vector.extract_strided_slice %0 {offsets = [0, 0, 0, 0], sizes = [8, 1, 4, 32], strides = [1, 1, 1, 1]} : vector<8x2x4x32xf32> to vector<8x1x4x32xf32>
    %2 = vector.shape_cast %1 : vector<8x1x4x32xf32> to vector<8x4x32xf32>
    %3 = vector.extract_strided_slice %0 {offsets = [0, 1, 0, 0], sizes = [8, 1, 4, 32], strides = [1, 1, 1, 1]} : vector<8x2x4x32xf32> to vector<8x1x4x32xf32>
    %4 = vector.shape_cast %3 : vector<8x1x4x32xf32> to vector<8x4x32xf32>
    %5 = arith.addf %2, %4 : vector<8x4x32xf32>
    %6 = vector.extract_strided_slice %5 {offsets = [0, 0, 0], sizes = [8, 4, 16], strides = [1, 1, 1]} : vector<8x4x32xf32> to vector<8x4x16xf32>
    %7 = vector.extract_strided_slice %5 {offsets = [0, 0, 16], sizes = [8, 4, 16], strides = [1, 1, 1]} : vector<8x4x32xf32> to vector<8x4x16xf32>
    %8 = arith.addf %6, %7 : vector<8x4x16xf32>
    %cst = arith.constant 2.500000e-01 : f32
    %9 = vector.broadcast %cst : f32 to vector<8x4x16xf32>
    %10 = arith.mulf %8, %9 : vector<8x4x16xf32>
    %c0_3 = arith.constant 0 : index
    %c0_4 = arith.constant 0 : index
    %c0_5 = arith.constant 0 : index
    %11 = vector.load %arg2[%c0_3, %c0_4, %c0_5] : memref<8x4x16xf32, #tpu.memory_space<vmem>>, vector<8x4x16xf32>
    tpu.vector_store %arg2[%c0_3, %c0_4, %c0_5], %10 {strides = array<i32>} : memref<8x4x16xf32, #tpu.memory_space<vmem>>, vector<8x4x16xf32>,
    return
  }
  func.func @transform_0(%arg0: i32) -> (i32, i32, i32, i32) {
    %c0_i32 = arith.constant 0 : i32
    %c0_i32_0 = arith.constant 0 : i32
    %c0_i32_1 = arith.constant 0 : i32
    %c0_i32_2 = arith.constant 0 : i32
    return %arg0, %c0_i32, %c0_i32_0, %c0_i32_1 : i32, i32, i32, i32
  }
  func.func @transform_1(%arg0: i32) -> (i32, i32, i32) {
    %c0_i32 = arith.constant 0 : i32
    %c0_i32_0 = arith.constant 0 : i32
    %c0_i32_1 = arith.constant 0 : i32
    return %arg0, %c0_i32, %c0_i32_0 : i32, i32, i32
  }
}

module attributes {stable_mosaic.version = 11 : i64} {
  func.func @_mbstd_kernel(%arg0: memref<2x256xf32, #tpu.memory_space<vmem>>, %arg1: memref<1x1xf32, #tpu.memory_space<vmem>>) attributes {dimension_semantics = [], scalar_prefetch = 0 : i64, scratch_operands = 0 : i64, tpu.core_type = #tpu.core_type<tc>} {
    %c0 = arith.constant 0 : index
    %c0_0 = arith.constant 0 : index
    %0 = vector.load %arg0[%c0, %c0_0] : memref<2x256xf32, #tpu.memory_space<vmem>>, vector<2x256xf32>
    %cst = arith.constant dense<0.000000e+00> : vector<256xf32>
    %1 = vector.multi_reduction <add>, %0, %cst [0] : vector<2x256xf32> to vector<256xf32>
    %2 = vector.shape_cast %1 : vector<256xf32> to vector<1x256xf32>
    %cst_1 = arith.constant 2.000000e+00 : f32
    %3 = vector.broadcast %cst_1 : f32 to vector<1x256xf32>
    %4 = arith.divf %2, %3 : vector<1x256xf32>
    %5 = vector.broadcast %4 : vector<1x256xf32> to vector<2x256xf32>
    %6 = arith.subf %0, %5 : vector<2x256xf32>
    %7 = arith.mulf %6, %6 : vector<2x256xf32>
    %cst_2 = arith.constant dense<0.000000e+00> : vector<256xf32>
    %8 = vector.multi_reduction <add>, %7, %cst_2 [0] : vector<2x256xf32> to vector<256xf32>
    %9 = vector.shape_cast %8 : vector<256xf32> to vector<1x256xf32>
    %cst_3 = arith.constant 2.000000e+00 : f32
    %10 = vector.broadcast %cst_3 : f32 to vector<1x256xf32>
    %11 = arith.divf %9, %10 : vector<1x256xf32>
    %cst_4 = arith.constant 9.99999993E-9 : f32
    %12 = vector.broadcast %cst_4 : f32 to vector<1x256xf32>
    %13 = arith.addf %11, %12 : vector<1x256xf32>
    %14 = math.sqrt %13 : vector<1x256xf32>
    %15 = vector.shape_cast %14 : vector<1x256xf32> to vector<1x1x256xf32>
    %cst_5 = arith.constant dense<0.000000e+00> : vector<1xf32>
    %16 = vector.multi_reduction <add>, %15, %cst_5 [1, 2] : vector<1x1x256xf32> to vector<1xf32>
    %17 = vector.shape_cast %16 : vector<1xf32> to vector<1x1x1xf32>
    %18 = vector.extract %17[0, 0, 0] : f32 from vector<1x1x1xf32>
    %19 = vector.broadcast %18 : f32 to vector<1x1xf32>
    %cst_6 = arith.constant 2.560000e+02 : f32
    %20 = vector.broadcast %cst_6 : f32 to vector<1x1xf32>
    %21 = arith.divf %19, %20 : vector<1x1xf32>
    %c0_7 = arith.constant 0 : index
    %c0_8 = arith.constant 0 : index
    %22 = vector.load %arg1[%c0_7, %c0_8] : memref<1x1xf32, #tpu.memory_space<vmem>>, vector<1x1xf32>
    tpu.vector_store %arg1[%c0_7, %c0_8], %21 {strides = array<i32>} : memref<1x1xf32, #tpu.memory_space<vmem>>, vector<1x1xf32>,
    return
  }
}

module attributes {stable_mosaic.version = 11 : i64} {
  func.func @kernel(%arg0: memref<2x256xbf16, #tpu.memory_space<vmem>>, %arg1: memref<256x16xbf16, #tpu.memory_space<vmem>>, %arg2: memref<1x16xf32, #tpu.memory_space<vmem>>, %arg3: memref<1xf32, #tpu.memory_space<smem>>, %arg4: memref<1xf32, #tpu.memory_space<smem>>, %arg5: memref<2x1xf32, #tpu.memory_space<vmem>>) attributes {dimension_semantics = [], scalar_prefetch = 0 : i64, scratch_operands = 0 : i64, tpu.core_type = #tpu.core_type<tc>} {
    %c0 = arith.constant 0 : index
    %c0_0 = arith.constant 0 : index
    %0 = vector.load %arg0[%c0, %c0_0] : memref<2x256xbf16, #tpu.memory_space<vmem>>, vector<2x256xbf16>
    %c0_1 = arith.constant 0 : index
    %c0_2 = arith.constant 0 : index
    %1 = vector.load %arg1[%c0_1, %c0_2] : memref<256x16xbf16, #tpu.memory_space<vmem>>, vector<256x16xbf16>
    %cst = arith.constant dense<0.000000e+00> : vector<2x16xf32>
    %2 = tpu.matmul %0, %1, %cst {dimension_numbers = #tpu.dot_dimension_numbers<[1], [0], [0], [1], [0, 0, 1, 1], [], []>} : vector<2x256xbf16>, vector<256x16xbf16>, vector<2x16xf32> -> vector<2x16xf32>
    %c0_3 = arith.constant 0 : index
    %3 = memref.load %arg3[%c0_3] : memref<1xf32, #tpu.memory_space<smem>>
    %4 = vector.broadcast %3 : f32 to vector<2x16xf32>
    %5 = arith.mulf %2, %4 : vector<2x16xf32>
    %cst_4 = arith.constant 0.000000e+00 : f32
    %6 = vector.broadcast %cst_4 : f32 to vector<2x16xf32>
    %7 = arith.cmpf oge, %5, %6 : vector<2x16xf32>
    %cst_5 = arith.constant 2.000000e-01 : f32
    %8 = vector.broadcast %cst_5 : f32 to vector<2x16xf32>
    %9 = arith.mulf %8, %5 : vector<2x16xf32>
    %10 = arith.select %7, %5, %9 : vector<2x16xi1>, vector<2x16xf32>
    %c0_6 = arith.constant 0 : index
    %c0_7 = arith.constant 0 : index
    %11 = vector.load %arg2[%c0_6, %c0_7] : memref<1x16xf32, #tpu.memory_space<vmem>>, vector<1x16xf32>
    %12 = vector.broadcast %11 : vector<1x16xf32> to vector<2x16xf32>
    %13 = arith.mulf %10, %12 : vector<2x16xf32>
    %cst_8 = arith.constant dense<0.000000e+00> : vector<2xf32>
    %14 = vector.multi_reduction <add>, %13, %cst_8 [1] : vector<2x16xf32> to vector<2xf32>
    %15 = vector.shape_cast %14 : vector<2xf32> to vector<2x1xf32>
    %c0_9 = arith.constant 0 : index
    %16 = memref.load %arg4[%c0_9] : memref<1xf32, #tpu.memory_space<smem>>
    %17 = vector.broadcast %16 : f32 to vector<2x1xf32>
    %18 = arith.mulf %15, %17 : vector<2x1xf32>
    %c0_10 = arith.constant 0 : index
    %c0_11 = arith.constant 0 : index
    %19 = vector.load %arg5[%c0_10, %c0_11] : memref<2x1xf32, #tpu.memory_space<vmem>>, vector<2x1xf32>
    tpu.vector_store %arg5[%c0_10, %c0_11], %18 {strides = array<i32>} : memref<2x1xf32, #tpu.memory_space<vmem>>, vector<2x1xf32>,
    return
  }
}

module attributes {stable_mosaic.version = 11 : i64} {
  func.func @kernel(%arg0: i32, %arg1: i32, %arg2: memref<1x6x6x17xbf16, #tpu.memory_space<vmem>>, %arg3: memref<153x16xbf16, #tpu.memory_space<vmem>>, %arg4: memref<1xf32, #tpu.memory_space<smem>>, %arg5: memref<1x16x16xf32, #tpu.memory_space<vmem>>) attributes {dimension_semantics = [#tpu.dimension_semantics<parallel>, #tpu.dimension_semantics<parallel>], iteration_bounds = array<i64: 2, 1>, scalar_prefetch = 0 : i64, scratch_operands = 0 : i64, tpu.core_type = #tpu.core_type<tc>, window_params = [{transform_indices = @transform_0, window_bounds = array<i64: 1, 6, 6, 17>}, {transform_indices = @transform_1, window_bounds = array<i64: 153, 16>}, {transform_indices = @transform_2, window_bounds = array<i64: 1>}, {transform_indices = @transform_3, window_bounds = array<i64: 1, 16, 16>}]} {
    %c0 = arith.constant 0 : index
    %c0_0 = arith.constant 0 : index
    %c0_1 = arith.constant 0 : index
    %c0_2 = arith.constant 0 : index
    %0 = vector.load %arg2[%c0, %c0_0, %c0_1, %c0_2] : memref<1x6x6x17xbf16, #tpu.memory_space<vmem>>, vector<1x6x6x17xbf16>
    %1 = vector.shape_cast %0 : vector<1x6x6x17xbf16> to vector<6x6x17xbf16>
    %2 = vector.extract_strided_slice %1 {offsets = [0, 0, 0], sizes = [4, 4, 17], strides = [1, 1, 1]} : vector<6x6x17xbf16> to vector<4x4x17xbf16>
    %3 = vector.shape_cast %2 : vector<4x4x17xbf16> to vector<16x17xbf16>
    %4 = vector.extract_strided_slice %1 {offsets = [0, 1, 0], sizes = [4, 4, 17], strides = [1, 1, 1]} : vector<6x6x17xbf16> to vector<4x4x17xbf16>
    %5 = vector.shape_cast %4 : vector<4x4x17xbf16> to vector<16x17xbf16>
    %6 = vector.extract_strided_slice %1 {offsets = [0, 2, 0], sizes = [4, 4, 17], strides = [1, 1, 1]} : vector<6x6x17xbf16> to vector<4x4x17xbf16>
    %7 = vector.shape_cast %6 : vector<4x4x17xbf16> to vector<16x17xbf16>
    %8 = vector.extract_strided_slice %1 {offsets = [1, 0, 0], sizes = [4, 4, 17], strides = [1, 1, 1]} : vector<6x6x17xbf16> to vector<4x4x17xbf16>
    %9 = vector.shape_cast %8 : vector<4x4x17xbf16> to vector<16x17xbf16>
    %10 = vector.extract_strided_slice %1 {offsets = [1, 1, 0], sizes = [4, 4, 17], strides = [1, 1, 1]} : vector<6x6x17xbf16> to vector<4x4x17xbf16>
    %11 = vector.shape_cast %10 : vector<4x4x17xbf16> to vector<16x17xbf16>
    %12 = vector.extract_strided_slice %1 {offsets = [1, 2, 0], sizes = [4, 4, 17], strides = [1, 1, 1]} : vector<6x6x17xbf16> to vector<4x4x17xbf16>
    %13 = vector.shape_cast %12 : vector<4x4x17xbf16> to vector<16x17xbf16>
    %14 = vector.extract_strided_slice %1 {offsets = [2, 0, 0], sizes = [4, 4, 17], strides = [1, 1, 1]} : vector<6x6x17xbf16> to vector<4x4x17xbf16>
    %15 = vector.shape_cast %14 : vector<4x4x17xbf16> to vector<16x17xbf16>
    %16 = vector.extract_strided_slice %1 {offsets = [2, 1, 0], sizes = [4, 4, 17], strides = [1, 1, 1]} : vector<6x6x17xbf16> to vector<4x4x17xbf16>
    %17 = vector.shape_cast %16 : vector<4x4x17xbf16> to vector<16x17xbf16>
    %18 = vector.extract_strided_slice %1 {offsets = [2, 2, 0], sizes = [4, 4, 17], strides = [1, 1, 1]} : vector<6x6x17xbf16> to vector<4x4x17xbf16>
    %19 = vector.shape_cast %18 : vector<4x4x17xbf16> to vector<16x17xbf16>
    %20 = tpu.concatenate %3, %5, %7, %9, %11, %13, %15, %17, %19 in 1 : vector<16x17xbf16>, vector<16x17xbf16>, vector<16x17xbf16>, vector<16x17xbf16>, vector<16x17xbf16>, vector<16x17xbf16>, vector<16x17xbf16>, vector<16x17xbf16>, vector<16x17xbf16> -> vector<16x153xbf16>
    %c0_3 = arith.constant 0 : index
    %c0_4 = arith.constant 0 : index
    %21 = vector.load %arg3[%c0_3, %c0_4] : memref<153x16xbf16, #tpu.memory_space<vmem>>, vector<153x16xbf16>
    %cst = arith.constant dense<0.000000e+00> : vector<16x16xf32>
    %22 = tpu.matmul %20, %21, %cst {dimension_numbers = #tpu.dot_dimension_numbers<[1], [0], [0], [1], [0, 0, 1, 1], [], []>} : vector<16x153xbf16>, vector<153x16xbf16>, vector<16x16xf32> -> vector<16x16xf32>
    %c0_5 = arith.constant 0 : index
    %23 = memref.load %arg4[%c0_5] : memref<1xf32, #tpu.memory_space<smem>>
    %24 = vector.broadcast %23 : f32 to vector<16x16xf32>
    %25 = arith.mulf %22, %24 : vector<16x16xf32>
    %cst_6 = arith.constant 0.000000e+00 : f32
    %26 = vector.broadcast %cst_6 : f32 to vector<16x16xf32>
    %27 = arith.cmpf oge, %25, %26 : vector<16x16xf32>
    %cst_7 = arith.constant 2.000000e-01 : f32
    %28 = vector.broadcast %cst_7 : f32 to vector<16x16xf32>
    %29 = arith.mulf %28, %25 : vector<16x16xf32>
    %30 = arith.select %27, %25, %29 : vector<16x16xi1>, vector<16x16xf32>
    %31 = vector.shape_cast %30 : vector<16x16xf32> to vector<1x16x16xf32>
    %c0_8 = arith.constant 0 : index
    %c0_9 = arith.constant 0 : index
    %c0_10 = arith.constant 0 : index
    %32 = vector.load %arg5[%c0_8, %c0_9, %c0_10] : memref<1x16x16xf32, #tpu.memory_space<vmem>>, vector<1x16x16xf32>
    tpu.vector_store %arg5[%c0_8, %c0_9, %c0_10], %31 {strides = array<i32>} : memref<1x16x16xf32, #tpu.memory_space<vmem>>, vector<1x16x16xf32>,
    return
  }
  func.func @transform_0(%arg0: i32, %arg1: i32) -> (i32, i32, i32, i32) {
    %c0_i32 = arith.constant 0 : i32
    %c0_i32_0 = arith.constant 0 : i32
    %c0_i32_1 = arith.constant 0 : i32
    %c0_i32_2 = arith.constant 0 : i32
    return %arg0, %c0_i32, %c0_i32_0, %c0_i32_1 : i32, i32, i32, i32
  }
  func.func @transform_1(%arg0: i32, %arg1: i32) -> (i32, i32) {
    %c0_i32 = arith.constant 0 : i32
    %c0_i32_0 = arith.constant 0 : i32
    return %c0_i32, %arg1 : i32, i32
  }
  func.func @transform_2(%arg0: i32, %arg1: i32) -> i32 {
    %c0_i32 = arith.constant 0 : i32
    %c0_i32_0 = arith.constant 0 : i32
    return %c0_i32 : i32
  }
  func.func @transform_3(%arg0: i32, %arg1: i32) -> (i32, i32, i32) {
    %c0_i32 = arith.constant 0 : i32
    %c0_i32_0 = arith.constant 0 : i32
    return %arg0, %c0_i32, %arg1 : i32, i32, i32
  }
}

</mosaic_0001>

<bundles_post_ra>
// kernel: _lambda_.10
= control target key start
LH: loop header
LB: loop body
LE: loop exit
PB: predicated region body
PF: predicated region fallthrough
CT: control target
= control target key end

     0   :  { %v801_v0 = vmov 0   ;;  %vm728_vm0 = vcmask 31744   ;;  %s1408_s0 = inlined_call_operand.vmem [shape: f32[512,1], index: 0, kind: input, shape index: {}]   ;;  %s1409_s1 = inlined_call_operand.vmem [shape: f32[1,4], index: 1, kind: input, shape index: {}]   ;;  %s1410_s2 = inlined_call_operand.<no memory space> [shape: f32[1], index: 2, kind: input, shape index: {}]   ;;  %s1411_s3 = inlined_call_operand.vmem [shape: f32[512,4], index: 3, kind: output, shape index: {}]  }
   0x1   :  { %800 = vset.pattern.permute.xlu1 %v801_v0  ;;  %799 = vset.pattern.permute.xlu0 %v801_v0  ;;  %v17_v1 = vld [vmem:[%s1408_s0 + $0x10] sm:$0xff]  ;;  %v15_v2 = vld [vmem:[%s1408_s0] sm:$0xff]  ;;  %v18_v3 = vld [vmem:[%s1408_s0 + $0x18] sm:$0xff] }
   0x2   :  { %92 = vperm.xlu1 %800, %v17_v1   ;;  %82 = vperm.xlu0 %799, %v15_v2   ;;  %v16_v4 = vld [vmem:[%s1408_s0 + $0x8] sm:$0xff]  ;;  %v19_v6 = vld [vmem:[%s1408_s0 + $0x20] sm:$0xff]  ;;  %v22_v7 = vld [vmem:[%s1408_s0 + $0x38] sm:$0xff]  ;;  %v1022_v2 = vstv %s1410_s2 }
   0x3   :  { %v20_v5 = vld [vmem:[%s1408_s0 + $0x28] sm:$0xff]  ;;  %v21_v8 = vld [vmem:[%s1408_s0 + $0x30] sm:$0xff]  ;;  %v23_v10 = vld [vmem:[%s1408_s0 + $0x40] sm:$0xff] }
   0x4   :  { %v24_v9 = vld [vmem:[%s1408_s0 + $0x48] sm:$0xff]  ;;  %v26_v11 = vld [vmem:[%s1408_s0 + $0x58] sm:$0xff]  ;;  %v25_v12 = vld [vmem:[%s1408_s0 + $0x50] sm:$0xff] }
   0x5   :  { %v28_v13 = vld [vmem:[%s1408_s0 + $0x68] sm:$0xff]  ;;  %v27_v14 = vld [vmem:[%s1408_s0 + $0x60] sm:$0xff]  ;;  %v30_v15 = vld [vmem:[%s1408_s0 + $0x78] sm:$0xff] }
   0x6   :  { %97 = vperm.xlu1 %800, %v18_v3   ;;  %87 = vperm.xlu0 %799, %v16_v4   ;;  %v29_v16 = vld [vmem:[%s1408_s0 + $0x70] sm:$0xff]  ;;  %v32_v17 = vld [vmem:[%s1408_s0 + $0x88] sm:$0xff]  ;;  %v31_v18 = vld [vmem:[%s1408_s0 + $0x80] sm:$0xff] }
   0x7   :  { %v34_v19 = vld [vmem:[%s1408_s0 + $0x98] sm:$0xff]  ;;  %v33_v20 = vld [vmem:[%s1408_s0 + $0x90] sm:$0xff]  ;;  %v36_v21 = vld [vmem:[%s1408_s0 + $0xa8] sm:$0xff] }
   0x8   :  { %v35_v22 = vld [vmem:[%s1408_s0 + $0xa0] sm:$0xff]  ;;  %v38_v23 = vld [vmem:[%s1408_s0 + $0xb8] sm:$0xff]  ;;  %v37_v24 = vld [vmem:[%s1408_s0 + $0xb0] sm:$0xff] }
   0x9   :  { %v40_v25 = vld [vmem:[%s1408_s0 + $0xc8] sm:$0xff]  ;;  %v39_v26 = vld [vmem:[%s1408_s0 + $0xc0] sm:$0xff]  ;;  %v42_v27 = vld [vmem:[%s1408_s0 + $0xd8] sm:$0xff] }
   0xa   :  { %107 = vperm.xlu1 %800, %v20_v5   ;;  %102 = vperm.xlu0 %799, %v19_v6   ;;  %v41_v28 = vld [vmem:[%s1408_s0 + $0xd0] sm:$0xff]  ;;  %v44_v29 = vld [vmem:[%s1408_s0 + $0xe8] sm:$0xff]  ;;  %v43_v30 = vld [vmem:[%s1408_s0 + $0xe0] sm:$0xff] }
   0xb   :  { %v46_v31 = vld [vmem:[%s1408_s0 + $0xf8] sm:$0xff]  ;;  %v45_v32 = vld [vmem:[%s1408_s0 + $0xf0] sm:$0xff]  ;;  %v48_v33 = vld [vmem:[%s1408_s0 + $0x108] sm:$0xff] }
   0xc   :  { %v47_v34 = vld [vmem:[%s1408_s0 + $0x100] sm:$0xff]  ;;  %v50_v35 = vld [vmem:[%s1408_s0 + $0x118] sm:$0xff]  ;;  %v49_v36 = vld [vmem:[%s1408_s0 + $0x110] sm:$0xff] }
   0xd   :  { %v52_v37 = vld [vmem:[%s1408_s0 + $0x128] sm:$0xff]  ;;  %v51_v38 = vld [vmem:[%s1408_s0 + $0x120] sm:$0xff]  ;;  %v54_v39 = vld [vmem:[%s1408_s0 + $0x138] sm:$0xff] }
   0xe   :  { %117 = vperm.xlu1 %800, %v22_v7   ;;  %112 = vperm.xlu0 %799, %v21_v8   ;;  %v53_v40 = vld [vmem:[%s1408_s0 + $0x130] sm:$0xff]  ;;  %v56_v41 = vld [vmem:[%s1408_s0 + $0x148] sm:$0xff]  ;;  %v55_v42 = vld [vmem:[%s1408_s0 + $0x140] sm:$0xff] }
   0xf   :  { %v58_v43 = vld [vmem:[%s1408_s0 + $0x158] sm:$0xff]  ;;  %v57_v44 = vld [vmem:[%s1408_s0 + $0x150] sm:$0xff]  ;;  %v60_v45 = vld [vmem:[%s1408_s0 + $0x168] sm:$0xff] }
  0x10   :  { %v59_v46 = vld [vmem:[%s1408_s0 + $0x160] sm:$0xff]  ;;  %v62_v47 = vld [vmem:[%s1408_s0 + $0x178] sm:$0xff]  ;;  %v61_v48 = vld [vmem:[%s1408_s0 + $0x170] sm:$0xff] }
  0x11   :  { %v64_v49 = vld [vmem:[%s1408_s0 + $0x188] sm:$0xff]  ;;  %v63_v50 = vld [vmem:[%s1408_s0 + $0x180] sm:$0xff]  ;;  %v66_v51 = vld [vmem:[%s1408_s0 + $0x198] sm:$0xff] }
  0x12   :  { %127 = vperm.xlu1 %800, %v24_v9   ;;  %122 = vperm.xlu0 %799, %v23_v10   ;;  %v65_v52 = vld [vmem:[%s1408_s0 + $0x190] sm:$0xff]  ;;  %v68_v53 = vld [vmem:[%s1408_s0 + $0x1a8] sm:$0xff]  ;;  %v67_v54 = vld [vmem:[%s1408_s0 + $0x1a0] sm:$0xff] }
  0x13   :  { %v70_v55 = vld [vmem:[%s1408_s0 + $0x1b8] sm:$0xff]  ;;  %v69_v56 = vld [vmem:[%s1408_s0 + $0x1b0] sm:$0xff]  ;;  %v72_v57 = vld [vmem:[%s1408_s0 + $0x1c8] sm:$0xff] }
  0x14   :  { %v71_v58 = vld [vmem:[%s1408_s0 + $0x1c0] sm:$0xff]  ;;  %v74_v59 = vld [vmem:[%s1408_s0 + $0x1d8] sm:$0xff]  ;;  %v73_v60 = vld [vmem:[%s1408_s0 + $0x1d0] sm:$0xff] }
  0x15   :  { %v76_v61 = vld [vmem:[%s1408_s0 + $0x1e8] sm:$0xff]  ;;  %v75_v62 = vld [vmem:[%s1408_s0 + $0x1e0] sm:$0xff]  ;;  %v78_v63 = vld [vmem:[%s1408_s0 + $0x1f8] sm:$0xff] }
  0x16   :  { %137 = vperm.xlu1 %800, %v26_v11   ;;  %132 = vperm.xlu0 %799, %v25_v12   ;;  %v77_v0 = vld [vmem:[%s1408_s0 + $0x1f0] sm:$0xff]  ;;  %v1017_v1 = vld [vmem:[%s1409_s1] ss:$0 sm:$0xff] }
  0x1a   :  { %147 = vperm.xlu1 %800, %v28_v13   ;;  %142 = vperm.xlu0 %799, %v27_v14  }
  0x1e   :  { %157 = vperm.xlu1 %800, %v30_v15   ;;  %152 = vperm.xlu0 %799, %v29_v16  }
  0x22   :  { %167 = vperm.xlu1 %800, %v32_v17   ;;  %162 = vperm.xlu0 %799, %v31_v18  }
  0x26   :  { %177 = vperm.xlu1 %800, %v34_v19   ;;  %172 = vperm.xlu0 %799, %v33_v20  }
  0x2a   :  { %187 = vperm.xlu1 %800, %v36_v21   ;;  %182 = vperm.xlu0 %799, %v35_v22  }
  0x2e   :  { %197 = vperm.xlu1 %800, %v38_v23   ;;  %192 = vperm.xlu0 %799, %v37_v24  }
  0x32   :  { %207 = vperm.xlu1 %800, %v40_v25   ;;  %202 = vperm.xlu0 %799, %v39_v26  }
  0x36   :  { %217 = vperm.xlu1 %800, %v42_v27   ;;  %212 = vperm.xlu0 %799, %v41_v28  }
  0x3a   :  { %227 = vperm.xlu1 %800, %v44_v29   ;;  %222 = vperm.xlu0 %799, %v43_v30  }
  0x3e   :  { %237 = vperm.xlu1 %800, %v46_v31   ;;  %232 = vperm.xlu0 %799, %v45_v32  }
  0x42   :  { %247 = vperm.xlu1 %800, %v48_v33   ;;  %242 = vperm.xlu0 %799, %v47_v34  }
  0x46   :  { %257 = vperm.xlu1 %800, %v50_v35   ;;  %252 = vperm.xlu0 %799, %v49_v36  }
  0x4a   :  { %267 = vperm.xlu1 %800, %v52_v37   ;;  %262 = vperm.xlu0 %799, %v51_v38  }
  0x4e   :  { %277 = vperm.xlu1 %800, %v54_v39   ;;  %272 = vperm.xlu0 %799, %v53_v40  }
  0x52   :  { %287 = vperm.xlu1 %800, %v56_v41   ;;  %282 = vperm.xlu0 %799, %v55_v42  }
  0x56   :  { %297 = vperm.xlu1 %800, %v58_v43   ;;  %292 = vperm.xlu0 %799, %v57_v44  }
  0x5a   :  { %307 = vperm.xlu1 %800, %v60_v45   ;;  %302 = vperm.xlu0 %799, %v59_v46  }
  0x5e   :  { %317 = vperm.xlu1 %800, %v62_v47   ;;  %312 = vperm.xlu0 %799, %v61_v48  }
  0x62   :  { %327 = vperm.xlu1 %800, %v64_v49   ;;  %322 = vperm.xlu0 %799, %v63_v50  }
  0x66   :  { %337 = vperm.xlu1 %800, %v66_v51   ;;  %332 = vperm.xlu0 %799, %v65_v52  }
  0x6a   :  { %347 = vperm.xlu1 %800, %v68_v53   ;;  %342 = vperm.xlu0 %799, %v67_v54  }
  0x6e   :  { %357 = vperm.xlu1 %800, %v70_v55   ;;  %352 = vperm.xlu0 %799, %v69_v56  }
  0x72   :  { %367 = vperm.xlu1 %800, %v72_v57   ;;  %362 = vperm.xlu0 %799, %v71_v58  }
  0x76   :  { %377 = vperm.xlu1 %800, %v74_v59   ;;  %372 = vperm.xlu0 %799, %v73_v60  }
  0x7a   :  { %387 = vperm.xlu1 %800, %v76_v61   ;;  %382 = vperm.xlu0 %799, %v75_v62  }
  0x7e   :  { %397 = vperm.xlu1 %800, %v78_v63   ;;  %392 = vperm.xlu0 %799, %v77_v0  }
  0x81   :  { %v93_v3 = vpop.permute.xlu1 %92  ;;  %v83_v4 = vpop.permute.xlu0 %82 }
  0x82   :  { %v408_v5 = vmul.f32 %v1017_v1, %v93_v3  ;;  %v406_v6 = vmul.f32 %v1017_v1, %v83_v4 }
  0x84   :  { %v474_v7 = vmul.f32 %v1022_v2, %v408_v5  ;;  %v472_v8 = vmul.f32 %v1022_v2, %v406_v6 }
  0x85   :  { %v98_v9 = vpop.permute.xlu1 %97  ;;  %v88_v10 = vpop.permute.xlu0 %87 }
  0x86   :  { %vm538_vm1 = vcmp.ge.f32.partialorder %v474_v7, 0.0  ;;  %v602_v11 = vmul.f32 0.2, %v474_v7  ;;  %vm536_vm2 = vcmp.ge.f32.partialorder %v472_v8, 0.0  ;;  %v600_v12 = vmul.f32 0.2, %v472_v8 }
  0x87   :  { %v409_v13 = vmul.f32 %v1017_v1, %v98_v9  ;;  %v407_v14 = vmul.f32 %v1017_v1, %v88_v10 }
  0x88   :  { %v666_v15 = vsel %vm538_vm1, %v474_v7, %v602_v11  ;;  %v664_v16 = vsel %vm536_vm2, %v472_v8, %v600_v12 }
  0x89   :  { %731 = vst.msk [vmem:[%s1411_s3 + $0x10] sm:$0xff] %vm728_vm0, %v666_v15  ;;  %729 = vst.msk [vmem:[%s1411_s3] sm:$0xff] %vm728_vm0, %v664_v16  ;;  %v475_v17 = vmul.f32 %v1022_v2, %v409_v13  ;;  %v473_v18 = vmul.f32 %v1022_v2, %v407_v14  ;;  %v108_v19 = vpop.permute.xlu1 %107  ;;  %v103_v20 = vpop.permute.xlu0 %102 }
  0x8a   :  { %v411_v21 = vmul.f32 %v1017_v1, %v108_v19  ;;  %v410_v22 = vmul.f32 %v1017_v1, %v103_v20 }
  0x8b   :  { %vm539_vm3 = vcmp.ge.f32.partialorder %v475_v17, 0.0  ;;  %v603_v23 = vmul.f32 0.2, %v475_v17  ;;  %vm537_vm4 = vcmp.ge.f32.partialorder %v473_v18, 0.0  ;;  %v601_v24 = vmul.f32 0.2, %v473_v18 }
  0x8c   :  { %v477_v25 = vmul.f32 %v1022_v2, %v411_v21  ;;  %v476_v26 = vmul.f32 %v1022_v2, %v410_v22 }
  0x8d   :  { %v667_v27 = vsel %vm539_vm3, %v475_v17, %v603_v23  ;;  %v665_v28 = vsel %vm537_vm4, %v473_v18, %v601_v24  ;;  %v118_v29 = vpop.permute.xlu1 %117  ;;  %v113_v30 = vpop.permute.xlu0 %112 }
  0x8e   :  { %732 = vst.msk [vmem:[%s1411_s3 + $0x18] sm:$0xff] %vm728_vm0, %v667_v27  ;;  %730 = vst.msk [vmem:[%s1411_s3 + $0x8] sm:$0xff] %vm728_vm0, %v665_v28  ;;  %vm541_vm5 = vcmp.ge.f32.partialorder %v477_v25, 0.0  ;;  %v605_v31 = vmul.f32 0.2, %v477_v25  ;;  %vm540_vm6 = vcmp.ge.f32.partialorder %v476_v26, 0.0  ;;  %v413_v33 = vmul.f32 %v1017_v1, %v118_v29 }
  0x8f   :  { %v604_v32 = vmul.f32 0.2, %v476_v26  ;;  %v412_v34 = vmul.f32 %v1017_v1, %v113_v30 }
  0x90   :  { %v669_v35 = vsel %vm541_vm5, %v477_v25, %v605_v31  ;;  %v479_v37 = vmul.f32 %v1022_v2, %v413_v33 }
  0x91   :  { %v668_v36 = vsel %vm540_vm6, %v476_v26, %v604_v32  ;;  %734 = vst.msk [vmem:[%s1411_s3 + $0x28] sm:$0xff] %vm728_vm0, %v669_v35  ;;  %v478_v38 = vmul.f32 %v1022_v2, %v412_v34  ;;  %v128_v39 = vpop.permute.xlu1 %127  ;;  %v123_v40 = vpop.permute.xlu0 %122 }
  0x92   :  { %733 = vst.msk [vmem:[%s1411_s3 + $0x20] sm:$0xff] %vm728_vm0, %v668_v36  ;;  %v415_v41 = vmul.f32 %v1017_v1, %v128_v39  ;;  %v414_v42 = vmul.f32 %v1017_v1, %v123_v40  ;;  %vm543_vm7 = vcmp.ge.f32.partialorder %v479_v37, 0.0  ;;  %v607_v43 = vmul.f32 0.2, %v479_v37 }
  0x93   :  { %vm542_vm8 = vcmp.ge.f32.partialorder %v478_v38, 0.0  ;;  %v606_v44 = vmul.f32 0.2, %v478_v38 }
  0x94   :  { %v481_v45 = vmul.f32 %v1022_v2, %v415_v41  ;;  %v480_v46 = vmul.f32 %v1022_v2, %v414_v42  ;;  %v671_v47 = vsel %vm543_vm7, %v479_v37, %v607_v43 }
  0x95   :  { %v670_v48 = vsel %vm542_vm8, %v478_v38, %v606_v44  ;;  %v138_v49 = vpop.permute.xlu1 %137  ;;  %v133_v50 = vpop.permute.xlu0 %132  ;;  %736 = vst.msk [vmem:[%s1411_s3 + $0x38] sm:$0xff] %vm728_vm0, %v671_v47 }
  0x96   :  { %735 = vst.msk [vmem:[%s1411_s3 + $0x30] sm:$0xff] %vm728_vm0, %v670_v48  ;;  %vm545_vm9 = vcmp.ge.f32.partialorder %v481_v45, 0.0  ;;  %v609_v51 = vmul.f32 0.2, %v481_v45  ;;  %vm544_vm10 = vcmp.ge.f32.partialorder %v480_v46, 0.0  ;;  %v417_v53 = vmul.f32 %v1017_v1, %v138_v49 }
  0x97   :  { %v608_v52 = vmul.f32 0.2, %v480_v46  ;;  %v416_v54 = vmul.f32 %v1017_v1, %v133_v50 }
  0x98   :  { %v673_v55 = vsel %vm545_vm9, %v481_v45, %v609_v51  ;;  %v483_v57 = vmul.f32 %v1022_v2, %v417_v53 }
  0x99   :  { %v672_v56 = vsel %vm544_vm10, %v480_v46, %v608_v52  ;;  %738 = vst.msk [vmem:[%s1411_s3 + $0x48] sm:$0xff] %vm728_vm0, %v673_v55  ;;  %v482_v58 = vmul.f32 %v1022_v2, %v416_v54  ;;  %v148_v59 = vpop.permute.xlu1 %147  ;;  %v143_v60 = vpop.permute.xlu0 %142 }
  0x9a   :  { %737 = vst.msk [vmem:[%s1411_s3 + $0x40] sm:$0xff] %vm728_vm0, %v672_v56  ;;  %v419_v61 = vmul.f32 %v1017_v1, %v148_v59  ;;  %v418_v62 = vmul.f32 %v1017_v1, %v143_v60  ;;  %vm547_vm11 = vcmp.ge.f32.partialorder %v483_v57, 0.0  ;;  %v611_v63 = vmul.f32 0.2, %v483_v57 }
  0x9b   :  { %vm546_vm12 = vcmp.ge.f32.partialorder %v482_v58, 0.0  ;;  %v610_v0 = vmul.f32 0.2, %v482_v58 }
  0x9c   :  { %v485_v3 = vmul.f32 %v1022_v2, %v419_v61  ;;  %v484_v4 = vmul.f32 %v1022_v2, %v418_v62  ;;  %v675_v5 = vsel %vm547_vm11, %v483_v57, %v611_v63 }
  0x9d   :  { %v674_v6 = vsel %vm546_vm12, %v482_v58, %v610_v0  ;;  %v158_v7 = vpop.permute.xlu1 %157  ;;  %v153_v8 = vpop.permute.xlu0 %152  ;;  %740 = vst.msk [vmem:[%s1411_s3 + $0x58] sm:$0xff] %vm728_vm0, %v675_v5 }
  0x9e   :  { %739 = vst.msk [vmem:[%s1411_s3 + $0x50] sm:$0xff] %vm728_vm0, %v674_v6  ;;  %vm549_vm13 = vcmp.ge.f32.partialorder %v485_v3, 0.0  ;;  %v613_v9 = vmul.f32 0.2, %v485_v3  ;;  %vm548_vm14 = vcmp.ge.f32.partialorder %v484_v4, 0.0  ;;  %v421_v11 = vmul.f32 %v1017_v1, %v158_v7 }
  0x9f   :  { %v612_v10 = vmul.f32 0.2, %v484_v4  ;;  %v420_v12 = vmul.f32 %v1017_v1, %v153_v8 }
  0xa0   :  { %v677_v13 = vsel %vm549_vm13, %v485_v3, %v613_v9  ;;  %v487_v15 = vmul.f32 %v1022_v2, %v421_v11 }
  0xa1   :  { %v676_v14 = vsel %vm548_vm14, %v484_v4, %v612_v10  ;;  %742 = vst.msk [vmem:[%s1411_s3 + $0x68] sm:$0xff] %vm728_vm0, %v677_v13  ;;  %v486_v16 = vmul.f32 %v1022_v2, %v420_v12  ;;  %v168_v17 = vpop.permute.xlu1 %167  ;;  %v163_v18 = vpop.permute.xlu0 %162 }
  0xa2   :  { %741 = vst.msk [vmem:[%s1411_s3 + $0x60] sm:$0xff] %vm728_vm0, %v676_v14  ;;  %v423_v19 = vmul.f32 %v1017_v1, %v168_v17  ;;  %v422_v20 = vmul.f32 %v1017_v1, %v163_v18  ;;  %vm551_vm15 = vcmp.ge.f32.partialorder %v487_v15, 0.0  ;;  %v615_v21 = vmul.f32 0.2, %v487_v15 }
  0xa3   :  { %vm550_vm1 = vcmp.ge.f32.partialorder %v486_v16, 0.0  ;;  %v614_v22 = vmul.f32 0.2, %v486_v16 }
  0xa4   :  { %v489_v23 = vmul.f32 %v1022_v2, %v423_v19  ;;  %v488_v24 = vmul.f32 %v1022_v2, %v422_v20  ;;  %v679_v25 = vsel %vm551_vm15, %v487_v15, %v615_v21 }
  0xa5   :  { %v678_v26 = vsel %vm550_vm1, %v486_v16, %v614_v22  ;;  %v178_v27 = vpop.permute.xlu1 %177  ;;  %v173_v28 = vpop.permute.xlu0 %172  ;;  %744 = vst.msk [vmem:[%s1411_s3 + $0x78] sm:$0xff] %vm728_vm0, %v679_v25 }
  0xa6   :  { %743 = vst.msk [vmem:[%s1411_s3 + $0x70] sm:$0xff] %vm728_vm0, %v678_v26  ;;  %vm553_vm2 = vcmp.ge.f32.partialorder %v489_v23, 0.0  ;;  %v617_v29 = vmul.f32 0.2, %v489_v23  ;;  %vm552_vm3 = vcmp.ge.f32.partialorder %v488_v24, 0.0  ;;  %v425_v31 = vmul.f32 %v1017_v1, %v178_v27 }
  0xa7   :  { %v616_v30 = vmul.f32 0.2, %v488_v24  ;;  %v424_v32 = vmul.f32 %v1017_v1, %v173_v28 }
  0xa8   :  { %v681_v33 = vsel %vm553_vm2, %v489_v23, %v617_v29  ;;  %v491_v35 = vmul.f32 %v1022_v2, %v425_v31 }
  0xa9   :  { %v680_v34 = vsel %vm552_vm3, %v488_v24, %v616_v30  ;;  %746 = vst.msk [vmem:[%s1411_s3 + $0x88] sm:$0xff] %vm728_vm0, %v681_v33  ;;  %v490_v36 = vmul.f32 %v1022_v2, %v424_v32  ;;  %v188_v37 = vpop.permute.xlu1 %187  ;;  %v183_v38 = vpop.permute.xlu0 %182 }
  0xaa   :  { %745 = vst.msk [vmem:[%s1411_s3 + $0x80] sm:$0xff] %vm728_vm0, %v680_v34  ;;  %v427_v39 = vmul.f32 %v1017_v1, %v188_v37  ;;  %v426_v40 = vmul.f32 %v1017_v1, %v183_v38  ;;  %vm555_vm4 = vcmp.ge.f32.partialorder %v491_v35, 0.0  ;;  %v619_v41 = vmul.f32 0.2, %v491_v35 }
  0xab   :  { %vm554_vm5 = vcmp.ge.f32.partialorder %v490_v36, 0.0  ;;  %v618_v42 = vmul.f32 0.2, %v490_v36 }
  0xac   :  { %v493_v43 = vmul.f32 %v1022_v2, %v427_v39  ;;  %v492_v44 = vmul.f32 %v1022_v2, %v426_v40  ;;  %v683_v45 = vsel %vm555_vm4, %v491_v35, %v619_v41 }
  0xad   :  { %v682_v46 = vsel %vm554_vm5, %v490_v36, %v618_v42  ;;  %v198_v47 = vpop.permute.xlu1 %197  ;;  %v193_v48 = vpop.permute.xlu0 %192  ;;  %748 = vst.msk [vmem:[%s1411_s3 + $0x98] sm:$0xff] %vm728_vm0, %v683_v45 }
  0xae   :  { %747 = vst.msk [vmem:[%s1411_s3 + $0x90] sm:$0xff] %vm728_vm0, %v682_v46  ;;  %vm557_vm6 = vcmp.ge.f32.partialorder %v493_v43, 0.0  ;;  %v621_v49 = vmul.f32 0.2, %v493_v43  ;;  %vm556_vm7 = vcmp.ge.f32.partialorder %v492_v44, 0.0  ;;  %v429_v51 = vmul.f32 %v1017_v1, %v198_v47 }
  0xaf   :  { %v620_v50 = vmul.f32 0.2, %v492_v44  ;;  %v428_v52 = vmul.f32 %v1017_v1, %v193_v48 }
  0xb0   :  { %v685_v53 = vsel %vm557_vm6, %v493_v43, %v621_v49  ;;  %v495_v55 = vmul.f32 %v1022_v2, %v429_v51 }
  0xb1   :  { %v684_v54 = vsel %vm556_vm7, %v492_v44, %v620_v50  ;;  %750 = vst.msk [vmem:[%s1411_s3 + $0xa8] sm:$0xff] %vm728_vm0, %v685_v53  ;;  %v494_v56 = vmul.f32 %v1022_v2, %v428_v52  ;;  %v208_v57 = vpop.permute.xlu1 %207  ;;  %v203_v58 = vpop.permute.xlu0 %202 }
  0xb2   :  { %749 = vst.msk [vmem:[%s1411_s3 + $0xa0] sm:$0xff] %vm728_vm0, %v684_v54  ;;  %v431_v59 = vmul.f32 %v1017_v1, %v208_v57  ;;  %v430_v60 = vmul.f32 %v1017_v1, %v203_v58  ;;  %vm559_vm8 = vcmp.ge.f32.partialorder %v495_v55, 0.0  ;;  %v623_v61 = vmul.f32 0.2, %v495_v55 }
  0xb3   :  { %vm558_vm9 = vcmp.ge.f32.partialorder %v494_v56, 0.0  ;;  %v622_v62 = vmul.f32 0.2, %v494_v56 }
  0xb4   :  { %v497_v63 = vmul.f32 %v1022_v2, %v431_v59  ;;  %v496_v0 = vmul.f32 %v1022_v2, %v430_v60  ;;  %v687_v3 = vsel %vm559_vm8, %v495_v55, %v623_v61 }
  0xb5   :  { %v686_v4 = vsel %vm558_vm9, %v494_v56, %v622_v62  ;;  %v218_v5 = vpop.permute.xlu1 %217  ;;  %v213_v6 = vpop.permute.xlu0 %212  ;;  %752 = vst.msk [vmem:[%s1411_s3 + $0xb8] sm:$0xff] %vm728_vm0, %v687_v3 }
  0xb6   :  { %751 = vst.msk [vmem:[%s1411_s3 + $0xb0] sm:$0xff] %vm728_vm0, %v686_v4  ;;  %vm561_vm10 = vcmp.ge.f32.partialorder %v497_v63, 0.0  ;;  %v625_v7 = vmul.f32 0.2, %v497_v63  ;;  %vm560_vm11 = vcmp.ge.f32.partialorder %v496_v0, 0.0  ;;  %v433_v9 = vmul.f32 %v1017_v1, %v218_v5 }
  0xb7   :  { %v624_v8 = vmul.f32 0.2, %v496_v0  ;;  %v432_v10 = vmul.f32 %v1017_v1, %v213_v6 }
  0xb8   :  { %v689_v11 = vsel %vm561_vm10, %v497_v63, %v625_v7  ;;  %v499_v13 = vmul.f32 %v1022_v2, %v433_v9 }
  0xb9   :  { %v688_v12 = vsel %vm560_vm11, %v496_v0, %v624_v8  ;;  %754 = vst.msk [vmem:[%s1411_s3 + $0xc8] sm:$0xff] %vm728_vm0, %v689_v11  ;;  %v498_v14 = vmul.f32 %v1022_v2, %v432_v10  ;;  %v228_v15 = vpop.permute.xlu1 %227  ;;  %v223_v16 = vpop.permute.xlu0 %222 }
  0xba   :  { %753 = vst.msk [vmem:[%s1411_s3 + $0xc0] sm:$0xff] %vm728_vm0, %v688_v12  ;;  %v435_v17 = vmul.f32 %v1017_v1, %v228_v15  ;;  %v434_v18 = vmul.f32 %v1017_v1, %v223_v16  ;;  %vm563_vm12 = vcmp.ge.f32.partialorder %v499_v13, 0.0  ;;  %v627_v19 = vmul.f32 0.2, %v499_v13 }
  0xbb   :  { %vm562_vm13 = vcmp.ge.f32.partialorder %v498_v14, 0.0  ;;  %v626_v20 = vmul.f32 0.2, %v498_v14 }
  0xbc   :  { %v501_v21 = vmul.f32 %v1022_v2, %v435_v17  ;;  %v500_v22 = vmul.f32 %v1022_v2, %v434_v18  ;;  %v691_v23 = vsel %vm563_vm12, %v499_v13, %v627_v19 }
  0xbd   :  { %v690_v24 = vsel %vm562_vm13, %v498_v14, %v626_v20  ;;  %v238_v25 = vpop.permute.xlu1 %237  ;;  %v233_v26 = vpop.permute.xlu0 %232  ;;  %756 = vst.msk [vmem:[%s1411_s3 + $0xd8] sm:$0xff] %vm728_vm0, %v691_v23 }
  0xbe   :  { %755 = vst.msk [vmem:[%s1411_s3 + $0xd0] sm:$0xff] %vm728_vm0, %v690_v24  ;;  %vm565_vm14 = vcmp.ge.f32.partialorder %v501_v21, 0.0  ;;  %v629_v27 = vmul.f32 0.2, %v501_v21  ;;  %vm564_vm15 = vcmp.ge.f32.partialorder %v500_v22, 0.0  ;;  %v437_v29 = vmul.f32 %v1017_v1, %v238_v25 }
  0xbf   :  { %v628_v28 = vmul.f32 0.2, %v500_v22  ;;  %v436_v30 = vmul.f32 %v1017_v1, %v233_v26 }
  0xc0   :  { %v693_v31 = vsel %vm565_vm14, %v501_v21, %v629_v27  ;;  %v503_v33 = vmul.f32 %v1022_v2, %v437_v29 }
  0xc1   :  { %v692_v32 = vsel %vm564_vm15, %v500_v22, %v628_v28  ;;  %758 = vst.msk [vmem:[%s1411_s3 + $0xe8] sm:$0xff] %vm728_vm0, %v693_v31  ;;  %v502_v34 = vmul.f32 %v1022_v2, %v436_v30  ;;  %v248_v35 = vpop.permute.xlu1 %247  ;;  %v243_v36 = vpop.permute.xlu0 %242 }
  0xc2   :  { %757 = vst.msk [vmem:[%s1411_s3 + $0xe0] sm:$0xff] %vm728_vm0, %v692_v32  ;;  %v439_v37 = vmul.f32 %v1017_v1, %v248_v35  ;;  %v438_v38 = vmul.f32 %v1017_v1, %v243_v36  ;;  %vm567_vm1 = vcmp.ge.f32.partialorder %v503_v33, 0.0  ;;  %v631_v39 = vmul.f32 0.2, %v503_v33 }
  0xc3   :  { %vm566_vm2 = vcmp.ge.f32.partialorder %v502_v34, 0.0  ;;  %v630_v40 = vmul.f32 0.2, %v502_v34 }
  0xc4   :  { %v505_v41 = vmul.f32 %v1022_v2, %v439_v37  ;;  %v504_v42 = vmul.f32 %v1022_v2, %v438_v38  ;;  %v695_v43 = vsel %vm567_vm1, %v503_v33, %v631_v39 }
  0xc5   :  { %v694_v44 = vsel %vm566_vm2, %v502_v34, %v630_v40  ;;  %v258_v45 = vpop.permute.xlu1 %257  ;;  %v253_v46 = vpop.permute.xlu0 %252  ;;  %760 = vst.msk [vmem:[%s1411_s3 + $0xf8] sm:$0xff] %vm728_vm0, %v695_v43 }
  0xc6   :  { %759 = vst.msk [vmem:[%s1411_s3 + $0xf0] sm:$0xff] %vm728_vm0, %v694_v44  ;;  %vm569_vm3 = vcmp.ge.f32.partialorder %v505_v41, 0.0  ;;  %v633_v47 = vmul.f32 0.2, %v505_v41  ;;  %vm568_vm4 = vcmp.ge.f32.partialorder %v504_v42, 0.0  ;;  %v441_v49 = vmul.f32 %v1017_v1, %v258_v45 }
  0xc7   :  { %v632_v48 = vmul.f32 0.2, %v504_v42  ;;  %v440_v50 = vmul.f32 %v1017_v1, %v253_v46 }
  0xc8   :  { %v697_v51 = vsel %vm569_vm3, %v505_v41, %v633_v47  ;;  %v507_v53 = vmul.f32 %v1022_v2, %v441_v49 }
  0xc9   :  { %v696_v52 = vsel %vm568_vm4, %v504_v42, %v632_v48  ;;  %762 = vst.msk [vmem:[%s1411_s3 + $0x108] sm:$0xff] %vm728_vm0, %v697_v51  ;;  %v506_v54 = vmul.f32 %v1022_v2, %v440_v50  ;;  %v268_v55 = vpop.permute.xlu1 %267  ;;  %v263_v56 = vpop.permute.xlu0 %262 }
  0xca   :  { %761 = vst.msk [vmem:[%s1411_s3 + $0x100] sm:$0xff] %vm728_vm0, %v696_v52  ;;  %v443_v57 = vmul.f32 %v1017_v1, %v268_v55  ;;  %v442_v58 = vmul.f32 %v1017_v1, %v263_v56  ;;  %vm571_vm5 = vcmp.ge.f32.partialorder %v507_v53, 0.0  ;;  %v635_v59 = vmul.f32 0.2, %v507_v53 }
  0xcb   :  { %vm570_vm6 = vcmp.ge.f32.partialorder %v506_v54, 0.0  ;;  %v634_v60 = vmul.f32 0.2, %v506_v54 }
  0xcc   :  { %v509_v61 = vmul.f32 %v1022_v2, %v443_v57  ;;  %v508_v62 = vmul.f32 %v1022_v2, %v442_v58  ;;  %v699_v63 = vsel %vm571_vm5, %v507_v53, %v635_v59 }
  0xcd   :  { %v698_v0 = vsel %vm570_vm6, %v506_v54, %v634_v60  ;;  %v278_v3 = vpop.permute.xlu1 %277  ;;  %v273_v4 = vpop.permute.xlu0 %272  ;;  %764 = vst.msk [vmem:[%s1411_s3 + $0x118] sm:$0xff] %vm728_vm0, %v699_v63 }
  0xce   :  { %763 = vst.msk [vmem:[%s1411_s3 + $0x110] sm:$0xff] %vm728_vm0, %v698_v0  ;;  %vm573_vm7 = vcmp.ge.f32.partialorder %v509_v61, 0.0  ;;  %v637_v5 = vmul.f32 0.2, %v509_v61  ;;  %vm572_vm8 = vcmp.ge.f32.partialorder %v508_v62, 0.0  ;;  %v445_v7 = vmul.f32 %v1017_v1, %v278_v3 }
  0xcf   :  { %v636_v6 = vmul.f32 0.2, %v508_v62  ;;  %v444_v8 = vmul.f32 %v1017_v1, %v273_v4 }
  0xd0   :  { %v701_v9 = vsel %vm573_vm7, %v509_v61, %v637_v5  ;;  %v511_v11 = vmul.f32 %v1022_v2, %v445_v7 }
  0xd1   :  { %v700_v10 = vsel %vm572_vm8, %v508_v62, %v636_v6  ;;  %766 = vst.msk [vmem:[%s1411_s3 + $0x128] sm:$0xff] %vm728_vm0, %v701_v9  ;;  %v510_v12 = vmul.f32 %v1022_v2, %v444_v8  ;;  %v288_v13 = vpop.permute.xlu1 %287  ;;  %v283_v14 = vpop.permute.xlu0 %282 }
  0xd2   :  { %765 = vst.msk [vmem:[%s1411_s3 + $0x120] sm:$0xff] %vm728_vm0, %v700_v10  ;;  %v447_v15 = vmul.f32 %v1017_v1, %v288_v13  ;;  %v446_v16 = vmul.f32 %v1017_v1, %v283_v14  ;;  %vm575_vm9 = vcmp.ge.f32.partialorder %v511_v11, 0.0  ;;  %v639_v17 = vmul.f32 0.2, %v511_v11 }
  0xd3   :  { %vm574_vm10 = vcmp.ge.f32.partialorder %v510_v12, 0.0  ;;  %v638_v18 = vmul.f32 0.2, %v510_v12 }
  0xd4   :  { %v513_v19 = vmul.f32 %v1022_v2, %v447_v15  ;;  %v512_v20 = vmul.f32 %v1022_v2, %v446_v16  ;;  %v703_v21 = vsel %vm575_vm9, %v511_v11, %v639_v17 }
  0xd5   :  { %v702_v22 = vsel %vm574_vm10, %v510_v12, %v638_v18  ;;  %v298_v23 = vpop.permute.xlu1 %297  ;;  %v293_v24 = vpop.permute.xlu0 %292  ;;  %768 = vst.msk [vmem:[%s1411_s3 + $0x138] sm:$0xff] %vm728_vm0, %v703_v21 }
  0xd6   :  { %767 = vst.msk [vmem:[%s1411_s3 + $0x130] sm:$0xff] %vm728_vm0, %v702_v22  ;;  %vm577_vm11 = vcmp.ge.f32.partialorder %v513_v19, 0.0  ;;  %v641_v25 = vmul.f32 0.2, %v513_v19  ;;  %vm576_vm12 = vcmp.ge.f32.partialorder %v512_v20, 0.0  ;;  %v449_v27 = vmul.f32 %v1017_v1, %v298_v23 }
  0xd7   :  { %v640_v26 = vmul.f32 0.2, %v512_v20  ;;  %v448_v28 = vmul.f32 %v1017_v1, %v293_v24 }
  0xd8   :  { %v705_v29 = vsel %vm577_vm11, %v513_v19, %v641_v25  ;;  %v515_v31 = vmul.f32 %v1022_v2, %v449_v27 }
  0xd9   :  { %v704_v30 = vsel %vm576_vm12, %v512_v20, %v640_v26  ;;  %770 = vst.msk [vmem:[%s1411_s3 + $0x148] sm:$0xff] %vm728_vm0, %v705_v29  ;;  %v514_v32 = vmul.f32 %v1022_v2, %v448_v28  ;;  %v308_v33 = vpop.permute.xlu1 %307  ;;  %v303_v34 = vpop.permute.xlu0 %302 }
  0xda   :  { %769 = vst.msk [vmem:[%s1411_s3 + $0x140] sm:$0xff] %vm728_vm0, %v704_v30  ;;  %v451_v35 = vmul.f32 %v1017_v1, %v308_v33  ;;  %v450_v36 = vmul.f32 %v1017_v1, %v303_v34  ;;  %vm579_vm13 = vcmp.ge.f32.partialorder %v515_v31, 0.0  ;;  %v643_v37 = vmul.f32 0.2, %v515_v31 }
  0xdb   :  { %vm578_vm14 = vcmp.ge.f32.partialorder %v514_v32, 0.0  ;;  %v642_v38 = vmul.f32 0.2, %v514_v32 }
  0xdc   :  { %v517_v39 = vmul.f32 %v1022_v2, %v451_v35  ;;  %v516_v40 = vmul.f32 %v1022_v2, %v450_v36  ;;  %v707_v41 = vsel %vm579_vm13, %v515_v31, %v643_v37 }
  0xdd   :  { %v706_v42 = vsel %vm578_vm14, %v514_v32, %v642_v38  ;;  %v318_v43 = vpop.permute.xlu1 %317  ;;  %v313_v44 = vpop.permute.xlu0 %312  ;;  %772 = vst.msk [vmem:[%s1411_s3 + $0x158] sm:$0xff] %vm728_vm0, %v707_v41 }
  0xde   :  { %771 = vst.msk [vmem:[%s1411_s3 + $0x150] sm:$0xff] %vm728_vm0, %v706_v42  ;;  %vm581_vm15 = vcmp.ge.f32.partialorder %v517_v39, 0.0  ;;  %v645_v45 = vmul.f32 0.2, %v517_v39  ;;  %vm580_vm1 = vcmp.ge.f32.partialorder %v516_v40, 0.0  ;;  %v453_v47 = vmul.f32 %v1017_v1, %v318_v43 }
  0xdf   :  { %v644_v46 = vmul.f32 0.2, %v516_v40  ;;  %v452_v48 = vmul.f32 %v1017_v1, %v313_v44 }
  0xe0   :  { %v709_v49 = vsel %vm581_vm15, %v517_v39, %v645_v45  ;;  %v519_v51 = vmul.f32 %v1022_v2, %v453_v47 }
  0xe1   :  { %v708_v50 = vsel %vm580_vm1, %v516_v40, %v644_v46  ;;  %774 = vst.msk [vmem:[%s1411_s3 + $0x168] sm:$0xff] %vm728_vm0, %v709_v49  ;;  %v518_v52 = vmul.f32 %v1022_v2, %v452_v48  ;;  %v328_v53 = vpop.permute.xlu1 %327  ;;  %v323_v54 = vpop.permute.xlu0 %322 }
  0xe2   :  { %773 = vst.msk [vmem:[%s1411_s3 + $0x160] sm:$0xff] %vm728_vm0, %v708_v50  ;;  %v455_v55 = vmul.f32 %v1017_v1, %v328_v53  ;;  %v454_v56 = vmul.f32 %v1017_v1, %v323_v54  ;;  %vm583_vm2 = vcmp.ge.f32.partialorder %v519_v51, 0.0  ;;  %v647_v57 = vmul.f32 0.2, %v519_v51 }
  0xe3   :  { %vm582_vm3 = vcmp.ge.f32.partialorder %v518_v52, 0.0  ;;  %v646_v58 = vmul.f32 0.2, %v518_v52 }
  0xe4   :  { %v521_v59 = vmul.f32 %v1022_v2, %v455_v55  ;;  %v520_v60 = vmul.f32 %v1022_v2, %v454_v56  ;;  %v711_v61 = vsel %vm583_vm2, %v519_v51, %v647_v57 }
  0xe5   :  { %v710_v62 = vsel %vm582_vm3, %v518_v52, %v646_v58  ;;  %v338_v63 = vpop.permute.xlu1 %337  ;;  %v333_v0 = vpop.permute.xlu0 %332  ;;  %776 = vst.msk [vmem:[%s1411_s3 + $0x178] sm:$0xff] %vm728_vm0, %v711_v61 }
  0xe6   :  { %775 = vst.msk [vmem:[%s1411_s3 + $0x170] sm:$0xff] %vm728_vm0, %v710_v62  ;;  %vm585_vm4 = vcmp.ge.f32.partialorder %v521_v59, 0.0  ;;  %v649_v3 = vmul.f32 0.2, %v521_v59  ;;  %vm584_vm5 = vcmp.ge.f32.partialorder %v520_v60, 0.0  ;;  %v457_v5 = vmul.f32 %v1017_v1, %v338_v63 }
  0xe7   :  { %v648_v4 = vmul.f32 0.2, %v520_v60  ;;  %v456_v6 = vmul.f32 %v1017_v1, %v333_v0 }
  0xe8   :  { %v713_v7 = vsel %vm585_vm4, %v521_v59, %v649_v3  ;;  %v523_v9 = vmul.f32 %v1022_v2, %v457_v5 }
  0xe9   :  { %v712_v8 = vsel %vm584_vm5, %v520_v60, %v648_v4  ;;  %778 = vst.msk [vmem:[%s1411_s3 + $0x188] sm:$0xff] %vm728_vm0, %v713_v7  ;;  %v522_v10 = vmul.f32 %v1022_v2, %v456_v6  ;;  %v348_v11 = vpop.permute.xlu1 %347  ;;  %v343_v12 = vpop.permute.xlu0 %342 }
  0xea   :  { %777 = vst.msk [vmem:[%s1411_s3 + $0x180] sm:$0xff] %vm728_vm0, %v712_v8  ;;  %v459_v13 = vmul.f32 %v1017_v1, %v348_v11  ;;  %v458_v14 = vmul.f32 %v1017_v1, %v343_v12  ;;  %vm587_vm6 = vcmp.ge.f32.partialorder %v523_v9, 0.0  ;;  %v651_v15 = vmul.f32 0.2, %v523_v9 }
  0xeb   :  { %vm586_vm7 = vcmp.ge.f32.partialorder %v522_v10, 0.0  ;;  %v650_v16 = vmul.f32 0.2, %v522_v10 }
  0xec   :  { %v525_v17 = vmul.f32 %v1022_v2, %v459_v13  ;;  %v524_v18 = vmul.f32 %v1022_v2, %v458_v14  ;;  %v715_v19 = vsel %vm587_vm6, %v523_v9, %v651_v15 }
  0xed   :  { %v714_v20 = vsel %vm586_vm7, %v522_v10, %v650_v16  ;;  %v358_v21 = vpop.permute.xlu1 %357  ;;  %v353_v22 = vpop.permute.xlu0 %352  ;;  %780 = vst.msk [vmem:[%s1411_s3 + $0x198] sm:$0xff] %vm728_vm0, %v715_v19 }
  0xee   :  { %779 = vst.msk [vmem:[%s1411_s3 + $0x190] sm:$0xff] %vm728_vm0, %v714_v20  ;;  %vm589_vm8 = vcmp.ge.f32.partialorder %v525_v17, 0.0  ;;  %v653_v23 = vmul.f32 0.2, %v525_v17  ;;  %vm588_vm9 = vcmp.ge.f32.partialorder %v524_v18, 0.0  ;;  %v461_v25 = vmul.f32 %v1017_v1, %v358_v21 }
  0xef   :  { %v652_v24 = vmul.f32 0.2, %v524_v18  ;;  %v460_v26 = vmul.f32 %v1017_v1, %v353_v22 }
  0xf0   :  { %v717_v27 = vsel %vm589_vm8, %v525_v17, %v653_v23  ;;  %v527_v29 = vmul.f32 %v1022_v2, %v461_v25 }
  0xf1   :  { %v716_v28 = vsel %vm588_vm9, %v524_v18, %v652_v24  ;;  %782 = vst.msk [vmem:[%s1411_s3 + $0x1a8] sm:$0xff] %vm728_vm0, %v717_v27  ;;  %v526_v30 = vmul.f32 %v1022_v2, %v460_v26  ;;  %v368_v31 = vpop.permute.xlu1 %367  ;;  %v363_v32 = vpop.permute.xlu0 %362 }
  0xf2   :  { %781 = vst.msk [vmem:[%s1411_s3 + $0x1a0] sm:$0xff] %vm728_vm0, %v716_v28  ;;  %v463_v33 = vmul.f32 %v1017_v1, %v368_v31  ;;  %v462_v34 = vmul.f32 %v1017_v1, %v363_v32  ;;  %vm591_vm10 = vcmp.ge.f32.partialorder %v527_v29, 0.0  ;;  %v655_v35 = vmul.f32 0.2, %v527_v29 }
  0xf3   :  { %vm590_vm11 = vcmp.ge.f32.partialorder %v526_v30, 0.0  ;;  %v654_v36 = vmul.f32 0.2, %v526_v30 }
  0xf4   :  { %v529_v37 = vmul.f32 %v1022_v2, %v463_v33  ;;  %v528_v38 = vmul.f32 %v1022_v2, %v462_v34  ;;  %v719_v39 = vsel %vm591_vm10, %v527_v29, %v655_v35 }
  0xf5   :  { %v718_v40 = vsel %vm590_vm11, %v526_v30, %v654_v36  ;;  %v378_v41 = vpop.permute.xlu1 %377  ;;  %v373_v42 = vpop.permute.xlu0 %372  ;;  %784 = vst.msk [vmem:[%s1411_s3 + $0x1b8] sm:$0xff] %vm728_vm0, %v719_v39 }
  0xf6   :  { %783 = vst.msk [vmem:[%s1411_s3 + $0x1b0] sm:$0xff] %vm728_vm0, %v718_v40  ;;  %vm593_vm12 = vcmp.ge.f32.partialorder %v529_v37, 0.0  ;;  %v657_v43 = vmul.f32 0.2, %v529_v37  ;;  %vm592_vm13 = vcmp.ge.f32.partialorder %v528_v38, 0.0  ;;  %v465_v45 = vmul.f32 %v1017_v1, %v378_v41 }
  0xf7   :  { %v656_v44 = vmul.f32 0.2, %v528_v38  ;;  %v464_v46 = vmul.f32 %v1017_v1, %v373_v42 }
  0xf8   :  { %v721_v47 = vsel %vm593_vm12, %v529_v37, %v657_v43  ;;  %v531_v49 = vmul.f32 %v1022_v2, %v465_v45 }
  0xf9   :  { %v720_v48 = vsel %vm592_vm13, %v528_v38, %v656_v44  ;;  %786 = vst.msk [vmem:[%s1411_s3 + $0x1c8] sm:$0xff] %vm728_vm0, %v721_v47  ;;  %v530_v50 = vmul.f32 %v1022_v2, %v464_v46  ;;  %v388_v51 = vpop.permute.xlu1 %387  ;;  %v383_v52 = vpop.permute.xlu0 %382 }
  0xfa   :  { %785 = vst.msk [vmem:[%s1411_s3 + $0x1c0] sm:$0xff] %vm728_vm0, %v720_v48  ;;  %v467_v53 = vmul.f32 %v1017_v1, %v388_v51  ;;  %v466_v54 = vmul.f32 %v1017_v1, %v383_v52  ;;  %vm595_vm14 = vcmp.ge.f32.partialorder %v531_v49, 0.0  ;;  %v659_v55 = vmul.f32 0.2, %v531_v49 }
  0xfb   :  { %vm594_vm15 = vcmp.ge.f32.partialorder %v530_v50, 0.0  ;;  %v658_v56 = vmul.f32 0.2, %v530_v50 }
  0xfc   :  { %v533_v57 = vmul.f32 %v1022_v2, %v467_v53  ;;  %v532_v58 = vmul.f32 %v1022_v2, %v466_v54  ;;  %v723_v59 = vsel %vm595_vm14, %v531_v49, %v659_v55 }
  0xfd   :  { %v722_v60 = vsel %vm594_vm15, %v530_v50, %v658_v56  ;;  %v398_v61 = vpop.permute.xlu1 %397  ;;  %v393_v62 = vpop.permute.xlu0 %392  ;;  %788 = vst.msk [vmem:[%s1411_s3 + $0x1d8] sm:$0xff] %vm728_vm0, %v723_v59 }
  0xfe   :  { %787 = vst.msk [vmem:[%s1411_s3 + $0x1d0] sm:$0xff] %vm728_vm0, %v722_v60  ;;  %vm597_vm1 = vcmp.ge.f32.partialorder %v533_v57, 0.0  ;;  %v661_v63 = vmul.f32 0.2, %v533_v57  ;;  %vm596_vm2 = vcmp.ge.f32.partialorder %v532_v58, 0.0  ;;  %v469_v3 = vmul.f32 %v1017_v1, %v398_v61 }
  0xff   :  { %v660_v0 = vmul.f32 0.2, %v532_v58  ;;  %v468_v4 = vmul.f32 %v1017_v1, %v393_v62 }
 0x100   :  { %v725_v5 = vsel %vm597_vm1, %v533_v57, %v661_v63  ;;  %v535_v7 = vmul.f32 %v1022_v2, %v469_v3 }
 0x101   :  { %v724_v6 = vsel %vm596_vm2, %v532_v58, %v660_v0  ;;  %790 = vst.msk [vmem:[%s1411_s3 + $0x1e8] sm:$0xff] %vm728_vm0, %v725_v5  ;;  %v534_v8 = vmul.f32 %v1022_v2, %v468_v4 }
 0x102   :  { %789 = vst.msk [vmem:[%s1411_s3 + $0x1e0] sm:$0xff] %vm728_vm0, %v724_v6  ;;  %vm599_vm3 = vcmp.ge.f32.partialorder %v535_v7, 0.0  ;;  %v663_v9 = vmul.f32 0.2, %v535_v7 }
 0x103   :  { %vm598_vm4 = vcmp.ge.f32.partialorder %v534_v8, 0.0  ;;  %v662_v1 = vmul.f32 0.2, %v534_v8 }
 0x104   :  { %v727_v10 = vsel %vm599_vm3, %v535_v7, %v663_v9 }
 0x105   :  { %v726_v11 = vsel %vm598_vm4, %v534_v8, %v662_v1  ;;  %792 = vst.msk [vmem:[%s1411_s3 + $0x1f8] sm:$0xff] %vm728_vm0, %v727_v10 }
 0x106   :  { %791 = vst.msk [vmem:[%s1411_s3 + $0x1f0] sm:$0xff] %vm728_vm0, %v726_v11 }

// kernel: _lambda_.13
= control target key start
LH: loop header
LB: loop body
LE: loop exit
PB: predicated region body
PF: predicated region fallthrough
CT: control target
= control target key end

     0   :  { %s174_s22 = smov 120   ;;  %vm152_vm0 = vcmask 64512   ;;  %s425_s0 = inlined_call_operand.vmem [shape: f32[16,2,8,16], index: 0, kind: input, shape index: {}]   ;;  %s426_s1 = inlined_call_operand.vmem [shape: f32[16,8,8], index: 1, kind: output, shape index: {}]  }
   0x1   :  { %v12_v0 = vld [vmem:[%s425_s0 + $0x20] sm:$0xff]  ;;  %v13_v1 = vld [vmem:[%s425_s0 + $0x28] sm:$0xff]  ;;  %v14_v5 = vld [vmem:[%s425_s0 + $0x30] sm:$0xff] }
   0x2   :  { %v8_v2 = vld [vmem:[%s425_s0] sm:$0xff]  ;;  %v194_v3 = vadd.f32 %v13_v1, %v12_v0  ;;  %v9_v4 = vld [vmem:[%s425_s0 + $0x8] sm:$0xff]  ;;  %v15_v6 = vld [vmem:[%s425_s0 + $0x38] sm:$0xff] }
   0x3   :  { %v205_v7 = vadd.f32 %v9_v4, %v8_v2  ;;  %v10_v8 = vld [vmem:[%s425_s0 + $0x10] sm:$0xff]  ;;  %v11_v9 = vld [vmem:[%s425_s0 + $0x18] sm:$0xff]  ;;  %v215_v10 = vadd.f32 %v15_v6, %v14_v5  ;;  %v16_v14 = vld [vmem:[%s425_s0 + $0x40] sm:$0xff] }
   0x4   :  { %76 = vrot.lane.b32.xlu1 %v194_v3, %s174_s22  ;;  %v219_v11 = vadd.f32 %v11_v9, %v10_v8  ;;  %v18_v12 = vld [vmem:[%s425_s0 + $0x50] sm:$0xff]  ;;  %v19_v13 = vld [vmem:[%s425_s0 + $0x58] sm:$0xff]  ;;  %v17_v15 = vld [vmem:[%s425_s0 + $0x48] sm:$0xff] }
   0x5   :  { %72 = vrot.lane.b32.xlu0 %v205_v7, %s174_s22  ;;  %v235_v16 = vadd.f32 %v19_v13, %v18_v12  ;;  %v239_v17 = vadd.f32 %v17_v15, %v16_v14  ;;  %v22_v18 = vld [vmem:[%s425_s0 + $0x70] sm:$0xff]  ;;  %v23_v19 = vld [vmem:[%s425_s0 + $0x78] sm:$0xff]  ;;  %v20_v20 = vld [vmem:[%s425_s0 + $0x60] sm:$0xff] }
   0x6   :  { %v21_v21 = vld [vmem:[%s425_s0 + $0x68] sm:$0xff]  ;;  %v255_v22 = vadd.f32 %v23_v19, %v22_v18  ;;  %v26_v24 = vld [vmem:[%s425_s0 + $0x90] sm:$0xff]  ;;  %v27_v25 = vld [vmem:[%s425_s0 + $0x98] sm:$0xff] }
   0x7   :  { %v259_v23 = vadd.f32 %v21_v21, %v20_v20  ;;  %v24_v26 = vld [vmem:[%s425_s0 + $0x80] sm:$0xff]  ;;  %v25_v27 = vld [vmem:[%s425_s0 + $0x88] sm:$0xff]  ;;  %v275_v28 = vadd.f32 %v27_v25, %v26_v24  ;;  %v30_v30 = vld [vmem:[%s425_s0 + $0xb0] sm:$0xff] }
   0x8   :  { %78 = vrot.lane.b32.xlu1 %v215_v10, %s174_s22  ;;  %v279_v29 = vadd.f32 %v25_v27, %v24_v26  ;;  %v31_v31 = vld [vmem:[%s425_s0 + $0xb8] sm:$0xff]  ;;  %v28_v32 = vld [vmem:[%s425_s0 + $0xa0] sm:$0xff]  ;;  %v29_v33 = vld [vmem:[%s425_s0 + $0xa8] sm:$0xff] }
   0x9   :  { %74 = vrot.lane.b32.xlu0 %v219_v11, %s174_s22  ;;  %v295_v34 = vadd.f32 %v31_v31, %v30_v30  ;;  %v299_v35 = vadd.f32 %v29_v33, %v28_v32  ;;  %v34_v36 = vld [vmem:[%s425_s0 + $0xd0] sm:$0xff]  ;;  %v35_v37 = vld [vmem:[%s425_s0 + $0xd8] sm:$0xff]  ;;  %v32_v38 = vld [vmem:[%s425_s0 + $0xc0] sm:$0xff] }
   0xa   :  { %v33_v39 = vld [vmem:[%s425_s0 + $0xc8] sm:$0xff]  ;;  %v315_v40 = vadd.f32 %v35_v37, %v34_v36  ;;  %v38_v42 = vld [vmem:[%s425_s0 + $0xf0] sm:$0xff]  ;;  %v39_v43 = vld [vmem:[%s425_s0 + $0xf8] sm:$0xff] }
   0xb   :  { %v319_v41 = vadd.f32 %v33_v39, %v32_v38  ;;  %v36_v44 = vld [vmem:[%s425_s0 + $0xe0] sm:$0xff]  ;;  %v37_v45 = vld [vmem:[%s425_s0 + $0xe8] sm:$0xff]  ;;  %v335_v46 = vadd.f32 %v39_v43, %v38_v42 }
   0xc   :  { %82 = vrot.lane.b32.xlu1 %v235_v16, %s174_s22  ;;  %v339_v47 = vadd.f32 %v37_v45, %v36_v44 }
   0xd   :  { %80 = vrot.lane.b32.xlu0 %v239_v17, %s174_s22 }
  0x10   :  { %86 = vrot.lane.b32.xlu1 %v255_v22, %s174_s22 }
  0x11   :  { %84 = vrot.lane.b32.xlu0 %v259_v23, %s174_s22 }
  0x14   :  { %90 = vrot.lane.b32.xlu1 %v275_v28, %s174_s22 }
  0x15   :  { %88 = vrot.lane.b32.xlu0 %v279_v29, %s174_s22 }
  0x18   :  { %94 = vrot.lane.b32.xlu1 %v295_v34, %s174_s22 }
  0x19   :  { %92 = vrot.lane.b32.xlu0 %v299_v35, %s174_s22 }
  0x1c   :  { %98 = vrot.lane.b32.xlu1 %v315_v40, %s174_s22 }
  0x1d   :  { %96 = vrot.lane.b32.xlu0 %v319_v41, %s174_s22 }
  0x20   :  { %102 = vrot.lane.b32.xlu1 %v335_v46, %s174_s22 }
  0x21   :  { %100 = vrot.lane.b32.xlu0 %v339_v47, %s174_s22 }
  0x76   :  { %v77_v48 = vpop.permute.xlu1 %76 }
  0x77   :  { %v122_v49 = vadd.f32 %v77_v48, %v194_v3  ;;  %v73_v50 = vpop.permute.xlu0 %72 }
  0x78   :  { %v120_v51 = vadd.f32 %v73_v50, %v205_v7 }
  0x79   :  { %v138_v52 = vmul.f32 0.25, %v122_v49 }
  0x7a   :  { %v136_v53 = vmul.f32 0.25, %v120_v51  ;;  %v79_v54 = vpop.permute.xlu1 %78 }
  0x7b   :  { %155 = vst.msk [vmem:[%s426_s1 + $0x10] sm:$0xff] %vm152_vm0, %v138_v52  ;;  %v123_v55 = vadd.f32 %v79_v54, %v215_v10  ;;  %v75_v56 = vpop.permute.xlu0 %74 }
  0x7c   :  { %153 = vst.msk [vmem:[%s426_s1] sm:$0xff] %vm152_vm0, %v136_v53  ;;  %v121_v57 = vadd.f32 %v75_v56, %v219_v11 }
  0x7d   :  { %v139_v58 = vmul.f32 0.25, %v123_v55 }
  0x7e   :  { %v137_v59 = vmul.f32 0.25, %v121_v57  ;;  %v83_v60 = vpop.permute.xlu1 %82 }
  0x7f   :  { %156 = vst.msk [vmem:[%s426_s1 + $0x18] sm:$0xff] %vm152_vm0, %v139_v58  ;;  %v125_v61 = vadd.f32 %v83_v60, %v235_v16  ;;  %v81_v62 = vpop.permute.xlu0 %80 }
  0x80   :  { %154 = vst.msk [vmem:[%s426_s1 + $0x8] sm:$0xff] %vm152_vm0, %v137_v59  ;;  %v124_v63 = vadd.f32 %v81_v62, %v239_v17 }
  0x81   :  { %v141_v0 = vmul.f32 0.25, %v125_v61 }
  0x82   :  { %v140_v1 = vmul.f32 0.25, %v124_v63  ;;  %v87_v2 = vpop.permute.xlu1 %86 }
  0x83   :  { %158 = vst.msk [vmem:[%s426_s1 + $0x28] sm:$0xff] %vm152_vm0, %v141_v0  ;;  %v127_v3 = vadd.f32 %v87_v2, %v255_v22  ;;  %v85_v4 = vpop.permute.xlu0 %84 }
  0x84   :  { %157 = vst.msk [vmem:[%s426_s1 + $0x20] sm:$0xff] %vm152_vm0, %v140_v1  ;;  %v126_v5 = vadd.f32 %v85_v4, %v259_v23 }
  0x85   :  { %v143_v6 = vmul.f32 0.25, %v127_v3 }
  0x86   :  { %v142_v7 = vmul.f32 0.25, %v126_v5  ;;  %v91_v8 = vpop.permute.xlu1 %90 }
  0x87   :  { %160 = vst.msk [vmem:[%s426_s1 + $0x38] sm:$0xff] %vm152_vm0, %v143_v6  ;;  %v129_v9 = vadd.f32 %v91_v8, %v275_v28  ;;  %v89_v10 = vpop.permute.xlu0 %88 }
  0x88   :  { %159 = vst.msk [vmem:[%s426_s1 + $0x30] sm:$0xff] %vm152_vm0, %v142_v7  ;;  %v128_v11 = vadd.f32 %v89_v10, %v279_v29 }
  0x89   :  { %v145_v12 = vmul.f32 0.25, %v129_v9 }
  0x8a   :  { %v144_v13 = vmul.f32 0.25, %v128_v11  ;;  %v95_v14 = vpop.permute.xlu1 %94 }
  0x8b   :  { %162 = vst.msk [vmem:[%s426_s1 + $0x48] sm:$0xff] %vm152_vm0, %v145_v12  ;;  %v131_v15 = vadd.f32 %v95_v14, %v295_v34  ;;  %v93_v16 = vpop.permute.xlu0 %92 }
  0x8c   :  { %161 = vst.msk [vmem:[%s426_s1 + $0x40] sm:$0xff] %vm152_vm0, %v144_v13  ;;  %v130_v17 = vadd.f32 %v93_v16, %v299_v35 }
  0x8d   :  { %v147_v18 = vmul.f32 0.25, %v131_v15 }
  0x8e   :  { %v146_v19 = vmul.f32 0.25, %v130_v17  ;;  %v99_v20 = vpop.permute.xlu1 %98 }
  0x8f   :  { %164 = vst.msk [vmem:[%s426_s1 + $0x58] sm:$0xff] %vm152_vm0, %v147_v18  ;;  %v133_v21 = vadd.f32 %v99_v20, %v315_v40  ;;  %v97_v22 = vpop.permute.xlu0 %96 }
  0x90   :  { %163 = vst.msk [vmem:[%s426_s1 + $0x50] sm:$0xff] %vm152_vm0, %v146_v19  ;;  %v132_v23 = vadd.f32 %v97_v22, %v319_v41 }
  0x91   :  { %v149_v24 = vmul.f32 0.25, %v133_v21 }
  0x92   :  { %v148_v25 = vmul.f32 0.25, %v132_v23  ;;  %v103_v26 = vpop.permute.xlu1 %102 }
  0x93   :  { %166 = vst.msk [vmem:[%s426_s1 + $0x68] sm:$0xff] %vm152_vm0, %v149_v24  ;;  %v135_v27 = vadd.f32 %v103_v26, %v335_v46  ;;  %v101_v28 = vpop.permute.xlu0 %100 }
  0x94   :  { %165 = vst.msk [vmem:[%s426_s1 + $0x60] sm:$0xff] %vm152_vm0, %v148_v25  ;;  %v134_v29 = vadd.f32 %v101_v28, %v339_v47 }
  0x95   :  { %v151_v30 = vmul.f32 0.25, %v135_v27 }
  0x96   :  { %v150_v31 = vmul.f32 0.25, %v134_v29 }
  0x97   :  { %168 = vst.msk [vmem:[%s426_s1 + $0x78] sm:$0xff] %vm152_vm0, %v151_v30 }
  0x98   :  { %167 = vst.msk [vmem:[%s426_s1 + $0x70] sm:$0xff] %vm152_vm0, %v150_v31 }

// kernel: _lambda_.12
= control target key start
LH: loop header
LB: loop body
LE: loop exit
PB: predicated region body
PF: predicated region fallthrough
CT: control target
= control target key end

     0   :  { %s2360_s14 = smov 0   ;;  %s2362_s15 = smov 0   ;;  %s3599_s0 = inlined_call_operand.vmem [shape: bf16[2,18,18,8], index: 0, kind: input, shape index: {}]   ;;  %s3600_s1 = inlined_call_operand.vmem [shape: bf16[72,8], index: 1, kind: input, shape index: {}]   ;;  %s3601_s2 = inlined_call_operand.<no memory space> [shape: f32[1], index: 2, kind: input, shape index: {}]   ;;  %s3602_s3 = inlined_call_operand.vmem [shape: f32[2,256,8], index: 3, kind: output, shape index: {}]  }
   0x1   :  { %8 = sst [smem:[#allocation2]] %s3601_s2  ;;  %s2364_s16 = smov 0  }
   0x2 LB: > { %s26_s2 = sadd.s32 1, %s2323_s15  ;;  %p2074_p0 = scmp.ge.s32.totalorder %s2327_s16, 1  ;;  %s2327_s16 = sphi %s2364_s16, %s14_s16   ;;  %s2323_s15 = sphi %s2362_s15, %s3629_s15   ;;  %s2319_s14 = sphi %s2360_s14, %s3628_s14  }
   0x3   : > { %p28_p1 = scmp.ge.s32.totalorder %s26_s2, 2  ;;  %p161_p2 = scmp.lt.s32.totalorder %s2327_s16, 3 }
   0x5   : > { %s3631_s2 = smov (%p28_p1, %s26_s2), 0  ;;  %p162_p3 = pnand %p2074_p0, %p161_p2 }
   0x7   : > { %165 = sbr.rel (%p162_p3) target bundleno = 627 (0x273), region = 32 }
   0xe   : > { %p192_p4 = scmp.lt.s32.totalorder %s2319_s14, 1  ;;  %vm699_vm0 = vcmask 1042432   ;;  %vm700_vm1 = vcmask 1046532   ;;  %vm264_vm2 = vsmask.f32 3328  ;;  %s2329_s21 = smov 24  }
   0xf   : > { %vm265_vm3 = vsmask.f32 7440  ;;  %vm2416_vm4 = vmor %vm699_vm0, %vm700_vm1  ;;  %s2330_s22 = smov 16   ;;  %s2331_s23 = smov 8   ;;  %vm1649_vm6 = vcmask 1043456   ;;  %vm1300_vm7 = vcmask 64512  }
  0x10   : > { %s3633_s14 = smov (!%p192_p4, %s2319_s14), 1  ;;  %vm2461_vm5 = vmor %vm264_vm2, %vm265_vm3  ;;  %s2332_s24 = smov 32   ;;  %vm1349_vm8 = vcmask 130048   ;;  %vm1382_vm9 = vcmask 195584   ;;  %vm1415_vm10 = vcmask 261120   ;;  %vm1448_vm11 = vcmask 326656  }
  0x11   : > { %s2249_s17 = smul.u32 216, %s3633_s14  ;;  %s2333_s25 = smov 40   ;;  %vm1481_vm12 = vcmask 392192   ;;  %vm1514_vm13 = vcmask 457728   ;;  %vm1547_vm14 = vcmask 523264   ;;  %vm1616_vm15 = vcmask 588800  }
  0x12   : > { %s2334_s28 = smov 48   ;;  %s2335_s6 = smov 56  }
  0x13   : > { %s2384_s20 = scalar_lea.vmem %s3599_s0, %s2249_s17  ;;  %s2336_s9 = smov 64  }
  0x14   : > { %v2387_v0 = vld [vmem:[%s2384_s20 + $0x6c] sm:$0xf]  ;;  %v2390_v1 = vld [vmem:[%s2384_s20 + $0x70] sm:$0xf]  ;;  %v2404_v12 = vld [vmem:[%s2384_s20 + $0x60] sm:$0xf] }
  0x15   : > { %v213_v2 = vld [vmem:[%s2384_s20 + $0xc] sm:$0xf]  ;;  %v497_v3 = vshrl.u32 %v2390_v1, 16  ;;  %v2396_v4 = vcombine.low %v2387_v0, %v2390_v1  ;;  %v484_v5 = vshrl.u32 %v2387_v0, 16  ;;  %v487_v6 = vshll.u32 %v2387_v0, 16  ;;  %s1814_s12 = sld [smem:[#allocation2]] }
  0x16   : > { %v214_v7 = vld [vmem:[%s2384_s20 + $0x10] sm:$0xf]  ;;  %v292_v11 = vshrl.u32 %v213_v2, 16  ;;  %v295_v13 = vshll.u32 %v213_v2, 16  ;;  %v2409_v14 = vld [vmem:[%s2384_s20 + $0x64] sm:$0xf] }
  0x17   : > { %v301_v8 = vshll.u32 %v214_v7, 16  ;;  %v305_v9 = vshrl.u32 %v214_v7, 16  ;;  %v2401_v10 = vcombine.low %v213_v2, %v214_v7  ;;  %1109 = vrot.lane.b32.xlu1 %v2396_v4, %s2329_s21  ;;  %v2412_v15 = vld [vmem:[%s2384_s20 + $0x68] sm:$0x1]  ;;  %v2086_v17 = vrot.slane %v2404_v12, 9  ;;  %s2173_s13 = sshll.u32 %s3633_s14, 8 }
  0x18   : > { %v294_v19 = vrot.slane %v292_v11, 4  ;;  %v760_v20 = vrot.slane %v2409_v14, 5  ;;  %v763_v21 = vrot.slane %v2412_v15, 5  ;;  %v2426_v22 = vld [vmem:[%s2384_s20] sm:$0xf]  ;;  %v297_v23 = vrot.slane %v295_v13, 5  ;;  %s3494_s19 = scalar_lea.vmem %s3602_s3, %s2173_s13 }
  0x19   : > { %v307_v18 = vrot.slane %v305_v9, 4  ;;  %1093 = vrot.lane.b32.xlu0 %v2401_v10, %s2329_s21  ;;  %v2429_v24 = vld [vmem:[%s2384_s20 + $0x4] sm:$0xf]  ;;  %v212_v25 = vld [vmem:[%s2384_s20 + $0x8] sm:$0x1]  ;;  %v2078_v26 = vrot.slane %v2426_v22, 9 }
  0x1a   : > { %v761_v27 = vsel %vm2416_vm4, %v2086_v17, %v760_v20  ;;  %v762_v28 = vrot.slane %v760_v20, 4  ;;  %v704_v29 = vrot.slane %v2429_v24, 5  ;;  %v707_v30 = vrot.slane %v212_v25, 5  ;;  %v2437_v31 = vld [vmem:[%s2384_s20 + $0x74] sm:$0x1] }
  0x1b   : > { %v2087_v32 = vrot.slane %v2387_v0, 9  ;;  %v767_v33 = vrot.slane %v2390_v1, 5  ;;  %v770_v34 = vrot.slane %v2437_v31, 5  ;;  %v215_v35 = vld [vmem:[%s2384_s20 + $0x14] sm:$0x1]  ;;  %v2079_v36 = vrot.slane %v213_v2, 9 }
  0x1c   : > { %v764_v37 = vsel %vm2416_vm4, %v762_v28, %v763_v21  ;;  %v705_v38 = vsel %vm2416_vm4, %v2078_v26, %v704_v29  ;;  %v706_v39 = vrot.slane %v704_v29, 4  ;;  %v711_v40 = vrot.slane %v214_v7, 5 }
  0x1d   : > { %v2447_v41 = vcombine.low %v761_v27, %v764_v37  ;;  %v768_v42 = vsel %vm2416_vm4, %v2087_v32, %v767_v33  ;;  %v769_v43 = vrot.slane %v767_v33, 4  ;;  %v714_v44 = vrot.slane %v215_v35, 5 }
  0x1e   : > { %v708_v45 = vsel %vm2416_vm4, %v706_v39, %v707_v30  ;;  %v712_v46 = vsel %vm2416_vm4, %v2079_v36, %v711_v40  ;;  %v713_v47 = vrot.slane %v711_v40, 4  ;;  %v298_v48 = vor.u32 %v297_v23, %v294_v19  ;;  %v2505_v39 = vld [vmem:[%s2384_s20 + $0x7c] sm:$0xf] }
  0x1f   : > { %1074 = vrot.lane.b32.xlu1 %v2447_v41, %s2330_s22  ;;  %v2128_v49 = vcombine.low %v705_v38, %v708_v45  ;;  %v771_v50 = vsel %vm2416_vm4, %v769_v43, %v770_v34  ;;  %v303_v52 = vrot.slane %v301_v8, 5  ;;  %v311_v53 = vshll.u32 %v215_v35, 16  ;;  %v2500_v35 = vld [vmem:[%s2384_s20 + $0x78] sm:$0xf] }
  0x20   : > { %v2465_v54 = vcombine.low %v768_v42, %v771_v50  ;;  %v715_v55 = vsel %vm2416_vm4, %v713_v47, %v714_v44  ;;  %v299_v56 = vrot.slane %v298_v48, 4  ;;  %v268_v57 = vshrl.u32 %v2426_v22, 16  ;;  %v2517_v50 = vld [vmem:[%s2384_s20 + $0x1c] sm:$0xf] }
  0x21   : > { %1058 = vrot.lane.b32.xlu0 %v2128_v49, %s2330_s22  ;;  %v2471_v58 = vcombine.low %v712_v46, %v715_v55  ;;  %v308_v59 = vor.u32 %v307_v18, %v303_v52  ;;  %v313_v60 = vrot.slane %v311_v53, 5  ;;  %v271_v61 = vshll.u32 %v2426_v22, 16  ;;  %v2514_v49 = vld [vmem:[%s2384_s20 + $0x18] sm:$0xf] }
  0x22   : > { %3614 = vst [vmem:[#allocation3_spill] sm:$0xff] %v2465_v54  ;;  %v304_v62 = vsel %vm2461_vm5, %v299_v56, %v303_v52  ;;  %v270_v63 = vrot.slane %v268_v57, 4  ;;  %v277_v2 = vshll.u32 %v2429_v24, 16  ;;  %v281_v7 = vshrl.u32 %v2429_v24, 16 }
  0x23   : > { %1076 = vrot.lane.b32.xlu1 %v2465_v54, %s2330_s22  ;;  %v309_v8 = vrot.slane %v308_v59, 4  ;;  %v273_v9 = vrot.slane %v271_v61, 5  ;;  %v287_v11 = vshll.u32 %v212_v25, 16  ;;  %v486_v13 = vrot.slane %v484_v5, 4 }
  0x24   : > { %v279_v17 = vrot.slane %v277_v2, 5  ;;  %v283_v18 = vrot.slane %v281_v7, 4  ;;  %v489_v19 = vrot.slane %v487_v6, 5  ;;  %v493_v20 = vshll.u32 %v2390_v1, 16 }
  0x25   : > { %1060 = vrot.lane.b32.xlu0 %v2471_v58, %s2330_s22  ;;  %v314_v21 = vsel %vm2461_vm5, %v309_v8, %v313_v60  ;;  %v274_v23 = vor.u32 %v273_v9, %v270_v63  ;;  %v289_v26 = vrot.slane %v287_v11, 5  ;;  %v499_v25 = vrot.slane %v497_v3, 4  ;;  %v242_v60 = vld [vmem:[%s2384_s20 + $0x80] sm:$0x1] }
  0x26   : > { %v2491_v5 = vcombine.low %v304_v62, %v314_v21  ;;  %v284_v27 = vor.u32 %v283_v18, %v279_v17  ;;  %v490_v28 = vor.u32 %v489_v19, %v486_v13  ;;  %v495_v0 = vrot.slane %v493_v20, 5  ;;  %v2541_v20 = vld [vmem:[%s2384_s20 + $0x20] sm:$0x1] }
  0x27   : > { %v275_v6 = vrot.slane %v274_v23, 4  ;;  %v503_v29 = vshll.u32 %v2437_v31, 16  ;;  %v460_v30 = vshrl.u32 %v2404_v12, 16  ;;  %v463_v32 = vshll.u32 %v2404_v12, 16 }
  0x28   : > { %980 = vrot.lane.b32.xlu1 %v2491_v5, %s2331_s23  ;;  %v285_v1 = vrot.slane %v284_v27, 4  ;;  %v491_v33 = vrot.slane %v490_v28, 4  ;;  %v500_v3 = vor.u32 %v499_v25, %v495_v0  ;;  %v469_v34 = vshll.u32 %v2409_v14, 16 }
  0x29   : > { %v280_v31 = vsel %vm2461_vm5, %v275_v6, %v279_v17  ;;  %v505_v36 = vrot.slane %v503_v29, 5  ;;  %v462_v37 = vrot.slane %v460_v30, 4  ;;  %v465_v38 = vrot.slane %v463_v32, 5 }
  0x2a   : > { %v290_v40 = vsel %vm2461_vm5, %v285_v1, %v289_v26  ;;  %v496_v42 = vsel %vm2461_vm5, %v491_v33, %v495_v0  ;;  %v501_v43 = vrot.slane %v500_v3, 4  ;;  %v471_v44 = vrot.slane %v469_v34, 5 }
  0x2b   : > { %v2112_v45 = vcombine.low %v280_v31, %v290_v40  ;;  %v466_v46 = vor.u32 %v465_v38, %v462_v37  ;;  %v473_v47 = vshrl.u32 %v2409_v14, 16  ;;  %v479_v48 = vshll.u32 %v2412_v15, 16 }
  0x2c   : > { %v506_v52 = vsel %vm2461_vm5, %v501_v43, %v505_v36  ;;  %v508_v53 = vshrl.u32 %v2500_v35, 16  ;;  %v511_v55 = vshll.u32 %v2500_v35, 16  ;;  %v521_v56 = vshrl.u32 %v2505_v39, 16 }
  0x2d   : > { %978 = vrot.lane.b32.xlu0 %v2112_v45, %s2331_s23  ;;  %v2525_v57 = vcombine.low %v496_v42, %v506_v52  ;;  %v467_v59 = vrot.slane %v466_v46, 4  ;;  %v475_v15 = vrot.slane %v473_v47, 4  ;;  %v481_v61 = vrot.slane %v479_v48, 5  ;;  %v2568_v52 = vld [vmem:[%s2384_s20 + $0x84] sm:$0xf] }
  0x2e   : > { %v316_v62 = vshrl.u32 %v2514_v49, 16  ;;  %v319_v63 = vshll.u32 %v2514_v49, 16  ;;  %v329_v2 = vshrl.u32 %v2517_v50, 16  ;;  %v2537_v9 = vcombine.low %v2500_v35, %v2505_v39 }
  0x2f   : > { %3615 = vst [vmem:[#allocation4_spill] sm:$0xff] %v2525_v57  ;;  %996 = vrot.lane.b32.xlu1 %v2525_v57, %s2331_s23  ;;  %v472_v7 = vsel %vm2461_vm5, %v467_v59, %v471_v44  ;;  %v476_v8 = vor.u32 %v475_v15, %v471_v44  ;;  %v510_v11 = vrot.slane %v508_v53, 4  ;;  %v513_v13 = vrot.slane %v511_v55, 5  ;;  %v2571_v53 = vld [vmem:[%s2384_s20 + $0x88] sm:$0xf] }
  0x30   : > { %v517_v17 = vshll.u32 %v2505_v39, 16  ;;  %v523_v18 = vrot.slane %v521_v56, 4  ;;  %v527_v19 = vshll.u32 %v242_v60, 16  ;;  %v318_v23 = vrot.slane %v316_v62, 4 }
  0x31   : > { %v477_v21 = vrot.slane %v476_v8, 4  ;;  %v321_v26 = vrot.slane %v319_v63, 5  ;;  %v325_v25 = vshll.u32 %v2517_v50, 16  ;;  %v514_v27 = vor.u32 %v513_v13, %v510_v11  ;;  %v2601_v13 = vld [vmem:[%s2384_s20 + $0x24] sm:$0xf] }
  0x32   : > { %v519_v28 = vrot.slane %v517_v17, 5  ;;  %v331_v0 = vrot.slane %v329_v2, 4  ;;  %v335_v32 = vshll.u32 %v2541_v20, 16  ;;  %v529_v34 = vrot.slane %v527_v19, 5  ;;  %v2604_v17 = vld [vmem:[%s2384_s20 + $0x28] sm:$0xf] }
  0x33   : > { %v482_v6 = vsel %vm2461_vm5, %v477_v21, %v481_v61  ;;  %1111 = vrot.lane.b32.xlu1 %v2537_v9, %s2329_s21  ;;  %v322_v29 = vor.u32 %v321_v26, %v318_v23  ;;  %v327_v30 = vrot.slane %v325_v25, 5  ;;  %v515_v33 = vrot.slane %v514_v27, 4  ;;  %v2607_v23 = vld [vmem:[%s2384_s20 + $0x8c] sm:$0x1] }
  0x34   : > { %v2549_v1 = vcombine.low %v472_v7, %v482_v6  ;;  %v524_v3 = vor.u32 %v523_v18, %v519_v28  ;;  %v774_v36 = vrot.slane %v2505_v39, 5  ;;  %v2556_v37 = vcombine.low %v2514_v49, %v2517_v50 }
  0x35   : > { %v332_v31 = vor.u32 %v331_v0, %v327_v30  ;;  %v520_v38 = vsel %vm2461_vm5, %v515_v33, %v519_v28  ;;  %v323_v42 = vrot.slane %v322_v29, 4  ;;  %v337_v44 = vrot.slane %v335_v32, 5 }
  0x36   : > { %994 = vrot.lane.b32.xlu0 %v2549_v1, %s2331_s23  ;;  %v525_v40 = vrot.slane %v524_v3, 4  ;;  %v2088_v39 = vrot.slane %v2500_v35, 9  ;;  %v776_v46 = vrot.slane %v774_v36, 4  ;;  %v777_v47 = vrot.slane %v242_v60, 5 }
  0x37   : > { %1144 = vrot.lane.b32.xlu1 %v2525_v57, %s2332_s24  ;;  %v333_v43 = vrot.slane %v332_v31, 4  ;;  %v328_v35 = vsel %vm2461_vm5, %v323_v42, %v327_v30  ;;  %v718_v59 = vrot.slane %v2517_v50, 5  ;;  %v532_v60 = vshrl.u32 %v2568_v52, 16  ;;  %v2296_v30 = vld [vmem:[%s3600_s1] sm:$0xff]  }
  0x38   : > { %v530_v45 = vsel %vm2461_vm5, %v525_v40, %v529_v34  ;;  %v775_v56 = vsel %vm2416_vm4, %v2088_v39, %v774_v36  ;;  %v778_v15 = vsel %vm2416_vm4, %v776_v46, %v777_v47  ;;  %v535_v61 = vshll.u32 %v2568_v52, 16  ;;  %2195 = vmatprep.subr.bf16.mxu0 %v2296_v30  ;;  %2237 = vmatprep.subr.bf16.mxu1 %v2296_v30 }
  0x39   : > { %v2565_v48 = vcombine.low %v520_v38, %v530_v45  ;;  %v338_v55 = vsel %vm2461_vm5, %v333_v43, %v337_v44  ;;  %v545_v62 = vshrl.u32 %v2571_v53, 16  ;;  %v541_v63 = vshll.u32 %v2571_v53, 16  ;;  %v221_v43 = vld [vmem:[%s2384_s20 + $0x2c] sm:$0x1]  ;;  %2196 = vmatpush3.bf16.msra.mxu0 %v2296_v30  ;;  %2242 = vmatpush3.bf16.msra.mxu1 %v2296_v30 }
  0x3a   : > { %1095 = vrot.lane.b32.xlu0 %v2556_v37, %s2329_s21  ;;  %v2592_v2 = vcombine.low %v328_v35, %v338_v55  ;;  %v2080_v7 = vrot.slane %v2514_v49, 9  ;;  %v2597_v50 = vcombine.low %v775_v56, %v778_v15  ;;  %v720_v8 = vrot.slane %v718_v59, 4  ;;  %v2298_v35 = vld [vmem:[%s3600_s1 + $0x10] sm:$0xff]  }
  0x3b   : > { %1146 = vrot.lane.b32.xlu1 %v2565_v48, %s2332_s24  ;;  %v721_v11 = vrot.slane %v2541_v20, 5  ;;  %v534_v18 = vrot.slane %v532_v60, 4  ;;  %v537_v19 = vrot.slane %v535_v61, 5  ;;  %v547_v21 = vrot.slane %v545_v62, 4  ;;  %v2299_v62 = vld [vmem:[%s3600_s1 + $0x18] sm:$0xff]  }
  0x3c   : > { %v719_v49 = vsel %vm2416_vm4, %v2080_v7, %v718_v59  ;;  %v340_v26 = vshrl.u32 %v2601_v13, 16  ;;  %v343_v25 = vshll.u32 %v2601_v13, 16  ;;  %v353_v27 = vshrl.u32 %v2604_v17, 16 }
  0x3d   : > { %v722_v20 = vsel %vm2416_vm4, %v720_v8, %v721_v11  ;;  %v349_v28 = vshll.u32 %v2604_v17, 16  ;;  %v538_v0 = vor.u32 %v537_v19, %v534_v18  ;;  %v551_v29 = vshll.u32 %v2607_v23, 16 }
  0x3e   : > { %1128 = vrot.lane.b32.xlu0 %v2491_v5, %s2332_s24  ;;  %v543_v5 = vrot.slane %v541_v63, 5  ;;  %v2627_v32 = vcombine.low %v719_v49, %v722_v20  ;;  %v2631_v33 = vcombine.low %v2568_v52, %v2571_v53  ;;  %v342_v3 = vrot.slane %v340_v26, 4  ;;  %v2701_v20 = vld [vmem:[%s2384_s20 + $0x90] sm:$0xf] }
  0x3f   : > { %1179 = vrot.lane.b32.xlu1 %v2465_v54, %s2333_s25  ;;  %v345_v34 = vrot.slane %v343_v25, 5  ;;  %v351_v31 = vrot.slane %v349_v28, 5  ;;  %v355_v36 = vrot.slane %v353_v27, 4  ;;  %v539_v38 = vrot.slane %v538_v0, 4  ;;  %v2704_v25 = vld [vmem:[%s2384_s20 + $0x94] sm:$0xf] }
  0x40   : > { %v548_v6 = vor.u32 %v547_v21, %v543_v5  ;;  %v553_v42 = vrot.slane %v551_v29, 5  ;;  %v359_v45 = vshll.u32 %v221_v43, 16  ;;  %v2654_v55 = vcombine.low %v2601_v13, %v2604_v17  ;;  %v2724_v29 = vld [vmem:[%s2384_s20 + $0x34] sm:$0xf] }
  0x41   : > { %v346_v44 = vor.u32 %v345_v34, %v342_v3  ;;  %v356_v39 = vor.u32 %v355_v36, %v351_v31  ;;  %v544_v46 = vsel %vm2461_vm5, %v539_v38, %v543_v5  ;;  %v781_v61 = vrot.slane %v2571_v53, 5  ;;  %v248_v36 = vld [vmem:[%s2384_s20 + $0x98] sm:$0x1] }
  0x42   : > { %1130 = vrot.lane.b32.xlu0 %v2592_v2, %s2332_s24  ;;  %v549_v40 = vrot.slane %v548_v6, 4  ;;  %3616 = vst [vmem:[#allocation5_spill] sm:$0xff] %v2654_v55  ;;  %v361_v60 = vrot.slane %v359_v45, 5  ;;  %v2089_v53 = vrot.slane %v2568_v52, 9  ;;  %v784_v11 = vrot.slane %v2607_v23, 5 }
  0x43   : > { %1181 = vrot.lane.b32.xlu1 %v2597_v50, %s2333_s25  ;;  %v347_v59 = vrot.slane %v346_v44, 4  ;;  %v357_v15 = vrot.slane %v356_v39, 4  ;;  %v783_v8 = vrot.slane %v781_v61, 4  ;;  %v725_v19 = vrot.slane %v2604_v17, 5  ;;  %v2302_v45 = vld [vmem:[%s3600_s1 + $0x20] ss:$0 sps:$4 sm:$0xff]  }
  0x44   : > { %v554_v47 = vsel %vm2461_vm5, %v549_v40, %v553_v42  ;;  %v782_v52 = vsel %vm2416_vm4, %v2089_v53, %v781_v61  ;;  %v2081_v23 = vrot.slane %v2601_v13, 9  ;;  %v728_v26 = vrot.slane %v221_v43, 5 }
  0x45   : > { %v2658_v56 = vcombine.low %v544_v46, %v554_v47  ;;  %v352_v63 = vsel %vm2461_vm5, %v347_v59, %v351_v31  ;;  %v362_v7 = vsel %vm2461_vm5, %v357_v15, %v361_v60  ;;  %v785_v5 = vsel %vm2416_vm4, %v783_v8, %v784_v11 }
  0x46   : > { %1163 = vrot.lane.b32.xlu0 %v2471_v58, %s2333_s25  ;;  %v2297_v58 = vld [vmem:[%s3600_s1 + $0x8] sm:$0xff]   ;;  %v2676_v18 = vcombine.low %v352_v63, %v362_v7  ;;  %v2689_v21 = vcombine.low %v782_v52, %v785_v5  ;;  %v727_v49 = vrot.slane %v725_v19, 4  ;;  %v726_v17 = vsel %vm2416_vm4, %v2081_v23, %v725_v19 }
  0x47   : > { %1214 = vrot.lane.b32.xlu1 %v2537_v9, %s2334_s28  ;;  %2197 = vmatprep.subr.bf16.mxu0 %v2297_v58  ;;  %v556_v27 = vshrl.u32 %v2701_v20, 16  ;;  %v559_v28 = vshll.u32 %v2701_v20, 16  ;;  %v569_v0 = vshrl.u32 %v2704_v25, 16  ;;  %v565_v6 = vshll.u32 %v2704_v25, 16 }
  0x48   : > { %2238 = vmatprep.subr.bf16.mxu1 %v2297_v58  ;;  %2198 = vmatpush3.bf16.msra.mxu0 %v2297_v58  ;;  %v373_v42 = vshll.u32 %v2724_v29, 16  ;;  %v575_v44 = vshll.u32 %v248_v36, 16  ;;  %v2739_v39 = vcombine.low %v2701_v20, %v2704_v25  ;;  %v788_v19 = vrot.slane %v2704_v25, 5 }
  0x49   : > { %2243 = vmatpush3.bf16.msra.mxu1 %v2297_v58  ;;  %2199 = vmatprep.subr.bf16.mxu0 %v2298_v35  ;;  %v558_v30 = vrot.slane %v556_v27, 4  ;;  %v561_v3 = vrot.slane %v559_v28, 5  ;;  %v567_v34 = vrot.slane %v565_v6, 5  ;;  %v571_v31 = vrot.slane %v569_v0, 4  ;;  %v2768_v27 = vld [vmem:[%s2384_s20 + $0x9c] sm:$0xf] }
  0x4a   : > { %1165 = vrot.lane.b32.xlu0 %v2627_v32, %s2333_s25  ;;  %2239 = vmatprep.subr.bf16.mxu1 %v2298_v35  ;;  %3617 = vst [vmem:[#allocation6_spill] sm:$0xff] %v2739_v39  ;;  %v577_v61 = vrot.slane %v575_v44, 5  ;;  %v2090_v5 = vrot.slane %v2701_v20, 9  ;;  %v791_v25 = vrot.slane %v248_v36, 5  ;;  %v2771_v28 = vld [vmem:[%s2384_s20 + $0xa0] sm:$0xf] }
  0x4b   : > { %1216 = vrot.lane.b32.xlu1 %v2631_v33, %s2334_s28  ;;  %v562_v43 = vor.u32 %v561_v3, %v558_v30  ;;  %v572_v58 = vor.u32 %v571_v31, %v567_v34  ;;  %v732_v0 = vrot.slane %v2724_v29, 5  ;;  %v580_v30 = vshrl.u32 %v2768_v27, 16 }
  0x4c   : > { %2200 = vmatpush3.bf16.msra.mxu0 %v2298_v35  ;;  %v789_v6 = vsel %vm2416_vm4, %v2090_v5, %v788_v19  ;;  %v589_v31 = vshll.u32 %v2771_v28, 16 }
  0x4d   : > { %2244 = vmatpush3.bf16.msra.mxu1 %v2298_v35  ;;  %2201 = vmatprep.subr.bf16.mxu0 %v2299_v62  ;;  %v375_v35 = vrot.slane %v373_v42, 5  ;;  %v563_v15 = vrot.slane %v562_v43, 4  ;;  %v573_v60 = vrot.slane %v572_v58, 4  ;;  %v2800_v43 = vld [vmem:[%s2384_s20 + $0x3c] sm:$0xf]  ;;  %v582_v44 = vrot.slane %v580_v30, 4 }
  0x4e   : > { %1198 = vrot.lane.b32.xlu0 %v2556_v37, %s2334_s28  ;;  %2240 = vmatprep.subr.bf16.mxu1 %v2299_v62  ;;  %v2803_v58 = vld [vmem:[%s2384_s20 + $0x40] sm:$0xf] }
  0x4f   : > { %1249 = vrot.lane.b32.xlu1 %v2565_v48, %s2335_s6  ;;  %v568_v8 = vsel %vm2461_vm5, %v563_v15, %v567_v34  ;;  %v578_v11 = vsel %vm2461_vm5, %v573_v60, %v577_v61  ;;  %v593_v34 = vshrl.u32 %v2771_v28, 16  ;;  %v401_v15 = vshrl.u32 %v2803_v58, 16 }
  0x50   : > { %2202 = vmatpush3.bf16.msra.mxu0 %v2299_v62  ;;  %v2765_v23 = vcombine.low %v568_v8, %v578_v11  ;;  %v397_v60 = vshll.u32 %v2803_v58, 16 }
  0x51   : > { %2245 = vmatpush3.bf16.msra.mxu1 %v2299_v62  ;;  %v224_v62 = vld [vmem:[%s2384_s20 + $0x38] sm:$0x1]  ;;  %2247 = vmatprep.subr.msk.bf16.mxu0 %vm1649_vm6, %v2302_v45 }
  0x52   : > { %1200 = vrot.lane.b32.xlu0 %v2654_v55, %s2334_s28  ;;  %v383_v53 = vshll.u32 %v224_v62, 16  ;;  %2248 = vmatprep.subr.msk.bf16.mxu1 %vm1649_vm6, %v2302_v45  ;;  %v399_v11 = vrot.slane %v397_v60, 5 }
  0x53   : > { %1251 = vrot.lane.b32.xlu1 %v2658_v56, %s2335_s6 }
  0x56   : > { %1233 = vrot.lane.b32.xlu0 %v2592_v2, %s2335_s6 }
  0x57   : > { %1284 = vrot.lane.b32.xlu1 %v2597_v50, %s2336_s9 }
  0x5a   : > { %1235 = vrot.lane.b32.xlu0 %v2676_v18, %s2335_s6 }
  0x5b   : > { %998 = vrot.lane.b32.xlu1 %v2565_v48, %s2331_s23  ;;  %v729_v48 = vsel %vm2416_vm4, %v727_v49, %v728_v26 }
  0x5c   : > { %v2708_v13 = vcombine.low %v726_v17, %v729_v48  ;;  %v385_v17 = vrot.slane %v383_v53, 5  ;;  %v790_v48 = vrot.slane %v788_v19, 4  ;;  %v403_v19 = vrot.slane %v401_v15, 4 }
  0x5e   : > { %1268 = vrot.lane.b32.xlu0 %v2627_v32, %s2336_s9  ;;  %v792_v3 = vsel %vm2416_vm4, %v790_v48, %v791_v25  ;;  %v404_v25 = vor.u32 %v403_v19, %v399_v11 }
  0x5f   : > { %1286 = vrot.lane.b32.xlu1 %v2689_v21, %s2336_s9  ;;  %v2797_v42 = vcombine.low %v789_v6, %v792_v3  ;;  %v2843_v6 = vcombine.low %v2800_v43, %v2803_v58 }
  0x61   : > { %3620 = vst [vmem:[#allocation9_spill] sm:$0xff] %v2843_v6 }
  0x62   : > { %982 = vrot.lane.b32.xlu0 %v2592_v2, %s2331_s23  ;;  %v2721_v2 = vld [vmem:[%s2384_s20 + $0x30] sm:$0xf] }
  0x63   : > { %1000 = vrot.lane.b32.xlu1 %v2658_v56, %s2331_s23  ;;  %v364_v38 = vshrl.u32 %v2721_v2, 16  ;;  %v367_v40 = vshll.u32 %v2721_v2, 16  ;;  %v2760_v52 = vcombine.low %v2721_v2, %v2724_v29 }
  0x65   : > { %v366_v46 = vrot.slane %v364_v38, 4  ;;  %v369_v47 = vrot.slane %v367_v40, 5  ;;  %3618 = vst [vmem:[#allocation7_spill] sm:$0xff] %v2760_v52  ;;  %v2082_v38 = vrot.slane %v2721_v2, 9  ;;  %v734_v40 = vrot.slane %v732_v0, 4 }
  0x66   : > { %1270 = vrot.lane.b32.xlu0 %v2708_v13, %s2336_s9 }
  0x67   : > { %1078 = vrot.lane.b32.xlu1 %v2597_v50, %s2330_s22  ;;  %v377_v50 = vshrl.u32 %v2724_v29, 16  ;;  %v370_v63 = vor.u32 %v369_v47, %v366_v46  ;;  %v583_v29 = vshll.u32 %v2768_v27, 16  ;;  %v591_v46 = vrot.slane %v589_v31, 5 }
  0x68   : > { %v595_v47 = vrot.slane %v593_v34, 4  ;;  %v733_v2 = vsel %vm2416_vm4, %v2082_v38, %v732_v0  ;;  %v795_v38 = vrot.slane %v2771_v28, 5 }
  0x69   : > { %v379_v59 = vrot.slane %v377_v50, 4  ;;  %v371_v49 = vrot.slane %v370_v63, 4  ;;  %v735_v50 = vrot.slane %v224_v62, 5 }
  0x6a   : > { %984 = vrot.lane.b32.xlu0 %v2676_v18, %s2331_s23  ;;  %v596_v62 = vor.u32 %v595_v47, %v591_v46 }
  0x6b   : > { %1080 = vrot.lane.b32.xlu1 %v2689_v21, %s2330_s22  ;;  %v380_v7 = vor.u32 %v379_v59, %v375_v35  ;;  %v391_v59 = vshll.u32 %v2800_v43, 16 }
  0x6d   : > { %v381_v26 = vrot.slane %v380_v7, 4  ;;  %v2824_v7 = vcombine.low %v2768_v27, %v2771_v28  ;;  %v393_v8 = vrot.slane %v391_v59, 5 }
  0x6e   : > { %1062 = vrot.lane.b32.xlu0 %v2627_v32, %s2330_s22  ;;  %v1651_v32 = vsel %vm1649_vm6, %v2302_v45, 0  ;;  %v585_v45 = vrot.slane %v583_v29, 5  ;;  %v405_v29 = vrot.slane %v404_v25, 4 }
  0x6f   : > { %1113 = vrot.lane.b32.xlu1 %v2631_v33, %s2329_s21  ;;  %2204 = vmatpush3.bf16.msra.mxu0 %v1651_v32  ;;  %v386_v20 = vsel %vm2461_vm5, %v381_v26, %v385_v17  ;;  %3619 = vst [vmem:[#allocation8_spill] sm:$0xff] %v2824_v7  ;;  %v227_v17 = vld [vmem:[%s2384_s20 + $0x44] sm:$0x1] }
  0x70   : > { %2246 = vmatpush3.bf16.msra.mxu1 %v1651_v32  ;;  %v586_v61 = vor.u32 %v585_v45, %v582_v44  ;;  %v407_v0 = vshll.u32 %v227_v17, 16  ;;  %v2091_v45 = vrot.slane %v2768_v27, 9 }
  0x72   : > { %1064 = vrot.lane.b32.xlu0 %v2708_v13, %s2330_s22  ;;  %v587_v5 = vrot.slane %v586_v61, 4  ;;  %v409_v34 = vrot.slane %v407_v0, 5  ;;  %v796_v27 = vsel %vm2416_vm4, %v2091_v45, %v795_v38  ;;  %v742_v61 = vrot.slane %v227_v17, 5  ;;  %v2929_v0 = vld [vmem:[%s2384_s20 + $0x4c] sm:$0xf] }
  0x73   : > { %1115 = vrot.lane.b32.xlu1 %v2739_v39, %s2329_s21  ;;  %v421_v45 = vshll.u32 %v2929_v0, 16 }
  0x74   : > { %v410_v44 = vsel %vm2461_vm5, %v405_v29, %v409_v34 }
  0x76   : > { %1097 = vrot.lane.b32.xlu0 %v2654_v55, %s2329_s21 }
  0x77   : > { %1148 = vrot.lane.b32.xlu1 %v2658_v56, %s2332_s24  ;;  %v376_v56 = vsel %vm2461_vm5, %v371_v49, %v375_v35  ;;  %v388_v35 = vshrl.u32 %v2800_v43, 16  ;;  %v597_v49 = vrot.slane %v596_v62, 4 }
  0x78   : > { %v2792_v36 = vcombine.low %v376_v56, %v386_v20  ;;  %v592_v56 = vsel %vm2461_vm5, %v587_v5, %v591_v46  ;;  %v797_v46 = vrot.slane %v795_v38, 4  ;;  %v254_v38 = vld [vmem:[%s2384_s20 + $0xb0] sm:$0x1] }
  0x79   : > { %v390_v53 = vrot.slane %v388_v35, 4  ;;  %v739_v35 = vrot.slane %v2803_v58, 5  ;;  %v2083_v58 = vrot.slane %v2800_v43, 9  ;;  %v2900_v43 = vld [vmem:[%s2384_s20 + $0xa8] sm:$0xf] }
  0x7a   : > { %1099 = vrot.lane.b32.xlu0 %v2760_v52, %s2329_s21  ;;  %v604_v5 = vshrl.u32 %v2900_v43, 16 }
  0x7b   : > { %1150 = vrot.lane.b32.xlu1 %v2765_v23, %s2332_s24  ;;  %v394_v48 = vor.u32 %v393_v8, %v390_v53  ;;  %v741_v60 = vrot.slane %v739_v35, 4  ;;  %v2903_v8 = vld [vmem:[%s2384_s20 + $0xac] sm:$0xf] }
  0x7c   : > { %v613_v17 = vshll.u32 %v2903_v8, 16 }
  0x7d   : > { %v395_v3 = vrot.slane %v394_v48, 4 }
  0x7e   : > { %1132 = vrot.lane.b32.xlu0 %v2676_v18, %s2332_s24  ;;  %v251_v18 = vld [vmem:[%s2384_s20 + $0xa4] sm:$0x1] }
  0x7f   : > { %1183 = vrot.lane.b32.xlu1 %v2689_v21, %s2333_s25  ;;  %v736_v21 = vsel %vm2416_vm4, %v734_v40, %v735_v50  ;;  %v599_v32 = vshll.u32 %v251_v18, 16  ;;  %v400_v50 = vsel %vm2461_vm5, %v395_v3, %v399_v11  ;;  %v798_v47 = vrot.slane %v251_v18, 5 }
  0x80   : > { %v2820_v63 = vcombine.low %v733_v2, %v736_v21  ;;  %v2867_v28 = vcombine.low %v400_v50, %v410_v44  ;;  %v615_v3 = vrot.slane %v613_v17, 5  ;;  %v425_v44 = vshrl.u32 %v2929_v0, 16 }
  0x81   : > { %v601_v26 = vrot.slane %v599_v32, 5  ;;  %v799_v18 = vsel %vm2416_vm4, %v797_v46, %v798_v47  ;;  %v740_v32 = vsel %vm2416_vm4, %v2083_v58, %v739_v35  ;;  %v2950_v58 = vcombine.low %v2900_v43, %v2903_v8 }
  0x82   : > { %1134 = vrot.lane.b32.xlu0 %v2792_v36, %s2332_s24  ;;  %v2884_v15 = vcombine.low %v796_v27, %v799_v18  ;;  %v623_v27 = vshll.u32 %v254_v38, 16 }
  0x83   : > { %1185 = vrot.lane.b32.xlu1 %v2797_v42, %s2333_s25  ;;  %v602_v20 = vsel %vm2461_vm5, %v597_v49, %v601_v26  ;;  %v607_v49 = vshll.u32 %v2900_v43, 16  ;;  %v617_v26 = vshrl.u32 %v2903_v8, 16 }
  0x84   : > { %v2847_v30 = vcombine.low %v592_v56, %v602_v20  ;;  %v606_v56 = vrot.slane %v604_v5, 4  ;;  %v625_v17 = vrot.slane %v623_v27, 5 }
  0x85   : > { %v609_v20 = vrot.slane %v607_v49, 5  ;;  %v619_v29 = vrot.slane %v617_v26, 4 }
  0x86   : > { %1167 = vrot.lane.b32.xlu0 %v2708_v13, %s2333_s25 }
  0x87   : > { %1218 = vrot.lane.b32.xlu1 %v2739_v39, %s2334_s28  ;;  %v610_v47 = vor.u32 %v609_v20, %v606_v56  ;;  %v620_v35 = vor.u32 %v619_v29, %v615_v3  ;;  %v2957_v56 = vld [vmem:[%s2384_s20 + $0x50] sm:$0x1] }
  0x89   : > { %v2833_v13 = vpop.permute.xlu1 %1109  ;;  %v611_v49 = vrot.slane %v610_v47, 4  ;;  %v621_v26 = vrot.slane %v620_v35, 4  ;;  %v802_v47 = vrot.slane %v2903_v8, 5 }
  0x8a   : > { %1169 = vrot.lane.b32.xlu0 %v2820_v63, %s2333_s25 }
  0x8b   : > { %1220 = vrot.lane.b32.xlu1 %v2824_v7, %s2334_s28  ;;  %v2849_v31 = vpop.permute.xlu0 %1093 }
  0x8e   : > { %1202 = vrot.lane.b32.xlu0 %v2760_v52, %s2334_s28  ;;  %v2994_v52 = vld [vmem:[%s2384_s20 + $0xb8] sm:$0xf] }
  0x8f   : > { %1253 = vrot.lane.b32.xlu1 %v2765_v23, %s2335_s6 }
  0x91   : > { %v2852_v40 = vpop.permute.xlu1 %1074 }
  0x92   : > { %1204 = vrot.lane.b32.xlu0 %v2843_v6, %s2334_s28 }
  0x93   : > { %1255 = vrot.lane.b32.xlu1 %v2847_v30, %s2335_s6  ;;  %v2869_v21 = vpop.permute.xlu0 %1058 }
  0x95   : > { %v2863_v2 = vpop.permute.xlu1 %1076 }
  0x96   : > { %1237 = vrot.lane.b32.xlu0 %v2792_v36, %s2335_s6 }
  0x97   : > { %1288 = vrot.lane.b32.xlu1 %v2797_v42, %s2336_s9  ;;  %v2887_v62 = vpop.permute.xlu0 %1060 }
  0x9a   : > { %1239 = vrot.lane.b32.xlu0 %v2867_v28, %s2335_s6  ;;  %v2882_v59 = vpop.permute.xlu1 %980 }
  0x9b   : > { %1002 = vrot.lane.b32.xlu1 %v2765_v23, %s2331_s23  ;;  %v743_v23 = vsel %vm2416_vm4, %v741_v60, %v742_v61 }
  0x9c   : > { %v2909_v19 = vcombine.low %v740_v32, %v743_v23  ;;  %v423_v32 = vrot.slane %v421_v45, 5  ;;  %v427_v23 = vrot.slane %v425_v44, 4  ;;  %v616_v44 = vsel %vm2461_vm5, %v611_v49, %v615_v3 }
  0x9d   : > { %v626_v45 = vsel %vm2461_vm5, %v621_v26, %v625_v17  ;;  %v804_v26 = vrot.slane %v802_v47, 4  ;;  %v805_v17 = vrot.slane %v254_v38, 5 }
  0x9e   : > { %1272 = vrot.lane.b32.xlu0 %v2820_v63, %s2336_s9  ;;  %v428_v29 = vor.u32 %v427_v23, %v423_v32  ;;  %v2984_v3 = vcombine.low %v616_v44, %v626_v45  ;;  %v641_v44 = vshrl.u32 %v2994_v52, 16 }
  0x9f   : > { %1290 = vrot.lane.b32.xlu1 %v2884_v15, %s2336_s9  ;;  %v2907_v11 = vpop.permute.xlu0 %978 }
  0xa0   : > { %v429_v23 = vrot.slane %v428_v29, 4 }
  0xa1   : > { %v2897_v53 = vpop.permute.xlu1 %996 }
  0xa2   : > { %986 = vrot.lane.b32.xlu0 %v2792_v36, %s2331_s23  ;;  %v2924_v36 = vld [vmem:[%s2384_s20 + $0x48] sm:$0xf] }
  0xa3   : > { %1004 = vrot.lane.b32.xlu1 %v2847_v30, %s2331_s23  ;;  %v415_v50 = vshll.u32 %v2924_v36, 16  ;;  %v2979_v27 = vcombine.low %v2924_v36, %v2929_v0 }
  0xa5   : > { %v2917_v48 = vpop.permute.xlu1 %1111  ;;  %v417_v61 = vrot.slane %v415_v50, 5 }
  0xa6   : > { %1274 = vrot.lane.b32.xlu0 %v2909_v19, %s2336_s9 }
  0xa7   : > { %1082 = vrot.lane.b32.xlu1 %v2797_v42, %s2330_s22  ;;  %v412_v42 = vshrl.u32 %v2924_v36, 16 }
  0xa8   : > { %v2926_v25 = vpop.permute.xlu0 %994 }
  0xa9   : > { %v2931_v34 = vpop.permute.xlu1 %1144  ;;  %v414_v60 = vrot.slane %v412_v42, 4  ;;  %v431_v42 = vshll.u32 %v2957_v56, 16 }
  0xaa   : > { %988 = vrot.lane.b32.xlu0 %v2867_v28, %s2331_s23 }
  0xab   : > { %1084 = vrot.lane.b32.xlu1 %v2884_v15, %s2330_s22  ;;  %v433_v49 = vrot.slane %v431_v42, 5 }
  0xac   : > { %v2942_v46 = vpop.permute.xlu0 %1095 }
  0xad   : > { %v2944_v18 = vpop.permute.xlu1 %1146 }
  0xae   : > { %1066 = vrot.lane.b32.xlu0 %v2820_v63, %s2330_s22  ;;  %v418_v63 = vor.u32 %v417_v61, %v414_v60  ;;  %v2092_v60 = vrot.slane %v2900_v43, 9  ;;  %v2998_v43 = vcombine.low %v2404_v12, %v2409_v14 }
  0xaf   : > { %1117 = vrot.lane.b32.xlu1 %v2824_v7, %s2329_s21  ;;  %v2989_v7 = vld [vmem:[%s2384_s20 + $0xb4] sm:$0xf] }
  0xb0   : > { %v2954_v5 = vpop.permute.xlu0 %1128  ;;  %v419_v61 = vrot.slane %v418_v63, 4  ;;  %v434_v63 = vsel %vm2461_vm5, %v429_v23, %v433_v49  ;;  %v803_v29 = vsel %vm2416_vm4, %v2092_v60, %v802_v47  ;;  %v628_v12 = vshrl.u32 %v2989_v7, 16 }
  0xb1   : > { %v2959_v20 = vpop.permute.xlu1 %1179  ;;  %v631_v42 = vshll.u32 %v2989_v7, 16  ;;  %v749_v23 = vrot.slane %v2957_v56, 5  ;;  %v2096_v49 = vcombine.low %v2426_v22, %v2429_v24  ;;  %v643_v22 = vrot.slane %v641_v44, 4 }
  0xb2   : > { %1068 = vrot.lane.b32.xlu0 %v2909_v19, %s2330_s22  ;;  %v424_v38 = vsel %vm2461_vm5, %v419_v61, %v423_v32  ;;  %v637_v32 = vshll.u32 %v2994_v52, 16  ;;  %v2084_v61 = vrot.slane %v2924_v36, 9  ;;  %v630_v56 = vrot.slane %v628_v12, 4 }
  0xb3   : > { %1119 = vrot.lane.b32.xlu1 %v2950_v58, %s2329_s21  ;;  %v3024_v47 = vcombine.low %v424_v38, %v434_v63  ;;  %v3042_v38 = vld [vmem:[%s2384_s20 + $0x58] sm:$0xf]  ;;  %v633_v63 = vrot.slane %v631_v42, 5  ;;  %v3073_v57 = vcombine.low %v2989_v7, %v2994_v52  ;;  %v1303_v55 = vsel %vm1300_vm7, %v2096_v49, %v2907_v11 }
  0xb4   : > { %v2966_v50 = vpop.permute.xlu0 %1130  ;;  %v3044_v39 = vrot.slane %v637_v32, 5  ;;  %v445_v44 = vshll.u32 %v3042_v38, 16 }
  0xb5   : > { %v2973_v35 = vpop.permute.xlu1 %1181  ;;  %v634_v32 = vor.u32 %v633_v63, %v630_v56 }
  0xb6   : > { %1101 = vrot.lane.b32.xlu0 %v2843_v6, %s2329_s21 }
  0xb7   : > { %1152 = vrot.lane.b32.xlu1 %v2847_v30, %s2332_s24  ;;  %v746_v30 = vrot.slane %v2929_v0, 5  ;;  %v806_v0 = vsel %vm2416_vm4, %v804_v26, %v805_v17  ;;  %v1327_v26 = vsel %vm1300_vm7, %v2998_v43, %v2926_v25  ;;  %v3037_v17 = vld [vmem:[%s2384_s20 + $0x54] sm:$0xf]  ;;  %v3049_v25 = vld [vmem:[%s2384_s20 + $0xbc] sm:$0x1] }
  0xb8   : > { %v2986_v8 = vpop.permute.xlu0 %1163  ;;  %v3034_v36 = vcombine.low %v803_v29, %v806_v0  ;;  %v1367_v29 = vsel %vm1349_vm8, %v1327_v26, %v2852_v40  ;;  %v436_v0 = vshrl.u32 %v3037_v17, 16  ;;  %v439_v42 = vshll.u32 %v3037_v17, 16 }
  0xb9   : > { %v2991_v6 = vpop.permute.xlu1 %1214  ;;  %v748_v60 = vrot.slane %v746_v30, 4 }
  0xba   : > { %1103 = vrot.lane.b32.xlu0 %v2979_v27, %s2329_s21  ;;  %v438_v63 = vrot.slane %v436_v0, 4 }
  0xbb   : > { %1154 = vrot.lane.b32.xlu1 %v2984_v3, %s2332_s24  ;;  %v750_v12 = vsel %vm2416_vm4, %v748_v60, %v749_v23  ;;  %v647_v60 = vshll.u32 %v3049_v25, 16  ;;  %v1400_v23 = vsel %vm1382_vm9, %v1367_v29, %v2833_v13  ;;  %v3088_v29 = vrot.slane %v445_v44, 5 }
  0xbc   : > { %v3012_v14 = vpop.permute.xlu0 %1165  ;;  %v1433_v56 = vsel %vm1415_vm10, %v1400_v23, %v2931_v34 }
  0xbd   : > { %v3019_v45 = vpop.permute.xlu1 %1216  ;;  %v1466_v13 = vsel %vm1448_vm11, %v1433_v56, %v2959_v20  ;;  %v649_v0 = vrot.slane %v647_v60, 5  ;;  %v1330_v20 = vsel %vm1300_vm7, %v2396_v4, %v2897_v53 }
  0xbe   : > { %1136 = vrot.lane.b32.xlu0 %v2867_v28, %s2332_s24  ;;  %v1499_v34 = vsel %vm1481_vm12, %v1466_v13, %v2991_v6 }
  0xbf   : > { %1187 = vrot.lane.b32.xlu1 %v2884_v15, %s2333_s25  ;;  %v747_v15 = vsel %vm2416_vm4, %v2084_v61, %v746_v30  ;;  %v449_v30 = vshrl.u32 %v3042_v38, 16  ;;  %v644_v61 = vor.u32 %v643_v22, %v3044_v39  ;;  %v441_v22 = vrot.slane %v439_v42, 5 }
  0xc0   : > { %v3039_v28 = vpop.permute.xlu0 %1198  ;;  %v3069_v26 = vcombine.low %v747_v15, %v750_v12  ;;  %v3086_v15 = vld [vmem:[%s2384_s20 + $0x5c] sm:$0x1]  ;;  %v635_v12 = vrot.slane %v634_v32, 4  ;;  %v1351_v42 = vsel %vm1349_vm8, %v1303_v55, %v2869_v21  ;;  %v1369_v21 = vsel %vm1349_vm8, %v1330_v20, %v2863_v2 }
  0xc1   : > { %v1250_v24 = vpop.permute.xlu1 %1249  ;;  %v451_v11 = vrot.slane %v449_v30, 4  ;;  %v442_v6 = vor.u32 %v441_v22, %v438_v63  ;;  %v455_v44 = vshll.u32 %v3086_v15, 16  ;;  %v1384_v53 = vsel %vm1382_vm9, %v1351_v42, %v2849_v31 }
  0xc2   : > { %1138 = vrot.lane.b32.xlu0 %v3024_v47, %s2332_s24  ;;  %v1532_v23 = vsel %vm1514_vm13, %v1499_v34, %v1250_v24  ;;  %v640_v32 = vsel %vm2461_vm5, %v635_v12, %v3044_v39  ;;  %v1402_v60 = vsel %vm1382_vm9, %v1369_v21, %v2917_v48  ;;  %v1417_v63 = vsel %vm1415_vm10, %v1384_v53, %v2954_v5 }
  0xc3   : > { %1189 = vrot.lane.b32.xlu1 %v3034_v36, %s2333_s25  ;;  %v452_v55 = vor.u32 %v451_v11, %v3088_v29  ;;  %v3121_v2 = vcombine.low %v3037_v17, %v3042_v38  ;;  %v1435_v31 = vsel %vm1415_vm10, %v1402_v60, %v2944_v18  ;;  %v1450_v39 = vsel %vm1448_vm11, %v1417_v63, %v2986_v8 }
  0xc4   : > { %v3063_v40 = vpop.permute.xlu0 %1200  ;;  %v443_v13 = vrot.slane %v442_v6, 4  ;;  %v457_v48 = vrot.slane %v455_v44, 5  ;;  %v1468_v5 = vsel %vm1448_vm11, %v1435_v31, %v2973_v35  ;;  %v1483_v11 = vsel %vm1481_vm12, %v1450_v39, %v3039_v28  ;;  %v259_v39 = vld [vmem:[%s2384_s20 + $0xc4] sm:$0xf] }
  0xc5   : > { %v1252_v54 = vpop.permute.xlu1 %1251  ;;  %v453_v18 = vrot.slane %v452_v55, 4  ;;  %v1306_v8 = vsel %vm1300_vm7, %v2401_v10, %v2882_v59  ;;  %v1501_v12 = vsel %vm1481_vm12, %v1468_v5, %v3019_v45  ;;  %v809_v35 = vrot.slane %v2994_v52, 5 }
  0xc6   : > { %1171 = vrot.lane.b32.xlu0 %v2909_v19, %s2333_s25  ;;  %v645_v19 = vrot.slane %v644_v61, 4  ;;  %v1534_v28 = vsel %vm1514_vm13, %v1501_v12, %v1252_v54  ;;  %v1353_v59 = vsel %vm1349_vm8, %v1306_v8, %v2887_v62  ;;  %v448_v54 = vsel %vm2461_vm5, %v443_v13, %v3088_v29 }
  0xc7   : > { %1222 = vrot.lane.b32.xlu1 %v2950_v58, %s2334_s28  ;;  %v458_v52 = vsel %vm2461_vm5, %v453_v18, %v457_v48  ;;  %v1386_v45 = vsel %vm1382_vm9, %v1353_v59, %v2942_v46  ;;  %v811_v62 = vrot.slane %v809_v35, 4  ;;  %v828_v18 = vshrl.u32 %v259_v39, 16 }
  0xc8   : > { %v1234_v49 = vpop.permute.xlu0 %1233  ;;  %v650_v61 = vsel %vm2461_vm5, %v645_v19, %v649_v0  ;;  %v3176_v44 = vcombine.low %v448_v54, %v458_v52  ;;  %v824_v8 = vshll.u32 %v259_v39, 16 }
  0xc9   : > { %v1285_v56 = vpop.permute.xlu1 %1284  ;;  %v3137_v34 = vcombine.low %v640_v32, %v650_v61  ;;  %v1516_v19 = vsel %vm1514_vm13, %v1483_v11, %v1234_v49  ;;  %v756_v32 = vrot.slane %v3086_v15, 5  ;;  %v258_v15 = vld [vmem:[%s2384_s20 + $0xc0] sm:$0xf] }
  0xca   : > { %1173 = vrot.lane.b32.xlu0 %v3069_v26, %s2333_s25  ;;  %v1565_v30 = vsel %vm1547_vm14, %v1532_v23, %v1285_v56  ;;  %v2093_v23 = vrot.slane %v2989_v7, 9  ;;  %v812_v56 = vrot.slane %v3049_v25, 5  ;;  %v753_v7 = vrot.slane %v3042_v38, 5 }
  0xcb   : > { %1224 = vrot.lane.b32.xlu1 %v3073_v57, %s2334_s28  ;;  %2221 = vmatprep.mubr.msk.bf16.mxu1 %vm1616_vm15, %v1565_v30  ;;  %v1419_v30 = vsel %vm1415_vm10, %v1386_v45, %v2966_v50  ;;  %v815_v5 = vshrl.u32 %v258_v15, 16  ;;  %v818_v11 = vshll.u32 %v258_v15, 16  ;;  %v2144_v45 = vcombine.low %v258_v15, %v259_v39 }
  0xcc   : > { %v1236_v24 = vpop.permute.xlu0 %1235  ;;  %v1452_v29 = vsel %vm1448_vm11, %v1419_v30, %v3012_v14  ;;  %v810_v55 = vsel %vm2416_vm4, %v2093_v23, %v809_v35  ;;  %v813_v14 = vsel %vm2416_vm4, %v811_v62, %v812_v56  ;;  %v826_v35 = vrot.slane %v824_v8, 5 }
  0xcd   : > { %v3123_v22 = vpop.permute.xlu1 %998  ;;  %v1485_v46 = vsel %vm1481_vm12, %v1452_v29, %v3063_v40  ;;  %v3196_v38 = vcombine.low %v810_v55, %v813_v14  ;;  %v2085_v40 = vrot.slane %v3037_v17, 9 }
  0xce   : > { %1206 = vrot.lane.b32.xlu0 %v2979_v27, %s2334_s28  ;;  %v1518_v50 = vsel %vm1514_vm13, %v1485_v46, %v1236_v24  ;;  %v755_v24 = vrot.slane %v753_v7, 4 }
  0xcf   : > { %1257 = vrot.lane.b32.xlu1 %v2984_v3, %s2335_s6 }
  0xd0   : > { %v1269_v0 = vpop.permute.xlu0 %1268  ;;  %v757_v63 = vsel %vm2416_vm4, %v755_v24, %v756_v32  ;;  %v3271_v32 = vld [vmem:[%s2384_s20 + $0xcc] sm:$0xf] }
  0xd1   : > { %v1549_v42 = vsel %vm1547_vm14, %v1516_v19, %v1269_v0  ;;  %v1287_v20 = vpop.permute.xlu1 %1286  ;;  %v817_v19 = vrot.slane %v815_v5, 4  ;;  %v820_v0 = vrot.slane %v818_v11, 5 }
  0xd2   : > { %1208 = vrot.lane.b32.xlu0 %v3121_v2, %s2334_s28  ;;  %2205 = vmatprep.mubr.msk.bf16.mxu0 %vm1616_vm15, %v1549_v42  ;;  %v1567_v10 = vsel %vm1547_vm14, %v1534_v28, %v1287_v20  ;;  %v830_v28 = vrot.slane %v828_v18, 4  ;;  %v260_v20 = vld [vmem:[%s2384_s20 + $0xc8] sm:$0x1] }
  0xd3   : > { %1259 = vrot.lane.b32.xlu1 %v3137_v34, %s2335_s6  ;;  %2222 = vmatmul.mubr.msk.bf16.vlgmr.msra.gmra.mrb[0].mxu1 %vm1616_vm15, %v1567_v10  ;;  %v821_v59 = vor.u32 %v820_v0, %v817_v19  ;;  %v846_v24 = vrot.slane %v260_v20, 5 }
  0xd4   : > { %v3164_v49 = vpop.permute.xlu0 %982  ;;  %v831_v54 = vor.u32 %v830_v28, %v826_v35 }
  0xd5   : > { %v3170_v6 = vpop.permute.xlu1 %1000  ;;  %v822_v62 = vrot.slane %v821_v59, 4 }
  0xd6   : > { %1241 = vrot.lane.b32.xlu0 %v3024_v47, %s2335_s6  ;;  %v832_v56 = vrot.slane %v831_v54, 4 }
  0xd7   : > { %1292 = vrot.lane.b32.xlu1 %v3034_v36, %s2336_s9 }
  0xd8   : > { %v1271_v25 = vpop.permute.xlu0 %1270 }
  0xd9   : > { %v1551_v21 = vsel %vm1547_vm14, %v1518_v50, %v1271_v25  ;;  %v3189_v53 = vpop.permute.xlu1 %1078  ;;  %v843_v50 = vrot.slane %v259_v39, 5  ;;  %v852_v39 = vshll.u32 %v3271_v32, 16 }
  0xda   : > { %1243 = vrot.lane.b32.xlu0 %v3176_v44, %s2335_s6  ;;  %2206 = vmatmul.mubr.msk.bf16.vlgmr.msra.gmra.mrb[0].mxu0 %vm1616_vm15, %v1551_v21  ;;  %v2094_v21 = vrot.slane %v258_v15, 9 }
  0xdb   : > { %1006 = vrot.lane.b32.xlu1 %v2984_v3, %s2331_s23  ;;  %v754_v3 = vsel %vm2416_vm4, %v2085_v40, %v753_v7  ;;  %v845_v40 = vrot.slane %v843_v50, 4  ;;  %v854_v28 = vrot.slane %v852_v39, 5 }
  0xdc   : > { %v3200_v61 = vpop.permute.xlu0 %984  ;;  %v3220_v13 = vcombine.low %v754_v3, %v757_v63  ;;  %v3274_v63 = vld [vmem:[%s2384_s20 + $0xd0] sm:$0xf]  ;;  %v844_v15 = vsel %vm2416_vm4, %v2094_v21, %v843_v50 }
  0xdd   : > { %v3202_v60 = vpop.permute.xlu1 %1080  ;;  %v847_v11 = vsel %vm2416_vm4, %v845_v40, %v846_v24  ;;  %v862_v18 = vshrl.u32 %v3274_v63, 16  ;;  %v858_v8 = vshll.u32 %v3274_v63, 16 }
  0xde   : > { %1276 = vrot.lane.b32.xlu0 %v3069_v26, %s2336_s9  ;;  %v3294_v0 = vcombine.low %v844_v15, %v847_v11 }
  0xdf   : > { %1294 = vrot.lane.b32.xlu1 %v3196_v38, %s2336_s9  ;;  %v860_v59 = vrot.slane %v858_v8, 5  ;;  %v864_v54 = vrot.slane %v862_v18, 4 }
  0xe0   : > { %v3212_v17 = vpop.permute.xlu0 %1062 }
  0xe1   : > { %v3214_v31 = vpop.permute.xlu1 %1113 }
  0xe2   : > { %990 = vrot.lane.b32.xlu0 %v3024_v47, %s2331_s23 }
  0xe3   : > { %1008 = vrot.lane.b32.xlu1 %v3137_v34, %s2331_s23 }
  0xe4   : > { %v3224_v48 = vpop.permute.xlu0 %1064 }
  0xe5   : > { %v3226_v12 = vpop.permute.xlu1 %1115 }
  0xe6   : > { %1278 = vrot.lane.b32.xlu0 %v3220_v13, %s2336_s9 }
  0xe7   : > { %1086 = vrot.lane.b32.xlu1 %v3034_v36, %s2330_s22  ;;  %v834_v36 = vshll.u32 %v260_v20, 16 }
  0xe8   : > { %v3232_v47 = vpop.permute.xlu0 %1097 }
  0xe9   : > { %v3234_v42 = vpop.permute.xlu1 %1148  ;;  %v836_v30 = vrot.slane %v834_v36, 5 }
  0xea   : > { %992 = vrot.lane.b32.xlu0 %v3176_v44, %s2331_s23 }
  0xeb   : > { %1088 = vrot.lane.b32.xlu1 %v3196_v38, %s2330_s22  ;;  %v837_v7 = vsel %vm2461_vm5, %v832_v56, %v836_v30 }
  0xec   : > { %v3241_v10 = vpop.permute.xlu0 %1099 }
  0xed   : > { %v3243_v52 = vpop.permute.xlu1 %1150 }
  0xee   : > { %1070 = vrot.lane.b32.xlu0 %v3069_v26, %s2330_s22  ;;  %v827_v26 = vsel %vm2461_vm5, %v822_v62, %v826_v35  ;;  %v3297_v62 = vld [vmem:[%s2384_s20 + $0xd4] sm:$0x1] }
  0xef   : > { %1121 = vrot.lane.b32.xlu1 %v3073_v57, %s2329_s21  ;;  %v3266_v55 = vcombine.low %v827_v26, %v837_v7  ;;  %v865_v26 = vor.u32 %v864_v54, %v860_v59  ;;  %v868_v7 = vshll.u32 %v3297_v62, 16  ;;  %v880_v54 = vrot.slane %v3297_v62, 5 }
  0xf0   : > { %v3249_v23 = vpop.permute.xlu0 %1132 }
  0xf1   : > { %v1184_v29 = vpop.permute.xlu1 %1183  ;;  %v866_v39 = vrot.slane %v865_v26, 4 }
  0xf2   : > { %1072 = vrot.lane.b32.xlu0 %v3220_v13, %s2330_s22 }
  0xf3   : > { %1123 = vrot.lane.b32.xlu1 %v2144_v45, %s2329_s21 }
  0xf4   : > { %v3254_v46 = vpop.permute.xlu0 %1134 }
  0xf5   : > { %v3260_v25 = vpop.permute.xlu1 %1185 }
  0xf6   : > { %1105 = vrot.lane.b32.xlu0 %v3121_v2, %s2329_s21 }
  0xf7   : > { %1156 = vrot.lane.b32.xlu1 %v3137_v34, %s2332_s24  ;;  %v849_v34 = vshrl.u32 %v3271_v32, 16 }
  0xf8   : > { %v3268_v14 = vpop.permute.xlu0 %1167 }
  0xf9   : > { %v1219_v3 = vpop.permute.xlu1 %1218  ;;  %v851_v35 = vrot.slane %v849_v34, 4 }
  0xfa   : > { %1107 = vrot.lane.b32.xlu0 %v2998_v43, %s2329_s21 }
  0xfb   : > { %1158 = vrot.lane.b32.xlu1 %v3266_v55, %s2332_s24 }
  0xfc   : > { %v3282_v5 = vpop.permute.xlu0 %1169 }
  0xfd   : > { %v1221_v19 = vpop.permute.xlu1 %1220 }
  0xfe   : > { %1140 = vrot.lane.b32.xlu0 %v3176_v44, %s2332_s24  ;;  %v1333_v44 = vsel %vm1300_vm7, %v2537_v9, %v3123_v22  ;;  %v2147_v22 = vcombine.low %v3271_v32, %v3274_v63 }
  0xff   : > { %1191 = vrot.lane.b32.xlu1 %v3196_v38, %s2333_s25  ;;  %v855_v38 = vor.u32 %v854_v28, %v851_v35  ;;  %v1371_v56 = vsel %vm1349_vm8, %v1333_v44, %v3189_v53 }
 0x100   : > { %v1203_v20 = vpop.permute.xlu0 %1202  ;;  %v1404_v50 = vsel %vm1382_vm9, %v1371_v56, %v3214_v31  ;;  %v870_v31 = vrot.slane %v868_v7, 5 }
 0x101   : > { %v1254_v36 = vpop.permute.xlu1 %1253  ;;  %v1437_v40 = vsel %vm1415_vm10, %v1404_v50, %v3234_v42  ;;  %v856_v53 = vrot.slane %v855_v38, 4 }
 0x102   : > { %1142 = vrot.lane.b32.xlu0 %v2549_v1, %s2332_s24  ;;  %v1470_v9 = vsel %vm1448_vm11, %v1437_v40, %v1184_v29  ;;  %v3623_v40 = vld [vmem:[#allocation3_spill] sm:$0xff] }
 0x103   : > { %1193 = vrot.lane.b32.xlu1 %v3294_v0, %s2333_s25  ;;  %v1503_v24 = vsel %vm1481_vm12, %v1470_v9, %v1219_v3  ;;  %v861_v3 = vsel %vm2461_vm5, %v856_v53, %v860_v59 }
 0x104   : > { %v3308_v30 = vpop.permute.xlu0 %1204  ;;  %v1536_v15 = vsel %vm1514_vm13, %v1503_v24, %v1254_v36 }
 0x105   : > { %v1256_v21 = vpop.permute.xlu1 %1255 }
 0x106   : > { %1175 = vrot.lane.b32.xlu0 %v3220_v13, %s2333_s25  ;;  %v1309_v13 = vsel %vm1300_vm7, %v2556_v37, %v3164_v49 }
 0x107   : > { %1226 = vrot.lane.b32.xlu1 %v2144_v45, %s2334_s28  ;;  %v1336_v45 = vsel %vm1300_vm7, %v2631_v33, %v3170_v6  ;;  %v1355_v29 = vsel %vm1349_vm8, %v1309_v13, %v3212_v17  ;;  %v871_v33 = vsel %vm2461_vm5, %v866_v39, %v870_v31  ;;  %v877_v6 = vrot.slane %v3274_v63, 5 }
 0x108   : > { %v1238_v34 = vpop.permute.xlu0 %1237  ;;  %v1373_v37 = vsel %vm1349_vm8, %v1336_v45, %v3202_v60  ;;  %v1388_v49 = vsel %vm1382_vm9, %v1355_v29, %v3232_v47 }
 0x109   : > { %v1289_v11 = vpop.permute.xlu1 %1288  ;;  %v1406_v17 = vsel %vm1382_vm9, %v1373_v37, %v3226_v12  ;;  %v1421_v8 = vsel %vm1415_vm10, %v1388_v49, %v3249_v23  ;;  %v2148_v12 = vcombine.low %v861_v3, %v871_v33  ;;  %v2095_v23 = vrot.slane %v3271_v32, 9  ;;  %v3624_v49 = vld [vmem:[#allocation6_spill] sm:$0xff] }
 0x10a   : > { %1177 = vrot.lane.b32.xlu0 %v2447_v41, %s2333_s25  ;;  %v1569_v42 = vsel %vm1547_vm14, %v1536_v15, %v1289_v11  ;;  %v1439_v60 = vsel %vm1415_vm10, %v1406_v17, %v3243_v52  ;;  %v1454_v47 = vsel %vm1448_vm11, %v1421_v8, %v3268_v14  ;;  %v879_v14 = vrot.slane %v877_v6, 4 }
 0x10b   : > { %1228 = vrot.lane.b32.xlu1 %v2147_v22, %s2334_s28  ;;  %2225 = vmatprep.mubr.msk.bf16.mxu1 %vm1616_vm15, %v1569_v42  ;;  %v1472_v51 = vsel %vm1448_vm11, %v1439_v60, %v3260_v25  ;;  %v1487_v63 = vsel %vm1481_vm12, %v1454_v47, %v1203_v20  ;;  %v3621_v20 = vld [vmem:[#allocation5_spill] sm:$0xff] }
 0x10c   : > { %v1240_v18 = vpop.permute.xlu0 %1239  ;;  %v1505_v28 = vsel %vm1481_vm12, %v1472_v51, %v1221_v19  ;;  %v1520_v52 = vsel %vm1514_vm13, %v1487_v63, %v1238_v34 }
 0x10d   : > { %v3349_v35 = vpop.permute.xlu1 %1002 }
 0x10e   : > { %1210 = vrot.lane.b32.xlu0 %v2998_v43, %s2334_s28  ;;  %v1538_v43 = vsel %vm1514_vm13, %v1505_v28, %v1256_v21  ;;  %v3622_v21 = vld [vmem:[#allocation4_spill] sm:$0xff]  ;;  %v3625_v28 = vld [vmem:[#allocation7_spill] sm:$0xff] }
 0x10f   : > { %1261 = vrot.lane.b32.xlu1 %v3266_v55, %s2335_s6  ;;  %v1312_v55 = vsel %vm1300_vm7, %v3621_v20, %v3200_v61  ;;  %v878_v61 = vsel %vm2416_vm4, %v2095_v23, %v877_v6 }
 0x110   : > { %v1273_v59 = vpop.permute.xlu0 %1272  ;;  %v1357_v19 = vsel %vm1349_vm8, %v1312_v55, %v3224_v48 }
 0x111   : > { %v1553_v25 = vsel %vm1547_vm14, %v1520_v52, %v1273_v59  ;;  %v1291_v36 = vpop.permute.xlu1 %1290  ;;  %v1390_v62 = vsel %vm1382_vm9, %v1357_v19, %v3241_v10  ;;  %v3626_v59 = vld [vmem:[#allocation8_spill] sm:$0xff] }
 0x112   : > { %1212 = vrot.lane.b32.xlu0 %v2396_v4, %s2334_s28  ;;  %2209 = vmatprep.mubr.msk.bf16.mxu0 %vm1616_vm15, %v1553_v25  ;;  %v1571_v32 = vsel %vm1547_vm14, %v1538_v43, %v1291_v36  ;;  %v881_v4 = vsel %vm2416_vm4, %v879_v14, %v880_v54  ;;  %v1423_v38 = vsel %vm1415_vm10, %v1390_v62, %v3254_v46 }
 0x113   : > { %1263 = vrot.lane.b32.xlu1 %v2148_v12, %s2335_s6  ;;  %2226 = vmatmul.mubr.msk.bf16.gmra.mrb[4].mxu1 %vm1616_vm15, %v1571_v32  ;;  %v1456_v48 = vsel %vm1448_vm11, %v1423_v38, %v3282_v5  ;;  %v2149_v26 = vcombine.low %v878_v61, %v881_v4 }
 0x114   : > { %v987_v44 = vpop.permute.xlu0 %986  ;;  %v1489_v10 = vsel %vm1481_vm12, %v1456_v48, %v3308_v30 }
 0x115   : > { %v1005_v56 = vpop.permute.xlu1 %1004  ;;  %v1522_v16 = vsel %vm1514_vm13, %v1489_v10, %v1240_v18  ;;  %v1339_v18 = vsel %vm1300_vm7, %v3624_v49, %v3349_v35  ;;  %v1315_v52 = vsel %vm1300_vm7, %v3625_v28, %v987_v44 }
 0x116   : > { %1245 = vrot.lane.b32.xlu0 %v2549_v1, %s2335_s6  ;;  %v1342_v14 = vsel %vm1300_vm7, %v3626_v59, %v1005_v56 }
 0x117   : > { %1296 = vrot.lane.b32.xlu1 %v3294_v0, %s2336_s9 }
 0x118   : > { %v1275_v7 = vpop.permute.xlu0 %1274 }
 0x119   : > { %v1555_v50 = vsel %vm1547_vm14, %v1522_v16, %v1275_v7  ;;  %v1083_v46 = vpop.permute.xlu1 %1082  ;;  %v3627_v16 = vld [vmem:[#allocation9_spill] sm:$0xff] }
 0x11a   : > { %1247 = vrot.lane.b32.xlu0 %v3622_v21, %s2335_s6  ;;  %2210 = vmatmul.mubr.msk.bf16.gmra.mrb[4].mxu0 %vm1616_vm15, %v1555_v50  ;;  %v1375_v33 = vsel %vm1349_vm8, %v1339_v18, %v1083_v46 }
 0x11b   : > { %1298 = vrot.lane.b32.xlu1 %v2149_v26, %s2336_s9 }
 0x11c   : > { %v989_v1 = vpop.permute.xlu0 %988 }
 0x11d   : > { %v1085_v5 = vpop.permute.xlu1 %1084  ;;  %v1318_v7 = vsel %vm1300_vm7, %v3627_v16, %v989_v1 }
 0x11e   : > { %1280 = vrot.lane.b32.xlu0 %v2447_v41, %s2336_s9  ;;  %v1377_v43 = vsel %vm1349_vm8, %v1342_v14, %v1085_v5 }
 0x120   : > { %v1067_v0 = vpop.permute.xlu0 %1066 }
 0x121   : > { %v1118_v30 = vpop.permute.xlu1 %1117  ;;  %v1359_v54 = vsel %vm1349_vm8, %v1315_v52, %v1067_v0 }
 0x122   : > { %1282 = vrot.lane.b32.xlu0 %v3623_v40, %s2336_s9  ;;  %v1408_v17 = vsel %vm1382_vm9, %v1375_v33, %v1118_v30 }
 0x124   : > { %v1069_v9 = vpop.permute.xlu0 %1068 }
 0x125   : > { %v1120_v22 = vpop.permute.xlu1 %1119  ;;  %v1361_v46 = vsel %vm1349_vm8, %v1318_v7, %v1069_v9 }
 0x126   : > { %v1410_v20 = vsel %vm1382_vm9, %v1377_v43, %v1120_v22 }
 0x128   : > { %v1102_v53 = vpop.permute.xlu0 %1101 }
 0x129   : > { %v1153_v24 = vpop.permute.xlu1 %1152  ;;  %v1392_v25 = vsel %vm1382_vm9, %v1359_v54, %v1102_v53 }
 0x12a   : > { %v1441_v60 = vsel %vm1415_vm10, %v1408_v17, %v1153_v24 }
 0x12c   : > { %v1104_v34 = vpop.permute.xlu0 %1103 }
 0x12d   : > { %v1155_v39 = vpop.permute.xlu1 %1154  ;;  %v1394_v21 = vsel %vm1382_vm9, %v1361_v46, %v1104_v34 }
 0x12e   : > { %v1443_v19 = vsel %vm1415_vm10, %v1410_v20, %v1155_v39 }
 0x130   : > { %v1137_v31 = vpop.permute.xlu0 %1136 }
 0x131   : > { %v1188_v15 = vpop.permute.xlu1 %1187  ;;  %v1425_v55 = vsel %vm1415_vm10, %v1392_v25, %v1137_v31 }
 0x132   : > { %v1474_v47 = vsel %vm1448_vm11, %v1441_v60, %v1188_v15 }
 0x134   : > { %v1139_v11 = vpop.permute.xlu0 %1138 }
 0x135   : > { %v1190_v13 = vpop.permute.xlu1 %1189  ;;  %v1427_v0 = vsel %vm1415_vm10, %v1394_v21, %v1139_v11 }
 0x136   : > { %v1476_v44 = vsel %vm1448_vm11, %v1443_v19, %v1190_v13 }
 0x138   : > { %v1172_v42 = vpop.permute.xlu0 %1171 }
 0x139   : > { %v1223_v45 = vpop.permute.xlu1 %1222  ;;  %v1458_v62 = vsel %vm1448_vm11, %v1425_v55, %v1172_v42 }
 0x13a   : > { %v1507_v51 = vsel %vm1481_vm12, %v1474_v47, %v1223_v45 }
 0x13c   : > { %v1174_v29 = vpop.permute.xlu0 %1173 }
 0x13d   : > { %v1225_v3 = vpop.permute.xlu1 %1224  ;;  %v1460_v40 = vsel %vm1448_vm11, %v1427_v0, %v1174_v29 }
 0x13e   : > { %v1509_v4 = vsel %vm1481_vm12, %v1476_v44, %v1225_v3 }
 0x140   : > { %v1207_v41 = vpop.permute.xlu0 %1206 }
 0x141   : > { %v1258_v37 = vpop.permute.xlu1 %1257  ;;  %v1491_v61 = vsel %vm1481_vm12, %v1458_v62, %v1207_v41 }
 0x142   : > { %v1540_v12 = vsel %vm1514_vm13, %v1507_v51, %v1258_v37 }
 0x144   : > { %v1209_v6 = vpop.permute.xlu0 %1208 }
 0x145   : > { %v1260_v8 = vpop.permute.xlu1 %1259  ;;  %v1493_v22 = vsel %vm1481_vm12, %v1460_v40, %v1209_v6 }
 0x146   : > { %v1542_v48 = vsel %vm1514_vm13, %v1509_v4, %v1260_v8 }
 0x148   : > { %v1242_v63 = vpop.permute.xlu0 %1241 }
 0x149   : > { %v1293_v23 = vpop.permute.xlu1 %1292  ;;  %v1524_v38 = vsel %vm1514_vm13, %v1491_v61, %v1242_v63 }
 0x14a   : > { %v1573_v35 = vsel %vm1547_vm14, %v1540_v12, %v1293_v23 }
 0x14b   : > { %2229 = vmatprep.mubr.msk.bf16.mxu1 %vm1616_vm15, %v1573_v35 }
 0x14c   : > { %v1244_v36 = vpop.permute.xlu0 %1243 }
 0x14d   : > { %v1007_v32 = vpop.permute.xlu1 %1006  ;;  %v1526_v1 = vsel %vm1514_vm13, %v1493_v22, %v1244_v36 }
 0x14e   : > { %v1345_v51 = vsel %vm1300_vm7, %v2950_v58, %v1007_v32 }
 0x150   : > { %v1277_v56 = vpop.permute.xlu0 %1276 }
 0x151   : > { %v1557_v10 = vsel %vm1547_vm14, %v1524_v38, %v1277_v56  ;;  %v1295_v26 = vpop.permute.xlu1 %1294 }
 0x152   : > { %2213 = vmatprep.mubr.msk.bf16.mxu0 %vm1616_vm15, %v1557_v10  ;;  %v1575_v50 = vsel %vm1547_vm14, %v1542_v48, %v1295_v26 }
 0x153   : > { %2230 = vmatmul.mubr.msk.bf16.gmra.mrb[8].mxu1 %vm1616_vm15, %v1575_v50 }
 0x154   : > { %v991_v5 = vpop.permute.xlu0 %990 }
 0x155   : > { %v1009_v30 = vpop.permute.xlu1 %1008  ;;  %v1321_v20 = vsel %vm1300_vm7, %v2979_v27, %v991_v5 }
 0x156   : > { %v1348_v35 = vsel %vm1300_vm7, %v3073_v57, %v1009_v30 }
 0x158   : > { %v1279_v53 = vpop.permute.xlu0 %1278 }
 0x159   : > { %v1559_v24 = vsel %vm1547_vm14, %v1526_v1, %v1279_v53  ;;  %v1087_v39 = vpop.permute.xlu1 %1086  ;;  %v3486_v1 = vstv %s1814_s12 }
 0x15a   : > { %2214 = vmatmul.mubr.msk.bf16.gmra.mrb[8].mxu0 %vm1616_vm15, %v1559_v24  ;;  %v1379_v63 = vsel %vm1349_vm8, %v1345_v51, %v1087_v39 }
 0x15c   : > { %v993_v9 = vpop.permute.xlu0 %992 }
 0x15d   : > { %v1089_v31 = vpop.permute.xlu1 %1088  ;;  %v1324_v56 = vsel %vm1300_vm7, %v3121_v2, %v993_v9 }
 0x15e   : > { %v1381_v14 = vsel %vm1349_vm8, %v1348_v35, %v1089_v31 }
 0x160   : > { %v1071_v15 = vpop.permute.xlu0 %1070 }
 0x161   : > { %v1122_v34 = vpop.permute.xlu1 %1121  ;;  %v1363_v57 = vsel %vm1349_vm8, %v1321_v20, %v1071_v15 }
 0x162   : > { %v1412_v23 = vsel %vm1382_vm9, %v1379_v63, %v1122_v34 }
 0x164   : > { %v1073_v13 = vpop.permute.xlu0 %1072 }
 0x165   : > { %v1124_v42 = vpop.permute.xlu1 %1123  ;;  %v1365_v26 = vsel %vm1349_vm8, %v1324_v56, %v1073_v13 }
 0x166   : > { %v1414_v58 = vsel %vm1382_vm9, %v1381_v14, %v1124_v42 }
 0x168   : > { %v1106_v11 = vpop.permute.xlu0 %1105 }
 0x169   : > { %v1157_v45 = vpop.permute.xlu1 %1156  ;;  %v1396_v62 = vsel %vm1382_vm9, %v1363_v57, %v1106_v11 }
 0x16a   : > { %v1445_v52 = vsel %vm1415_vm10, %v1412_v23, %v1157_v45 }
 0x16c   : > { %v1108_v3 = vpop.permute.xlu0 %1107 }
 0x16d   : > { %v1159_v29 = vpop.permute.xlu1 %1158  ;;  %v1398_v7 = vsel %vm1382_vm9, %v1365_v26, %v1108_v3 }
 0x16e   : > { %v1447_v55 = vsel %vm1415_vm10, %v1414_v58, %v1159_v29 }
 0x170   : > { %v1141_v41 = vpop.permute.xlu0 %1140 }
 0x171   : > { %v1192_v37 = vpop.permute.xlu1 %1191  ;;  %v1429_v4 = vsel %vm1415_vm10, %v1396_v62, %v1141_v41 }
 0x172   : > { %v1478_v59 = vsel %vm1448_vm11, %v1445_v52, %v1192_v37 }
 0x174   : > { %v1143_v49 = vpop.permute.xlu0 %1142 }
 0x175   : > { %v1194_v18 = vpop.permute.xlu1 %1193  ;;  %v1431_v21 = vsel %vm1415_vm10, %v1398_v7, %v1143_v49 }
 0x176   : > { %v1480_v19 = vsel %vm1448_vm11, %v1447_v55, %v1194_v18 }
 0x178   : > { %v1176_v33 = vpop.permute.xlu0 %1175 }
 0x179   : > { %v1227_v6 = vpop.permute.xlu1 %1226  ;;  %v1462_v48 = vsel %vm1448_vm11, %v1429_v4, %v1176_v33 }
 0x17a   : > { %v1511_v54 = vsel %vm1481_vm12, %v1478_v59, %v1227_v6 }
 0x17c   : > { %v1178_v17 = vpop.permute.xlu0 %1177 }
 0x17d   : > { %v1229_v8 = vpop.permute.xlu1 %1228  ;;  %v1464_v5 = vsel %vm1448_vm11, %v1431_v21, %v1178_v17 }
 0x17e   : > { %v1513_v44 = vsel %vm1481_vm12, %v1480_v19, %v1229_v8 }
 0x180   : > { %v1211_v60 = vpop.permute.xlu0 %1210 }
 0x181   : > { %v1262_v47 = vpop.permute.xlu1 %1261  ;;  %v1495_v16 = vsel %vm1481_vm12, %v1462_v48, %v1211_v60 }
 0x182   : > { %v1544_v25 = vsel %vm1514_vm13, %v1511_v54, %v1262_v47 }
 0x184   : > { %v1213_v12 = vpop.permute.xlu0 %1212 }
 0x185   : > { %v1264_v28 = vpop.permute.xlu1 %1263  ;;  %v1497_v0 = vsel %vm1481_vm12, %v1464_v5, %v1213_v12 }
 0x186   : > { %v1546_v38 = vsel %vm1514_vm13, %v1513_v44, %v1264_v28 }
 0x188   : > { %v1246_v43 = vpop.permute.xlu0 %1245 }
 0x189   : > { %v1297_v36 = vpop.permute.xlu1 %1296  ;;  %v1528_v50 = vsel %vm1514_vm13, %v1495_v16, %v1246_v43 }
 0x18a   : > { %v1577_v32 = vsel %vm1547_vm14, %v1544_v25, %v1297_v36 }
 0x18b   : > { %2233 = vmatprep.mubr.msk.bf16.mxu1 %vm1616_vm15, %v1577_v32 }
 0x18c   : > { %v1248_v61 = vpop.permute.xlu0 %1247 }
 0x18d   : > { %v1299_v27 = vpop.permute.xlu1 %1298  ;;  %v1530_v30 = vsel %vm1514_vm13, %v1497_v0, %v1248_v61 }
 0x18e   : > { %v1579_v10 = vsel %vm1547_vm14, %v1546_v38, %v1299_v27 }
 0x18f   : > { %2234 = vmatmul.mubr.msk.bf16.gmra.mrb[12].mxu1 %vm1616_vm15, %v1579_v10 }
 0x190   : > { %v1281_v46 = vpop.permute.xlu0 %1280 }
 0x191   : > { %v1561_v2 = vsel %vm1547_vm14, %v1528_v50, %v1281_v46 }
 0x192   : > { %2217 = vmatprep.mubr.msk.bf16.mxu0 %vm1616_vm15, %v1561_v2 }
 0x194   : > { %v1283_v40 = vpop.permute.xlu0 %1282 }
 0x195   : > { %v1563_v22 = vsel %vm1547_vm14, %v1530_v30, %v1283_v40 }
 0x196   : > { %2218 = vmatmul.mubr.msk.bf16.gmra.mrb[12].mxu0 %vm1616_vm15, %v1563_v22 }
 0x1a6   : > { %v2223_v53 = vpop.f32.mrb[0].mxu1 }
 0x1a7   : > { %v1834_v24 = vmul.f32 %v2223_v53, %v3486_v1  ;;  %v1751_v39 = vpop.f32.mrb[1].mxu1 }
 0x1a8   : > { %v1832_v9 = vmul.f32 %v3486_v1, %v1751_v39  ;;  %v2224_v31 = vpop.f32.mrb[2].mxu1 }
 0x1a9   : > { %vm1866_vm0 = vcmp.ge.f32.partialorder %v1834_v24, 0.0  ;;  %v1898_v15 = vmul.f32 0.2, %v1834_v24  ;;  %v1835_v34 = vmul.f32 %v2224_v31, %v3486_v1  ;;  %v1754_v13 = vpop.f32.mrb[3].mxu1 }
 0x1aa   : > { %vm1864_vm1 = vcmp.ge.f32.partialorder %v1832_v9, 0.0  ;;  %v1896_v42 = vmul.f32 0.2, %v1832_v9  ;;  %v1833_v11 = vmul.f32 %v3486_v1, %v1754_v13 }
 0x1ab   : > { %v1930_v45 = vsel %vm1866_vm0, %v1834_v24, %v1898_v15  ;;  %vm1867_vm2 = vcmp.ge.f32.partialorder %v1835_v34, 0.0  ;;  %v1899_v3 = vmul.f32 0.2, %v1835_v34 }
 0x1ac   : > { %1962 = vst.msk [vmem:[%s3494_s19 + $0x90] sm:$0xff] %vm1300_vm7, %v1930_v45  ;;  %v1928_v29 = vsel %vm1864_vm1, %v1832_v9, %v1896_v42  ;;  %vm1865_vm3 = vcmp.ge.f32.partialorder %v1833_v11, 0.0  ;;  %v1897_v41 = vmul.f32 0.2, %v1833_v11 }
 0x1ad   : > { %v2207_v37 = vpop.f32.mrb[0].mxu0  ;;  %1960 = vst.msk [vmem:[%s3494_s19 + $0x80] sm:$0xff] %vm1300_vm7, %v1928_v29  ;;  %v1931_v49 = vsel %vm1867_vm2, %v1835_v34, %v1899_v3 }
 0x1ae   : > { %v1818_v18 = vmul.f32 %v2207_v37, %v3486_v1  ;;  %v1687_v33 = vpop.f32.mrb[1].mxu0  ;;  %1963 = vst.msk [vmem:[%s3494_s19 + $0x98] sm:$0xff] %vm1300_vm7, %v1931_v49  ;;  %v1929_v6 = vsel %vm1865_vm3, %v1833_v11, %v1897_v41 }
 0x1af   : > { %v1816_v17 = vmul.f32 %v3486_v1, %v1687_v33  ;;  %v2208_v8 = vpop.f32.mrb[2].mxu0  ;;  %1961 = vst.msk [vmem:[%s3494_s19 + $0x88] sm:$0xff] %vm1300_vm7, %v1929_v6 }
 0x1b0   : > { %vm1850_vm4 = vcmp.ge.f32.partialorder %v1818_v18, 0.0  ;;  %v1882_v60 = vmul.f32 0.2, %v1818_v18  ;;  %v1819_v47 = vmul.f32 %v2208_v8, %v3486_v1  ;;  %v1690_v51 = vpop.f32.mrb[3].mxu0 }
 0x1b1   : > { %vm1848_vm5 = vcmp.ge.f32.partialorder %v1816_v17, 0.0  ;;  %v1880_v63 = vmul.f32 0.2, %v1816_v17  ;;  %v1817_v12 = vmul.f32 %v3486_v1, %v1690_v51 }
 0x1b2   : > { %v1914_v23 = vsel %vm1850_vm4, %v1818_v18, %v1882_v60  ;;  %vm1851_vm6 = vcmp.ge.f32.partialorder %v1819_v47, 0.0  ;;  %v1883_v28 = vmul.f32 0.2, %v1819_v47 }
 0x1b3   : > { %1946 = vst.msk [vmem:[%s3494_s19 + $0x10] sm:$0xff] %vm1300_vm7, %v1914_v23  ;;  %v1912_v52 = vsel %vm1848_vm5, %v1816_v17, %v1880_v63  ;;  %vm1849_vm8 = vcmp.ge.f32.partialorder %v1817_v12, 0.0  ;;  %v1881_v35 = vmul.f32 0.2, %v1817_v12 }
 0x1b4   : > { %1944 = vst.msk [vmem:[%s3494_s19] sm:$0xff] %vm1300_vm7, %v1912_v52  ;;  %v1915_v59 = vsel %vm1851_vm6, %v1819_v47, %v1883_v28 }
 0x1b5   : > { %1947 = vst.msk [vmem:[%s3494_s19 + $0x18] sm:$0xff] %vm1300_vm7, %v1915_v59  ;;  %v1913_v14 = vsel %vm1849_vm8, %v1817_v12, %v1881_v35 }
 0x1b6   : > { %1945 = vst.msk [vmem:[%s3494_s19 + $0x8] sm:$0xff] %vm1300_vm7, %v1913_v14 }
 0x1e6   : > { %v2227_v54 = vpop.f32.mrb[4].mxu1 }
 0x1e7   : > { %v1838_v43 = vmul.f32 %v2227_v54, %v3486_v1  ;;  %v1767_v58 = vpop.f32.mrb[5].mxu1 }
 0x1e8   : > { %v1836_v25 = vmul.f32 %v3486_v1, %v1767_v58  ;;  %v2228_v36 = vpop.f32.mrb[6].mxu1 }
 0x1e9   : > { %vm1870_vm9 = vcmp.ge.f32.partialorder %v1838_v43, 0.0  ;;  %v1902_v20 = vmul.f32 0.2, %v1838_v43  ;;  %v1839_v55 = vmul.f32 %v2228_v36, %v3486_v1  ;;  %v1770_v32 = vpop.f32.mrb[7].mxu1 }
 0x1ea   : > { %vm1868_vm10 = vcmp.ge.f32.partialorder %v1836_v25, 0.0  ;;  %v1900_v57 = vmul.f32 0.2, %v1836_v25  ;;  %v1837_v19 = vmul.f32 %v3486_v1, %v1770_v32 }
 0x1eb   : > { %v1934_v62 = vsel %vm1870_vm9, %v1838_v43, %v1902_v20  ;;  %vm1871_vm11 = vcmp.ge.f32.partialorder %v1839_v55, 0.0  ;;  %v1903_v44 = vmul.f32 0.2, %v1839_v55 }
 0x1ec   : > { %1966 = vst.msk [vmem:[%s3494_s19 + $0xb0] sm:$0xff] %vm1300_vm7, %v1934_v62  ;;  %v1932_v61 = vsel %vm1868_vm10, %v1836_v25, %v1900_v57  ;;  %vm1869_vm12 = vcmp.ge.f32.partialorder %v1837_v19, 0.0  ;;  %v1901_v4 = vmul.f32 0.2, %v1837_v19 }
 0x1ed   : > { %v2211_v38 = vpop.f32.mrb[4].mxu0  ;;  %1964 = vst.msk [vmem:[%s3494_s19 + $0xa0] sm:$0xff] %vm1300_vm7, %v1932_v61  ;;  %v1935_v27 = vsel %vm1871_vm11, %v1839_v55, %v1903_v44 }
 0x1ee   : > { %v1822_v56 = vmul.f32 %v2211_v38, %v3486_v1  ;;  %v1703_v48 = vpop.f32.mrb[5].mxu0  ;;  %1967 = vst.msk [vmem:[%s3494_s19 + $0xb8] sm:$0xff] %vm1300_vm7, %v1935_v27  ;;  %v1933_v10 = vsel %vm1869_vm12, %v1837_v19, %v1901_v4 }
 0x1ef   : > { %v1820_v26 = vmul.f32 %v3486_v1, %v1703_v48  ;;  %v2212_v16 = vpop.f32.mrb[6].mxu0  ;;  %1965 = vst.msk [vmem:[%s3494_s19 + $0xa8] sm:$0xff] %vm1300_vm7, %v1933_v10 }
 0x1f0   : > { %vm1854_vm13 = vcmp.ge.f32.partialorder %v1822_v56, 0.0  ;;  %v1886_v7 = vmul.f32 0.2, %v1822_v56  ;;  %v1823_v50 = vmul.f32 %v2212_v16, %v3486_v1  ;;  %v1706_v46 = vpop.f32.mrb[7].mxu0 }
 0x1f1   : > { %vm1852_vm14 = vcmp.ge.f32.partialorder %v1820_v26, 0.0  ;;  %v1884_v21 = vmul.f32 0.2, %v1820_v26  ;;  %v1821_v2 = vmul.f32 %v3486_v1, %v1706_v46 }
 0x1f2   : > { %v1918_v5 = vsel %vm1854_vm13, %v1822_v56, %v1886_v7  ;;  %vm1855_vm15 = vcmp.ge.f32.partialorder %v1823_v50, 0.0  ;;  %v1887_v0 = vmul.f32 0.2, %v1823_v50 }
 0x1f3   : > { %1950 = vst.msk [vmem:[%s3494_s19 + $0x30] sm:$0xff] %vm1300_vm7, %v1918_v5  ;;  %v1916_v30 = vsel %vm1852_vm14, %v1820_v26, %v1884_v21  ;;  %vm1853_vm0 = vcmp.ge.f32.partialorder %v1821_v2, 0.0  ;;  %v1885_v40 = vmul.f32 0.2, %v1821_v2 }
 0x1f4   : > { %1948 = vst.msk [vmem:[%s3494_s19 + $0x20] sm:$0xff] %vm1300_vm7, %v1916_v30  ;;  %v1919_v22 = vsel %vm1855_vm15, %v1823_v50, %v1887_v0 }
 0x1f5   : > { %1951 = vst.msk [vmem:[%s3494_s19 + $0x38] sm:$0xff] %vm1300_vm7, %v1919_v22  ;;  %v1917_v53 = vsel %vm1853_vm0, %v1821_v2, %v1885_v40 }
 0x1f6   : > { %1949 = vst.msk [vmem:[%s3494_s19 + $0x28] sm:$0xff] %vm1300_vm7, %v1917_v53 }
 0x226   : > { %v2231_v24 = vpop.f32.mrb[8].mxu1 }
 0x227   : > { %v1842_v39 = vmul.f32 %v2231_v24, %v3486_v1  ;;  %v1783_v9 = vpop.f32.mrb[9].mxu1 }
 0x228   : > { %v1840_v31 = vmul.f32 %v3486_v1, %v1783_v9  ;;  %v2232_v15 = vpop.f32.mrb[10].mxu1 }
 0x229   : > { %vm1874_vm1 = vcmp.ge.f32.partialorder %v1842_v39, 0.0  ;;  %v1906_v34 = vmul.f32 0.2, %v1842_v39  ;;  %v1843_v13 = vmul.f32 %v2232_v15, %v3486_v1  ;;  %v1786_v42 = vpop.f32.mrb[11].mxu1 }
 0x22a   : > { %vm1872_vm2 = vcmp.ge.f32.partialorder %v1840_v31, 0.0  ;;  %v1904_v11 = vmul.f32 0.2, %v1840_v31  ;;  %v1841_v45 = vmul.f32 %v3486_v1, %v1786_v42 }
 0x22b   : > { %v1938_v3 = vsel %vm1874_vm1, %v1842_v39, %v1906_v34  ;;  %vm1875_vm3 = vcmp.ge.f32.partialorder %v1843_v13, 0.0  ;;  %v1907_v29 = vmul.f32 0.2, %v1843_v13 }
 0x22c   : > { %1970 = vst.msk [vmem:[%s3494_s19 + $0xd0] sm:$0xff] %vm1300_vm7, %v1938_v3  ;;  %v1936_v41 = vsel %vm1872_vm2, %v1840_v31, %v1904_v11  ;;  %vm1873_vm4 = vcmp.ge.f32.partialorder %v1841_v45, 0.0  ;;  %v1905_v37 = vmul.f32 0.2, %v1841_v45 }
 0x22d   : > { %v2215_v49 = vpop.f32.mrb[8].mxu0  ;;  %1968 = vst.msk [vmem:[%s3494_s19 + $0xc0] sm:$0xff] %vm1300_vm7, %v1936_v41  ;;  %v1939_v18 = vsel %vm1875_vm3, %v1843_v13, %v1907_v29 }
 0x22e   : > { %v1826_v33 = vmul.f32 %v2215_v49, %v3486_v1  ;;  %v1719_v6 = vpop.f32.mrb[9].mxu0  ;;  %1971 = vst.msk [vmem:[%s3494_s19 + $0xd8] sm:$0xff] %vm1300_vm7, %v1939_v18  ;;  %v1937_v17 = vsel %vm1873_vm4, %v1841_v45, %v1905_v37 }
 0x22f   : > { %v1824_v8 = vmul.f32 %v3486_v1, %v1719_v6  ;;  %v2216_v60 = vpop.f32.mrb[10].mxu0  ;;  %1969 = vst.msk [vmem:[%s3494_s19 + $0xc8] sm:$0xff] %vm1300_vm7, %v1937_v17 }
 0x230   : > { %vm1858_vm5 = vcmp.ge.f32.partialorder %v1826_v33, 0.0  ;;  %v1890_v47 = vmul.f32 0.2, %v1826_v33  ;;  %v1827_v51 = vmul.f32 %v2216_v60, %v3486_v1  ;;  %v1722_v63 = vpop.f32.mrb[11].mxu0 }
 0x231   : > { %vm1856_vm6 = vcmp.ge.f32.partialorder %v1824_v8, 0.0  ;;  %v1888_v12 = vmul.f32 0.2, %v1824_v8  ;;  %v1825_v23 = vmul.f32 %v3486_v1, %v1722_v63 }
 0x232   : > { %v1922_v28 = vsel %vm1858_vm5, %v1826_v33, %v1890_v47  ;;  %vm1859_vm8 = vcmp.ge.f32.partialorder %v1827_v51, 0.0  ;;  %v1891_v52 = vmul.f32 0.2, %v1827_v51 }
 0x233   : > { %1954 = vst.msk [vmem:[%s3494_s19 + $0x50] sm:$0xff] %vm1300_vm7, %v1922_v28  ;;  %v1920_v35 = vsel %vm1856_vm6, %v1824_v8, %v1888_v12  ;;  %vm1857_vm9 = vcmp.ge.f32.partialorder %v1825_v23, 0.0  ;;  %v1889_v59 = vmul.f32 0.2, %v1825_v23 }
 0x234   : > { %1952 = vst.msk [vmem:[%s3494_s19 + $0x40] sm:$0xff] %vm1300_vm7, %v1920_v35  ;;  %v1923_v14 = vsel %vm1859_vm8, %v1827_v51, %v1891_v52 }
 0x235   : > { %1955 = vst.msk [vmem:[%s3494_s19 + $0x58] sm:$0xff] %vm1300_vm7, %v1923_v14  ;;  %v1921_v54 = vsel %vm1857_vm9, %v1825_v23, %v1889_v59 }
 0x236   : > { %1953 = vst.msk [vmem:[%s3494_s19 + $0x48] sm:$0xff] %vm1300_vm7, %v1921_v54 }
 0x262   : > { %v2235_v43 = vpop.f32.mrb[12].mxu1 }
 0x263   : > { %v1846_v58 = vmul.f32 %v2235_v43, %v3486_v1  ;;  %v1799_v25 = vpop.f32.mrb[13].mxu1 }
 0x264   : > { %v1844_v36 = vmul.f32 %v3486_v1, %v1799_v25  ;;  %v2236_v20 = vpop.f32.mrb[14].mxu1 }
 0x265   : > { %vm1878_vm10 = vcmp.ge.f32.partialorder %v1846_v58, 0.0  ;;  %v1910_v55 = vmul.f32 0.2, %v1846_v58  ;;  %v1847_v32 = vmul.f32 %v2236_v20, %v3486_v1  ;;  %v1802_v57 = vpop.f32.mrb[15].mxu1 }
 0x266   : > { %vm1876_vm11 = vcmp.ge.f32.partialorder %v1844_v36, 0.0  ;;  %v1908_v19 = vmul.f32 0.2, %v1844_v36  ;;  %v1845_v62 = vmul.f32 %v3486_v1, %v1802_v57 }
 0x267   : > { %v1942_v44 = vsel %vm1878_vm10, %v1846_v58, %v1910_v55  ;;  %vm1879_vm12 = vcmp.ge.f32.partialorder %v1847_v32, 0.0  ;;  %v1911_v61 = vmul.f32 0.2, %v1847_v32 }
 0x268   : > { %1974 = vst.msk [vmem:[%s3494_s19 + $0xf0] sm:$0xff] %vm1300_vm7, %v1942_v44  ;;  %v1940_v4 = vsel %vm1876_vm11, %v1844_v36, %v1908_v19  ;;  %vm1877_vm13 = vcmp.ge.f32.partialorder %v1845_v62, 0.0  ;;  %v1909_v38 = vmul.f32 0.2, %v1845_v62 }
 0x269   : > { %v2219_v27 = vpop.f32.mrb[12].mxu0  ;;  %1972 = vst.msk [vmem:[%s3494_s19 + $0xe0] sm:$0xff] %vm1300_vm7, %v1940_v4  ;;  %v1943_v56 = vsel %vm1879_vm12, %v1847_v32, %v1911_v61 }
 0x26a   : > { %v1830_v48 = vmul.f32 %v2219_v27, %v3486_v1  ;;  %v1735_v10 = vpop.f32.mrb[13].mxu0  ;;  %1975 = vst.msk [vmem:[%s3494_s19 + $0xf8] sm:$0xff] %vm1300_vm7, %v1943_v56  ;;  %v1941_v26 = vsel %vm1877_vm13, %v1845_v62, %v1909_v38 }
 0x26b   : > { %v1828_v16 = vmul.f32 %v3486_v1, %v1735_v10  ;;  %v2220_v7 = vpop.f32.mrb[14].mxu0  ;;  %1973 = vst.msk [vmem:[%s3494_s19 + $0xe8] sm:$0xff] %vm1300_vm7, %v1941_v26 }
 0x26c   : > { %vm1862_vm14 = vcmp.ge.f32.partialorder %v1830_v48, 0.0  ;;  %v1894_v50 = vmul.f32 0.2, %v1830_v48  ;;  %v1831_v46 = vmul.f32 %v2220_v7, %v3486_v1  ;;  %v1738_v21 = vpop.f32.mrb[15].mxu0 }
 0x26d   : > { %vm1860_vm15 = vcmp.ge.f32.partialorder %v1828_v16, 0.0  ;;  %v1892_v2 = vmul.f32 0.2, %v1828_v16  ;;  %v1829_v5 = vmul.f32 %v3486_v1, %v1738_v21 }
 0x26e   : > { %v1926_v0 = vsel %vm1862_vm14, %v1830_v48, %v1894_v50  ;;  %vm1863_vm0 = vcmp.ge.f32.partialorder %v1831_v46, 0.0  ;;  %v1895_v30 = vmul.f32 0.2, %v1831_v46 }
 0x26f   : > { %1958 = vst.msk [vmem:[%s3494_s19 + $0x70] sm:$0xff] %vm1300_vm7, %v1926_v0  ;;  %v1924_v40 = vsel %vm1860_vm15, %v1828_v16, %v1892_v2  ;;  %vm1861_vm1 = vcmp.ge.f32.partialorder %v1829_v5, 0.0  ;;  %v1893_v22 = vmul.f32 0.2, %v1829_v5 }
 0x270   : > { %1956 = vst.msk [vmem:[%s3494_s19 + $0x60] sm:$0xff] %vm1300_vm7, %v1924_v40  ;;  %v1927_v53 = vsel %vm1863_vm0, %v1831_v46, %v1895_v30 }
 0x271   : > { %1959 = vst.msk [vmem:[%s3494_s19 + $0x78] sm:$0xff] %vm1300_vm7, %v1927_v53  ;;  %v1925_v24 = vsel %vm1861_vm1, %v1829_v5, %v1893_v22 }
 0x272   : > { %1957 = vst.msk [vmem:[%s3494_s19 + $0x68] sm:$0xff] %vm1300_vm7, %v1925_v24 }
 0x273 PF: > { %s14_s16 = sadd.s32 1, %s2327_s16   ;;  %s3628_s14 = smov %s2323_s15 }
 0x274   : > { %p11_p5 = scmp.ge.s32.totalorder %s14_s16, 4   ;;  %s3629_s15 = smov %s3631_s2 }
 0x276   :  { %13 = sbr.rel (!%p11_p5) target bundleno = 2 (0x2), region = 65 }

// kernel: _lambda_.14
= control target key start
LH: loop header
LB: loop body
LE: loop exit
PB: predicated region body
PF: predicated region fallthrough
CT: control target
= control target key end

     0   :  { %s1081_s14 = smov 0   ;;  %s1083_s15 = smov 0   ;;  %s1438_s0 = inlined_call_operand.vmem [shape: bf16[2,10,10,8], index: 0, kind: input, shape index: {}]   ;;  %s1439_s1 = inlined_call_operand.vmem [shape: bf16[72,16], index: 1, kind: input, shape index: {}]   ;;  %s1440_s2 = inlined_call_operand.<no memory space> [shape: f32[1], index: 2, kind: input, shape index: {}]   ;;  %s1441_s3 = inlined_call_operand.vmem [shape: f32[2,64,16], index: 3, kind: output, shape index: {}]  }
   0x1   :  { %8 = sst [smem:[#allocation2]] %s1440_s2  ;;  %s1085_s16 = smov 0  }
   0x2 LB: > { %s26_s2 = sadd.s32 1, %s1044_s15  ;;  %p887_p0 = scmp.ge.s32.totalorder %s1048_s16, 1  ;;  %s1048_s16 = sphi %s1085_s16, %s14_s16   ;;  %s1044_s15 = sphi %s1083_s15, %s1447_s15   ;;  %s1040_s14 = sphi %s1081_s14, %s1446_s14  }
   0x3   : > { %p28_p1 = scmp.ge.s32.totalorder %s26_s2, 2  ;;  %p161_p2 = scmp.lt.s32.totalorder %s1048_s16, 3 }
   0x5   : > { %s1449_s2 = smov (%p28_p1, %s26_s2), 0  ;;  %p162_p3 = pnand %p887_p0, %p161_p2 }
   0x6   : > { %p192_p4 = scmp.lt.s32.totalorder (!%p162_p3), %s1040_s14, 1  ;;  %vm361_vm0 = vcmask (!%p162_p3), 1042432   ;;  %vm362_vm1 = vcmask (!%p162_p3), 1046532   ;;  %s1050_s21 = smov (!%p162_p3), 24   ;;  %vm230_vm3 = vsmask.f32 (!%p162_p3), 3328 }
   0x7   : > { %165 = sbr.rel (%p162_p3) target bundleno = 435 (0x1b3), region = 32  ;;  %vm1107_vm2 = vmor (!%p162_p3), %vm361_vm0, %vm362_vm1  ;;  %vm231_vm4 = vsmask.f32 (!%p162_p3), 7440  ;;  %s1051_s22 = smov (!%p162_p3), 16   ;;  %vm678_vm6 = vcmask (!%p162_p3), 1043456   ;;  %vm557_vm7 = vcmask (!%p162_p3), 64512  }
   0x8   : > { %vm1230_vm5 = vmor (!%p162_p3), %vm230_vm3, %vm231_vm4  ;;  %s1052_s23 = smov (!%p162_p3), 8   ;;  %s1053_s24 = smov (!%p162_p3), 32   ;;  %vm570_vm8 = vcmask (!%p162_p3), 130048   ;;  %vm588_vm9 = vcmask (!%p162_p3), 261120   ;;  %vm579_vm10 = vcmask (!%p162_p3), 195584   ;;  %vm597_vm11 = vcmask (!%p162_p3), 326656  }
   0x9   : > { %s1054_s27 = smov (!%p162_p3), 40   ;;  %s1055_s5 = smov (!%p162_p3), 48   ;;  %vm606_vm12 = vcmask (!%p162_p3), 392192   ;;  %vm615_vm13 = vcmask (!%p162_p3), 457728   ;;  %vm624_vm14 = vcmask (!%p162_p3), 523264   ;;  %vm669_vm15 = vcmask (!%p162_p3), 588800  }
   0xa   : > { %s1056_s10 = smov (!%p162_p3), 56   ;;  %s1057_s11 = smov (!%p162_p3), 64  }
   0xb   : > { %s747_s12 = sld [smem:[#allocation2]] (!%p162_p3) }
   0xe   : > { %s1451_s14 = smov (!%p192_p4, %s1040_s14), 1 }
   0xf   : > { %s979_s17 = smul.u32 80, %s1451_s14  ;;  %s939_s13 = sshll.u32 %s1451_s14, 6 }
  0x10   : > { %s1411_s19 = scalar_lea.vmem %s1441_s3, %s939_s13 }
  0x11   : > { %s1105_s20 = scalar_lea.vmem %s1438_s0, %s979_s17 }
  0x12   : > { %v1112_v1 = vld [vmem:[%s1105_s20 + $0x28] sm:$0xf]  ;;  %v1115_v2 = vld [vmem:[%s1105_s20 + $0x30] sm:$0xf]  ;;  %v1126_v6 = vld [vmem:[%s1105_s20 + $0x20] sm:$0xf] }
  0x13   : > { %v1118_v3 = vld [vmem:[%s1105_s20 + $0x8] sm:$0xf]  ;;  %v915_v4 = vcombine.low %v1112_v1, %v1115_v2  ;;  %v1123_v5 = vld [vmem:[%s1105_s20 + $0x10] sm:$0xf]  ;;  %v1129_v7 = vld [vmem:[%s1105_s20 + $0x24] sm:$0x1] }
  0x14   : > { %v913_v8 = vcombine.low %v1118_v3, %v1123_v5  ;;  %v1134_v9 = vld [vmem:[%s1105_s20 + $0x2c] sm:$0x1]  ;;  %v895_v10 = vrot.slane %v1126_v6, 9  ;;  %v382_v11 = vrot.slane %v1129_v7, 5  ;;  %v896_v12 = vrot.slane %v1112_v1, 9 }
  0x15   : > { %497 = vrot.lane.b32.xlu1 %v915_v4, %s1050_s21  ;;  %v386_v13 = vrot.slane %v1134_v9, 5  ;;  %v1142_v14 = vld [vmem:[%s1105_s20] sm:$0xf]  ;;  %v1145_v15 = vld [vmem:[%s1105_s20 + $0x4] sm:$0x1]  ;;  %v892_v16 = vrot.slane %v1118_v3, 9 }
  0x16   : > { %493 = vrot.lane.b32.xlu0 %v913_v8, %s1050_s21  ;;  %v1151_v17 = vsel %vm1107_vm2, %v895_v10, %v382_v11  ;;  %v1154_v18 = vld [vmem:[%s1105_s20 + $0xc] sm:$0x1]  ;;  %v891_v19 = vrot.slane %v1142_v14, 9  ;;  %v366_v20 = vrot.slane %v1145_v15, 5  ;;  %v1159_v21 = vld [vmem:[%s1105_s20 + $0x34] sm:$0x1] }
  0x17   : > { %v1163_v22 = vsel %vm1107_vm2, %v896_v12, %v386_v13  ;;  %v370_v23 = vrot.slane %v1154_v18, 5  ;;  %v1167_v24 = vld [vmem:[%s1105_s20 + $0x38] sm:$0xf]  ;;  %v1170_v25 = vld [vmem:[%s1105_s20 + $0x3c] sm:$0x1]  ;;  %v897_v26 = vrot.slane %v1115_v2, 9 }
  0x18   : > { %v1175_v27 = vcombine.low %v1151_v17, %v1163_v22  ;;  %v367_v28 = vsel %vm1107_vm2, %v891_v19, %v366_v20  ;;  %v390_v29 = vrot.slane %v1159_v21, 5  ;;  %v898_v30 = vrot.slane %v1167_v24, 9  ;;  %v215_v31 = vld [vmem:[%s1105_s20 + $0x14] sm:$0x1]  ;;  %v1183_v32 = vld [vmem:[%s1105_s20 + $0x18] sm:$0xf] }
  0x19   : > { %v1187_v33 = vsel %vm1107_vm2, %v892_v16, %v370_v23  ;;  %v394_v34 = vrot.slane %v1170_v25, 5  ;;  %v217_v35 = vld [vmem:[%s1105_s20 + $0x1c] sm:$0x1]  ;;  %v893_v36 = vrot.slane %v1123_v5, 9  ;;  %v374_v37 = vrot.slane %v215_v31, 5 }
  0x1a   : > { %484 = vrot.lane.b32.xlu1 %v1175_v27, %s1051_s22  ;;  %v909_v38 = vcombine.low %v367_v28, %v1187_v33  ;;  %v1196_v39 = vsel %vm1107_vm2, %v897_v26, %v390_v29  ;;  %v894_v40 = vrot.slane %v1183_v32, 9  ;;  %v378_v41 = vrot.slane %v217_v35, 5 }
  0x1b   : > { %v1201_v42 = vsel %vm1107_vm2, %v898_v30, %v394_v34  ;;  %v1205_v43 = vsel %vm1107_vm2, %v893_v36, %v374_v37  ;;  %v262_v44 = vshrl.u32 %v1123_v5, 16  ;;  %v265_v45 = vshll.u32 %v1123_v5, 16 }
  0x1c   : > { %480 = vrot.lane.b32.xlu0 %v909_v38, %s1051_s22  ;;  %v1211_v46 = vcombine.low %v1196_v39, %v1201_v42  ;;  %v1215_v47 = vsel %vm1107_vm2, %v894_v40, %v378_v41  ;;  %v271_v48 = vshll.u32 %v215_v31, 16  ;;  %v276_v49 = vshrl.u32 %v1183_v32, 16 }
  0x1d   : > { %v1220_v50 = vcombine.low %v1205_v43, %v1215_v47  ;;  %v264_v51 = vrot.slane %v262_v44, 4  ;;  %v267_v52 = vrot.slane %v265_v45, 5  ;;  %v279_v53 = vshll.u32 %v1183_v32, 16 }
  0x1e   : > { %486 = vrot.lane.b32.xlu1 %v1211_v46, %s1051_s22  ;;  %v273_v54 = vrot.slane %v271_v48, 5  ;;  %v278_v55 = vrot.slane %v276_v49, 4  ;;  %v285_v56 = vshll.u32 %v217_v35, 16  ;;  %v234_v57 = vshrl.u32 %v1142_v14, 16 }
  0x1f   : > { %v268_v58 = vor.u32 %v267_v52, %v264_v51  ;;  %v281_v59 = vrot.slane %v279_v53, 5  ;;  %v237_v60 = vshll.u32 %v1142_v14, 16  ;;  %v243_v61 = vshll.u32 %v1145_v15, 16 }
  0x20   : > { %482 = vrot.lane.b32.xlu0 %v1220_v50, %s1051_s22  ;;  %v287_v63 = vrot.slane %v285_v56, 5  ;;  %v236_v4 = vrot.slane %v234_v57, 4  ;;  %v248_v8 = vshrl.u32 %v1118_v3, 16  ;;  %v251_v10 = vshll.u32 %v1118_v3, 16 }
  0x21   : > { %v269_v11 = vrot.slane %v268_v58, 4  ;;  %v282_v12 = vor.u32 %v281_v59, %v278_v55  ;;  %v239_v13 = vrot.slane %v237_v60, 5  ;;  %v245_v16 = vrot.slane %v243_v61, 5 }
  0x22   : > { %v250_v19 = vrot.slane %v248_v8, 4  ;;  %v253_v15 = vrot.slane %v251_v10, 5  ;;  %v257_v20 = vshll.u32 %v1154_v18, 16  ;;  %v318_v23 = vshrl.u32 %v1115_v2, 16 }
  0x23   : > { %v1240_v26 = vsel %vm1230_vm5, %v269_v11, %v273_v54  ;;  %v283_v28 = vrot.slane %v282_v12, 4  ;;  %v240_v29 = vor.u32 %v239_v13, %v236_v4  ;;  %v321_v30 = vshll.u32 %v1115_v2, 16  ;;  %v1269_v11 = vld [vmem:[%s1105_s20 + $0x40] sm:$0xf] }
  0x24   : > { %v254_v31 = vor.u32 %v253_v15, %v250_v19  ;;  %v259_v34 = vrot.slane %v257_v20, 5  ;;  %v320_v35 = vrot.slane %v318_v23, 4  ;;  %v327_v36 = vshll.u32 %v1159_v21, 16 }
  0x25   : > { %v1246_v37 = vsel %vm1230_vm5, %v283_v28, %v287_v63  ;;  %v241_v18 = vrot.slane %v240_v29, 4  ;;  %v323_v38 = vrot.slane %v321_v30, 5  ;;  %v332_v40 = vshrl.u32 %v1167_v24, 16 }
  0x26   : > { %v1251_v41 = vcombine.low %v1240_v26, %v1246_v37  ;;  %v255_v44 = vrot.slane %v254_v31, 4  ;;  %v329_v45 = vrot.slane %v327_v36, 5  ;;  %v335_v48 = vshll.u32 %v1167_v24, 16 }
  0x27   : > { %v246_v49 = vsel %vm1230_vm5, %v241_v18, %v245_v16  ;;  %v324_v21 = vor.u32 %v323_v38, %v320_v35  ;;  %v334_v51 = vrot.slane %v332_v40, 4  ;;  %v341_v52 = vshll.u32 %v1170_v25, 16 }
  0x28   : > { %462 = vrot.lane.b32.xlu1 %v1251_v41, %s1052_s23  ;;  %v260_v53 = vsel %vm1230_vm5, %v255_v44, %v259_v34  ;;  %v337_v54 = vrot.slane %v335_v48, 5  ;;  %v290_v55 = vshrl.u32 %v1126_v6, 16  ;;  %v293_v56 = vshll.u32 %v1126_v6, 16 }
  0x29   : > { %v905_v57 = vcombine.low %v246_v49, %v260_v53  ;;  %v325_v58 = vrot.slane %v324_v21, 4  ;;  %v343_v59 = vrot.slane %v341_v52, 5  ;;  %v299_v60 = vshll.u32 %v1129_v7, 16  ;;  %v227_v7 = vld [vmem:[%s1105_s20 + $0x44] sm:$0x1] }
  0x2a   : > { %v338_v25 = vor.u32 %v337_v54, %v334_v51  ;;  %v292_v61 = vrot.slane %v290_v55, 4  ;;  %v295_v63 = vrot.slane %v293_v56, 5  ;;  %v304_v4 = vshrl.u32 %v1112_v1, 16 }
  0x2b   : > { %460 = vrot.lane.b32.xlu0 %v905_v57, %s1052_s23  ;;  %v307_v8 = vshll.u32 %v1112_v1, 16  ;;  %v313_v10 = vshll.u32 %v1134_v9, 16  ;;  %v330_v12 = vsel %vm1230_vm5, %v325_v58, %v329_v45  ;;  %v301_v15 = vrot.slane %v299_v60, 5 }
  0x2c   : > { %v339_v13 = vrot.slane %v338_v25, 4  ;;  %v296_v16 = vor.u32 %v295_v63, %v292_v61  ;;  %v306_v19 = vrot.slane %v304_v4, 4  ;;  %v397_v29 = vshrl.u32 %v1269_v11, 16  ;;  %v1306_v25 = vld [vmem:[%s1105_s20 + $0x48] sm:$0xf] }
  0x2d   : > { %v309_v20 = vrot.slane %v307_v8, 5  ;;  %v400_v30 = vshll.u32 %v1269_v11, 16  ;;  %v315_v34 = vrot.slane %v313_v10, 5  ;;  %v406_v35 = vshll.u32 %v227_v7, 16 }
  0x2e   : > { %v344_v23 = vsel %vm1230_vm5, %v339_v13, %v343_v59  ;;  %v297_v28 = vrot.slane %v296_v16, 4  ;;  %v399_v36 = vrot.slane %v397_v29, 4  ;;  %v916_v44 = vcombine.low %v1167_v24, %v1269_v11  ;;  %v1022_v13 = vld [vmem:[%s1439_s1 + $0x8] sm:$0xff]  }
  0x2f   : > { %v1278_v9 = vcombine.low %v330_v12, %v344_v23  ;;  %v310_v31 = vor.u32 %v309_v20, %v306_v19  ;;  %v402_v18 = vrot.slane %v400_v30, 5  ;;  %v408_v48 = vrot.slane %v406_v35, 5  ;;  %v1023_v19 = vld [vmem:[%s1439_s1 + $0x10] sm:$0xff]  }
  0x30   : > { %v302_v38 = vsel %vm1230_vm5, %v297_v28, %v301_v15  ;;  %v914_v54 = vcombine.low %v1183_v32, %v1126_v6  ;;  %v901_v56 = vcombine.low %v1142_v14, %v1118_v3  ;;  %v917_v58 = vcombine.low %v260_v53, %v1240_v26  ;;  %v1021_v53 = vld [vmem:[%s1439_s1] sm:$0xff]  }
  0x31   : > { %466 = vrot.lane.b32.xlu1 %v1278_v9, %s1052_s23  ;;  %v311_v40 = vrot.slane %v310_v31, 4  ;;  %v403_v45 = vor.u32 %v402_v18, %v399_v36  ;;  %v899_v59 = vrot.slane %v1269_v11, 9  ;;  %v414_v60 = vrot.slane %v227_v7, 5  ;;  %949 = vmatprep.subr.bf16.mxu0 %v1021_v53  ;;  %v1024_v7 = vld [vmem:[%s1439_s1 + $0x18] sm:$0xff]  }
  0x32   : > { %v923_v61 = vcombine.low %v1163_v22, %v1196_v39  ;;  %v918_v63 = vcombine.low %v1246_v37, %v302_v38  ;;  %v417_v8 = vshrl.u32 %v1306_v25, 16  ;;  %v420_v26 = vshll.u32 %v1306_v25, 16  ;;  %967 = vmatprep.subr.bf16.mxu1 %v1021_v53  ;;  %950 = vmatpush3.bf16.msra.mxu0 %v1021_v53 }
  0x33   : > { %v316_v49 = vsel %vm1230_vm5, %v311_v40, %v315_v34  ;;  %v404_v51 = vrot.slane %v403_v45, 4  ;;  %v1313_v4 = vsel %vm1107_vm2, %v899_v59, %v414_v60  ;;  %v921_v39 = vcombine.low %v1187_v33, %v1205_v43  ;;  %972 = vmatpush3.bf16.msra.mxu1 %v1021_v53  ;;  %951 = vmatprep.subr.bf16.mxu0 %v1022_v13 }
  0x34   : > { %v1288_v21 = vcombine.low %v302_v38, %v316_v49  ;;  %v919_v52 = vcombine.low %v316_v49, %v330_v12  ;;  %v924_v22 = vcombine.low %v1201_v42, %v1313_v4  ;;  %v419_v37 = vrot.slane %v417_v8, 4  ;;  %v229_v12 = vld [vmem:[%s1105_s20 + $0x4c] sm:$0x1]  ;;  %968 = vmatprep.subr.bf16.mxu1 %v1022_v13 }
  0x35   : > { %499 = vrot.lane.b32.xlu1 %v916_v44, %s1050_s21  ;;  %v1297_v55 = vsel %vm1230_vm5, %v404_v51, %v408_v48  ;;  %v422_v10 = vrot.slane %v420_v26, 5  ;;  %v1330_v16 = vcombine.low %v1115_v2, %v1167_v24  ;;  %v922_v33 = vcombine.low %v1215_v47, %v1151_v17 }
  0x36   : > { %464 = vrot.lane.b32.xlu0 %v1288_v21, %s1052_s23  ;;  %v920_v57 = vcombine.low %v344_v23, %v1297_v55  ;;  %v426_v43 = vshll.u32 %v229_v12, 16  ;;  %952 = vmatpush3.bf16.msra.mxu0 %v1022_v13  ;;  %v925_v2 = vcombine.low %v1269_v11, %v1306_v25  ;;  %v1342_v17 = vcombine.low %v1123_v5, %v1183_v32  ;;  %v1025_v32 = vld [vmem:[%s1439_s1 + $0x20] ss:$0 sps:$4 sm:$0xff]  }
  0x37   : > { %v423_v42 = vor.u32 %v422_v10, %v419_v37  ;;  %973 = vmatpush3.bf16.msra.mxu1 %v1022_v13  ;;  %953 = vmatprep.subr.bf16.mxu0 %v1023_v19  ;;  %v903_v11 = vcombine.low %v1126_v6, %v1112_v1  ;;  %v900_v1 = vrot.slane %v1306_v25, 9  ;;  %v434_v6 = vrot.slane %v229_v12, 5 }
  0x38   : > { %v428_v47 = vrot.slane %v426_v43, 5  ;;  %969 = vmatprep.subr.bf16.mxu1 %v1023_v19  ;;  %v680_v62 = vsel %vm678_vm6, %v1025_v32, 0 }
  0x39   : > { %510 = vrot.lane.b32.xlu1 %v919_v52, %s1053_s24  ;;  %v424_v24 = vrot.slane %v423_v42, 4  ;;  %v435_v20 = vsel %vm1107_vm2, %v900_v1, %v434_v6 }
  0x3a   : > { %495 = vrot.lane.b32.xlu0 %v914_v54, %s1050_s21  ;;  %954 = vmatpush3.bf16.msra.mxu0 %v1023_v19  ;;  %v927_v23 = vcombine.low %v1313_v4, %v435_v20 }
  0x3b   : > { %974 = vmatpush3.bf16.msra.mxu1 %v1023_v19  ;;  %v429_v5 = vsel %vm1230_vm5, %v424_v24, %v428_v47  ;;  %955 = vmatprep.subr.bf16.mxu0 %v1024_v7 }
  0x3c   : > { %970 = vmatprep.subr.bf16.mxu1 %v1024_v7  ;;  %v926_v15 = vcombine.low %v1297_v55, %v429_v5 }
  0x3d   : > { %512 = vrot.lane.b32.xlu1 %v920_v57, %s1053_s24 }
  0x3e   : > { %506 = vrot.lane.b32.xlu0 %v917_v58, %s1053_s24  ;;  %956 = vmatpush3.bf16.msra.mxu0 %v1024_v7 }
  0x3f   : > { %975 = vmatpush3.bf16.msra.mxu1 %v1024_v7  ;;  %977 = vmatprep.subr.msk.bf16.mxu0 %vm678_vm6, %v1025_v32 }
  0x40   : > { %978 = vmatprep.subr.msk.bf16.mxu1 %vm678_vm6, %v1025_v32 }
  0x41   : > { %523 = vrot.lane.b32.xlu1 %v923_v61, %s1054_s27 }
  0x42   : > { %508 = vrot.lane.b32.xlu0 %v918_v63, %s1053_s24  ;;  %958 = vmatpush3.bf16.msra.mxu0 %v680_v62 }
  0x43   : > { %976 = vmatpush3.bf16.msra.mxu1 %v680_v62 }
  0x45   : > { %525 = vrot.lane.b32.xlu1 %v924_v22, %s1054_s27 }
  0x46   : > { %519 = vrot.lane.b32.xlu0 %v921_v39, %s1054_s27 }
  0x49   : > { %533 = vrot.lane.b32.xlu1 %v1330_v16, %s1055_s5 }
  0x4a   : > { %521 = vrot.lane.b32.xlu0 %v922_v33, %s1054_s27 }
  0x4d   : > { %535 = vrot.lane.b32.xlu1 %v925_v2, %s1055_s5 }
  0x4e   : > { %529 = vrot.lane.b32.xlu0 %v1342_v17, %s1055_s5 }
  0x51   : > { %543 = vrot.lane.b32.xlu1 %v1278_v9, %s1056_s10 }
  0x52   : > { %531 = vrot.lane.b32.xlu0 %v903_v11, %s1055_s5 }
  0x55   : > { %545 = vrot.lane.b32.xlu1 %v926_v15, %s1056_s10 }
  0x56   : > { %539 = vrot.lane.b32.xlu0 %v1251_v41, %s1056_s10 }
  0x59   : > { %553 = vrot.lane.b32.xlu1 %v1211_v46, %s1057_s11 }
  0x5a   : > { %541 = vrot.lane.b32.xlu0 %v1288_v21, %s1056_s10 }
  0x5d   : > { %555 = vrot.lane.b32.xlu1 %v927_v23, %s1057_s11 }
  0x5e   : > { %549 = vrot.lane.b32.xlu0 %v1220_v50, %s1057_s11 }
  0x62   : > { %551 = vrot.lane.b32.xlu0 %v1175_v27, %s1057_s11 }
  0x87   : > { %v498_v28 = vpop.permute.xlu1 %497 }
  0x88   : > { %v494_v29 = vpop.permute.xlu0 %493 }
  0x8c   : > { %v485_v30 = vpop.permute.xlu1 %484 }
  0x8e   : > { %v481_v9 = vpop.permute.xlu0 %480 }
  0x90   : > { %v487_v41 = vpop.permute.xlu1 %486 }
  0x92   : > { %v483_v31 = vpop.permute.xlu0 %482 }
  0x9a   : > { %v463_v0 = vpop.permute.xlu1 %462 }
  0x9b   : > { %v563_v39 = vsel %vm557_vm7, %v1342_v17, %v463_v0 }
  0x9c   : > { %v574_v19 = vsel %vm570_vm8, %v563_v39, %v483_v31 }
  0x9d   : > { %v461_v34 = vpop.permute.xlu0 %460 }
  0x9e   : > { %v560_v59 = vsel %vm557_vm7, %v901_v56, %v461_v34 }
  0x9f   : > { %v572_v8 = vsel %vm570_vm8, %v560_v59, %v481_v9 }
  0xa0   : > { %v581_v37 = vsel %vm579_vm10, %v572_v8, %v494_v29 }
  0xa3   : > { %v467_v35 = vpop.permute.xlu1 %466 }
  0xa4   : > { %v569_v60 = vsel %vm557_vm7, %v1330_v16, %v467_v35 }
  0xa5   : > { %v578_v3 = vsel %vm570_vm8, %v569_v60, %v487_v41 }
  0xa7   : > { %v500_v36 = vpop.permute.xlu1 %499 }
  0xa8   : > { %v465_v46 = vpop.permute.xlu0 %464  ;;  %v587_v56 = vsel %vm579_vm10, %v578_v3, %v500_v36 }
  0xa9   : > { %v566_v54 = vsel %vm557_vm7, %v903_v11, %v465_v46 }
  0xaa   : > { %v576_v57 = vsel %vm570_vm8, %v566_v54, %v485_v30 }
  0xab   : > { %v511_v18 = vpop.permute.xlu1 %510  ;;  %v585_v25 = vsel %vm579_vm10, %v576_v57, %v498_v28  ;;  %v748_v28 = vstv %s747_s12 }
  0xac   : > { %v496_v38 = vpop.permute.xlu0 %495  ;;  %v594_v63 = vsel %vm588_vm9, %v585_v25, %v511_v18 }
  0xad   : > { %v583_v47 = vsel %vm579_vm10, %v574_v19, %v496_v38 }
  0xaf   : > { %v513_v40 = vpop.permute.xlu1 %512 }
  0xb0   : > { %v507_v44 = vpop.permute.xlu0 %506  ;;  %v596_v10 = vsel %vm588_vm9, %v587_v56, %v513_v40 }
  0xb1   : > { %v590_v16 = vsel %vm588_vm9, %v581_v37, %v507_v44 }
  0xb3   : > { %v524_v45 = vpop.permute.xlu1 %523 }
  0xb4   : > { %v509_v48 = vpop.permute.xlu0 %508  ;;  %v603_v26 = vsel %vm597_vm11, %v594_v63, %v524_v45 }
  0xb5   : > { %v592_v32 = vsel %vm588_vm9, %v583_v47, %v509_v48 }
  0xb7   : > { %v526_v50 = vpop.permute.xlu1 %525 }
  0xb8   : > { %v520_v49 = vpop.permute.xlu0 %519  ;;  %v605_v33 = vsel %vm597_vm11, %v596_v10, %v526_v50 }
  0xb9   : > { %v599_v42 = vsel %vm597_vm11, %v590_v16, %v520_v49 }
  0xbb   : > { %v534_v27 = vpop.permute.xlu1 %533 }
  0xbc   : > { %v522_v21 = vpop.permute.xlu0 %521  ;;  %v612_v14 = vsel %vm606_vm12, %v603_v26, %v534_v27 }
  0xbd   : > { %v601_v1 = vsel %vm597_vm11, %v592_v32, %v522_v21 }
  0xbf   : > { %v536_v51 = vpop.permute.xlu1 %535 }
  0xc0   : > { %v530_v52 = vpop.permute.xlu0 %529  ;;  %v614_v43 = vsel %vm606_vm12, %v605_v33, %v536_v51 }
  0xc1   : > { %v608_v2 = vsel %vm606_vm12, %v599_v42, %v530_v52 }
  0xc3   : > { %v544_v55 = vpop.permute.xlu1 %543 }
  0xc4   : > { %v532_v58 = vpop.permute.xlu0 %531  ;;  %v621_v53 = vsel %vm615_vm13, %v612_v14, %v544_v55 }
  0xc5   : > { %v610_v6 = vsel %vm606_vm12, %v601_v1, %v532_v58 }
  0xc7   : > { %v546_v61 = vpop.permute.xlu1 %545 }
  0xc8   : > { %v540_v4 = vpop.permute.xlu0 %539  ;;  %v623_v17 = vsel %vm615_vm13, %v614_v43, %v546_v61 }
  0xc9   : > { %v617_v7 = vsel %vm615_vm13, %v608_v2, %v540_v4 }
  0xcb   : > { %v554_v22 = vpop.permute.xlu1 %553 }
  0xcc   : > { %v542_v12 = vpop.permute.xlu0 %541  ;;  %v630_v13 = vsel %vm624_vm14, %v621_v53, %v554_v22 }
  0xcd   : > { %963 = vmatprep.mubr.msk.bf16.mxu1 %vm669_vm15, %v630_v13  ;;  %v619_v62 = vsel %vm615_vm13, %v610_v6, %v542_v12 }
  0xcf   : > { %v556_v24 = vpop.permute.xlu1 %555 }
  0xd0   : > { %v550_v11 = vpop.permute.xlu0 %549  ;;  %v632_v5 = vsel %vm624_vm14, %v623_v17, %v556_v24 }
  0xd1   : > { %v626_v15 = vsel %vm624_vm14, %v617_v7, %v550_v11  ;;  %964 = vmatmul.mubr.msk.bf16.vlgmr.msra.gmra.mrb[0].mxu1 %vm669_vm15, %v632_v5 }
  0xd2   : > { %959 = vmatprep.mubr.msk.bf16.mxu0 %vm669_vm15, %v626_v15 }
  0xd4   : > { %v552_v20 = vpop.permute.xlu0 %551 }
  0xd5   : > { %v628_v23 = vsel %vm624_vm14, %v619_v62, %v552_v20 }
  0xd6   : > { %960 = vmatmul.mubr.msk.bf16.vlgmr.msra.gmra.mrb[0].mxu0 %vm669_vm15, %v628_v23 }
 0x1a4   : > { %v965_v29 = vpop.f32.mrb[0].mxu1 }
 0x1a5   : > { %v755_v30 = vmul.f32 %v965_v29, %v748_v28  ;;  %v732_v9 = vpop.f32.mrb[1].mxu1 }
 0x1a6   : > { %v753_v41 = vmul.f32 %v748_v28, %v732_v9  ;;  %v966_v31 = vpop.f32.mrb[2].mxu1 }
 0x1a7   : > { %vm763_vm0 = vcmp.ge.f32.partialorder %v755_v30, 0.0  ;;  %v771_v0 = vmul.f32 0.2, %v755_v30  ;;  %v756_v34 = vmul.f32 %v966_v31, %v748_v28  ;;  %v735_v35 = vpop.f32.mrb[3].mxu1 }
 0x1a8   : > { %vm761_vm1 = vcmp.ge.f32.partialorder %v753_v41, 0.0  ;;  %v769_v36 = vmul.f32 0.2, %v753_v41  ;;  %v754_v46 = vmul.f32 %v748_v28, %v735_v35 }
 0x1a9   : > { %v961_v18 = vpop.f32.mrb[0].mxu0  ;;  %v779_v38 = vsel %vm763_vm0, %v755_v30, %v771_v0  ;;  %vm764_vm2 = vcmp.ge.f32.partialorder %v756_v34, 0.0  ;;  %v772_v40 = vmul.f32 0.2, %v756_v34 }
 0x1aa   : > { %v751_v44 = vmul.f32 %v961_v18, %v748_v28  ;;  %787 = vst.msk [vmem:[%s1411_s19 + $0x30] sm:$0xff] %vm570_vm8, %v779_v38  ;;  %v716_v45 = vpop.f32.mrb[1].mxu0  ;;  %v777_v48 = vsel %vm761_vm1, %v753_v41, %v769_v36  ;;  %vm762_vm3 = vcmp.ge.f32.partialorder %v754_v46, 0.0  ;;  %v770_v50 = vmul.f32 0.2, %v754_v46 }
 0x1ab   : > { %v749_v49 = vmul.f32 %v748_v28, %v716_v45  ;;  %785 = vst.msk [vmem:[%s1411_s19 + $0x20] sm:$0xff] %vm570_vm8, %v777_v48  ;;  %v962_v27 = vpop.f32.mrb[2].mxu0  ;;  %v780_v21 = vsel %vm764_vm2, %v756_v34, %v772_v40 }
 0x1ac   : > { %vm759_vm4 = vcmp.ge.f32.partialorder %v751_v44, 0.0  ;;  %v767_v51 = vmul.f32 0.2, %v751_v44  ;;  %v752_v52 = vmul.f32 %v962_v27, %v748_v28  ;;  %788 = vst.msk [vmem:[%s1411_s19 + $0x38] sm:$0xff] %vm570_vm8, %v780_v21  ;;  %v719_v54 = vpop.f32.mrb[3].mxu0  ;;  %v778_v55 = vsel %vm762_vm3, %v754_v46, %v770_v50 }
 0x1ad   : > { %vm757_vm5 = vcmp.ge.f32.partialorder %v749_v49, 0.0  ;;  %v765_v57 = vmul.f32 0.2, %v749_v49  ;;  %v750_v58 = vmul.f32 %v748_v28, %v719_v54  ;;  %786 = vst.msk [vmem:[%s1411_s19 + $0x28] sm:$0xff] %vm570_vm8, %v778_v55 }
 0x1ae   : > { %v775_v59 = vsel %vm759_vm4, %v751_v44, %v767_v51  ;;  %vm760_vm6 = vcmp.ge.f32.partialorder %v752_v52, 0.0  ;;  %v768_v60 = vmul.f32 0.2, %v752_v52 }
 0x1af   : > { %783 = vst.msk [vmem:[%s1411_s19 + $0x10] sm:$0xff] %vm570_vm8, %v775_v59  ;;  %v773_v25 = vsel %vm757_vm5, %v749_v49, %v765_v57  ;;  %vm758_vm7 = vcmp.ge.f32.partialorder %v750_v58, 0.0  ;;  %v766_v61 = vmul.f32 0.2, %v750_v58 }
 0x1b0   : > { %781 = vst.msk [vmem:[%s1411_s19] sm:$0xff] %vm570_vm8, %v773_v25  ;;  %v776_v63 = vsel %vm760_vm6, %v752_v52, %v768_v60 }
 0x1b1   : > { %784 = vst.msk [vmem:[%s1411_s19 + $0x18] sm:$0xff] %vm570_vm8, %v776_v63  ;;  %v774_v4 = vsel %vm758_vm7, %v750_v58, %v766_v61 }
 0x1b2   : > { %782 = vst.msk [vmem:[%s1411_s19 + $0x8] sm:$0xff] %vm570_vm8, %v774_v4 }
 0x1b3 PF: > { %s14_s16 = sadd.s32 1, %s1048_s16   ;;  %s1446_s14 = smov %s1044_s15 }
 0x1b4   : > { %p11_p5 = scmp.ge.s32.totalorder %s14_s16, 4   ;;  %s1447_s15 = smov %s1449_s2 }
 0x1b6   :  { %13 = sbr.rel (!%p11_p5) target bundleno = 2 (0x2), region = 65 }

// kernel: _lambda_.11
= control target key start
LH: loop header
LB: loop body
LE: loop exit
PB: predicated region body
PF: predicated region fallthrough
CT: control target
= control target key end

     0   :  { %s2330_s14 = smov 0   ;;  %s2332_s15 = smov 0   ;;  %s3563_s0 = inlined_call_operand.vmem [shape: bf16[2,18,18,4], index: 0, kind: input, shape index: {}]   ;;  %s3564_s1 = inlined_call_operand.vmem [shape: bf16[36,8], index: 1, kind: input, shape index: {}]   ;;  %s3565_s2 = inlined_call_operand.<no memory space> [shape: f32[1], index: 2, kind: input, shape index: {}]   ;;  %s3566_s3 = inlined_call_operand.vmem [shape: f32[2,256,8], index: 3, kind: output, shape index: {}]  }
   0x1   :  { %8 = sst [smem:[#allocation2]] %s3565_s2  ;;  %s2334_s16 = smov 0  }
   0x2 LB: > { %s26_s2 = sadd.s32 1, %s2293_s15  ;;  %p2058_p0 = scmp.ge.s32.totalorder %s2297_s16, 1  ;;  %s2297_s16 = sphi %s2334_s16, %s14_s16   ;;  %s2293_s15 = sphi %s2332_s15, %s3593_s15   ;;  %s2289_s14 = sphi %s2330_s14, %s3592_s14  }
   0x3   : > { %p28_p1 = scmp.ge.s32.totalorder %s26_s2, 2  ;;  %p161_p2 = scmp.lt.s32.totalorder %s2297_s16, 3 }
   0x5   : > { %s3595_s2 = smov (%p28_p1, %s26_s2), 0  ;;  %p162_p3 = pnand %p2058_p0, %p161_p2 }
   0x7   : > { %165 = sbr.rel (%p162_p3) target bundleno = 627 (0x273), region = 32 }
   0xe   : > { %p192_p4 = scmp.lt.s32.totalorder %s2289_s14, 1  ;;  %vm699_vm0 = vcmask 1042432   ;;  %vm700_vm1 = vcmask 1046532   ;;  %vm264_vm2 = vsmask.f32 3328  ;;  %s2299_s21 = smov 12  }
   0xf   : > { %vm265_vm3 = vsmask.f32 7440  ;;  %vm2386_vm4 = vmor %vm699_vm0, %vm700_vm1  ;;  %s2300_s22 = smov 8   ;;  %s2301_s23 = smov 4   ;;  %vm1633_vm6 = vcmask 1041408   ;;  %vm1300_vm7 = vcmask 31744  }
  0x10   : > { %s3597_s14 = smov (!%p192_p4, %s2289_s14), 1  ;;  %vm2431_vm5 = vmor %vm264_vm2, %vm265_vm3  ;;  %s2302_s24 = smov 16   ;;  %vm1349_vm8 = vcmask 64512   ;;  %vm1382_vm9 = vcmask 97280   ;;  %vm1415_vm10 = vcmask 130048   ;;  %vm1448_vm11 = vcmask 162816  }
  0x11   : > { %s2221_s17 = smul.u32 216, %s3597_s14  ;;  %s2303_s25 = smov 20   ;;  %vm1481_vm12 = vcmask 195584   ;;  %vm1514_vm13 = vcmask 228352   ;;  %vm1547_vm14 = vcmask 261120   ;;  %vm1600_vm15 = vcmask 293888  }
  0x12   : > { %s2304_s26 = smov 24   ;;  %s2305_s29 = smov 28  }
  0x13   : > { %s2354_s20 = scalar_lea.vmem %s3563_s0, %s2221_s17  ;;  %s2306_s5 = smov 32  }
  0x14   : > { %v2357_v0 = vld [vmem:[%s2354_s20 + $0x6c] sm:$0xf]  ;;  %v2360_v1 = vld [vmem:[%s2354_s20 + $0x70] sm:$0xf]  ;;  %v2374_v12 = vld [vmem:[%s2354_s20 + $0x60] sm:$0xf] }
  0x15   : > { %v213_v2 = vld [vmem:[%s2354_s20 + $0xc] sm:$0xf]  ;;  %v497_v3 = vshrl.u32 %v2360_v1, 16  ;;  %v2366_v4 = vcombine.low %v2357_v0, %v2360_v1  ;;  %v484_v5 = vshrl.u32 %v2357_v0, 16  ;;  %v487_v6 = vshll.u32 %v2357_v0, 16  ;;  %s1798_s8 = sld [smem:[#allocation2]] }
  0x16   : > { %v214_v7 = vld [vmem:[%s2354_s20 + $0x10] sm:$0xf]  ;;  %v292_v11 = vshrl.u32 %v213_v2, 16  ;;  %v295_v13 = vshll.u32 %v213_v2, 16  ;;  %v2379_v14 = vld [vmem:[%s2354_s20 + $0x64] sm:$0xf] }
  0x17   : > { %v301_v8 = vshll.u32 %v214_v7, 16  ;;  %v305_v9 = vshrl.u32 %v214_v7, 16  ;;  %v2371_v10 = vcombine.low %v213_v2, %v214_v7  ;;  %1109 = vrot.lane.b32.xlu1 %v2366_v4, %s2299_s21  ;;  %v2382_v15 = vld [vmem:[%s2354_s20 + $0x68] sm:$0x1]  ;;  %v2070_v17 = vrot.slane %v2374_v12, 9  ;;  %s2155_s9 = sshll.u32 %s3597_s14, 8 }
  0x18   : > { %v294_v19 = vrot.slane %v292_v11, 4  ;;  %v760_v20 = vrot.slane %v2379_v14, 5  ;;  %v763_v21 = vrot.slane %v2382_v15, 5  ;;  %v2396_v22 = vld [vmem:[%s2354_s20] sm:$0xf]  ;;  %v297_v23 = vrot.slane %v295_v13, 5  ;;  %s3458_s12 = scalar_lea.vmem %s3566_s3, %s2155_s9 }
  0x19   : > { %v307_v18 = vrot.slane %v305_v9, 4  ;;  %1093 = vrot.lane.b32.xlu0 %v2371_v10, %s2299_s21  ;;  %v2399_v24 = vld [vmem:[%s2354_s20 + $0x4] sm:$0xf]  ;;  %v212_v25 = vld [vmem:[%s2354_s20 + $0x8] sm:$0x1]  ;;  %v2062_v26 = vrot.slane %v2396_v22, 9 }
  0x1a   : > { %v761_v27 = vsel %vm2386_vm4, %v2070_v17, %v760_v20  ;;  %v762_v28 = vrot.slane %v760_v20, 4  ;;  %v704_v29 = vrot.slane %v2399_v24, 5  ;;  %v707_v30 = vrot.slane %v212_v25, 5  ;;  %v2407_v31 = vld [vmem:[%s2354_s20 + $0x74] sm:$0x1] }
  0x1b   : > { %v2071_v32 = vrot.slane %v2357_v0, 9  ;;  %v767_v33 = vrot.slane %v2360_v1, 5  ;;  %v770_v34 = vrot.slane %v2407_v31, 5  ;;  %v215_v35 = vld [vmem:[%s2354_s20 + $0x14] sm:$0x1]  ;;  %v2063_v36 = vrot.slane %v213_v2, 9 }
  0x1c   : > { %v764_v37 = vsel %vm2386_vm4, %v762_v28, %v763_v21  ;;  %v705_v38 = vsel %vm2386_vm4, %v2062_v26, %v704_v29  ;;  %v706_v39 = vrot.slane %v704_v29, 4  ;;  %v711_v40 = vrot.slane %v214_v7, 5 }
  0x1d   : > { %v2417_v41 = vcombine.low %v761_v27, %v764_v37  ;;  %v768_v42 = vsel %vm2386_vm4, %v2071_v32, %v767_v33  ;;  %v769_v43 = vrot.slane %v767_v33, 4  ;;  %v714_v44 = vrot.slane %v215_v35, 5 }
  0x1e   : > { %v708_v45 = vsel %vm2386_vm4, %v706_v39, %v707_v30  ;;  %v712_v46 = vsel %vm2386_vm4, %v2063_v36, %v711_v40  ;;  %v713_v47 = vrot.slane %v711_v40, 4  ;;  %v298_v48 = vor.u32 %v297_v23, %v294_v19  ;;  %v2475_v39 = vld [vmem:[%s2354_s20 + $0x7c] sm:$0xf] }
  0x1f   : > { %1074 = vrot.lane.b32.xlu1 %v2417_v41, %s2300_s22  ;;  %v2112_v49 = vcombine.low %v705_v38, %v708_v45  ;;  %v771_v50 = vsel %vm2386_vm4, %v769_v43, %v770_v34  ;;  %v303_v52 = vrot.slane %v301_v8, 5  ;;  %v311_v53 = vshll.u32 %v215_v35, 16  ;;  %v2470_v35 = vld [vmem:[%s2354_s20 + $0x78] sm:$0xf] }
  0x20   : > { %v2435_v54 = vcombine.low %v768_v42, %v771_v50  ;;  %v715_v55 = vsel %vm2386_vm4, %v713_v47, %v714_v44  ;;  %v299_v56 = vrot.slane %v298_v48, 4  ;;  %v268_v57 = vshrl.u32 %v2396_v22, 16  ;;  %v2487_v50 = vld [vmem:[%s2354_s20 + $0x1c] sm:$0xf] }
  0x21   : > { %1058 = vrot.lane.b32.xlu0 %v2112_v49, %s2300_s22  ;;  %v2441_v58 = vcombine.low %v712_v46, %v715_v55  ;;  %v308_v59 = vor.u32 %v307_v18, %v303_v52  ;;  %v313_v60 = vrot.slane %v311_v53, 5  ;;  %v271_v61 = vshll.u32 %v2396_v22, 16  ;;  %v2484_v49 = vld [vmem:[%s2354_s20 + $0x18] sm:$0xf] }
  0x22   : > { %3578 = vst [vmem:[#allocation3_spill] sm:$0xff] %v2435_v54  ;;  %v304_v62 = vsel %vm2431_vm5, %v299_v56, %v303_v52  ;;  %v270_v63 = vrot.slane %v268_v57, 4  ;;  %v277_v2 = vshll.u32 %v2399_v24, 16  ;;  %v281_v7 = vshrl.u32 %v2399_v24, 16 }
  0x23   : > { %1076 = vrot.lane.b32.xlu1 %v2435_v54, %s2300_s22  ;;  %v309_v8 = vrot.slane %v308_v59, 4  ;;  %v273_v9 = vrot.slane %v271_v61, 5  ;;  %v287_v11 = vshll.u32 %v212_v25, 16  ;;  %v486_v13 = vrot.slane %v484_v5, 4 }
  0x24   : > { %v279_v17 = vrot.slane %v277_v2, 5  ;;  %v283_v18 = vrot.slane %v281_v7, 4  ;;  %v489_v19 = vrot.slane %v487_v6, 5  ;;  %v493_v20 = vshll.u32 %v2360_v1, 16 }
  0x25   : > { %1060 = vrot.lane.b32.xlu0 %v2441_v58, %s2300_s22  ;;  %v314_v21 = vsel %vm2431_vm5, %v309_v8, %v313_v60  ;;  %v274_v23 = vor.u32 %v273_v9, %v270_v63  ;;  %v289_v26 = vrot.slane %v287_v11, 5  ;;  %v499_v25 = vrot.slane %v497_v3, 4  ;;  %v242_v60 = vld [vmem:[%s2354_s20 + $0x80] sm:$0x1] }
  0x26   : > { %v2461_v5 = vcombine.low %v304_v62, %v314_v21  ;;  %v284_v27 = vor.u32 %v283_v18, %v279_v17  ;;  %v490_v28 = vor.u32 %v489_v19, %v486_v13  ;;  %v495_v0 = vrot.slane %v493_v20, 5  ;;  %v2511_v20 = vld [vmem:[%s2354_s20 + $0x20] sm:$0x1] }
  0x27   : > { %v275_v6 = vrot.slane %v274_v23, 4  ;;  %v503_v29 = vshll.u32 %v2407_v31, 16  ;;  %v460_v30 = vshrl.u32 %v2374_v12, 16  ;;  %v463_v32 = vshll.u32 %v2374_v12, 16 }
  0x28   : > { %980 = vrot.lane.b32.xlu1 %v2461_v5, %s2301_s23  ;;  %v285_v1 = vrot.slane %v284_v27, 4  ;;  %v491_v33 = vrot.slane %v490_v28, 4  ;;  %v500_v3 = vor.u32 %v499_v25, %v495_v0  ;;  %v469_v34 = vshll.u32 %v2379_v14, 16 }
  0x29   : > { %v280_v31 = vsel %vm2431_vm5, %v275_v6, %v279_v17  ;;  %v505_v36 = vrot.slane %v503_v29, 5  ;;  %v462_v37 = vrot.slane %v460_v30, 4  ;;  %v465_v38 = vrot.slane %v463_v32, 5 }
  0x2a   : > { %v290_v40 = vsel %vm2431_vm5, %v285_v1, %v289_v26  ;;  %v496_v42 = vsel %vm2431_vm5, %v491_v33, %v495_v0  ;;  %v501_v43 = vrot.slane %v500_v3, 4  ;;  %v471_v44 = vrot.slane %v469_v34, 5 }
  0x2b   : > { %v2096_v45 = vcombine.low %v280_v31, %v290_v40  ;;  %v466_v46 = vor.u32 %v465_v38, %v462_v37  ;;  %v473_v47 = vshrl.u32 %v2379_v14, 16  ;;  %v479_v48 = vshll.u32 %v2382_v15, 16 }
  0x2c   : > { %v506_v52 = vsel %vm2431_vm5, %v501_v43, %v505_v36  ;;  %v508_v53 = vshrl.u32 %v2470_v35, 16  ;;  %v511_v55 = vshll.u32 %v2470_v35, 16  ;;  %v521_v56 = vshrl.u32 %v2475_v39, 16 }
  0x2d   : > { %978 = vrot.lane.b32.xlu0 %v2096_v45, %s2301_s23  ;;  %v2495_v57 = vcombine.low %v496_v42, %v506_v52  ;;  %v467_v59 = vrot.slane %v466_v46, 4  ;;  %v475_v15 = vrot.slane %v473_v47, 4  ;;  %v481_v61 = vrot.slane %v479_v48, 5  ;;  %v2538_v52 = vld [vmem:[%s2354_s20 + $0x84] sm:$0xf] }
  0x2e   : > { %v316_v62 = vshrl.u32 %v2484_v49, 16  ;;  %v319_v63 = vshll.u32 %v2484_v49, 16  ;;  %v329_v2 = vshrl.u32 %v2487_v50, 16  ;;  %v2507_v9 = vcombine.low %v2470_v35, %v2475_v39 }
  0x2f   : > { %3579 = vst [vmem:[#allocation4_spill] sm:$0xff] %v2495_v57  ;;  %996 = vrot.lane.b32.xlu1 %v2495_v57, %s2301_s23  ;;  %v472_v7 = vsel %vm2431_vm5, %v467_v59, %v471_v44  ;;  %v476_v8 = vor.u32 %v475_v15, %v471_v44  ;;  %v510_v11 = vrot.slane %v508_v53, 4  ;;  %v513_v13 = vrot.slane %v511_v55, 5  ;;  %v2541_v53 = vld [vmem:[%s2354_s20 + $0x88] sm:$0xf] }
  0x30   : > { %v517_v17 = vshll.u32 %v2475_v39, 16  ;;  %v523_v18 = vrot.slane %v521_v56, 4  ;;  %v527_v19 = vshll.u32 %v242_v60, 16  ;;  %v318_v23 = vrot.slane %v316_v62, 4 }
  0x31   : > { %v477_v21 = vrot.slane %v476_v8, 4  ;;  %v321_v26 = vrot.slane %v319_v63, 5  ;;  %v325_v25 = vshll.u32 %v2487_v50, 16  ;;  %v514_v27 = vor.u32 %v513_v13, %v510_v11  ;;  %v2571_v13 = vld [vmem:[%s2354_s20 + $0x24] sm:$0xf] }
  0x32   : > { %v519_v28 = vrot.slane %v517_v17, 5  ;;  %v331_v0 = vrot.slane %v329_v2, 4  ;;  %v335_v32 = vshll.u32 %v2511_v20, 16  ;;  %v529_v34 = vrot.slane %v527_v19, 5  ;;  %v2574_v17 = vld [vmem:[%s2354_s20 + $0x28] sm:$0xf] }
  0x33   : > { %v482_v6 = vsel %vm2431_vm5, %v477_v21, %v481_v61  ;;  %1111 = vrot.lane.b32.xlu1 %v2507_v9, %s2299_s21  ;;  %v322_v29 = vor.u32 %v321_v26, %v318_v23  ;;  %v327_v30 = vrot.slane %v325_v25, 5  ;;  %v515_v33 = vrot.slane %v514_v27, 4  ;;  %v2577_v23 = vld [vmem:[%s2354_s20 + $0x8c] sm:$0x1] }
  0x34   : > { %v2519_v1 = vcombine.low %v472_v7, %v482_v6  ;;  %v524_v3 = vor.u32 %v523_v18, %v519_v28  ;;  %v774_v36 = vrot.slane %v2475_v39, 5  ;;  %v2526_v37 = vcombine.low %v2484_v49, %v2487_v50 }
  0x35   : > { %v332_v31 = vor.u32 %v331_v0, %v327_v30  ;;  %v520_v38 = vsel %vm2431_vm5, %v515_v33, %v519_v28  ;;  %v323_v42 = vrot.slane %v322_v29, 4  ;;  %v337_v44 = vrot.slane %v335_v32, 5 }
  0x36   : > { %994 = vrot.lane.b32.xlu0 %v2519_v1, %s2301_s23  ;;  %v525_v40 = vrot.slane %v524_v3, 4  ;;  %v2072_v39 = vrot.slane %v2470_v35, 9  ;;  %v776_v46 = vrot.slane %v774_v36, 4  ;;  %v777_v47 = vrot.slane %v242_v60, 5 }
  0x37   : > { %1144 = vrot.lane.b32.xlu1 %v2495_v57, %s2302_s24  ;;  %v333_v43 = vrot.slane %v332_v31, 4  ;;  %v328_v35 = vsel %vm2431_vm5, %v323_v42, %v327_v30  ;;  %v718_v59 = vrot.slane %v2487_v50, 5  ;;  %v532_v60 = vshrl.u32 %v2538_v52, 16  ;;  %v221_v42 = vld [vmem:[%s2354_s20 + $0x2c] sm:$0x1] }
  0x38   : > { %v530_v45 = vsel %vm2431_vm5, %v525_v40, %v529_v34  ;;  %v775_v56 = vsel %vm2386_vm4, %v2072_v39, %v774_v36  ;;  %v778_v15 = vsel %vm2386_vm4, %v776_v46, %v777_v47  ;;  %v535_v61 = vshll.u32 %v2538_v52, 16  ;;  %v2268_v46 = vld [vmem:[%s3564_s1] sm:$0xff]  }
  0x39   : > { %v2535_v48 = vcombine.low %v520_v38, %v530_v45  ;;  %v338_v55 = vsel %vm2431_vm5, %v333_v43, %v337_v44  ;;  %v545_v62 = vshrl.u32 %v2541_v53, 16  ;;  %v541_v63 = vshll.u32 %v2541_v53, 16  ;;  %2175 = vmatprep.subr.bf16.mxu0 %v2268_v46  ;;  %2213 = vmatprep.subr.bf16.mxu1 %v2268_v46 }
  0x3a   : > { %1095 = vrot.lane.b32.xlu0 %v2526_v37, %s2299_s21  ;;  %v2562_v2 = vcombine.low %v328_v35, %v338_v55  ;;  %v2064_v7 = vrot.slane %v2484_v49, 9  ;;  %v2567_v50 = vcombine.low %v775_v56, %v778_v15  ;;  %v720_v8 = vrot.slane %v718_v59, 4  ;;  %2176 = vmatpush3.bf16.msra.mxu0 %v2268_v46 }
  0x3b   : > { %1146 = vrot.lane.b32.xlu1 %v2535_v48, %s2302_s24  ;;  %v721_v11 = vrot.slane %v2511_v20, 5  ;;  %v534_v18 = vrot.slane %v532_v60, 4  ;;  %v537_v19 = vrot.slane %v535_v61, 5  ;;  %v547_v21 = vrot.slane %v545_v62, 4  ;;  %2216 = vmatpush3.bf16.msra.mxu1 %v2268_v46  ;;  %v2269_v60 = vld [vmem:[%s3564_s1 + $0x8] sm:$0xff]  }
  0x3c   : > { %v719_v49 = vsel %vm2386_vm4, %v2064_v7, %v718_v59  ;;  %v340_v26 = vshrl.u32 %v2571_v13, 16  ;;  %v343_v25 = vshll.u32 %v2571_v13, 16  ;;  %v353_v27 = vshrl.u32 %v2574_v17, 16  ;;  %2177 = vmatprep.subr.bf16.mxu0 %v2269_v60  ;;  %2214 = vmatprep.subr.bf16.mxu1 %v2269_v60 }
  0x3d   : > { %v722_v20 = vsel %vm2386_vm4, %v720_v8, %v721_v11  ;;  %v349_v28 = vshll.u32 %v2574_v17, 16  ;;  %v538_v0 = vor.u32 %v537_v19, %v534_v18  ;;  %v551_v29 = vshll.u32 %v2577_v23, 16 }
  0x3e   : > { %1128 = vrot.lane.b32.xlu0 %v2461_v5, %s2302_s24  ;;  %v543_v5 = vrot.slane %v541_v63, 5  ;;  %v2594_v30 = vcombine.low %v719_v49, %v722_v20  ;;  %v2598_v32 = vcombine.low %v2538_v52, %v2541_v53  ;;  %v342_v33 = vrot.slane %v340_v26, 4  ;;  %2178 = vmatpush3.bf16.msra.mxu0 %v2269_v60  ;;  %v2665_v49 = vld [vmem:[%s2354_s20 + $0x90] sm:$0xf]  ;;  %v2668_v26 = vld [vmem:[%s2354_s20 + $0x94] sm:$0xf] }
  0x3f   : > { %1179 = vrot.lane.b32.xlu1 %v2435_v54, %s2303_s25  ;;  %v345_v3 = vrot.slane %v343_v25, 5  ;;  %v351_v34 = vrot.slane %v349_v28, 5  ;;  %v355_v31 = vrot.slane %v353_v27, 4  ;;  %v539_v36 = vrot.slane %v538_v0, 4  ;;  %2217 = vmatpush3.bf16.msra.mxu1 %v2269_v60  ;;  %v2688_v0 = vld [vmem:[%s2354_s20 + $0x34] sm:$0xf] }
  0x40   : > { %v548_v6 = vor.u32 %v547_v21, %v543_v5  ;;  %v553_v40 = vrot.slane %v551_v29, 5  ;;  %v359_v44 = vshll.u32 %v221_v42, 16  ;;  %v2618_v47 = vcombine.low %v2571_v13, %v2574_v17  ;;  %v224_v60 = vld [vmem:[%s2354_s20 + $0x38] sm:$0x1] }
  0x41   : > { %v356_v43 = vor.u32 %v355_v31, %v351_v34  ;;  %v544_v39 = vsel %vm2431_vm5, %v539_v36, %v543_v5  ;;  %v781_v15 = vrot.slane %v2541_v53, 5  ;;  %v2073_v53 = vrot.slane %v2538_v52, 9 }
  0x42   : > { %1130 = vrot.lane.b32.xlu0 %v2562_v2, %s2302_s24  ;;  %v549_v38 = vrot.slane %v548_v6, 4  ;;  %3580 = vst [vmem:[#allocation5_spill] sm:$0xff] %v2618_v47  ;;  %v361_v59 = vrot.slane %v359_v44, 5  ;;  %v784_v7 = vrot.slane %v2577_v23, 5  ;;  %v725_v11 = vrot.slane %v2574_v17, 5 }
  0x43   : > { %1181 = vrot.lane.b32.xlu1 %v2567_v50, %s2303_s25  ;;  %v357_v56 = vrot.slane %v356_v43, 4  ;;  %v783_v63 = vrot.slane %v781_v15, 4  ;;  %v782_v52 = vsel %vm2386_vm4, %v2073_v53, %v781_v15  ;;  %v2065_v5 = vrot.slane %v2571_v13, 9  ;;  %v2272_v44 = vld [vmem:[%s3564_s1 + $0x10] ss:$0 sps:$4 sm:$0x33]  }
  0x44   : > { %v554_v45 = vsel %vm2431_vm5, %v549_v38, %v553_v40  ;;  %v727_v21 = vrot.slane %v725_v11, 4  ;;  %v728_v23 = vrot.slane %v221_v42, 5  ;;  %v556_v20 = vshrl.u32 %v2665_v49, 16  ;;  %2219 = vmatprep.subr.msk.bf16.mxu0 %vm1633_vm6, %v2272_v44  ;;  %2220 = vmatprep.subr.msk.bf16.mxu1 %vm1633_vm6, %v2272_v44 }
  0x45   : > { %v2622_v35 = vcombine.low %v544_v39, %v554_v45  ;;  %v362_v62 = vsel %vm2431_vm5, %v357_v56, %v361_v59  ;;  %v785_v18 = vsel %vm2386_vm4, %v783_v63, %v784_v7  ;;  %v726_v17 = vsel %vm2386_vm4, %v2065_v5, %v725_v11 }
  0x46   : > { %1163 = vrot.lane.b32.xlu0 %v2441_v58, %s2303_s25  ;;  %v346_v58 = vor.u32 %v345_v3, %v342_v33  ;;  %v2653_v19 = vcombine.low %v782_v52, %v785_v18  ;;  %v559_v25 = vshll.u32 %v2665_v49, 16  ;;  %v569_v27 = vshrl.u32 %v2668_v26, 16 }
  0x47   : > { %1214 = vrot.lane.b32.xlu1 %v2507_v9, %s2304_s26  ;;  %v565_v28 = vshll.u32 %v2668_v26, 16  ;;  %v558_v6 = vrot.slane %v556_v20, 4  ;;  %v373_v38 = vshll.u32 %v2688_v0, 16  ;;  %v2703_v43 = vcombine.low %v2665_v49, %v2668_v26  ;;  %v2732_v20 = vld [vmem:[%s2354_s20 + $0x9c] sm:$0xf] }
  0x48   : > { %v347_v55 = vrot.slane %v346_v58, 4  ;;  %v561_v29 = vrot.slane %v559_v25, 5  ;;  %v571_v3 = vrot.slane %v569_v27, 4  ;;  %v383_v53 = vshll.u32 %v224_v60, 16  ;;  %v2735_v25 = vld [vmem:[%s2354_s20 + $0xa0] sm:$0xf] }
  0x49   : > { %v567_v33 = vrot.slane %v565_v28, 5  ;;  %3581 = vst [vmem:[#allocation6_spill] sm:$0xff] %v2703_v43  ;;  %v375_v46 = vrot.slane %v373_v38, 5  ;;  %v788_v11 = vrot.slane %v2668_v26, 5  ;;  %v2074_v18 = vrot.slane %v2665_v49, 9 }
  0x4a   : > { %1165 = vrot.lane.b32.xlu0 %v2594_v30, %s2303_s25  ;;  %v352_v61 = vsel %vm2431_vm5, %v347_v55, %v351_v34  ;;  %v248_v34 = vld [vmem:[%s2354_s20 + $0x98] sm:$0x1]  ;;  %v562_v40 = vor.u32 %v561_v29, %v558_v6  ;;  %v732_v27 = vrot.slane %v2688_v0, 5  ;;  %v580_v6 = vshrl.u32 %v2732_v20, 16 }
  0x4b   : > { %1216 = vrot.lane.b32.xlu1 %v2598_v32, %s2304_s26  ;;  %v2640_v8 = vcombine.low %v352_v61, %v362_v62  ;;  %v572_v42 = vor.u32 %v571_v3, %v567_v33  ;;  %v575_v58 = vshll.u32 %v248_v34, 16  ;;  %v791_v26 = vrot.slane %v248_v34, 5 }
  0x4c   : > { %v563_v56 = vrot.slane %v562_v40, 4  ;;  %v789_v28 = vsel %vm2386_vm4, %v2074_v18, %v788_v11  ;;  %v589_v3 = vshll.u32 %v2735_v25, 16  ;;  %v2764_v40 = vld [vmem:[%s2354_s20 + $0x3c] sm:$0xf] }
  0x4d   : > { %v573_v59 = vrot.slane %v572_v42, 4  ;;  %v577_v15 = vrot.slane %v575_v58, 5  ;;  %v2767_v42 = vld [vmem:[%s2354_s20 + $0x40] sm:$0xf]  ;;  %v582_v58 = vrot.slane %v580_v6, 4 }
  0x4e   : > { %1198 = vrot.lane.b32.xlu0 %v2526_v37, %s2304_s26  ;;  %v568_v63 = vsel %vm2431_vm5, %v563_v56, %v567_v33  ;;  %v593_v33 = vshrl.u32 %v2735_v25, 16  ;;  %v401_v56 = vshrl.u32 %v2767_v42, 16 }
  0x4f   : > { %1249 = vrot.lane.b32.xlu1 %v2535_v48, %s2305_s29  ;;  %v578_v7 = vsel %vm2431_vm5, %v573_v59, %v577_v15  ;;  %v397_v59 = vshll.u32 %v2767_v42, 16 }
  0x50   : > { %v2729_v5 = vcombine.low %v568_v63, %v578_v7 }
  0x51   : > { %v399_v7 = vrot.slane %v397_v59, 5 }
  0x52   : > { %1200 = vrot.lane.b32.xlu0 %v2618_v47, %s2304_s26 }
  0x53   : > { %1251 = vrot.lane.b32.xlu1 %v2622_v35, %s2305_s29 }
  0x56   : > { %1233 = vrot.lane.b32.xlu0 %v2562_v2, %s2305_s29 }
  0x57   : > { %1284 = vrot.lane.b32.xlu1 %v2567_v50, %s2306_s5 }
  0x5a   : > { %1235 = vrot.lane.b32.xlu0 %v2640_v8, %s2305_s29 }
  0x5b   : > { %998 = vrot.lane.b32.xlu1 %v2535_v48, %s2301_s23  ;;  %v729_v48 = vsel %vm2386_vm4, %v727_v21, %v728_v23 }
  0x5c   : > { %v2672_v13 = vcombine.low %v726_v17, %v729_v48  ;;  %v385_v17 = vrot.slane %v383_v53, 5  ;;  %v790_v48 = vrot.slane %v788_v11, 4  ;;  %v403_v11 = vrot.slane %v401_v56, 4 }
  0x5e   : > { %1268 = vrot.lane.b32.xlu0 %v2594_v30, %s2306_s5  ;;  %v792_v29 = vsel %vm2386_vm4, %v790_v48, %v791_v26  ;;  %v404_v26 = vor.u32 %v403_v11, %v399_v7 }
  0x5f   : > { %1286 = vrot.lane.b32.xlu1 %v2653_v19, %s2306_s5  ;;  %v2761_v38 = vcombine.low %v789_v28, %v792_v29  ;;  %v2807_v28 = vcombine.low %v2764_v40, %v2767_v42 }
  0x61   : > { %3584 = vst [vmem:[#allocation9_spill] sm:$0xff] %v2807_v28 }
  0x62   : > { %982 = vrot.lane.b32.xlu0 %v2562_v2, %s2301_s23  ;;  %v2685_v2 = vld [vmem:[%s2354_s20 + $0x30] sm:$0xf] }
  0x63   : > { %1000 = vrot.lane.b32.xlu1 %v2622_v35, %s2301_s23  ;;  %v364_v31 = vshrl.u32 %v2685_v2, 16  ;;  %v367_v36 = vshll.u32 %v2685_v2, 16  ;;  %v2724_v52 = vcombine.low %v2685_v2, %v2688_v0 }
  0x65   : > { %v366_v39 = vrot.slane %v364_v31, 4  ;;  %v369_v45 = vrot.slane %v367_v36, 5  ;;  %3582 = vst [vmem:[#allocation7_spill] sm:$0xff] %v2724_v52  ;;  %v2066_v31 = vrot.slane %v2685_v2, 9  ;;  %v734_v36 = vrot.slane %v732_v27, 4 }
  0x66   : > { %1270 = vrot.lane.b32.xlu0 %v2672_v13, %s2306_s5 }
  0x67   : > { %1078 = vrot.lane.b32.xlu1 %v2567_v50, %s2300_s22  ;;  %v377_v50 = vshrl.u32 %v2688_v0, 16  ;;  %v370_v61 = vor.u32 %v369_v45, %v366_v39  ;;  %v583_v0 = vshll.u32 %v2732_v20, 16  ;;  %v591_v39 = vrot.slane %v589_v3, 5 }
  0x68   : > { %v595_v45 = vrot.slane %v593_v33, 4  ;;  %v733_v2 = vsel %vm2386_vm4, %v2066_v31, %v732_v27  ;;  %v795_v31 = vrot.slane %v2735_v25, 5 }
  0x69   : > { %v379_v55 = vrot.slane %v377_v50, 4  ;;  %v371_v21 = vrot.slane %v370_v61, 4  ;;  %v735_v50 = vrot.slane %v224_v60, 5 }
  0x6a   : > { %984 = vrot.lane.b32.xlu0 %v2640_v8, %s2301_s23  ;;  %v596_v60 = vor.u32 %v595_v45, %v591_v39 }
  0x6b   : > { %1080 = vrot.lane.b32.xlu1 %v2653_v19, %s2300_s22  ;;  %v380_v62 = vor.u32 %v379_v55, %v375_v46  ;;  %v391_v55 = vshll.u32 %v2764_v40, 16 }
  0x6d   : > { %v381_v23 = vrot.slane %v380_v62, 4  ;;  %v2788_v62 = vcombine.low %v2732_v20, %v2735_v25  ;;  %v393_v63 = vrot.slane %v391_v55, 5 }
  0x6e   : > { %1062 = vrot.lane.b32.xlu0 %v2594_v30, %s2300_s22  ;;  %v1635_v30 = vsel %vm1633_vm6, %v2272_v44, 0  ;;  %v585_v44 = vrot.slane %v583_v0, 5  ;;  %v405_v0 = vrot.slane %v404_v26, 4 }
  0x6f   : > { %1113 = vrot.lane.b32.xlu1 %v2598_v32, %s2299_s21  ;;  %2180 = vmatpush3.bf16.msra.mxu0 %v1635_v30  ;;  %v386_v49 = vsel %vm2431_vm5, %v381_v23, %v385_v17  ;;  %3583 = vst [vmem:[#allocation8_spill] sm:$0xff] %v2788_v62  ;;  %v227_v17 = vld [vmem:[%s2354_s20 + $0x44] sm:$0x1] }
  0x70   : > { %2218 = vmatpush3.bf16.msra.mxu1 %v1635_v30  ;;  %v586_v15 = vor.u32 %v585_v44, %v582_v58  ;;  %v407_v27 = vshll.u32 %v227_v17, 16  ;;  %v2075_v44 = vrot.slane %v2732_v20, 9 }
  0x72   : > { %1064 = vrot.lane.b32.xlu0 %v2672_v13, %s2300_s22  ;;  %v587_v18 = vrot.slane %v586_v15, 4  ;;  %v409_v33 = vrot.slane %v407_v27, 5  ;;  %v796_v20 = vsel %vm2386_vm4, %v2075_v44, %v795_v31  ;;  %v742_v15 = vrot.slane %v227_v17, 5  ;;  %v2893_v27 = vld [vmem:[%s2354_s20 + $0x4c] sm:$0xf] }
  0x73   : > { %1115 = vrot.lane.b32.xlu1 %v2703_v43, %s2299_s21  ;;  %v421_v44 = vshll.u32 %v2893_v27, 16 }
  0x74   : > { %v410_v58 = vsel %vm2431_vm5, %v405_v0, %v409_v33 }
  0x76   : > { %1097 = vrot.lane.b32.xlu0 %v2618_v47, %s2299_s21 }
  0x77   : > { %1148 = vrot.lane.b32.xlu1 %v2622_v35, %s2302_s24  ;;  %v376_v35 = vsel %vm2431_vm5, %v371_v21, %v375_v46  ;;  %v388_v46 = vshrl.u32 %v2764_v40, 16  ;;  %v597_v21 = vrot.slane %v596_v60, 4 }
  0x78   : > { %v2756_v34 = vcombine.low %v376_v35, %v386_v49  ;;  %v592_v35 = vsel %vm2431_vm5, %v587_v18, %v591_v39  ;;  %v797_v39 = vrot.slane %v795_v31, 4  ;;  %v254_v31 = vld [vmem:[%s2354_s20 + $0xb0] sm:$0x1] }
  0x79   : > { %v390_v53 = vrot.slane %v388_v46, 4  ;;  %v739_v46 = vrot.slane %v2767_v42, 5  ;;  %v2067_v42 = vrot.slane %v2764_v40, 9  ;;  %v2864_v40 = vld [vmem:[%s2354_s20 + $0xa8] sm:$0xf] }
  0x7a   : > { %1099 = vrot.lane.b32.xlu0 %v2724_v52, %s2299_s21  ;;  %v604_v18 = vshrl.u32 %v2864_v40, 16 }
  0x7b   : > { %1150 = vrot.lane.b32.xlu1 %v2729_v5, %s2302_s24  ;;  %v394_v48 = vor.u32 %v393_v63, %v390_v53  ;;  %v741_v59 = vrot.slane %v739_v46, 4  ;;  %v2867_v63 = vld [vmem:[%s2354_s20 + $0xac] sm:$0xf] }
  0x7c   : > { %v613_v17 = vshll.u32 %v2867_v63, 16 }
  0x7d   : > { %v395_v29 = vrot.slane %v394_v48, 4 }
  0x7e   : > { %1132 = vrot.lane.b32.xlu0 %v2640_v8, %s2302_s24  ;;  %v251_v8 = vld [vmem:[%s2354_s20 + $0xa4] sm:$0x1] }
  0x7f   : > { %1183 = vrot.lane.b32.xlu1 %v2653_v19, %s2303_s25  ;;  %v736_v19 = vsel %vm2386_vm4, %v734_v36, %v735_v50  ;;  %v599_v30 = vshll.u32 %v251_v8, 16  ;;  %v400_v50 = vsel %vm2431_vm5, %v395_v29, %v399_v7  ;;  %v798_v45 = vrot.slane %v251_v8, 5 }
  0x80   : > { %v2784_v61 = vcombine.low %v733_v2, %v736_v19  ;;  %v2831_v25 = vcombine.low %v400_v50, %v410_v58  ;;  %v615_v29 = vrot.slane %v613_v17, 5  ;;  %v425_v58 = vshrl.u32 %v2893_v27, 16 }
  0x81   : > { %v601_v23 = vrot.slane %v599_v30, 5  ;;  %v799_v8 = vsel %vm2386_vm4, %v797_v39, %v798_v45  ;;  %v740_v30 = vsel %vm2386_vm4, %v2067_v42, %v739_v46  ;;  %v2914_v42 = vcombine.low %v2864_v40, %v2867_v63 }
  0x82   : > { %1134 = vrot.lane.b32.xlu0 %v2756_v34, %s2302_s24  ;;  %v2848_v56 = vcombine.low %v796_v20, %v799_v8  ;;  %v623_v20 = vshll.u32 %v254_v31, 16 }
  0x83   : > { %1185 = vrot.lane.b32.xlu1 %v2761_v38, %s2303_s25  ;;  %v602_v49 = vsel %vm2431_vm5, %v597_v21, %v601_v23  ;;  %v607_v21 = vshll.u32 %v2864_v40, 16  ;;  %v617_v23 = vshrl.u32 %v2867_v63, 16 }
  0x84   : > { %v2811_v6 = vcombine.low %v592_v35, %v602_v49  ;;  %v606_v35 = vrot.slane %v604_v18, 4  ;;  %v625_v17 = vrot.slane %v623_v20, 5 }
  0x85   : > { %v609_v49 = vrot.slane %v607_v21, 5  ;;  %v619_v0 = vrot.slane %v617_v23, 4 }
  0x86   : > { %1167 = vrot.lane.b32.xlu0 %v2672_v13, %s2303_s25 }
  0x87   : > { %1218 = vrot.lane.b32.xlu1 %v2703_v43, %s2304_s26  ;;  %v610_v45 = vor.u32 %v609_v49, %v606_v35  ;;  %v620_v46 = vor.u32 %v619_v0, %v615_v29  ;;  %v2921_v35 = vld [vmem:[%s2354_s20 + $0x50] sm:$0x1] }
  0x89   : > { %v2797_v13 = vpop.permute.xlu1 %1109  ;;  %v611_v21 = vrot.slane %v610_v45, 4  ;;  %v621_v23 = vrot.slane %v620_v46, 4  ;;  %v802_v45 = vrot.slane %v2867_v63, 5 }
  0x8a   : > { %1169 = vrot.lane.b32.xlu0 %v2784_v61, %s2303_s25 }
  0x8b   : > { %1220 = vrot.lane.b32.xlu1 %v2788_v62, %s2304_s26  ;;  %v2813_v3 = vpop.permute.xlu0 %1093 }
  0x8e   : > { %1202 = vrot.lane.b32.xlu0 %v2724_v52, %s2304_s26  ;;  %v2958_v52 = vld [vmem:[%s2354_s20 + $0xb8] sm:$0xf] }
  0x8f   : > { %1253 = vrot.lane.b32.xlu1 %v2729_v5, %s2305_s29 }
  0x91   : > { %v2816_v36 = vpop.permute.xlu1 %1074 }
  0x92   : > { %1204 = vrot.lane.b32.xlu0 %v2807_v28, %s2304_s26 }
  0x93   : > { %1255 = vrot.lane.b32.xlu1 %v2811_v6, %s2305_s29  ;;  %v2833_v19 = vpop.permute.xlu0 %1058 }
  0x95   : > { %v2827_v2 = vpop.permute.xlu1 %1076 }
  0x96   : > { %1237 = vrot.lane.b32.xlu0 %v2756_v34, %s2305_s29 }
  0x97   : > { %1288 = vrot.lane.b32.xlu1 %v2761_v38, %s2306_s5  ;;  %v2851_v60 = vpop.permute.xlu0 %1060 }
  0x9a   : > { %1239 = vrot.lane.b32.xlu0 %v2831_v25, %s2305_s29  ;;  %v2846_v55 = vpop.permute.xlu1 %980 }
  0x9b   : > { %1002 = vrot.lane.b32.xlu1 %v2729_v5, %s2301_s23  ;;  %v743_v5 = vsel %vm2386_vm4, %v741_v59, %v742_v15 }
  0x9c   : > { %v2873_v11 = vcombine.low %v740_v30, %v743_v5  ;;  %v423_v30 = vrot.slane %v421_v44, 5  ;;  %v427_v5 = vrot.slane %v425_v58, 4  ;;  %v616_v58 = vsel %vm2431_vm5, %v611_v21, %v615_v29 }
  0x9d   : > { %v626_v44 = vsel %vm2431_vm5, %v621_v23, %v625_v17  ;;  %v804_v23 = vrot.slane %v802_v45, 4  ;;  %v805_v17 = vrot.slane %v254_v31, 5 }
  0x9e   : > { %1272 = vrot.lane.b32.xlu0 %v2784_v61, %s2306_s5  ;;  %v428_v0 = vor.u32 %v427_v5, %v423_v30  ;;  %v2948_v29 = vcombine.low %v616_v58, %v626_v44  ;;  %v641_v58 = vshrl.u32 %v2958_v52, 16 }
  0x9f   : > { %1290 = vrot.lane.b32.xlu1 %v2848_v56, %s2306_s5  ;;  %v2871_v7 = vpop.permute.xlu0 %978 }
  0xa0   : > { %v429_v5 = vrot.slane %v428_v0, 4 }
  0xa1   : > { %v2861_v53 = vpop.permute.xlu1 %996 }
  0xa2   : > { %986 = vrot.lane.b32.xlu0 %v2756_v34, %s2301_s23  ;;  %v2888_v34 = vld [vmem:[%s2354_s20 + $0x48] sm:$0xf] }
  0xa3   : > { %1004 = vrot.lane.b32.xlu1 %v2811_v6, %s2301_s23  ;;  %v415_v50 = vshll.u32 %v2888_v34, 16  ;;  %v2943_v20 = vcombine.low %v2888_v34, %v2893_v27 }
  0xa5   : > { %v2881_v48 = vpop.permute.xlu1 %1111  ;;  %v417_v15 = vrot.slane %v415_v50, 5 }
  0xa6   : > { %1274 = vrot.lane.b32.xlu0 %v2873_v11, %s2306_s5 }
  0xa7   : > { %1082 = vrot.lane.b32.xlu1 %v2761_v38, %s2300_s22  ;;  %v412_v38 = vshrl.u32 %v2888_v34, 16 }
  0xa8   : > { %v2890_v26 = vpop.permute.xlu0 %994 }
  0xa9   : > { %v2895_v33 = vpop.permute.xlu1 %1144  ;;  %v414_v59 = vrot.slane %v412_v38, 4  ;;  %v431_v38 = vshll.u32 %v2921_v35, 16 }
  0xaa   : > { %988 = vrot.lane.b32.xlu0 %v2831_v25, %s2301_s23 }
  0xab   : > { %1084 = vrot.lane.b32.xlu1 %v2848_v56, %s2300_s22  ;;  %v433_v21 = vrot.slane %v431_v38, 5 }
  0xac   : > { %v2906_v39 = vpop.permute.xlu0 %1095 }
  0xad   : > { %v2908_v8 = vpop.permute.xlu1 %1146 }
  0xae   : > { %1066 = vrot.lane.b32.xlu0 %v2784_v61, %s2300_s22  ;;  %v418_v61 = vor.u32 %v417_v15, %v414_v59  ;;  %v2076_v59 = vrot.slane %v2864_v40, 9  ;;  %v2962_v40 = vcombine.low %v2374_v12, %v2379_v14 }
  0xaf   : > { %1117 = vrot.lane.b32.xlu1 %v2788_v62, %s2299_s21  ;;  %v2953_v62 = vld [vmem:[%s2354_s20 + $0xb4] sm:$0xf] }
  0xb0   : > { %v2918_v18 = vpop.permute.xlu0 %1128  ;;  %v419_v15 = vrot.slane %v418_v61, 4  ;;  %v434_v61 = vsel %vm2431_vm5, %v429_v5, %v433_v21  ;;  %v803_v0 = vsel %vm2386_vm4, %v2076_v59, %v802_v45  ;;  %v628_v12 = vshrl.u32 %v2953_v62, 16 }
  0xb1   : > { %v2923_v49 = vpop.permute.xlu1 %1179  ;;  %v631_v38 = vshll.u32 %v2953_v62, 16  ;;  %v749_v5 = vrot.slane %v2921_v35, 5  ;;  %v2080_v21 = vcombine.low %v2396_v22, %v2399_v24  ;;  %v643_v22 = vrot.slane %v641_v58, 4 }
  0xb2   : > { %1068 = vrot.lane.b32.xlu0 %v2873_v11, %s2300_s22  ;;  %v424_v31 = vsel %vm2431_vm5, %v419_v15, %v423_v30  ;;  %v637_v30 = vshll.u32 %v2958_v52, 16  ;;  %v2068_v15 = vrot.slane %v2888_v34, 9  ;;  %v630_v35 = vrot.slane %v628_v12, 4 }
  0xb3   : > { %1119 = vrot.lane.b32.xlu1 %v2914_v42, %s2299_s21  ;;  %v2988_v45 = vcombine.low %v424_v31, %v434_v61  ;;  %v3006_v31 = vld [vmem:[%s2354_s20 + $0x58] sm:$0xf]  ;;  %v633_v61 = vrot.slane %v631_v38, 5  ;;  %v3037_v57 = vcombine.low %v2953_v62, %v2958_v52  ;;  %v1303_v47 = vsel %vm1300_vm7, %v2080_v21, %v2871_v7 }
  0xb4   : > { %v2930_v50 = vpop.permute.xlu0 %1130  ;;  %v3008_v43 = vrot.slane %v637_v30, 5  ;;  %v445_v58 = vshll.u32 %v3006_v31, 16 }
  0xb5   : > { %v2937_v46 = vpop.permute.xlu1 %1181  ;;  %v634_v30 = vor.u32 %v633_v61, %v630_v35 }
  0xb6   : > { %1101 = vrot.lane.b32.xlu0 %v2807_v28, %s2299_s21 }
  0xb7   : > { %1152 = vrot.lane.b32.xlu1 %v2811_v6, %s2302_s24  ;;  %v746_v6 = vrot.slane %v2893_v27, 5  ;;  %v806_v27 = vsel %vm2386_vm4, %v804_v23, %v805_v17  ;;  %v1327_v23 = vsel %vm1300_vm7, %v2962_v40, %v2890_v26  ;;  %v3001_v17 = vld [vmem:[%s2354_s20 + $0x54] sm:$0xf]  ;;  %v3013_v26 = vld [vmem:[%s2354_s20 + $0xbc] sm:$0x1] }
  0xb8   : > { %v2950_v63 = vpop.permute.xlu0 %1163  ;;  %v2998_v34 = vcombine.low %v803_v0, %v806_v27  ;;  %v1367_v0 = vsel %vm1349_vm8, %v1327_v23, %v2816_v36  ;;  %v436_v27 = vshrl.u32 %v3001_v17, 16  ;;  %v439_v38 = vshll.u32 %v3001_v17, 16 }
  0xb9   : > { %v2955_v28 = vpop.permute.xlu1 %1214  ;;  %v748_v59 = vrot.slane %v746_v6, 4 }
  0xba   : > { %1103 = vrot.lane.b32.xlu0 %v2943_v20, %s2299_s21  ;;  %v438_v61 = vrot.slane %v436_v27, 4 }
  0xbb   : > { %1154 = vrot.lane.b32.xlu1 %v2948_v29, %s2302_s24  ;;  %v750_v12 = vsel %vm2386_vm4, %v748_v59, %v749_v5  ;;  %v647_v59 = vshll.u32 %v3013_v26, 16  ;;  %v1400_v5 = vsel %vm1382_vm9, %v1367_v0, %v2797_v13  ;;  %v3052_v0 = vrot.slane %v445_v58, 5 }
  0xbc   : > { %v2976_v14 = vpop.permute.xlu0 %1165  ;;  %v1433_v35 = vsel %vm1415_vm10, %v1400_v5, %v2895_v33 }
  0xbd   : > { %v2983_v44 = vpop.permute.xlu1 %1216  ;;  %v1466_v13 = vsel %vm1448_vm11, %v1433_v35, %v2923_v49  ;;  %v649_v27 = vrot.slane %v647_v59, 5  ;;  %v1330_v49 = vsel %vm1300_vm7, %v2366_v4, %v2861_v53 }
  0xbe   : > { %1136 = vrot.lane.b32.xlu0 %v2831_v25, %s2302_s24  ;;  %v1499_v33 = vsel %vm1481_vm12, %v1466_v13, %v2955_v28 }
  0xbf   : > { %1187 = vrot.lane.b32.xlu1 %v2848_v56, %s2303_s25  ;;  %v747_v56 = vsel %vm2386_vm4, %v2068_v15, %v746_v6  ;;  %v449_v6 = vshrl.u32 %v3006_v31, 16  ;;  %v644_v15 = vor.u32 %v643_v22, %v3008_v43  ;;  %v441_v22 = vrot.slane %v439_v38, 5 }
  0xc0   : > { %v3003_v25 = vpop.permute.xlu0 %1198  ;;  %v3033_v23 = vcombine.low %v747_v56, %v750_v12  ;;  %v3050_v56 = vld [vmem:[%s2354_s20 + $0x5c] sm:$0x1]  ;;  %v635_v12 = vrot.slane %v634_v30, 4  ;;  %v1351_v38 = vsel %vm1349_vm8, %v1303_v47, %v2833_v19  ;;  %v1369_v19 = vsel %vm1349_vm8, %v1330_v49, %v2827_v2 }
  0xc1   : > { %v1250_v24 = vpop.permute.xlu1 %1249  ;;  %v451_v7 = vrot.slane %v449_v6, 4  ;;  %v442_v28 = vor.u32 %v441_v22, %v438_v61  ;;  %v455_v58 = vshll.u32 %v3050_v56, 16  ;;  %v1384_v53 = vsel %vm1382_vm9, %v1351_v38, %v2813_v3 }
  0xc2   : > { %1138 = vrot.lane.b32.xlu0 %v2988_v45, %s2302_s24  ;;  %v1532_v5 = vsel %vm1514_vm13, %v1499_v33, %v1250_v24  ;;  %v640_v30 = vsel %vm2431_vm5, %v635_v12, %v3008_v43  ;;  %v1402_v59 = vsel %vm1382_vm9, %v1369_v19, %v2881_v48  ;;  %v1417_v61 = vsel %vm1415_vm10, %v1384_v53, %v2918_v18 }
  0xc3   : > { %1189 = vrot.lane.b32.xlu1 %v2998_v34, %s2303_s25  ;;  %v452_v47 = vor.u32 %v451_v7, %v3052_v0  ;;  %v3085_v2 = vcombine.low %v3001_v17, %v3006_v31  ;;  %v1435_v3 = vsel %vm1415_vm10, %v1402_v59, %v2908_v8  ;;  %v1450_v43 = vsel %vm1448_vm11, %v1417_v61, %v2950_v63 }
  0xc4   : > { %v3027_v36 = vpop.permute.xlu0 %1200  ;;  %v443_v13 = vrot.slane %v442_v28, 4  ;;  %v457_v48 = vrot.slane %v455_v58, 5  ;;  %v1468_v18 = vsel %vm1448_vm11, %v1435_v3, %v2937_v46  ;;  %v1483_v7 = vsel %vm1481_vm12, %v1450_v43, %v3003_v25  ;;  %v259_v43 = vld [vmem:[%s2354_s20 + $0xc4] sm:$0xf] }
  0xc5   : > { %v1252_v54 = vpop.permute.xlu1 %1251  ;;  %v453_v8 = vrot.slane %v452_v47, 4  ;;  %v1306_v63 = vsel %vm1300_vm7, %v2371_v10, %v2846_v55  ;;  %v1501_v12 = vsel %vm1481_vm12, %v1468_v18, %v2983_v44  ;;  %v809_v46 = vrot.slane %v2958_v52, 5 }
  0xc6   : > { %1171 = vrot.lane.b32.xlu0 %v2873_v11, %s2303_s25  ;;  %v645_v11 = vrot.slane %v644_v15, 4  ;;  %v1534_v25 = vsel %vm1514_vm13, %v1501_v12, %v1252_v54  ;;  %v1353_v55 = vsel %vm1349_vm8, %v1306_v63, %v2851_v60  ;;  %v448_v54 = vsel %vm2431_vm5, %v443_v13, %v3052_v0 }
  0xc7   : > { %1222 = vrot.lane.b32.xlu1 %v2914_v42, %s2304_s26  ;;  %v458_v52 = vsel %vm2431_vm5, %v453_v8, %v457_v48  ;;  %v1386_v44 = vsel %vm1382_vm9, %v1353_v55, %v2906_v39  ;;  %v811_v60 = vrot.slane %v809_v46, 4  ;;  %v828_v8 = vshrl.u32 %v259_v43, 16 }
  0xc8   : > { %v1234_v21 = vpop.permute.xlu0 %1233  ;;  %v650_v15 = vsel %vm2431_vm5, %v645_v11, %v649_v27  ;;  %v3140_v58 = vcombine.low %v448_v54, %v458_v52  ;;  %v824_v63 = vshll.u32 %v259_v43, 16 }
  0xc9   : > { %v1285_v35 = vpop.permute.xlu1 %1284  ;;  %v3101_v33 = vcombine.low %v640_v30, %v650_v15  ;;  %v1516_v11 = vsel %vm1514_vm13, %v1483_v7, %v1234_v21  ;;  %v756_v30 = vrot.slane %v3050_v56, 5  ;;  %v258_v56 = vld [vmem:[%s2354_s20 + $0xc0] sm:$0xf] }
  0xca   : > { %1173 = vrot.lane.b32.xlu0 %v3033_v23, %s2303_s25  ;;  %v1565_v6 = vsel %vm1547_vm14, %v1532_v5, %v1285_v35  ;;  %v2077_v5 = vrot.slane %v2953_v62, 9  ;;  %v812_v35 = vrot.slane %v3013_v26, 5  ;;  %v753_v62 = vrot.slane %v3006_v31, 5 }
  0xcb   : > { %1224 = vrot.lane.b32.xlu1 %v3037_v57, %s2304_s26  ;;  %2197 = vmatprep.mubr.msk.bf16.mxu1 %vm1600_vm15, %v1565_v6  ;;  %v1419_v6 = vsel %vm1415_vm10, %v1386_v44, %v2930_v50  ;;  %v815_v18 = vshrl.u32 %v258_v56, 16  ;;  %v818_v7 = vshll.u32 %v258_v56, 16  ;;  %v2128_v44 = vcombine.low %v258_v56, %v259_v43 }
  0xcc   : > { %v1236_v24 = vpop.permute.xlu0 %1235  ;;  %v1452_v0 = vsel %vm1448_vm11, %v1419_v6, %v2976_v14  ;;  %v810_v47 = vsel %vm2386_vm4, %v2077_v5, %v809_v46  ;;  %v813_v14 = vsel %vm2386_vm4, %v811_v60, %v812_v35  ;;  %v826_v46 = vrot.slane %v824_v63, 5 }
  0xcd   : > { %v3087_v22 = vpop.permute.xlu1 %998  ;;  %v1485_v39 = vsel %vm1481_vm12, %v1452_v0, %v3027_v36  ;;  %v3160_v31 = vcombine.low %v810_v47, %v813_v14  ;;  %v2069_v36 = vrot.slane %v3001_v17, 9 }
  0xce   : > { %1206 = vrot.lane.b32.xlu0 %v2943_v20, %s2304_s26  ;;  %v1518_v50 = vsel %vm1514_vm13, %v1485_v39, %v1236_v24  ;;  %v755_v24 = vrot.slane %v753_v62, 4 }
  0xcf   : > { %1257 = vrot.lane.b32.xlu1 %v2948_v29, %s2305_s29 }
  0xd0   : > { %v1269_v27 = vpop.permute.xlu0 %1268  ;;  %v757_v61 = vsel %vm2386_vm4, %v755_v24, %v756_v30  ;;  %v3235_v30 = vld [vmem:[%s2354_s20 + $0xcc] sm:$0xf] }
  0xd1   : > { %v1549_v38 = vsel %vm1547_vm14, %v1516_v11, %v1269_v27  ;;  %v1287_v49 = vpop.permute.xlu1 %1286  ;;  %v817_v11 = vrot.slane %v815_v18, 4  ;;  %v820_v27 = vrot.slane %v818_v7, 5 }
  0xd2   : > { %1208 = vrot.lane.b32.xlu0 %v3085_v2, %s2304_s26  ;;  %2181 = vmatprep.mubr.msk.bf16.mxu0 %vm1600_vm15, %v1549_v38  ;;  %v1567_v10 = vsel %vm1547_vm14, %v1534_v25, %v1287_v49  ;;  %v830_v25 = vrot.slane %v828_v8, 4  ;;  %v260_v49 = vld [vmem:[%s2354_s20 + $0xc8] sm:$0x1] }
  0xd3   : > { %1259 = vrot.lane.b32.xlu1 %v3101_v33, %s2305_s29  ;;  %2198 = vmatmul.mubr.msk.bf16.vlgmr.msra.gmra.mrb[0].mxu1 %vm1600_vm15, %v1567_v10  ;;  %v821_v55 = vor.u32 %v820_v27, %v817_v11  ;;  %v846_v24 = vrot.slane %v260_v49, 5 }
  0xd4   : > { %v3128_v21 = vpop.permute.xlu0 %982  ;;  %v831_v54 = vor.u32 %v830_v25, %v826_v46 }
  0xd5   : > { %v3134_v28 = vpop.permute.xlu1 %1000  ;;  %v822_v60 = vrot.slane %v821_v55, 4 }
  0xd6   : > { %1241 = vrot.lane.b32.xlu0 %v2988_v45, %s2305_s29  ;;  %v832_v35 = vrot.slane %v831_v54, 4 }
  0xd7   : > { %1292 = vrot.lane.b32.xlu1 %v2998_v34, %s2306_s5 }
  0xd8   : > { %v1271_v26 = vpop.permute.xlu0 %1270 }
  0xd9   : > { %v1551_v19 = vsel %vm1547_vm14, %v1518_v50, %v1271_v26  ;;  %v3153_v53 = vpop.permute.xlu1 %1078  ;;  %v843_v50 = vrot.slane %v259_v43, 5  ;;  %v852_v43 = vshll.u32 %v3235_v30, 16 }
  0xda   : > { %1243 = vrot.lane.b32.xlu0 %v3140_v58, %s2305_s29  ;;  %2182 = vmatmul.mubr.msk.bf16.vlgmr.msra.gmra.mrb[0].mxu0 %vm1600_vm15, %v1551_v19  ;;  %v2078_v19 = vrot.slane %v258_v56, 9 }
  0xdb   : > { %1006 = vrot.lane.b32.xlu1 %v2948_v29, %s2301_s23  ;;  %v754_v29 = vsel %vm2386_vm4, %v2069_v36, %v753_v62  ;;  %v845_v36 = vrot.slane %v843_v50, 4  ;;  %v854_v25 = vrot.slane %v852_v43, 5 }
  0xdc   : > { %v3164_v15 = vpop.permute.xlu0 %984  ;;  %v3184_v13 = vcombine.low %v754_v29, %v757_v61  ;;  %v3238_v61 = vld [vmem:[%s2354_s20 + $0xd0] sm:$0xf]  ;;  %v844_v56 = vsel %vm2386_vm4, %v2078_v19, %v843_v50 }
  0xdd   : > { %v3166_v59 = vpop.permute.xlu1 %1080  ;;  %v847_v7 = vsel %vm2386_vm4, %v845_v36, %v846_v24  ;;  %v862_v8 = vshrl.u32 %v3238_v61, 16  ;;  %v858_v63 = vshll.u32 %v3238_v61, 16 }
  0xde   : > { %1276 = vrot.lane.b32.xlu0 %v3033_v23, %s2306_s5  ;;  %v3258_v27 = vcombine.low %v844_v56, %v847_v7 }
  0xdf   : > { %1294 = vrot.lane.b32.xlu1 %v3160_v31, %s2306_s5  ;;  %v860_v55 = vrot.slane %v858_v63, 5  ;;  %v864_v54 = vrot.slane %v862_v8, 4 }
  0xe0   : > { %v3176_v17 = vpop.permute.xlu0 %1062 }
  0xe1   : > { %v3178_v3 = vpop.permute.xlu1 %1113 }
  0xe2   : > { %990 = vrot.lane.b32.xlu0 %v2988_v45, %s2301_s23 }
  0xe3   : > { %1008 = vrot.lane.b32.xlu1 %v3101_v33, %s2301_s23 }
  0xe4   : > { %v3188_v48 = vpop.permute.xlu0 %1064 }
  0xe5   : > { %v3190_v12 = vpop.permute.xlu1 %1115 }
  0xe6   : > { %1278 = vrot.lane.b32.xlu0 %v3184_v13, %s2306_s5 }
  0xe7   : > { %1086 = vrot.lane.b32.xlu1 %v2998_v34, %s2300_s22  ;;  %v834_v34 = vshll.u32 %v260_v49, 16 }
  0xe8   : > { %v3196_v45 = vpop.permute.xlu0 %1097 }
  0xe9   : > { %v3198_v38 = vpop.permute.xlu1 %1148  ;;  %v836_v6 = vrot.slane %v834_v34, 5 }
  0xea   : > { %992 = vrot.lane.b32.xlu0 %v3140_v58, %s2301_s23 }
  0xeb   : > { %1088 = vrot.lane.b32.xlu1 %v3160_v31, %s2300_s22  ;;  %v837_v62 = vsel %vm2431_vm5, %v832_v35, %v836_v6 }
  0xec   : > { %v3205_v10 = vpop.permute.xlu0 %1099 }
  0xed   : > { %v3207_v52 = vpop.permute.xlu1 %1150 }
  0xee   : > { %1070 = vrot.lane.b32.xlu0 %v3033_v23, %s2300_s22  ;;  %v827_v23 = vsel %vm2431_vm5, %v822_v60, %v826_v46  ;;  %v3261_v60 = vld [vmem:[%s2354_s20 + $0xd4] sm:$0x1] }
  0xef   : > { %1121 = vrot.lane.b32.xlu1 %v3037_v57, %s2299_s21  ;;  %v3230_v47 = vcombine.low %v827_v23, %v837_v62  ;;  %v865_v23 = vor.u32 %v864_v54, %v860_v55  ;;  %v868_v62 = vshll.u32 %v3261_v60, 16  ;;  %v880_v54 = vrot.slane %v3261_v60, 5 }
  0xf0   : > { %v3213_v5 = vpop.permute.xlu0 %1132 }
  0xf1   : > { %v1184_v0 = vpop.permute.xlu1 %1183  ;;  %v866_v43 = vrot.slane %v865_v23, 4 }
  0xf2   : > { %1072 = vrot.lane.b32.xlu0 %v3184_v13, %s2300_s22 }
  0xf3   : > { %1123 = vrot.lane.b32.xlu1 %v2128_v44, %s2299_s21 }
  0xf4   : > { %v3218_v39 = vpop.permute.xlu0 %1134 }
  0xf5   : > { %v3224_v26 = vpop.permute.xlu1 %1185 }
  0xf6   : > { %1105 = vrot.lane.b32.xlu0 %v3085_v2, %s2299_s21 }
  0xf7   : > { %1156 = vrot.lane.b32.xlu1 %v3101_v33, %s2302_s24  ;;  %v849_v33 = vshrl.u32 %v3235_v30, 16 }
  0xf8   : > { %v3232_v14 = vpop.permute.xlu0 %1167 }
  0xf9   : > { %v1219_v29 = vpop.permute.xlu1 %1218  ;;  %v851_v46 = vrot.slane %v849_v33, 4 }
  0xfa   : > { %1107 = vrot.lane.b32.xlu0 %v2962_v40, %s2299_s21 }
  0xfb   : > { %1158 = vrot.lane.b32.xlu1 %v3230_v47, %s2302_s24 }
  0xfc   : > { %v3246_v18 = vpop.permute.xlu0 %1169 }
  0xfd   : > { %v1221_v11 = vpop.permute.xlu1 %1220 }
  0xfe   : > { %1140 = vrot.lane.b32.xlu0 %v3140_v58, %s2302_s24  ;;  %v1333_v58 = vsel %vm1300_vm7, %v2507_v9, %v3087_v22  ;;  %v2131_v22 = vcombine.low %v3235_v30, %v3238_v61 }
  0xff   : > { %1191 = vrot.lane.b32.xlu1 %v3160_v31, %s2303_s25  ;;  %v855_v31 = vor.u32 %v854_v25, %v851_v46  ;;  %v1371_v35 = vsel %vm1349_vm8, %v1333_v58, %v3153_v53 }
 0x100   : > { %v1203_v49 = vpop.permute.xlu0 %1202  ;;  %v1404_v50 = vsel %vm1382_vm9, %v1371_v35, %v3178_v3  ;;  %v870_v3 = vrot.slane %v868_v62, 5 }
 0x101   : > { %v1254_v34 = vpop.permute.xlu1 %1253  ;;  %v1437_v36 = vsel %vm1415_vm10, %v1404_v50, %v3198_v38  ;;  %v856_v53 = vrot.slane %v855_v31, 4 }
 0x102   : > { %1142 = vrot.lane.b32.xlu0 %v2519_v1, %s2302_s24  ;;  %v1470_v9 = vsel %vm1448_vm11, %v1437_v36, %v1184_v0  ;;  %v3587_v36 = vld [vmem:[#allocation3_spill] sm:$0xff] }
 0x103   : > { %1193 = vrot.lane.b32.xlu1 %v3258_v27, %s2303_s25  ;;  %v1503_v24 = vsel %vm1481_vm12, %v1470_v9, %v1219_v29  ;;  %v861_v29 = vsel %vm2431_vm5, %v856_v53, %v860_v55 }
 0x104   : > { %v3272_v6 = vpop.permute.xlu0 %1204  ;;  %v1536_v56 = vsel %vm1514_vm13, %v1503_v24, %v1254_v34 }
 0x105   : > { %v1256_v19 = vpop.permute.xlu1 %1255 }
 0x106   : > { %1175 = vrot.lane.b32.xlu0 %v3184_v13, %s2303_s25  ;;  %v1309_v13 = vsel %vm1300_vm7, %v2526_v37, %v3128_v21 }
 0x107   : > { %1226 = vrot.lane.b32.xlu1 %v2128_v44, %s2304_s26  ;;  %v1336_v44 = vsel %vm1300_vm7, %v2598_v32, %v3134_v28  ;;  %v1355_v0 = vsel %vm1349_vm8, %v1309_v13, %v3176_v17  ;;  %v871_v32 = vsel %vm2431_vm5, %v866_v43, %v870_v3  ;;  %v877_v28 = vrot.slane %v3238_v61, 5 }
 0x108   : > { %v1238_v33 = vpop.permute.xlu0 %1237  ;;  %v1373_v37 = vsel %vm1349_vm8, %v1336_v44, %v3166_v59  ;;  %v1388_v21 = vsel %vm1382_vm9, %v1355_v0, %v3196_v45 }
 0x109   : > { %v1289_v7 = vpop.permute.xlu1 %1288  ;;  %v1406_v17 = vsel %vm1382_vm9, %v1373_v37, %v3190_v12  ;;  %v1421_v63 = vsel %vm1415_vm10, %v1388_v21, %v3213_v5  ;;  %v2132_v12 = vcombine.low %v861_v29, %v871_v32  ;;  %v2079_v5 = vrot.slane %v3235_v30, 9  ;;  %v3588_v21 = vld [vmem:[#allocation6_spill] sm:$0xff] }
 0x10a   : > { %1177 = vrot.lane.b32.xlu0 %v2417_v41, %s2303_s25  ;;  %v1569_v38 = vsel %vm1547_vm14, %v1536_v56, %v1289_v7  ;;  %v1439_v59 = vsel %vm1415_vm10, %v1406_v17, %v3207_v52  ;;  %v1454_v45 = vsel %vm1448_vm11, %v1421_v63, %v3232_v14  ;;  %v879_v14 = vrot.slane %v877_v28, 4 }
 0x10b   : > { %1228 = vrot.lane.b32.xlu1 %v2131_v22, %s2304_s26  ;;  %2201 = vmatprep.mubr.msk.bf16.mxu1 %vm1600_vm15, %v1569_v38  ;;  %v1472_v51 = vsel %vm1448_vm11, %v1439_v59, %v3224_v26  ;;  %v1487_v61 = vsel %vm1481_vm12, %v1454_v45, %v1203_v49  ;;  %v3585_v49 = vld [vmem:[#allocation5_spill] sm:$0xff] }
 0x10c   : > { %v1240_v8 = vpop.permute.xlu0 %1239  ;;  %v1505_v25 = vsel %vm1481_vm12, %v1472_v51, %v1221_v11  ;;  %v1520_v52 = vsel %vm1514_vm13, %v1487_v61, %v1238_v33 }
 0x10d   : > { %v3313_v46 = vpop.permute.xlu1 %1002 }
 0x10e   : > { %1210 = vrot.lane.b32.xlu0 %v2962_v40, %s2304_s26  ;;  %v1538_v40 = vsel %vm1514_vm13, %v1505_v25, %v1256_v19  ;;  %v3586_v19 = vld [vmem:[#allocation4_spill] sm:$0xff]  ;;  %v3589_v25 = vld [vmem:[#allocation7_spill] sm:$0xff] }
 0x10f   : > { %1261 = vrot.lane.b32.xlu1 %v3230_v47, %s2305_s29  ;;  %v1312_v47 = vsel %vm1300_vm7, %v3585_v49, %v3164_v15  ;;  %v878_v15 = vsel %vm2386_vm4, %v2079_v5, %v877_v28 }
 0x110   : > { %v1273_v55 = vpop.permute.xlu0 %1272  ;;  %v1357_v11 = vsel %vm1349_vm8, %v1312_v47, %v3188_v48 }
 0x111   : > { %v1553_v26 = vsel %vm1547_vm14, %v1520_v52, %v1273_v55  ;;  %v1291_v34 = vpop.permute.xlu1 %1290  ;;  %v1390_v60 = vsel %vm1382_vm9, %v1357_v11, %v3205_v10  ;;  %v3590_v55 = vld [vmem:[#allocation8_spill] sm:$0xff] }
 0x112   : > { %1212 = vrot.lane.b32.xlu0 %v2366_v4, %s2304_s26  ;;  %2185 = vmatprep.mubr.msk.bf16.mxu0 %vm1600_vm15, %v1553_v26  ;;  %v1571_v30 = vsel %vm1547_vm14, %v1538_v40, %v1291_v34  ;;  %v881_v4 = vsel %vm2386_vm4, %v879_v14, %v880_v54  ;;  %v1423_v31 = vsel %vm1415_vm10, %v1390_v60, %v3218_v39 }
 0x113   : > { %1263 = vrot.lane.b32.xlu1 %v2132_v12, %s2305_s29  ;;  %2202 = vmatmul.mubr.msk.bf16.gmra.mrb[4].mxu1 %vm1600_vm15, %v1571_v30  ;;  %v1456_v48 = vsel %vm1448_vm11, %v1423_v31, %v3246_v18  ;;  %v2133_v23 = vcombine.low %v878_v15, %v881_v4 }
 0x114   : > { %v987_v58 = vpop.permute.xlu0 %986  ;;  %v1489_v10 = vsel %vm1481_vm12, %v1456_v48, %v3272_v6 }
 0x115   : > { %v1005_v35 = vpop.permute.xlu1 %1004  ;;  %v1522_v16 = vsel %vm1514_vm13, %v1489_v10, %v1240_v8  ;;  %v1339_v8 = vsel %vm1300_vm7, %v3588_v21, %v3313_v46  ;;  %v1315_v52 = vsel %vm1300_vm7, %v3589_v25, %v987_v58 }
 0x116   : > { %1245 = vrot.lane.b32.xlu0 %v2519_v1, %s2305_s29  ;;  %v1342_v14 = vsel %vm1300_vm7, %v3590_v55, %v1005_v35 }
 0x117   : > { %1296 = vrot.lane.b32.xlu1 %v3258_v27, %s2306_s5 }
 0x118   : > { %v1275_v62 = vpop.permute.xlu0 %1274 }
 0x119   : > { %v1555_v50 = vsel %vm1547_vm14, %v1522_v16, %v1275_v62  ;;  %v1083_v39 = vpop.permute.xlu1 %1082  ;;  %v3591_v16 = vld [vmem:[#allocation9_spill] sm:$0xff] }
 0x11a   : > { %1247 = vrot.lane.b32.xlu0 %v3586_v19, %s2305_s29  ;;  %2186 = vmatmul.mubr.msk.bf16.gmra.mrb[4].mxu0 %vm1600_vm15, %v1555_v50  ;;  %v1375_v32 = vsel %vm1349_vm8, %v1339_v8, %v1083_v39 }
 0x11b   : > { %1298 = vrot.lane.b32.xlu1 %v2133_v23, %s2306_s5 }
 0x11c   : > { %v989_v1 = vpop.permute.xlu0 %988 }
 0x11d   : > { %v1085_v18 = vpop.permute.xlu1 %1084  ;;  %v1318_v62 = vsel %vm1300_vm7, %v3591_v16, %v989_v1 }
 0x11e   : > { %1280 = vrot.lane.b32.xlu0 %v2417_v41, %s2306_s5  ;;  %v1377_v40 = vsel %vm1349_vm8, %v1342_v14, %v1085_v18 }
 0x120   : > { %v1067_v27 = vpop.permute.xlu0 %1066 }
 0x121   : > { %v1118_v6 = vpop.permute.xlu1 %1117  ;;  %v1359_v54 = vsel %vm1349_vm8, %v1315_v52, %v1067_v27 }
 0x122   : > { %1282 = vrot.lane.b32.xlu0 %v3587_v36, %s2306_s5  ;;  %v1408_v17 = vsel %vm1382_vm9, %v1375_v32, %v1118_v6 }
 0x124   : > { %v1069_v9 = vpop.permute.xlu0 %1068 }
 0x125   : > { %v1120_v22 = vpop.permute.xlu1 %1119  ;;  %v1361_v39 = vsel %vm1349_vm8, %v1318_v62, %v1069_v9 }
 0x126   : > { %v1410_v49 = vsel %vm1382_vm9, %v1377_v40, %v1120_v22 }
 0x128   : > { %v1102_v53 = vpop.permute.xlu0 %1101 }
 0x129   : > { %v1153_v24 = vpop.permute.xlu1 %1152  ;;  %v1392_v26 = vsel %vm1382_vm9, %v1359_v54, %v1102_v53 }
 0x12a   : > { %v1441_v59 = vsel %vm1415_vm10, %v1408_v17, %v1153_v24 }
 0x12c   : > { %v1104_v33 = vpop.permute.xlu0 %1103 }
 0x12d   : > { %v1155_v43 = vpop.permute.xlu1 %1154  ;;  %v1394_v19 = vsel %vm1382_vm9, %v1361_v39, %v1104_v33 }
 0x12e   : > { %v1443_v11 = vsel %vm1415_vm10, %v1410_v49, %v1155_v43 }
 0x130   : > { %v1137_v3 = vpop.permute.xlu0 %1136 }
 0x131   : > { %v1188_v56 = vpop.permute.xlu1 %1187  ;;  %v1425_v47 = vsel %vm1415_vm10, %v1392_v26, %v1137_v3 }
 0x132   : > { %v1474_v45 = vsel %vm1448_vm11, %v1441_v59, %v1188_v56 }
 0x134   : > { %v1139_v7 = vpop.permute.xlu0 %1138 }
 0x135   : > { %v1190_v13 = vpop.permute.xlu1 %1189  ;;  %v1427_v27 = vsel %vm1415_vm10, %v1394_v19, %v1139_v7 }
 0x136   : > { %v1476_v58 = vsel %vm1448_vm11, %v1443_v11, %v1190_v13 }
 0x138   : > { %v1172_v38 = vpop.permute.xlu0 %1171 }
 0x139   : > { %v1223_v44 = vpop.permute.xlu1 %1222  ;;  %v1458_v60 = vsel %vm1448_vm11, %v1425_v47, %v1172_v38 }
 0x13a   : > { %v1507_v51 = vsel %vm1481_vm12, %v1474_v45, %v1223_v44 }
 0x13c   : > { %v1174_v0 = vpop.permute.xlu0 %1173 }
 0x13d   : > { %v1225_v29 = vpop.permute.xlu1 %1224  ;;  %v1460_v36 = vsel %vm1448_vm11, %v1427_v27, %v1174_v0 }
 0x13e   : > { %v1509_v4 = vsel %vm1481_vm12, %v1476_v58, %v1225_v29 }
 0x140   : > { %v1207_v41 = vpop.permute.xlu0 %1206 }
 0x141   : > { %v1258_v37 = vpop.permute.xlu1 %1257  ;;  %v1491_v15 = vsel %vm1481_vm12, %v1458_v60, %v1207_v41 }
 0x142   : > { %v1540_v12 = vsel %vm1514_vm13, %v1507_v51, %v1258_v37 }
 0x144   : > { %v1209_v28 = vpop.permute.xlu0 %1208 }
 0x145   : > { %v1260_v63 = vpop.permute.xlu1 %1259  ;;  %v1493_v22 = vsel %vm1481_vm12, %v1460_v36, %v1209_v28 }
 0x146   : > { %v1542_v48 = vsel %vm1514_vm13, %v1509_v4, %v1260_v63 }
 0x148   : > { %v1242_v61 = vpop.permute.xlu0 %1241 }
 0x149   : > { %v1293_v5 = vpop.permute.xlu1 %1292  ;;  %v1524_v31 = vsel %vm1514_vm13, %v1491_v15, %v1242_v61 }
 0x14a   : > { %v1573_v46 = vsel %vm1547_vm14, %v1540_v12, %v1293_v5 }
 0x14b   : > { %2205 = vmatprep.mubr.msk.bf16.mxu1 %vm1600_vm15, %v1573_v46 }
 0x14c   : > { %v1244_v34 = vpop.permute.xlu0 %1243 }
 0x14d   : > { %v1007_v30 = vpop.permute.xlu1 %1006  ;;  %v1526_v1 = vsel %vm1514_vm13, %v1493_v22, %v1244_v34 }
 0x14e   : > { %v1345_v51 = vsel %vm1300_vm7, %v2914_v42, %v1007_v30 }
 0x150   : > { %v1277_v35 = vpop.permute.xlu0 %1276 }
 0x151   : > { %v1557_v10 = vsel %vm1547_vm14, %v1524_v31, %v1277_v35  ;;  %v1295_v23 = vpop.permute.xlu1 %1294 }
 0x152   : > { %2189 = vmatprep.mubr.msk.bf16.mxu0 %vm1600_vm15, %v1557_v10  ;;  %v1575_v50 = vsel %vm1547_vm14, %v1542_v48, %v1295_v23 }
 0x153   : > { %2206 = vmatmul.mubr.msk.bf16.gmra.mrb[8].mxu1 %vm1600_vm15, %v1575_v50 }
 0x154   : > { %v991_v18 = vpop.permute.xlu0 %990 }
 0x155   : > { %v1009_v6 = vpop.permute.xlu1 %1008  ;;  %v1321_v49 = vsel %vm1300_vm7, %v2943_v20, %v991_v18 }
 0x156   : > { %v1348_v46 = vsel %vm1300_vm7, %v3037_v57, %v1009_v6 }
 0x158   : > { %v1279_v53 = vpop.permute.xlu0 %1278 }
 0x159   : > { %v1559_v24 = vsel %vm1547_vm14, %v1526_v1, %v1279_v53  ;;  %v1087_v43 = vpop.permute.xlu1 %1086  ;;  %v3450_v1 = vstv %s1798_s8 }
 0x15a   : > { %2190 = vmatmul.mubr.msk.bf16.gmra.mrb[8].mxu0 %vm1600_vm15, %v1559_v24  ;;  %v1379_v61 = vsel %vm1349_vm8, %v1345_v51, %v1087_v43 }
 0x15c   : > { %v993_v9 = vpop.permute.xlu0 %992 }
 0x15d   : > { %v1089_v3 = vpop.permute.xlu1 %1088  ;;  %v1324_v35 = vsel %vm1300_vm7, %v3085_v2, %v993_v9 }
 0x15e   : > { %v1381_v14 = vsel %vm1349_vm8, %v1348_v46, %v1089_v3 }
 0x160   : > { %v1071_v56 = vpop.permute.xlu0 %1070 }
 0x161   : > { %v1122_v33 = vpop.permute.xlu1 %1121  ;;  %v1363_v57 = vsel %vm1349_vm8, %v1321_v49, %v1071_v56 }
 0x162   : > { %v1412_v5 = vsel %vm1382_vm9, %v1379_v61, %v1122_v33 }
 0x164   : > { %v1073_v13 = vpop.permute.xlu0 %1072 }
 0x165   : > { %v1124_v38 = vpop.permute.xlu1 %1123  ;;  %v1365_v23 = vsel %vm1349_vm8, %v1324_v35, %v1073_v13 }
 0x166   : > { %v1414_v42 = vsel %vm1382_vm9, %v1381_v14, %v1124_v38 }
 0x168   : > { %v1106_v7 = vpop.permute.xlu0 %1105 }
 0x169   : > { %v1157_v44 = vpop.permute.xlu1 %1156  ;;  %v1396_v60 = vsel %vm1382_vm9, %v1363_v57, %v1106_v7 }
 0x16a   : > { %v1445_v52 = vsel %vm1415_vm10, %v1412_v5, %v1157_v44 }
 0x16c   : > { %v1108_v29 = vpop.permute.xlu0 %1107 }
 0x16d   : > { %v1159_v0 = vpop.permute.xlu1 %1158  ;;  %v1398_v62 = vsel %vm1382_vm9, %v1365_v23, %v1108_v29 }
 0x16e   : > { %v1447_v47 = vsel %vm1415_vm10, %v1414_v42, %v1159_v0 }
 0x170   : > { %v1141_v41 = vpop.permute.xlu0 %1140 }
 0x171   : > { %v1192_v37 = vpop.permute.xlu1 %1191  ;;  %v1429_v4 = vsel %vm1415_vm10, %v1396_v60, %v1141_v41 }
 0x172   : > { %v1478_v55 = vsel %vm1448_vm11, %v1445_v52, %v1192_v37 }
 0x174   : > { %v1143_v21 = vpop.permute.xlu0 %1142 }
 0x175   : > { %v1194_v8 = vpop.permute.xlu1 %1193  ;;  %v1431_v19 = vsel %vm1415_vm10, %v1398_v62, %v1143_v21 }
 0x176   : > { %v1480_v11 = vsel %vm1448_vm11, %v1447_v47, %v1194_v8 }
 0x178   : > { %v1176_v32 = vpop.permute.xlu0 %1175 }
 0x179   : > { %v1227_v28 = vpop.permute.xlu1 %1226  ;;  %v1462_v48 = vsel %vm1448_vm11, %v1429_v4, %v1176_v32 }
 0x17a   : > { %v1511_v54 = vsel %vm1481_vm12, %v1478_v55, %v1227_v28 }
 0x17c   : > { %v1178_v17 = vpop.permute.xlu0 %1177 }
 0x17d   : > { %v1229_v63 = vpop.permute.xlu1 %1228  ;;  %v1464_v18 = vsel %vm1448_vm11, %v1431_v19, %v1178_v17 }
 0x17e   : > { %v1513_v58 = vsel %vm1481_vm12, %v1480_v11, %v1229_v63 }
 0x180   : > { %v1211_v59 = vpop.permute.xlu0 %1210 }
 0x181   : > { %v1262_v45 = vpop.permute.xlu1 %1261  ;;  %v1495_v16 = vsel %vm1481_vm12, %v1462_v48, %v1211_v59 }
 0x182   : > { %v1544_v26 = vsel %vm1514_vm13, %v1511_v54, %v1262_v45 }
 0x184   : > { %v1213_v12 = vpop.permute.xlu0 %1212 }
 0x185   : > { %v1264_v25 = vpop.permute.xlu1 %1263  ;;  %v1497_v27 = vsel %vm1481_vm12, %v1464_v18, %v1213_v12 }
 0x186   : > { %v1546_v31 = vsel %vm1514_vm13, %v1513_v58, %v1264_v25 }
 0x188   : > { %v1246_v40 = vpop.permute.xlu0 %1245 }
 0x189   : > { %v1297_v34 = vpop.permute.xlu1 %1296  ;;  %v1528_v50 = vsel %vm1514_vm13, %v1495_v16, %v1246_v40 }
 0x18a   : > { %v1577_v30 = vsel %vm1547_vm14, %v1544_v26, %v1297_v34 }
 0x18b   : > { %2209 = vmatprep.mubr.msk.bf16.mxu1 %vm1600_vm15, %v1577_v30 }
 0x18c   : > { %v1248_v15 = vpop.permute.xlu0 %1247 }
 0x18d   : > { %v1299_v20 = vpop.permute.xlu1 %1298  ;;  %v1530_v6 = vsel %vm1514_vm13, %v1497_v27, %v1248_v15 }
 0x18e   : > { %v1579_v10 = vsel %vm1547_vm14, %v1546_v31, %v1299_v20 }
 0x18f   : > { %2210 = vmatmul.mubr.msk.bf16.gmra.mrb[12].mxu1 %vm1600_vm15, %v1579_v10 }
 0x190   : > { %v1281_v39 = vpop.permute.xlu0 %1280 }
 0x191   : > { %v1561_v2 = vsel %vm1547_vm14, %v1528_v50, %v1281_v39 }
 0x192   : > { %2193 = vmatprep.mubr.msk.bf16.mxu0 %vm1600_vm15, %v1561_v2 }
 0x194   : > { %v1283_v36 = vpop.permute.xlu0 %1282 }
 0x195   : > { %v1563_v22 = vsel %vm1547_vm14, %v1530_v6, %v1283_v36 }
 0x196   : > { %2194 = vmatmul.mubr.msk.bf16.gmra.mrb[12].mxu0 %vm1600_vm15, %v1563_v22 }
 0x1a6   : > { %v2199_v53 = vpop.f32.mrb[0].mxu1 }
 0x1a7   : > { %v1818_v24 = vmul.f32 %v2199_v53, %v3450_v1  ;;  %v1735_v43 = vpop.f32.mrb[1].mxu1 }
 0x1a8   : > { %v1816_v9 = vmul.f32 %v3450_v1, %v1735_v43  ;;  %v2200_v3 = vpop.f32.mrb[2].mxu1 }
 0x1a9   : > { %vm1850_vm0 = vcmp.ge.f32.partialorder %v1818_v24, 0.0  ;;  %v1882_v56 = vmul.f32 0.2, %v1818_v24  ;;  %v1819_v33 = vmul.f32 %v2200_v3, %v3450_v1  ;;  %v1738_v13 = vpop.f32.mrb[3].mxu1 }
 0x1aa   : > { %vm1848_vm1 = vcmp.ge.f32.partialorder %v1816_v9, 0.0  ;;  %v1880_v38 = vmul.f32 0.2, %v1816_v9  ;;  %v1817_v7 = vmul.f32 %v3450_v1, %v1738_v13 }
 0x1ab   : > { %v1914_v44 = vsel %vm1850_vm0, %v1818_v24, %v1882_v56  ;;  %vm1851_vm2 = vcmp.ge.f32.partialorder %v1819_v33, 0.0  ;;  %v1883_v29 = vmul.f32 0.2, %v1819_v33 }
 0x1ac   : > { %1946 = vst.msk [vmem:[%s3458_s12 + $0x90] sm:$0xff] %vm1349_vm8, %v1914_v44  ;;  %v1912_v0 = vsel %vm1848_vm1, %v1816_v9, %v1880_v38  ;;  %vm1849_vm3 = vcmp.ge.f32.partialorder %v1817_v7, 0.0  ;;  %v1881_v41 = vmul.f32 0.2, %v1817_v7 }
 0x1ad   : > { %v2183_v37 = vpop.f32.mrb[0].mxu0  ;;  %1944 = vst.msk [vmem:[%s3458_s12 + $0x80] sm:$0xff] %vm1349_vm8, %v1912_v0  ;;  %v1915_v21 = vsel %vm1851_vm2, %v1819_v33, %v1883_v29 }
 0x1ae   : > { %v1802_v8 = vmul.f32 %v2183_v37, %v3450_v1  ;;  %v1671_v32 = vpop.f32.mrb[1].mxu0  ;;  %1947 = vst.msk [vmem:[%s3458_s12 + $0x98] sm:$0xff] %vm1349_vm8, %v1915_v21  ;;  %v1913_v28 = vsel %vm1849_vm3, %v1817_v7, %v1881_v41 }
 0x1af   : > { %v1800_v17 = vmul.f32 %v3450_v1, %v1671_v32  ;;  %v2184_v63 = vpop.f32.mrb[2].mxu0  ;;  %1945 = vst.msk [vmem:[%s3458_s12 + $0x88] sm:$0xff] %vm1349_vm8, %v1913_v28 }
 0x1b0   : > { %vm1834_vm4 = vcmp.ge.f32.partialorder %v1802_v8, 0.0  ;;  %v1866_v59 = vmul.f32 0.2, %v1802_v8  ;;  %v1803_v45 = vmul.f32 %v2184_v63, %v3450_v1  ;;  %v1674_v51 = vpop.f32.mrb[3].mxu0 }
 0x1b1   : > { %vm1832_vm5 = vcmp.ge.f32.partialorder %v1800_v17, 0.0  ;;  %v1864_v61 = vmul.f32 0.2, %v1800_v17  ;;  %v1801_v12 = vmul.f32 %v3450_v1, %v1674_v51 }
 0x1b2   : > { %v1898_v5 = vsel %vm1834_vm4, %v1802_v8, %v1866_v59  ;;  %vm1835_vm6 = vcmp.ge.f32.partialorder %v1803_v45, 0.0  ;;  %v1867_v25 = vmul.f32 0.2, %v1803_v45 }
 0x1b3   : > { %1930 = vst.msk [vmem:[%s3458_s12 + $0x10] sm:$0xff] %vm1349_vm8, %v1898_v5  ;;  %v1896_v52 = vsel %vm1832_vm5, %v1800_v17, %v1864_v61  ;;  %vm1833_vm7 = vcmp.ge.f32.partialorder %v1801_v12, 0.0  ;;  %v1865_v46 = vmul.f32 0.2, %v1801_v12 }
 0x1b4   : > { %1928 = vst.msk [vmem:[%s3458_s12] sm:$0xff] %vm1349_vm8, %v1896_v52  ;;  %v1899_v55 = vsel %vm1835_vm6, %v1803_v45, %v1867_v25 }
 0x1b5   : > { %1931 = vst.msk [vmem:[%s3458_s12 + $0x18] sm:$0xff] %vm1349_vm8, %v1899_v55  ;;  %v1897_v14 = vsel %vm1833_vm7, %v1801_v12, %v1865_v46 }
 0x1b6   : > { %1929 = vst.msk [vmem:[%s3458_s12 + $0x8] sm:$0xff] %vm1349_vm8, %v1897_v14 }
 0x1e6   : > { %v2203_v54 = vpop.f32.mrb[4].mxu1 }
 0x1e7   : > { %v1822_v40 = vmul.f32 %v2203_v54, %v3450_v1  ;;  %v1751_v42 = vpop.f32.mrb[5].mxu1 }
 0x1e8   : > { %v1820_v26 = vmul.f32 %v3450_v1, %v1751_v42  ;;  %v2204_v34 = vpop.f32.mrb[6].mxu1 }
 0x1e9   : > { %vm1854_vm9 = vcmp.ge.f32.partialorder %v1822_v40, 0.0  ;;  %v1886_v49 = vmul.f32 0.2, %v1822_v40  ;;  %v1823_v47 = vmul.f32 %v2204_v34, %v3450_v1  ;;  %v1754_v30 = vpop.f32.mrb[7].mxu1 }
 0x1ea   : > { %vm1852_vm10 = vcmp.ge.f32.partialorder %v1820_v26, 0.0  ;;  %v1884_v57 = vmul.f32 0.2, %v1820_v26  ;;  %v1821_v11 = vmul.f32 %v3450_v1, %v1754_v30 }
 0x1eb   : > { %v1918_v60 = vsel %vm1854_vm9, %v1822_v40, %v1886_v49  ;;  %vm1855_vm11 = vcmp.ge.f32.partialorder %v1823_v47, 0.0  ;;  %v1887_v58 = vmul.f32 0.2, %v1823_v47 }
 0x1ec   : > { %1950 = vst.msk [vmem:[%s3458_s12 + $0xb0] sm:$0xff] %vm1349_vm8, %v1918_v60  ;;  %v1916_v15 = vsel %vm1852_vm10, %v1820_v26, %v1884_v57  ;;  %vm1853_vm12 = vcmp.ge.f32.partialorder %v1821_v11, 0.0  ;;  %v1885_v4 = vmul.f32 0.2, %v1821_v11 }
 0x1ed   : > { %v2187_v31 = vpop.f32.mrb[4].mxu0  ;;  %1948 = vst.msk [vmem:[%s3458_s12 + $0xa0] sm:$0xff] %vm1349_vm8, %v1916_v15  ;;  %v1919_v20 = vsel %vm1855_vm11, %v1823_v47, %v1887_v58 }
 0x1ee   : > { %v1806_v35 = vmul.f32 %v2187_v31, %v3450_v1  ;;  %v1687_v48 = vpop.f32.mrb[5].mxu0  ;;  %1951 = vst.msk [vmem:[%s3458_s12 + $0xb8] sm:$0xff] %vm1349_vm8, %v1919_v20  ;;  %v1917_v10 = vsel %vm1853_vm12, %v1821_v11, %v1885_v4 }
 0x1ef   : > { %v1804_v23 = vmul.f32 %v3450_v1, %v1687_v48  ;;  %v2188_v16 = vpop.f32.mrb[6].mxu0  ;;  %1949 = vst.msk [vmem:[%s3458_s12 + $0xa8] sm:$0xff] %vm1349_vm8, %v1917_v10 }
 0x1f0   : > { %vm1838_vm13 = vcmp.ge.f32.partialorder %v1806_v35, 0.0  ;;  %v1870_v62 = vmul.f32 0.2, %v1806_v35  ;;  %v1807_v50 = vmul.f32 %v2188_v16, %v3450_v1  ;;  %v1690_v39 = vpop.f32.mrb[7].mxu0 }
 0x1f1   : > { %vm1836_vm14 = vcmp.ge.f32.partialorder %v1804_v23, 0.0  ;;  %v1868_v19 = vmul.f32 0.2, %v1804_v23  ;;  %v1805_v2 = vmul.f32 %v3450_v1, %v1690_v39 }
 0x1f2   : > { %v1902_v18 = vsel %vm1838_vm13, %v1806_v35, %v1870_v62  ;;  %vm1839_vm15 = vcmp.ge.f32.partialorder %v1807_v50, 0.0  ;;  %v1871_v27 = vmul.f32 0.2, %v1807_v50 }
 0x1f3   : > { %1934 = vst.msk [vmem:[%s3458_s12 + $0x30] sm:$0xff] %vm1349_vm8, %v1902_v18  ;;  %v1900_v6 = vsel %vm1836_vm14, %v1804_v23, %v1868_v19  ;;  %vm1837_vm0 = vcmp.ge.f32.partialorder %v1805_v2, 0.0  ;;  %v1869_v36 = vmul.f32 0.2, %v1805_v2 }
 0x1f4   : > { %1932 = vst.msk [vmem:[%s3458_s12 + $0x20] sm:$0xff] %vm1349_vm8, %v1900_v6  ;;  %v1903_v22 = vsel %vm1839_vm15, %v1807_v50, %v1871_v27 }
 0x1f5   : > { %1935 = vst.msk [vmem:[%s3458_s12 + $0x38] sm:$0xff] %vm1349_vm8, %v1903_v22  ;;  %v1901_v53 = vsel %vm1837_vm0, %v1805_v2, %v1869_v36 }
 0x1f6   : > { %1933 = vst.msk [vmem:[%s3458_s12 + $0x28] sm:$0xff] %vm1349_vm8, %v1901_v53 }
 0x226   : > { %v2207_v24 = vpop.f32.mrb[8].mxu1 }
 0x227   : > { %v1826_v43 = vmul.f32 %v2207_v24, %v3450_v1  ;;  %v1767_v9 = vpop.f32.mrb[9].mxu1 }
 0x228   : > { %v1824_v3 = vmul.f32 %v3450_v1, %v1767_v9  ;;  %v2208_v56 = vpop.f32.mrb[10].mxu1 }
 0x229   : > { %vm1858_vm1 = vcmp.ge.f32.partialorder %v1826_v43, 0.0  ;;  %v1890_v33 = vmul.f32 0.2, %v1826_v43  ;;  %v1827_v13 = vmul.f32 %v2208_v56, %v3450_v1  ;;  %v1770_v38 = vpop.f32.mrb[11].mxu1 }
 0x22a   : > { %vm1856_vm2 = vcmp.ge.f32.partialorder %v1824_v3, 0.0  ;;  %v1888_v7 = vmul.f32 0.2, %v1824_v3  ;;  %v1825_v44 = vmul.f32 %v3450_v1, %v1770_v38 }
 0x22b   : > { %v1922_v29 = vsel %vm1858_vm1, %v1826_v43, %v1890_v33  ;;  %vm1859_vm3 = vcmp.ge.f32.partialorder %v1827_v13, 0.0  ;;  %v1891_v0 = vmul.f32 0.2, %v1827_v13 }
 0x22c   : > { %1954 = vst.msk [vmem:[%s3458_s12 + $0xd0] sm:$0xff] %vm1349_vm8, %v1922_v29  ;;  %v1920_v41 = vsel %vm1856_vm2, %v1824_v3, %v1888_v7  ;;  %vm1857_vm4 = vcmp.ge.f32.partialorder %v1825_v44, 0.0  ;;  %v1889_v37 = vmul.f32 0.2, %v1825_v44 }
 0x22d   : > { %v2191_v21 = vpop.f32.mrb[8].mxu0  ;;  %1952 = vst.msk [vmem:[%s3458_s12 + $0xc0] sm:$0xff] %vm1349_vm8, %v1920_v41  ;;  %v1923_v8 = vsel %vm1859_vm3, %v1827_v13, %v1891_v0 }
 0x22e   : > { %v1810_v32 = vmul.f32 %v2191_v21, %v3450_v1  ;;  %v1703_v28 = vpop.f32.mrb[9].mxu0  ;;  %1955 = vst.msk [vmem:[%s3458_s12 + $0xd8] sm:$0xff] %vm1349_vm8, %v1923_v8  ;;  %v1921_v17 = vsel %vm1857_vm4, %v1825_v44, %v1889_v37 }
 0x22f   : > { %v1808_v63 = vmul.f32 %v3450_v1, %v1703_v28  ;;  %v2192_v59 = vpop.f32.mrb[10].mxu0  ;;  %1953 = vst.msk [vmem:[%s3458_s12 + $0xc8] sm:$0xff] %vm1349_vm8, %v1921_v17 }
 0x230   : > { %vm1842_vm5 = vcmp.ge.f32.partialorder %v1810_v32, 0.0  ;;  %v1874_v45 = vmul.f32 0.2, %v1810_v32  ;;  %v1811_v51 = vmul.f32 %v2192_v59, %v3450_v1  ;;  %v1706_v61 = vpop.f32.mrb[11].mxu0 }
 0x231   : > { %vm1840_vm6 = vcmp.ge.f32.partialorder %v1808_v63, 0.0  ;;  %v1872_v12 = vmul.f32 0.2, %v1808_v63  ;;  %v1809_v5 = vmul.f32 %v3450_v1, %v1706_v61 }
 0x232   : > { %v1906_v25 = vsel %vm1842_vm5, %v1810_v32, %v1874_v45  ;;  %vm1843_vm7 = vcmp.ge.f32.partialorder %v1811_v51, 0.0  ;;  %v1875_v52 = vmul.f32 0.2, %v1811_v51 }
 0x233   : > { %1938 = vst.msk [vmem:[%s3458_s12 + $0x50] sm:$0xff] %vm1349_vm8, %v1906_v25  ;;  %v1904_v46 = vsel %vm1840_vm6, %v1808_v63, %v1872_v12  ;;  %vm1841_vm9 = vcmp.ge.f32.partialorder %v1809_v5, 0.0  ;;  %v1873_v55 = vmul.f32 0.2, %v1809_v5 }
 0x234   : > { %1936 = vst.msk [vmem:[%s3458_s12 + $0x40] sm:$0xff] %vm1349_vm8, %v1904_v46  ;;  %v1907_v14 = vsel %vm1843_vm7, %v1811_v51, %v1875_v52 }
 0x235   : > { %1939 = vst.msk [vmem:[%s3458_s12 + $0x58] sm:$0xff] %vm1349_vm8, %v1907_v14  ;;  %v1905_v54 = vsel %vm1841_vm9, %v1809_v5, %v1873_v55 }
 0x236   : > { %1937 = vst.msk [vmem:[%s3458_s12 + $0x48] sm:$0xff] %vm1349_vm8, %v1905_v54 }
 0x262   : > { %v2211_v40 = vpop.f32.mrb[12].mxu1 }
 0x263   : > { %v1830_v42 = vmul.f32 %v2211_v40, %v3450_v1  ;;  %v1783_v26 = vpop.f32.mrb[13].mxu1 }
 0x264   : > { %v1828_v34 = vmul.f32 %v3450_v1, %v1783_v26  ;;  %v2212_v49 = vpop.f32.mrb[14].mxu1 }
 0x265   : > { %vm1862_vm10 = vcmp.ge.f32.partialorder %v1830_v42, 0.0  ;;  %v1894_v47 = vmul.f32 0.2, %v1830_v42  ;;  %v1831_v30 = vmul.f32 %v2212_v49, %v3450_v1  ;;  %v1786_v57 = vpop.f32.mrb[15].mxu1 }
 0x266   : > { %vm1860_vm11 = vcmp.ge.f32.partialorder %v1828_v34, 0.0  ;;  %v1892_v11 = vmul.f32 0.2, %v1828_v34  ;;  %v1829_v60 = vmul.f32 %v3450_v1, %v1786_v57 }
 0x267   : > { %v1926_v58 = vsel %vm1862_vm10, %v1830_v42, %v1894_v47  ;;  %vm1863_vm12 = vcmp.ge.f32.partialorder %v1831_v30, 0.0  ;;  %v1895_v15 = vmul.f32 0.2, %v1831_v30 }
 0x268   : > { %1958 = vst.msk [vmem:[%s3458_s12 + $0xf0] sm:$0xff] %vm1349_vm8, %v1926_v58  ;;  %v1924_v4 = vsel %vm1860_vm11, %v1828_v34, %v1892_v11  ;;  %vm1861_vm13 = vcmp.ge.f32.partialorder %v1829_v60, 0.0  ;;  %v1893_v31 = vmul.f32 0.2, %v1829_v60 }
 0x269   : > { %v2195_v20 = vpop.f32.mrb[12].mxu0  ;;  %1956 = vst.msk [vmem:[%s3458_s12 + $0xe0] sm:$0xff] %vm1349_vm8, %v1924_v4  ;;  %v1927_v35 = vsel %vm1863_vm12, %v1831_v30, %v1895_v15 }
 0x26a   : > { %v1814_v48 = vmul.f32 %v2195_v20, %v3450_v1  ;;  %v1719_v10 = vpop.f32.mrb[13].mxu0  ;;  %1959 = vst.msk [vmem:[%s3458_s12 + $0xf8] sm:$0xff] %vm1349_vm8, %v1927_v35  ;;  %v1925_v23 = vsel %vm1861_vm13, %v1829_v60, %v1893_v31 }
 0x26b   : > { %v1812_v16 = vmul.f32 %v3450_v1, %v1719_v10  ;;  %v2196_v62 = vpop.f32.mrb[14].mxu0  ;;  %1957 = vst.msk [vmem:[%s3458_s12 + $0xe8] sm:$0xff] %vm1349_vm8, %v1925_v23 }
 0x26c   : > { %vm1846_vm14 = vcmp.ge.f32.partialorder %v1814_v48, 0.0  ;;  %v1878_v50 = vmul.f32 0.2, %v1814_v48  ;;  %v1815_v39 = vmul.f32 %v2196_v62, %v3450_v1  ;;  %v1722_v19 = vpop.f32.mrb[15].mxu0 }
 0x26d   : > { %vm1844_vm15 = vcmp.ge.f32.partialorder %v1812_v16, 0.0  ;;  %v1876_v2 = vmul.f32 0.2, %v1812_v16  ;;  %v1813_v18 = vmul.f32 %v3450_v1, %v1722_v19 }
 0x26e   : > { %v1910_v27 = vsel %vm1846_vm14, %v1814_v48, %v1878_v50  ;;  %vm1847_vm0 = vcmp.ge.f32.partialorder %v1815_v39, 0.0  ;;  %v1879_v6 = vmul.f32 0.2, %v1815_v39 }
 0x26f   : > { %1942 = vst.msk [vmem:[%s3458_s12 + $0x70] sm:$0xff] %vm1349_vm8, %v1910_v27  ;;  %v1908_v36 = vsel %vm1844_vm15, %v1812_v16, %v1876_v2  ;;  %vm1845_vm1 = vcmp.ge.f32.partialorder %v1813_v18, 0.0  ;;  %v1877_v22 = vmul.f32 0.2, %v1813_v18 }
 0x270   : > { %1940 = vst.msk [vmem:[%s3458_s12 + $0x60] sm:$0xff] %vm1349_vm8, %v1908_v36  ;;  %v1911_v53 = vsel %vm1847_vm0, %v1815_v39, %v1879_v6 }
 0x271   : > { %1943 = vst.msk [vmem:[%s3458_s12 + $0x78] sm:$0xff] %vm1349_vm8, %v1911_v53  ;;  %v1909_v24 = vsel %vm1845_vm1, %v1813_v18, %v1877_v22 }
 0x272   : > { %1941 = vst.msk [vmem:[%s3458_s12 + $0x68] sm:$0xff] %vm1349_vm8, %v1909_v24 }
 0x273 PF: > { %s14_s16 = sadd.s32 1, %s2297_s16   ;;  %s3592_s14 = smov %s2293_s15 }
 0x274   : > { %p11_p5 = scmp.ge.s32.totalorder %s14_s16, 4   ;;  %s3593_s15 = smov %s3595_s2 }
 0x276   :  { %13 = sbr.rel (!%p11_p5) target bundleno = 2 (0x2), region = 65 }

// kernel: _lambda_.15
= control target key start
LH: loop header
LB: loop body
LE: loop exit
PB: predicated region body
PF: predicated region fallthrough
CT: control target
= control target key end

     0   :  { %s1090_s14 = smov 0   ;;  %s1092_s15 = smov 0   ;;  %s1453_s0 = inlined_call_operand.vmem [shape: bf16[2,10,10,16], index: 0, kind: input, shape index: {}]   ;;  %s1454_s1 = inlined_call_operand.vmem [shape: bf16[144,16], index: 1, kind: input, shape index: {}]   ;;  %s1455_s2 = inlined_call_operand.<no memory space> [shape: f32[1], index: 2, kind: input, shape index: {}]   ;;  %s1456_s3 = inlined_call_operand.vmem [shape: f32[2,64,16], index: 3, kind: output, shape index: {}]  }
   0x1   :  { %8 = sst [smem:[#allocation2]] %s1455_s2  ;;  %s1094_s16 = smov 0  }
   0x2 LB: > { %s26_s2 = sadd.s32 1, %s1053_s15  ;;  %p909_p0 = scmp.ge.s32.totalorder %s1057_s16, 1  ;;  %s1057_s16 = sphi %s1094_s16, %s14_s16   ;;  %s1053_s15 = sphi %s1092_s15, %s1462_s15   ;;  %s1049_s14 = sphi %s1090_s14, %s1461_s14  }
   0x3   : > { %p28_p1 = scmp.ge.s32.totalorder %s26_s2, 2  ;;  %p161_p2 = scmp.lt.s32.totalorder %s1057_s16, 3 }
   0x5   : > { %s1464_s2 = smov (%p28_p1, %s26_s2), 0  ;;  %p162_p3 = pnand %p909_p0, %p161_p2 }
   0x6   : > { %p192_p4 = scmp.lt.s32.totalorder (!%p162_p3), %s1049_s14, 1  ;;  %vm361_vm0 = vcmask (!%p162_p3), 1042432   ;;  %vm362_vm1 = vcmask (!%p162_p3), 1046532   ;;  %v1025_v0 = vld [vmem:[%s1454_s1] sm:$0xff] (!%p162_p3)   ;;  %v1059_v1 = vmov (!%p162_p3), 0   ;;  %v1026_v3 = vld [vmem:[%s1454_s1 + $0x8] sm:$0xff] (!%p162_p3)  }
   0x7   : > { %165 = sbr.rel (%p162_p3) target bundleno = 420 (0x1a4), region = 32  ;;  %966 = vmatprep.subr.bf16.mxu1 (!%p162_p3), %v1059_v1  ;;  %704 = vmatprep.subr.bf16.mxu0 (!%p162_p3), %v1059_v1  ;;  %vm1116_vm2 = vmor (!%p162_p3), %vm361_vm0, %vm362_vm1  ;;  %v1027_v4 = vld [vmem:[%s1454_s1 + $0x10] sm:$0xff] (!%p162_p3)   ;;  %vm230_vm3 = vsmask.f32 (!%p162_p3), 3328  ;;  %vm231_vm4 = vsmask.f32 (!%p162_p3), 7440 }
   0x8   : > { %975 = vmatpush1.bf16.msra.mxu1 (!%p162_p3), %v1025_v0  ;;  %705 = vmatpush1.bf16.msra.mxu0 (!%p162_p3), %v1025_v0  ;;  %v1028_v17 = vld [vmem:[%s1454_s1 + $0x18] sm:$0xff] (!%p162_p3)   ;;  %s1060_s29 = smov (!%p162_p3), 48   ;;  %s1061_s30 = smov (!%p162_p3), 32   ;;  %v1029_v45 = vld [vmem:[%s1454_s1 + $0x20] sm:$0xff] (!%p162_p3)   ;;  %vm1226_vm5 = vmor (!%p162_p3), %vm230_vm3, %vm231_vm4  ;;  %vm549_vm6 = vcmask (!%p162_p3), 130048   ;;  %vm562_vm7 = vcmask (!%p162_p3), 261120  }
   0x9   : > { %967 = vmatprep.subr.bf16.mxu1 (!%p162_p3), %v1059_v1  ;;  %706 = vmatprep.subr.bf16.mxu0 (!%p162_p3), %v1059_v1  ;;  %s1062_s6 = smov (!%p162_p3), 80   ;;  %v1031_v62 = vld [vmem:[%s1454_s1 + $0x28] sm:$0xff] (!%p162_p3)   ;;  %s1063_s11 = smov (!%p162_p3), 16   ;;  %vm571_vm8 = vcmask (!%p162_p3), 392192   ;;  %vm580_vm9 = vcmask (!%p162_p3), 523264   ;;  %vm589_vm10 = vcmask (!%p162_p3), 654336  }
   0xa   : > { %s1065_s20 = smov (!%p162_p3), 96   ;;  %s1066_s21 = smov (!%p162_p3), 112   ;;  %vm598_vm11 = vcmask (!%p162_p3), 785408   ;;  %vm607_vm12 = vcmask (!%p162_p3), 916480  }
   0xb   : > { %s769_s22 = sld [smem:[#allocation2]] (!%p162_p3) }
   0xc   : > { %976 = vmatpush1.bf16.msra.mxu1 (!%p162_p3), %v1026_v3  ;;  %707 = vmatpush1.bf16.msra.mxu0 (!%p162_p3), %v1026_v3 }
   0xd   : > { %968 = vmatprep.subr.bf16.mxu1 (!%p162_p3), %v1059_v1  ;;  %708 = vmatprep.subr.bf16.mxu0 (!%p162_p3), %v1059_v1 }
   0xe   : > { %s1466_s14 = smov (!%p192_p4, %s1049_s14), 1 }
   0xf   : > { %s984_s19 = smul.u32 80, %s1466_s14  ;;  %s965_s23 = sshll.u32 %s1466_s14, 6 }
  0x10   : > { %977 = vmatpush1.bf16.msra.mxu1 %v1027_v4  ;;  %709 = vmatpush1.bf16.msra.mxu0 %v1027_v4 }
  0x11   : > { %s1131_s26 = scalar_lea.vmem %s1453_s0, %s984_s19  ;;  %969 = vmatprep.subr.bf16.mxu1 %v1059_v1  ;;  %710 = vmatprep.subr.bf16.mxu0 %v1059_v1  ;;  %s1064_s19 = smov 64  }
  0x12   : > { %v1134_v5 = vld [vmem:[%s1131_s26 + $0x28] sm:$0xf]  ;;  %v1137_v6 = vld [vmem:[%s1131_s26 + $0x30] sm:$0xf]  ;;  %v1148_v10 = vld [vmem:[%s1131_s26] sm:$0xf] }
  0x13   : > { %v1140_v7 = vld [vmem:[%s1131_s26 + $0x8] sm:$0xf]  ;;  %v937_v8 = vcombine.low %v1134_v5, %v1137_v6  ;;  %v1145_v9 = vld [vmem:[%s1131_s26 + $0x10] sm:$0xf]  ;;  %v211_v11 = vld [vmem:[%s1131_s26 + $0x4] sm:$0x1] }
  0x14   : > { %v935_v12 = vcombine.low %v1140_v7, %v1145_v9  ;;  %v1156_v13 = vld [vmem:[%s1131_s26 + $0xc] sm:$0x1]  ;;  %v913_v14 = vrot.slane %v1148_v10, 9  ;;  %v366_v15 = vrot.slane %v211_v11, 5  ;;  %v914_v16 = vrot.slane %v1140_v7, 9  ;;  %978 = vmatpush1.bf16.msra.mxu1 %v1028_v17  ;;  %711 = vmatpush1.bf16.msra.mxu0 %v1028_v17 }
  0x15   : > { %497 = vrot.lane.b32.xlu1 %v937_v8, %s1060_s29  ;;  %v370_v18 = vrot.slane %v1156_v13, 5  ;;  %v1166_v19 = vld [vmem:[%s1131_s26 + $0x14] sm:$0x1]  ;;  %v915_v20 = vrot.slane %v1145_v9, 9  ;;  %v1170_v21 = vld [vmem:[%s1131_s26 + $0x20] sm:$0xf]  ;;  %v923_v22 = vcombine.low %v1148_v10, %v1140_v7  ;;  %970 = vmatprep.subr.bf16.mxu1 %v1059_v1 }
  0x16   : > { %493 = vrot.lane.b32.xlu0 %v935_v12, %s1060_s29  ;;  %v367_v23 = vsel %vm1116_vm2, %v913_v14, %v366_v15  ;;  %v374_v24 = vrot.slane %v1166_v19, 5  ;;  %v1179_v25 = vld [vmem:[%s1131_s26 + $0x24] sm:$0x1]  ;;  %v1182_v26 = vld [vmem:[%s1131_s26 + $0x2c] sm:$0x1]  ;;  %v917_v27 = vrot.slane %v1170_v21, 9  ;;  %712 = vmatprep.subr.bf16.mxu0 %v1059_v1 }
  0x17   : > { %v371_v28 = vsel %vm1116_vm2, %v914_v16, %v370_v18  ;;  %v382_v29 = vrot.slane %v1179_v25, 5  ;;  %v918_v30 = vrot.slane %v1134_v5, 9  ;;  %v386_v31 = vrot.slane %v1182_v26, 5  ;;  %v1206_v40 = vld [vmem:[%s1131_s26 + $0x34] sm:$0x1] }
  0x18   : > { %v931_v32 = vcombine.low %v367_v23, %v371_v28  ;;  %v1193_v33 = vsel %vm1116_vm2, %v915_v20, %v374_v24  ;;  %v234_v34 = vshrl.u32 %v1148_v10, 16  ;;  %v237_v35 = vshll.u32 %v1148_v10, 16  ;;  %979 = vmatpush1.bf16.msra.mxu1 %v1029_v45  ;;  %713 = vmatpush1.bf16.msra.mxu0 %v1029_v45  ;;  %v1252_v18 = vld [vmem:[%s1131_s26 + $0x38] sm:$0xf]  ;;  %v1032_v20 = vld [vmem:[%s1454_s1 + $0x30] sm:$0xff]  }
  0x19   : > { %v943_v36 = vcombine.low %v371_v28, %v1193_v33  ;;  %v1201_v37 = vsel %vm1116_vm2, %v917_v27, %v382_v29  ;;  %v387_v38 = vsel %vm1116_vm2, %v918_v30, %v386_v31  ;;  %v243_v39 = vshll.u32 %v211_v11, 16  ;;  %971 = vmatprep.subr.bf16.mxu1 %v1059_v1  ;;  %714 = vmatprep.subr.bf16.mxu0 %v1059_v1 }
  0x1a   : > { %480 = vrot.lane.b32.xlu1 %v931_v32, %s1061_s30  ;;  %v1210_v41 = vcombine.low %v1201_v37, %v387_v38  ;;  %v236_v42 = vrot.slane %v234_v34, 4  ;;  %v239_v43 = vrot.slane %v237_v35, 5  ;;  %v248_v44 = vshrl.u32 %v1140_v7, 16 }
  0x1b   : > { %519 = vrot.lane.b32.xlu0 %v943_v36, %s1062_s6  ;;  %v245_v46 = vrot.slane %v243_v39, 5  ;;  %v251_v47 = vshll.u32 %v1140_v7, 16  ;;  %v257_v48 = vshll.u32 %v1156_v13, 16  ;;  %v919_v49 = vrot.slane %v1137_v6, 9  ;;  %v1267_v36 = vld [vmem:[%s1131_s26 + $0x18] sm:$0xf] }
  0x1c   : > { %v240_v50 = vor.u32 %v239_v43, %v236_v42  ;;  %v250_v51 = vrot.slane %v248_v44, 4  ;;  %v390_v52 = vrot.slane %v1206_v40, 5  ;;  %v290_v53 = vshrl.u32 %v1170_v21, 16  ;;  %980 = vmatpush1.bf16.msra.mxu1 %v1031_v62  ;;  %715 = vmatpush1.bf16.msra.mxu0 %v1031_v62  ;;  %v225_v43 = vld [vmem:[%s1131_s26 + $0x3c] sm:$0x1] }
  0x1d   : > { %v253_v55 = vrot.slane %v251_v47, 5  ;;  %v293_v56 = vshll.u32 %v1170_v21, 16  ;;  %v299_v57 = vshll.u32 %v1179_v25, 16  ;;  %v304_v61 = vshrl.u32 %v1134_v5, 16  ;;  %972 = vmatprep.subr.bf16.mxu1 %v1059_v1  ;;  %716 = vmatprep.subr.bf16.mxu0 %v1059_v1  ;;  %v1033_v47 = vld [vmem:[%s1454_s1 + $0x38] sm:$0xff]  }
  0x1e   : > { %484 = vrot.lane.b32.xlu1 %v1210_v41, %s1061_s30  ;;  %v241_v58 = vrot.slane %v240_v50, 4  ;;  %v1236_v59 = vsel %vm1116_vm2, %v919_v49, %v390_v52  ;;  %v292_v60 = vrot.slane %v290_v53, 4  ;;  %v259_v0 = vrot.slane %v257_v48, 5 }
  0x1f   : > { %v254_v63 = vor.u32 %v253_v55, %v250_v51  ;;  %v945_v3 = vcombine.low %v387_v38, %v1236_v59  ;;  %v295_v4 = vrot.slane %v293_v56, 5  ;;  %v306_v11 = vrot.slane %v304_v61, 4  ;;  %v217_v55 = vld [vmem:[%s1131_s26 + $0x1c] sm:$0x1] }
  0x20   : > { %v246_v8 = vsel %vm1226_vm5, %v241_v58, %v245_v46  ;;  %v307_v12 = vshll.u32 %v1134_v5, 16  ;;  %v313_v13 = vshll.u32 %v1182_v26, 16  ;;  %v318_v16 = vshrl.u32 %v1137_v6, 16  ;;  %981 = vmatpush1.bf16.msra.mxu1 %v1032_v20  ;;  %717 = vmatpush1.bf16.msra.mxu0 %v1032_v20 }
  0x21   : > { %v255_v14 = vrot.slane %v254_v63, 4  ;;  %v296_v15 = vor.u32 %v295_v4, %v292_v60  ;;  %v321_v17 = vshll.u32 %v1137_v6, 16  ;;  %v301_v23 = vrot.slane %v299_v57, 5  ;;  %973 = vmatprep.subr.bf16.mxu1 %v1059_v1  ;;  %718 = vmatprep.subr.bf16.mxu0 %v1059_v1  ;;  %v1034_v4 = vld [vmem:[%s1454_s1 + $0x40] sm:$0xff]  }
  0x22   : > { %523 = vrot.lane.b32.xlu1 %v945_v3, %s1062_s6  ;;  %v309_v24 = vrot.slane %v307_v12, 5  ;;  %v327_v25 = vshll.u32 %v1206_v40, 16  ;;  %v262_v26 = vshrl.u32 %v1145_v9, 16  ;;  %v320_v29 = vrot.slane %v318_v16, 4 }
  0x23   : > { %v1262_v27 = vsel %vm1226_vm5, %v255_v14, %v259_v0  ;;  %v297_v28 = vrot.slane %v296_v15, 4  ;;  %v323_v30 = vrot.slane %v321_v17, 5  ;;  %v315_v34 = vrot.slane %v313_v13, 5 }
  0x24   : > { %v927_v31 = vcombine.low %v246_v8, %v1262_v27  ;;  %v310_v32 = vor.u32 %v309_v24, %v306_v11  ;;  %v329_v35 = vrot.slane %v327_v25, 5  ;;  %v264_v39 = vrot.slane %v262_v26, 4  ;;  %982 = vmatpush1.bf16.msra.mxu1 %v1033_v47  ;;  %719 = vmatpush1.bf16.msra.mxu0 %v1033_v47  ;;  %v1311_v25 = vld [vmem:[%s1131_s26 + $0x40] sm:$0xf] }
  0x25   : > { %v324_v38 = vor.u32 %v323_v30, %v320_v29  ;;  %v265_v40 = vshll.u32 %v1145_v9, 16  ;;  %v271_v42 = vshll.u32 %v1166_v19, 16  ;;  %v1276_v44 = vsel %vm1226_vm5, %v297_v28, %v301_v23  ;;  %974 = vmatprep.subr.bf16.mxu1 %v1059_v1  ;;  %720 = vmatprep.subr.bf16.mxu0 %v1059_v1 }
  0x26   : > { %460 = vrot.lane.b32.xlu0 %v927_v31, %s1063_s11  ;;  %v311_v45 = vrot.slane %v310_v32, 4  ;;  %v332_v46 = vshrl.u32 %v1252_v18, 16  ;;  %v335_v50 = vshll.u32 %v1252_v18, 16  ;;  %v341_v53 = vshll.u32 %v225_v43, 16  ;;  %v227_v32 = vld [vmem:[%s1131_s26 + $0x44] sm:$0x1] }
  0x27   : > { %v325_v48 = vrot.slane %v324_v38, 4  ;;  %v267_v49 = vrot.slane %v265_v40, 5  ;;  %v273_v19 = vrot.slane %v271_v42, 5  ;;  %v276_v56 = vshrl.u32 %v1267_v36, 16 }
  0x28   : > { %v316_v51 = vsel %vm1226_vm5, %v311_v45, %v315_v34  ;;  %v334_v52 = vrot.slane %v332_v46, 4  ;;  %v337_v61 = vrot.slane %v335_v50, 5  ;;  %v343_v63 = vrot.slane %v341_v53, 5  ;;  %983 = vmatpush1.bf16.msra.mxu1 %v1034_v4  ;;  %721 = vmatpush1.bf16.msra.mxu0 %v1034_v4 }
  0x29   : > { %v1290_v57 = vcombine.low %v1276_v44, %v316_v51  ;;  %v330_v58 = vsel %vm1226_vm5, %v325_v48, %v329_v35  ;;  %v268_v60 = vor.u32 %v267_v49, %v264_v39  ;;  %v278_v0 = vrot.slane %v276_v56, 4  ;;  %v228_v35 = vld [vmem:[%s1131_s26 + $0x48] sm:$0xf]  ;;  %v229_v39 = vld [vmem:[%s1131_s26 + $0x4c] sm:$0x1]  ;;  %s1426_s26 = scalar_lea.vmem %s1456_s3, %s965_s23 }
  0x2a   : > { %v941_v62 = vcombine.low %v316_v51, %v330_v58  ;;  %v279_v3 = vshll.u32 %v1267_v36, 16  ;;  %v338_v11 = vor.u32 %v337_v61, %v334_v52  ;;  %v285_v12 = vshll.u32 %v217_v55, 16 }
  0x2b   : > { %464 = vrot.lane.b32.xlu0 %v1290_v57, %s1063_s11  ;;  %v269_v8 = vrot.slane %v268_v60, 4  ;;  %v920_v13 = vrot.slane %v1252_v18, 9  ;;  %v1304_v14 = vcombine.low %v1137_v6, %v1252_v18  ;;  %v394_v16 = vrot.slane %v225_v43, 5 }
  0x2c   : > { %510 = vrot.lane.b32.xlu1 %v941_v62, %s1064_s19  ;;  %v281_v15 = vrot.slane %v279_v3, 5  ;;  %v339_v20 = vrot.slane %v338_v11, 4  ;;  %v916_v23 = vrot.slane %v1267_v36, 9  ;;  %v378_v24 = vrot.slane %v217_v55, 5 }
  0x2d   : > { %v274_v17 = vsel %vm1226_vm5, %v269_v8, %v273_v19  ;;  %v287_v28 = vrot.slane %v285_v12, 5  ;;  %v1317_v29 = vcombine.low %v1145_v9, %v1267_v36  ;;  %v395_v31 = vsel %vm1116_vm2, %v920_v13, %v394_v16 }
  0x2e   : > { %v939_v26 = vcombine.low %v1262_v27, %v274_v17  ;;  %v282_v6 = vor.u32 %v281_v15, %v278_v0  ;;  %v344_v30 = vsel %vm1226_vm5, %v339_v20, %v343_v63  ;;  %v397_v34 = vshrl.u32 %v1311_v25, 16 }
  0x2f   : > { %v930_v1 = vcombine.low %v330_v58, %v344_v30  ;;  %v400_v9 = vshll.u32 %v1311_v25, 16  ;;  %v379_v38 = vsel %vm1116_vm2, %v916_v23, %v378_v24  ;;  %v921_v40 = vrot.slane %v1311_v25, 9 }
  0x30   : > { %506 = vrot.lane.b32.xlu0 %v939_v26, %s1064_s19  ;;  %533 = vrot.lane.b32.xlu1 %v1304_v14, %s1065_s20  ;;  %v283_v27 = vrot.slane %v282_v6, 4  ;;  %v414_v42 = vrot.slane %v227_v32, 5  ;;  %v922_v43 = vrot.slane %v228_v35, 9  ;;  %v399_v46 = vrot.slane %v397_v34, 4 }
  0x31   : > { %v402_v47 = vrot.slane %v400_v9, 5  ;;  %v434_v48 = vrot.slane %v229_v39, 5  ;;  %v934_v49 = vcombine.low %v1236_v59, %v395_v31  ;;  %v932_v52 = vcombine.low %v1193_v33, %v379_v38 }
  0x32   : > { %v288_v45 = vsel %vm1226_vm5, %v283_v27, %v287_v28  ;;  %v1342_v50 = vsel %vm1116_vm2, %v921_v40, %v414_v42  ;;  %v406_v55 = vshll.u32 %v227_v32, 16  ;;  %v417_v58 = vshrl.u32 %v228_v35, 16 }
  0x33   : > { %v928_v19 = vcombine.low %v274_v17, %v288_v45  ;;  %v1346_v51 = vsel %vm1116_vm2, %v922_v43, %v434_v48  ;;  %v403_v53 = vor.u32 %v402_v47, %v399_v46  ;;  %961 = vmatprep.mubr.msk.bf16.mxu1 %vm549_vm6, %v934_v49  ;;  %959 = vmatprep.mubr.msk.bf16.mxu0 %vm549_vm6, %v932_v52  ;;  %v420_v60 = vshll.u32 %v228_v35, 16 }
  0x34   : > { %529 = vrot.lane.b32.xlu0 %v1317_v29, %s1065_s20  ;;  %543 = vrot.lane.b32.xlu1 %v930_v1, %s1066_s21  ;;  %v949_v59 = vcombine.low %v1342_v50, %v1346_v51  ;;  %v408_v2 = vrot.slane %v406_v55, 5  ;;  %v938_v33 = vcombine.low %v1252_v18, %v1311_v25  ;;  %v419_v62 = vrot.slane %v417_v58, 4 }
  0x35   : > { %v404_v56 = vrot.slane %v403_v53, 4  ;;  %v422_v63 = vrot.slane %v420_v60, 5  ;;  %v936_v0 = vcombine.low %v1267_v36, %v1170_v21  ;;  %v426_v8 = vshll.u32 %v229_v39, 16 }
  0x36   : > { %v940_v18 = vcombine.low %v288_v45, %v1276_v44  ;;  %v946_v11 = vcombine.low %v395_v31, %v1342_v50  ;;  %v944_v15 = vcombine.low %v379_v38, %v1201_v37  ;;  %v947_v36 = vcombine.low %v1311_v25, %v228_v35 }
  0x37   : > { %v409_v61 = vsel %vm1226_vm5, %v404_v56, %v408_v2  ;;  %v423_v4 = vor.u32 %v422_v63, %v419_v62  ;;  %v428_v13 = vrot.slane %v426_v8, 5  ;;  %v925_v44 = vcombine.low %v1170_v21, %v1134_v5 }
  0x38   : > { %539 = vrot.lane.b32.xlu0 %v928_v19, %s1066_s21  ;;  %466 = vrot.lane.b32.xlu1 %v930_v1, %s1063_s11  ;;  %v942_v3 = vcombine.low %v344_v30, %v409_v61 }
  0x39   : > { %v424_v12 = vrot.slane %v423_v4, 4 }
  0x3b   : > { %v429_v16 = vsel %vm1226_vm5, %v424_v12, %v428_v13 }
  0x3c   : > { %462 = vrot.lane.b32.xlu0 %v928_v19, %s1063_s11  ;;  %486 = vrot.lane.b32.xlu1 %v934_v49, %s1061_s30  ;;  %v948_v17 = vcombine.low %v409_v61, %v429_v16 }
  0x40   : > { %482 = vrot.lane.b32.xlu0 %v932_v52, %s1061_s30  ;;  %499 = vrot.lane.b32.xlu1 %v938_v33, %s1060_s29 }
  0x44   : > { %495 = vrot.lane.b32.xlu0 %v936_v0, %s1060_s29  ;;  %512 = vrot.lane.b32.xlu1 %v942_v3, %s1064_s19 }
  0x48   : > { %508 = vrot.lane.b32.xlu0 %v940_v18, %s1064_s19  ;;  %525 = vrot.lane.b32.xlu1 %v946_v11, %s1062_s6  ;;  %v770_v11 = vstv %s769_s22 }
  0x4c   : > { %521 = vrot.lane.b32.xlu0 %v944_v15, %s1062_s6  ;;  %535 = vrot.lane.b32.xlu1 %v947_v36, %s1065_s20 }
  0x50   : > { %531 = vrot.lane.b32.xlu0 %v925_v44, %s1065_s20  ;;  %545 = vrot.lane.b32.xlu1 %v948_v17, %s1066_s21 }
  0x54   : > { %541 = vrot.lane.b32.xlu0 %v1290_v57, %s1066_s21 }
  0x87   : > { %v498_v37 = vpop.permute.xlu1 %497 }
  0x88   : > { %v494_v20 = vpop.permute.xlu0 %493 }
  0x8c   : > { %v481_v23 = vpop.permute.xlu1 %480 }
  0x8d   : > { %v520_v54 = vpop.permute.xlu0 %519 }
  0x90   : > { %v485_v24 = vpop.permute.xlu1 %484 }
  0x94   : > { %v524_v26 = vpop.permute.xlu1 %523 }
  0x98   : > { %v461_v25 = vpop.permute.xlu0 %460 }
  0x99   : > { %v552_v21 = vsel %vm549_vm6, %v923_v22, %v461_v25 }
  0x9a   : > { %v564_v31 = vsel %vm562_vm7, %v552_v21, %v481_v23 }
  0x9b   : > { %v573_v34 = vsel %vm571_vm8, %v564_v31, %v494_v20 }
  0x9d   : > { %v465_v6 = vpop.permute.xlu0 %464 }
  0x9e   : > { %v558_v28 = vsel %vm549_vm6, %v925_v44, %v465_v6  ;;  %v511_v5 = vpop.permute.xlu1 %510 }
  0x9f   : > { %v568_v30 = vsel %vm562_vm7, %v558_v28, %v485_v24 }
  0xa0   : > { %v577_v57 = vsel %vm571_vm8, %v568_v30, %v498_v37 }
  0xa1   : > { %v586_v32 = vsel %vm580_vm9, %v577_v57, %v511_v5 }
  0xa2   : > { %v507_v1 = vpop.permute.xlu0 %506  ;;  %v534_v27 = vpop.permute.xlu1 %533  ;;  %v595_v7 = vsel %vm589_vm10, %v586_v32, %v524_v26 }
  0xa3   : > { %v582_v10 = vsel %vm580_vm9, %v573_v34, %v507_v1  ;;  %v604_v22 = vsel %vm598_vm11, %v595_v7, %v534_v27 }
  0xa4   : > { %v591_v39 = vsel %vm589_vm10, %v582_v10, %v520_v54 }
  0xa6   : > { %v530_v9 = vpop.permute.xlu0 %529  ;;  %v544_v35 = vpop.permute.xlu1 %543 }
  0xa7   : > { %v615_v38 = vsel %vm607_vm12, %v604_v22, %v544_v35  ;;  %v600_v40 = vsel %vm598_vm11, %v591_v39, %v530_v9 }
  0xa8   : > { %753 = vmatmul.mubr.bf16.vlgmr.msra.gmra.mrb[0].mxu1 %v615_v38 }
  0xa9   : > { %962 = vmatprep.mubr.msk.bf16.mxu1 %vm549_vm6, %v949_v59 }
  0xaa   : > { %v540_v42 = vpop.permute.xlu0 %539  ;;  %v467_v43 = vpop.permute.xlu1 %466 }
  0xab   : > { %v609_v45 = vsel %vm607_vm12, %v600_v40, %v540_v42  ;;  %v561_v51 = vsel %vm549_vm6, %v1304_v14, %v467_v43 }
  0xac   : > { %737 = vmatmul.mubr.bf16.vlgmr.msra.gmra.mrb[0].mxu0 %v609_v45 }
  0xad   : > { %960 = vmatprep.mubr.msk.bf16.mxu0 %vm549_vm6, %v1210_v41 }
  0xae   : > { %v463_v46 = vpop.permute.xlu0 %462  ;;  %v487_v47 = vpop.permute.xlu1 %486 }
  0xaf   : > { %v570_v55 = vsel %vm562_vm7, %v561_v51, %v487_v47  ;;  %v555_v41 = vsel %vm549_vm6, %v1317_v29, %v463_v46 }
  0xb2   : > { %v483_v48 = vpop.permute.xlu0 %482  ;;  %v500_v49 = vpop.permute.xlu1 %499 }
  0xb3   : > { %v579_v2 = vsel %vm571_vm8, %v570_v55, %v500_v49  ;;  %v566_v33 = vsel %vm562_vm7, %v555_v41, %v483_v48 }
  0xb6   : > { %v496_v19 = vpop.permute.xlu0 %495  ;;  %v513_v52 = vpop.permute.xlu1 %512 }
  0xb7   : > { %v588_v58 = vsel %vm580_vm9, %v579_v2, %v513_v52  ;;  %v575_v63 = vsel %vm571_vm8, %v566_v33, %v496_v19 }
  0xba   : > { %v509_v53 = vpop.permute.xlu0 %508  ;;  %v526_v50 = vpop.permute.xlu1 %525 }
  0xbb   : > { %v597_v60 = vsel %vm589_vm10, %v588_v58, %v526_v50  ;;  %v584_v3 = vsel %vm580_vm9, %v575_v63, %v509_v53 }
  0xbe   : > { %v522_v59 = vpop.permute.xlu0 %521  ;;  %v536_v56 = vpop.permute.xlu1 %535 }
  0xbf   : > { %v606_v61 = vsel %vm598_vm11, %v597_v60, %v536_v56  ;;  %v593_v4 = vsel %vm589_vm10, %v584_v3, %v522_v59 }
  0xc2   : > { %v532_v62 = vpop.permute.xlu0 %531  ;;  %v546_v14 = vpop.permute.xlu1 %545 }
  0xc3   : > { %v618_v0 = vsel %vm607_vm12, %v606_v61, %v546_v14  ;;  %v602_v29 = vsel %vm598_vm11, %v593_v4, %v532_v62 }
  0xc4   : > { %761 = vmatmul.mubr.bf16.gmra.mrb[4].mxu1 %v618_v0 }
  0xc6   : > { %v542_v8 = vpop.permute.xlu0 %541 }
  0xc7   : > { %v612_v18 = vsel %vm607_vm12, %v602_v29, %v542_v8 }
  0xc8   : > { %745 = vmatmul.mubr.bf16.gmra.mrb[4].mxu0 %v612_v18 }
 0x17b   : > { %v754_v12 = vpop.f32.mrb[0].mxu1 }
 0x17c   : > { %v775_v13 = vmul.f32 %v770_v11, %v754_v12  ;;  %v756_v15 = vpop.f32.mrb[1].mxu1 }
 0x17d   : > { %v757_v36 = vpop.f32.mrb[2].mxu1 }
 0x17e   : > { %vm783_vm13 = vcmp.ge.f32.partialorder %v775_v13, 0.0  ;;  %v791_v16 = vmul.f32 0.2, %v775_v13  ;;  %v776_v44 = vmul.f32 %v770_v11, %v757_v36  ;;  %v759_v17 = vpop.f32.mrb[3].mxu1 }
 0x17f   : > { %v738_v37 = vpop.f32.mrb[0].mxu0 }
 0x180   : > { %v799_v20 = vsel %vm783_vm13, %v775_v13, %v791_v16  ;;  %v771_v23 = vmul.f32 %v770_v11, %v738_v37  ;;  %v740_v54 = vpop.f32.mrb[1].mxu0  ;;  %vm784_vm14 = vcmp.ge.f32.partialorder %v776_v44, 0.0  ;;  %v792_v24 = vmul.f32 0.2, %v776_v44 }
 0x181   : > { %807 = vst.msk [vmem:[%s1426_s26 + $0x20] sm:$0xff] %vm549_vm6, %v799_v20  ;;  %v741_v25 = vpop.f32.mrb[2].mxu0 }
 0x182   : > { %vm779_vm15 = vcmp.ge.f32.partialorder %v771_v23, 0.0  ;;  %v787_v26 = vmul.f32 0.2, %v771_v23  ;;  %v800_v6 = vsel %vm784_vm14, %v776_v44, %v792_v24  ;;  %v772_v28 = vmul.f32 %v770_v11, %v741_v25  ;;  %v743_v5 = vpop.f32.mrb[3].mxu0 }
 0x183   : > { %808 = vst.msk [vmem:[%s1426_s26 + $0x28] sm:$0xff] %vm549_vm6, %v800_v6 }
 0x184   : > { %v795_v21 = vsel %vm779_vm15, %v771_v23, %v787_v26  ;;  %vm780_vm0 = vcmp.ge.f32.partialorder %v772_v28, 0.0  ;;  %v788_v30 = vmul.f32 0.2, %v772_v28 }
 0x185   : > { %803 = vst.msk [vmem:[%s1426_s26] sm:$0xff] %vm549_vm6, %v795_v21 }
 0x186   : > { %v796_v57 = vsel %vm780_vm0, %v772_v28, %v788_v30 }
 0x187   : > { %804 = vst.msk [vmem:[%s1426_s26 + $0x8] sm:$0xff] %vm549_vm6, %v796_v57 }
 0x197   : > { %v762_v31 = vpop.f32.mrb[4].mxu1 }
 0x198   : > { %v777_v32 = vmul.f32 %v770_v11, %v762_v31  ;;  %v764_v1 = vpop.f32.mrb[5].mxu1 }
 0x199   : > { %v765_v27 = vpop.f32.mrb[6].mxu1 }
 0x19a   : > { %vm785_vm1 = vcmp.ge.f32.partialorder %v777_v32, 0.0  ;;  %v793_v34 = vmul.f32 0.2, %v777_v32  ;;  %v778_v7 = vmul.f32 %v770_v11, %v765_v27  ;;  %v767_v10 = vpop.f32.mrb[7].mxu1 }
 0x19b   : > { %v746_v22 = vpop.f32.mrb[4].mxu0 }
 0x19c   : > { %v801_v9 = vsel %vm785_vm1, %v777_v32, %v793_v34  ;;  %v773_v35 = vmul.f32 %v770_v11, %v746_v22  ;;  %v748_v38 = vpop.f32.mrb[5].mxu0  ;;  %vm786_vm2 = vcmp.ge.f32.partialorder %v778_v7, 0.0  ;;  %v794_v39 = vmul.f32 0.2, %v778_v7 }
 0x19d   : > { %809 = vst.msk [vmem:[%s1426_s26 + $0x30] sm:$0xff] %vm549_vm6, %v801_v9  ;;  %v749_v40 = vpop.f32.mrb[6].mxu0 }
 0x19e   : > { %vm781_vm3 = vcmp.ge.f32.partialorder %v773_v35, 0.0  ;;  %v789_v42 = vmul.f32 0.2, %v773_v35  ;;  %v802_v43 = vsel %vm786_vm2, %v778_v7, %v794_v39  ;;  %v774_v45 = vmul.f32 %v770_v11, %v749_v40  ;;  %v751_v46 = vpop.f32.mrb[7].mxu0 }
 0x19f   : > { %810 = vst.msk [vmem:[%s1426_s26 + $0x38] sm:$0xff] %vm549_vm6, %v802_v43 }
 0x1a0   : > { %v797_v47 = vsel %vm781_vm3, %v773_v35, %v789_v42  ;;  %vm782_vm4 = vcmp.ge.f32.partialorder %v774_v45, 0.0  ;;  %v790_v48 = vmul.f32 0.2, %v774_v45 }
 0x1a1   : > { %805 = vst.msk [vmem:[%s1426_s26 + $0x10] sm:$0xff] %vm549_vm6, %v797_v47 }
 0x1a2   : > { %v798_v49 = vsel %vm782_vm4, %v774_v45, %v790_v48 }
 0x1a3   : > { %806 = vst.msk [vmem:[%s1426_s26 + $0x18] sm:$0xff] %vm549_vm6, %v798_v49 }
 0x1a4 PF: > { %s14_s16 = sadd.s32 1, %s1057_s16   ;;  %s1461_s14 = smov %s1053_s15 }
 0x1a5   : > { %p11_p5 = scmp.ge.s32.totalorder %s14_s16, 4   ;;  %s1462_s15 = smov %s1464_s2 }
 0x1a7   :  { %13 = sbr.rel (!%p11_p5) target bundleno = 2 (0x2), region = 65 }

// kernel: _lambda_.16
= control target key start
LH: loop header
LB: loop body
LE: loop exit
PB: predicated region body
PF: predicated region fallthrough
CT: control target
= control target key end

     0   :  { %s94_s22 = smov 112   ;;  %vm80_vm0 = vcmask 125952   ;;  %s185_s0 = inlined_call_operand.vmem [shape: f32[8,2,4,32], index: 0, kind: input, shape index: {}]   ;;  %s186_s1 = inlined_call_operand.vmem [shape: f32[8,4,16], index: 1, kind: output, shape index: {}]  }
   0x1   :  { %v12_v0 = vld [vmem:[%s185_s0 + $0x10] sm:$0xf]  ;;  %v13_v1 = vld [vmem:[%s185_s0 + $0x14] sm:$0xf]  ;;  %v8_v2 = vld [vmem:[%s185_s0] sm:$0xf] }
   0x2   :  { %v26_v3 = vadd.f32 %v13_v1, %v12_v0  ;;  %v9_v4 = vld [vmem:[%s185_s0 + $0x4] sm:$0xf]  ;;  %v14_v5 = vld [vmem:[%s185_s0 + $0x18] sm:$0xf]  ;;  %v15_v6 = vld [vmem:[%s185_s0 + $0x1c] sm:$0xf] }
   0x3   :  { %v24_v7 = vadd.f32 %v9_v4, %v8_v2  ;;  %v10_v8 = vld [vmem:[%s185_s0 + $0x8] sm:$0xf]  ;;  %v11_v9 = vld [vmem:[%s185_s0 + $0xc] sm:$0xf]  ;;  %v27_v10 = vadd.f32 %v15_v6, %v14_v5  ;;  %v16_v14 = vld [vmem:[%s185_s0 + $0x20] sm:$0xf] }
   0x4   :  { %44 = vrot.lane.b32.xlu1 %v26_v3, %s94_s22  ;;  %v25_v11 = vadd.f32 %v11_v9, %v10_v8  ;;  %v18_v12 = vld [vmem:[%s185_s0 + $0x28] sm:$0xf]  ;;  %v19_v13 = vld [vmem:[%s185_s0 + $0x2c] sm:$0xf]  ;;  %v17_v15 = vld [vmem:[%s185_s0 + $0x24] sm:$0xf] }
   0x5   :  { %40 = vrot.lane.b32.xlu0 %v24_v7, %s94_s22  ;;  %v29_v16 = vadd.f32 %v19_v13, %v18_v12  ;;  %v28_v17 = vadd.f32 %v17_v15, %v16_v14  ;;  %v22_v18 = vld [vmem:[%s185_s0 + $0x38] sm:$0xf]  ;;  %v23_v19 = vld [vmem:[%s185_s0 + $0x3c] sm:$0xf]  ;;  %v20_v20 = vld [vmem:[%s185_s0 + $0x30] sm:$0xf] }
   0x6   :  { %v21_v21 = vld [vmem:[%s185_s0 + $0x34] sm:$0xf]  ;;  %v31_v22 = vadd.f32 %v23_v19, %v22_v18 }
   0x7   :  { %v30_v23 = vadd.f32 %v21_v21, %v20_v20 }
   0x8   :  { %46 = vrot.lane.b32.xlu1 %v27_v10, %s94_s22 }
   0x9   :  { %42 = vrot.lane.b32.xlu0 %v25_v11, %s94_s22 }
   0xc   :  { %50 = vrot.lane.b32.xlu1 %v29_v16, %s94_s22 }
   0xd   :  { %48 = vrot.lane.b32.xlu0 %v28_v17, %s94_s22 }
  0x10   :  { %54 = vrot.lane.b32.xlu1 %v31_v22, %s94_s22 }
  0x11   :  { %52 = vrot.lane.b32.xlu0 %v30_v23, %s94_s22 }
  0x76   :  { %v45_v24 = vpop.permute.xlu1 %44 }
  0x77   :  { %v66_v25 = vadd.f32 %v45_v24, %v26_v3  ;;  %v41_v26 = vpop.permute.xlu0 %40 }
  0x78   :  { %v64_v27 = vadd.f32 %v41_v26, %v24_v7 }
  0x79   :  { %v74_v28 = vmul.f32 0.25, %v66_v25 }
  0x7a   :  { %v72_v29 = vmul.f32 0.25, %v64_v27  ;;  %v47_v30 = vpop.permute.xlu1 %46 }
  0x7b   :  { %83 = vst.msk [vmem:[%s186_s1 + $0x8] sm:$0xf] %vm80_vm0, %v74_v28  ;;  %v67_v31 = vadd.f32 %v47_v30, %v27_v10  ;;  %v43_v32 = vpop.permute.xlu0 %42 }
  0x7c   :  { %81 = vst.msk [vmem:[%s186_s1] sm:$0xf] %vm80_vm0, %v72_v29  ;;  %v65_v33 = vadd.f32 %v43_v32, %v25_v11 }
  0x7d   :  { %v75_v34 = vmul.f32 0.25, %v67_v31 }
  0x7e   :  { %v73_v35 = vmul.f32 0.25, %v65_v33  ;;  %v51_v36 = vpop.permute.xlu1 %50 }
  0x7f   :  { %84 = vst.msk [vmem:[%s186_s1 + $0xc] sm:$0xf] %vm80_vm0, %v75_v34  ;;  %v69_v37 = vadd.f32 %v51_v36, %v29_v16  ;;  %v49_v38 = vpop.permute.xlu0 %48 }
  0x80   :  { %82 = vst.msk [vmem:[%s186_s1 + $0x4] sm:$0xf] %vm80_vm0, %v73_v35  ;;  %v68_v39 = vadd.f32 %v49_v38, %v28_v17 }
  0x81   :  { %v77_v40 = vmul.f32 0.25, %v69_v37 }
  0x82   :  { %v76_v41 = vmul.f32 0.25, %v68_v39  ;;  %v55_v42 = vpop.permute.xlu1 %54 }
  0x83   :  { %86 = vst.msk [vmem:[%s186_s1 + $0x14] sm:$0xf] %vm80_vm0, %v77_v40  ;;  %v71_v43 = vadd.f32 %v55_v42, %v31_v22  ;;  %v53_v44 = vpop.permute.xlu0 %52 }
  0x84   :  { %85 = vst.msk [vmem:[%s186_s1 + $0x10] sm:$0xf] %vm80_vm0, %v76_v41  ;;  %v70_v45 = vadd.f32 %v53_v44, %v30_v23 }
  0x85   :  { %v79_v46 = vmul.f32 0.25, %v71_v43 }
  0x86   :  { %v78_v47 = vmul.f32 0.25, %v70_v45 }
  0x87   :  { %88 = vst.msk [vmem:[%s186_s1 + $0x1c] sm:$0xf] %vm80_vm0, %v79_v46 }
  0x88   :  { %87 = vst.msk [vmem:[%s186_s1 + $0x18] sm:$0xf] %vm80_vm0, %v78_v47 }

// kernel: _lambda_.17
= control target key start
LH: loop header
LB: loop body
LE: loop exit
PB: predicated region body
PF: predicated region fallthrough
CT: control target
= control target key end

     0   :  { %v14_v0 = vlaneseq  ;;  %v159_v1 = vmov 1983009808   ;;  %s190_s0 = inlined_call_operand.vmem [shape: f32[2,256], index: 0, kind: input, shape index: {}]   ;;  %s191_s1 = inlined_call_operand.hbm [shape: f32[1,1], index: 1, kind: output, shape index: {}]  }
   0x1   :  { %v12_v2 = vunpack.c.l.s4 %v159_v1 }
   0x2   :  { %6 = vsyncpa [#allocation3], 0  ;;  %v15_v3 = vshrl.u32 %v14_v0, 7  ;;  %v9_v5 = vld [vmem:[%s190_s0] sm:$0xf]  ;;  %vm21_vm0 = vcmask 1041408  }
   0x3   :  { %v13_v4 = vunpack.c.0.s8 %v12_v2  ;;  %vm95_vm4 = vcmask 1040384   ;;  %s160_s0 = smov [#allocation2]   ;;  %vm111_vm6 = vcmask 0  }
   0x4   :  { %s119_s8 = sshll.u32 %s160_s0, 4  ;;  %s120_s8 = int_to_ptr.vmem [resolvable:$true] %s119_s8 }
   0x5   :  { %v16_v6 = vsub.s32 %v13_v4, %v15_v3  ;;  %s135_s10 = scalar_lea.vmem %s120_s8, 16  ;;  %s139_s11 = scalar_lea.vmem %s120_s8, 32 }
   0x6   :  { %p136_p0 = scmp.ne.s32.totalorder %s120_s8, %s135_s10  ;;  %p140_p1 = scmp.lt.s32.totalorder %s120_s8, %s120_s8 }
   0x7   :  { %v17_v7 = vrot.slane %v9_v5, %v16_v6  ;;  %p141_p2 = scmp.lt.s32.totalorder %s139_s11, %s135_s10 }
   0x9   :  { %v18_v8 = vcombine.high %v17_v7, %v17_v7  ;;  %v22_v9 = vsel %vm21_vm0, %v17_v7, 0.0  ;;  %p142_p3 = por %p141_p2, %p140_p1 }
   0xa   :  { %v23_v10 = vrot.slane %v22_v9, 4 }
   0xb   :  { %v29_v11 = vsel %vm21_vm0, %v18_v8, 0.0  ;;  %p143_p4 = pnand %p142_p3, %p136_p0 }
   0xc   :  { %v24_v12 = vadd.f32 %v23_v10, %v22_v9  ;;  %v30_v13 = vrot.slane %v29_v11, 4 }
   0xe   :  { %v25_v14 = vrot.slane %v24_v12, 2  ;;  %v31_v15 = vadd.f32 %v30_v13, %v29_v11 }
  0x10   :  { %v26_v16 = vadd.f32 %v25_v14, %v24_v12  ;;  %v32_v17 = vrot.slane %v31_v15, 2 }
  0x12   :  { %v27_v18 = vrot.slane %v26_v16, 1  ;;  %v33_v19 = vadd.f32 %v32_v17, %v31_v15 }
  0x14   :  { %v28_v20 = vadd.f32 %v27_v18, %v26_v16  ;;  %v34_v21 = vrot.slane %v33_v19, 1 }
  0x16   :  { %v35_v22 = vadd.f32 %v34_v21, %v33_v19  ;;  %v37_v23 = vmul.f32 0.5, %v28_v20 }
  0x18   :  { %v38_v24 = vmul.f32 0.5, %v35_v22 }
  0x1a   :  { %v41_v25 = vcombine.low %v37_v23, %v38_v24 }
  0x1c   :  { %v48_v26 = vrot.slane %v41_v25, %v16_v6 }
  0x1e   :  { %v50_v27 = vsub.f32 %v9_v5, %v48_v26 }
  0x20   :  { %v51_v28 = vmul.f32 %v50_v27, %v50_v27 }
  0x22   :  { %v59_v29 = vrot.slane %v51_v28, %v16_v6 }
  0x24   :  { %v60_v30 = vcombine.high %v59_v29, %v59_v29  ;;  %v63_v31 = vsel %vm21_vm0, %v59_v29, 0.0 }
  0x25   :  { %v64_v32 = vrot.slane %v63_v31, 4 }
  0x26   :  { %v70_v33 = vsel %vm21_vm0, %v60_v30, 0.0 }
  0x27   :  { %v65_v34 = vadd.f32 %v64_v32, %v63_v31  ;;  %v71_v35 = vrot.slane %v70_v33, 4 }
  0x29   :  { %v66_v36 = vrot.slane %v65_v34, 2  ;;  %v72_v37 = vadd.f32 %v71_v35, %v70_v33 }
  0x2b   :  { %v67_v38 = vadd.f32 %v66_v36, %v65_v34  ;;  %v73_v39 = vrot.slane %v72_v37, 2 }
  0x2d   :  { %v68_v40 = vrot.slane %v67_v38, 1  ;;  %v74_v41 = vadd.f32 %v73_v39, %v72_v37 }
  0x2f   :  { %v69_v42 = vadd.f32 %v68_v40, %v67_v38  ;;  %v75_v43 = vrot.slane %v74_v41, 1 }
  0x31   :  { %v76_v44 = vadd.f32 %v75_v43, %v74_v41  ;;  %v77_v45 = vmul.f32 0.5, %v69_v42 }
  0x33   :  { %v78_v46 = vmul.f32 0.5, %v76_v44  ;;  %v79_v47 = vadd.f32 1e-08, %v77_v45 }
  0x35   :  { %v80_v48 = vadd.f32 1e-08, %v78_v46  ;;  %131 = vrsqrt.f32 %v79_v47  ;;  %vm83_vm1 = vcmp.eq.f32.partialorder %v79_v47, inf  ;;  %v86_v50 = vand.u32 2147483648, %v79_v47 }
  0x36   :  { %vm85_vm2 = vcmp.eq.f32.partialorder %v79_v47, 0.0 }
  0x37   :  { %133 = vrsqrt.f32 %v80_v48  ;;  %vm90_vm3 = vcmp.eq.f32.partialorder %v80_v48, inf  ;;  %v93_v53 = vand.u32 2147483648, %v80_v48  ;;  %vm92_vm5 = vcmp.eq.f32.partialorder %v80_v48, 0.0 }
  0x3f   :  { %v132_v49 = vpop.eup %131 }
  0x40   :  { %v82_v51 = vmul.f32 %v132_v49, %v79_v47 }
  0x41   :  { %v134_v52 = vpop.eup %133 }
  0x42   :  { %v84_v54 = vsel %vm83_vm1, %v79_v47, %v82_v51  ;;  %v89_v55 = vmul.f32 %v134_v52, %v80_v48 }
  0x43   :  { %v87_v56 = vsel %vm85_vm2, %v86_v50, %v84_v54 }
  0x44   :  { %v91_v57 = vsel %vm90_vm3, %v80_v48, %v89_v55  ;;  %v96_v58 = vsel %vm95_vm4, %v87_v56, 0.0 }
  0x45   :  { %v94_v59 = vsel %vm92_vm5, %v93_v53, %v91_v57 }
  0x46   :  { %v97_v60 = vsel %vm95_vm4, %v94_v59, 0.0 }
  0x47   :  { %v98_v61 = vadd.f32 %v97_v60, %v96_v58 }
  0x49   :  { %99 = vadd.xlane.f32.xlu0 %v98_v61 }
  0xd6   :  { %v100_v62 = vpop.xlane.xlu0 %99 }
  0xd7   :  { %v101_v63 = vrot.slane %v100_v62, 4 }
  0xd9   :  { %v102_v0 = vadd.f32 %v101_v63, %v100_v62 }
  0xdb   :  { %v103_v1 = vrot.slane %v102_v0, 2 }
  0xdd   :  { %v104_v2 = vadd.f32 %v103_v1, %v102_v0 }
  0xdf   :  { %v105_v3 = vrot.slane %v104_v2, 1 }
  0xe1   :  { %v106_v4 = vadd.f32 %v105_v3, %v104_v2 }
  0xe3   :  { %127 = vpush %v106_v4 }
 0x114   :  { %s128_s9 = spop %127 }
 0x115   :  { %v108_v5 = vstv %s128_s9 }
 0x116   :  { %v110_v6 = vmul.f32 0.00390625, %v108_v5 }
 0x118   :  { %112 = vst.msk [vmem:[#allocation2] sm:$0x1] %vm111_vm6, %v110_v6 }
 0x119   :  { %146 = shalt.err (!%p143_p4)
}
 0x11a   :  { %s147_s14 = scalar_lea.hbm %s191_s1, 16 }
 0x11b   :  { %p148_p5 = scmp.ne.s32.totalorder %s191_s1, %s147_s14  ;;  %p151_p6 = scmp.lt.u32.totalorder %s147_s14, %s191_s1 }
 0x11d   :  { %p153_p7 = pnand %p151_p6, %p148_p5 }
 0x11f   :  { %156 = shalt.err (!%p153_p7)
}
 0x120   :  { %122 = dma.vmem_to_hbm [thread:$0]  %s120_s8, 16, %s191_s1, [#allocation3]  }
 0x121   :  { %157 = dma.done.wait [#allocation3], 16  }
 0x122   :  { %158 = vsyncadd [#allocation3], 4294967280 }
 0x123   :  { %126 = vsyncpa [#allocation3], 1 }

// kernel: _lambda_.19
= control target key start
LH: loop header
LB: loop body
LE: loop exit
PB: predicated region body
PF: predicated region fallthrough
CT: control target
= control target key end

     0   :  { %v301_v6 = vmov 1966171168   ;;  %v68_v8 = vlaneseq  ;;  %vm231_vm1 = vcmask 123904   ;;  %vm238_vm2 = vcmask 1024   ;;  %s395_s1 = inlined_call_operand.vmem [shape: bf16[256,16], index: 1, kind: input, shape index: {}]   ;;  %s396_s0 = inlined_call_operand.vmem [shape: bf16[2,256], index: 0, kind: input, shape index: {}]   ;;  %s397_s3 = inlined_call_operand.<no memory space> [shape: f32[1], index: 3, kind: input, shape index: {}]   ;;  %s398_s2 = inlined_call_operand.vmem [shape: f32[1,16], index: 2, kind: input, shape index: {}]   ;;  %s399_s4 = inlined_call_operand.<no memory space> [shape: f32[1], index: 4, kind: input, shape index: {}]   ;;  %s400_s5 = inlined_call_operand.vmem [shape: f32[2,1], index: 5, kind: output, shape index: {}]  }
   0x1   :  { %v285_v0 = vld [vmem:[%s395_s1 + $0x40] sm:$0xff]   ;;  %v287_v2 = vld [vmem:[%s395_s1 + $0x48] sm:$0xff]   ;;  %v289_v4 = vld [vmem:[%s395_s1 + $0x50] sm:$0xff]   ;;  %v66_v7 = vunpack.c.l.s4 %v301_v6  ;;  %v218_v28 = vstv %s397_s3 }
   0x2   :  { %v286_v1 = vld [vmem:[%s395_s1] sm:$0xff]   ;;  %262 = vmatprep.subr.bf16.mxu0 %v285_v0  ;;  %v288_v3 = vld [vmem:[%s395_s1 + $0x8] sm:$0xff]   ;;  %v290_v5 = vld [vmem:[%s395_s1 + $0x10] sm:$0xff]   ;;  %v69_v12 = vshrl.u32 %v68_v8, 7  ;;  %v236_v38 = vstv %s399_s4 }
   0x3   :  { %263 = vmatpush3.bf16.msra.mxu0 %v286_v1  ;;  %v291_v9 = vld [vmem:[%s395_s1 + $0x58] sm:$0xff]   ;;  %v67_v11 = vunpack.c.0.s8 %v66_v7  ;;  %v293_v13 = vld [vmem:[%s395_s1 + $0x60] sm:$0xff]   ;;  %v295_v16 = vld [vmem:[%s395_s1 + $0x68] sm:$0xff]  }
   0x4   :  { %264 = vmatprep.subr.bf16.mxu0 %v287_v2  ;;  %v292_v10 = vld [vmem:[%s395_s1 + $0x18] sm:$0xff]   ;;  %v294_v14 = vld [vmem:[%s395_s1 + $0x20] sm:$0xff]   ;;  %v296_v19 = vld [vmem:[%s395_s1 + $0x28] sm:$0xff]  }
   0x5   :  { %v70_v15 = vsub.s32 %v67_v11, %v69_v12  ;;  %v244_v17 = vld.sshfl [vmem:[%s396_s0] sm:$0x11 pattern:$0x75316420]  ;;  %v297_v21 = vld [vmem:[%s395_s1 + $0x70] sm:$0xff]   ;;  %v299_v23 = vld [vmem:[%s395_s1 + $0x78] sm:$0xff]  }
   0x6   :  { %v64_v18 = vcombine.high %v244_v17, %v244_v17  ;;  %v298_v22 = vld [vmem:[%s395_s1 + $0x30] sm:$0xff]   ;;  %v300_v24 = vld [vmem:[%s395_s1 + $0x38] sm:$0xff]   ;;  %v261_v34 = vld [vmem:[%s398_s2] ss:$0 sm:$0xff] }
   0x7   :  { %265 = vmatpush3.bf16.msra.mxu0 %v288_v3  ;;  %v71_v25 = vrot.slane %v244_v17, %v70_v15 }
   0x8   :  { %266 = vmatprep.subr.bf16.mxu0 %v289_v4  ;;  %v78_v20 = vrot.slane %v64_v18, %v70_v15 }
   0xa   :  { %209 = vmatprep.mubr.bf16.mxu0 %v78_v20 }
   0xb   :  { %267 = vmatpush3.bf16.msra.mxu0 %v290_v5 }
   0xc   :  { %268 = vmatprep.subr.bf16.mxu0 %v291_v9 }
   0xf   :  { %269 = vmatpush3.bf16.msra.mxu0 %v292_v10 }
  0x10   :  { %270 = vmatprep.subr.bf16.mxu0 %v293_v13 }
  0x13   :  { %271 = vmatpush3.bf16.msra.mxu0 %v294_v14 }
  0x14   :  { %272 = vmatprep.subr.bf16.mxu0 %v295_v16 }
  0x17   :  { %273 = vmatpush3.bf16.msra.mxu0 %v296_v19 }
  0x18   :  { %274 = vmatprep.subr.bf16.mxu0 %v297_v21 }
  0x1b   :  { %275 = vmatpush3.bf16.msra.mxu0 %v298_v22 }
  0x1c   :  { %276 = vmatprep.subr.bf16.mxu0 %v299_v23 }
  0x1f   :  { %277 = vmatpush3.bf16.msra.mxu0 %v300_v24 }
  0x22   :  { %210 = vmatmul.mubr.bf16.vlgmr.msra.gmra.mrb[0].mxu0 %v71_v25 }
  0xf5   :  { %v278_v26 = vpop.f32.mrb[0].mxu0 }
  0xf6   :  { %v279_v27 = vpop.f32.mrb[1].mxu0 }
  0xf7   :  { %v280_v29 = vadd.f32 %v279_v27, %v278_v26  ;;  %v281_v30 = vpop.f32.mrb[2].mxu0 }
  0xf8   :  { %v282_v31 = vpop.f32.mrb[3].mxu0 }
  0xf9   :  { %v219_v32 = vmul.f32 %v280_v29, %v218_v28 }
  0xfb   :  { %v221_v33 = vmul.f32 0.2, %v219_v32  ;;  %vm220_vm0 = vcmp.ge.f32.partialorder %v219_v32, 0.0 }
  0xfd   :  { %v222_v35 = vsel %vm220_vm0, %v219_v32, %v221_v33 }
  0xfe   :  { %v230_v36 = vmul.f32 %v261_v34, %v222_v35 }
 0x100   :  { %v232_v37 = vsel %vm231_vm1, %v230_v36, 0.0 }
 0x101   :  { %233 = vadd.xlane.f32.xlu0 %v232_v37 }
 0x18e   :  { %v234_v39 = vpop.xlane.xlu0 %233 }
 0x18f   :  { %v237_v40 = vmul.f32 %v236_v38, %v234_v39 }
 0x191   :  { %239 = vst.msk [vmem:[%s400_s5] sm:$0x3] %vm238_vm2, %v237_v40 }

// kernel: _lambda_.18
= control target key start
LH: loop header
LB: loop body
LE: loop exit
PB: predicated region body
PF: predicated region fallthrough
CT: control target
= control target key end

     0   :  { %s937_s14 = smov 0   ;;  %s939_s15 = smov 0   ;;  %s1194_s0 = inlined_call_operand.vmem [shape: bf16[2,6,6,17], index: 0, kind: input, shape index: {}]   ;;  %s1195_s1 = inlined_call_operand.vmem [shape: bf16[153,16], index: 1, kind: input, shape index: {}]   ;;  %s1196_s2 = inlined_call_operand.<no memory space> [shape: f32[1], index: 2, kind: input, shape index: {}]   ;;  %s1197_s3 = inlined_call_operand.vmem [shape: f32[2,16,16], index: 3, kind: output, shape index: {}]  }
   0x1   :  { %8 = sst [smem:[#allocation2]] %s1196_s2  ;;  %s941_s16 = smov 0  }
   0x2 LB: > { %s26_s2 = sadd.s32 1, %s897_s15  ;;  %p804_p0 = scmp.ge.s32.totalorder %s901_s16, 1  ;;  %s901_s16 = sphi %s941_s16, %s14_s16   ;;  %s897_s15 = sphi %s939_s15, %s1211_s15   ;;  %s893_s14 = sphi %s937_s14, %s1210_s14  }
   0x3   : > { %p28_p1 = scmp.ge.s32.totalorder %s26_s2, 2  ;;  %p161_p2 = scmp.lt.s32.totalorder %s901_s16, 3 }
   0x5   : > { %s1213_s2 = smov (%p28_p1, %s26_s2), 0  ;;  %p162_p3 = pnand %p804_p0, %p161_p2 }
   0x6   : > { %p192_p4 = scmp.lt.s32.totalorder (!%p162_p3), %s893_s14, 1  ;;  %v223_v0 = vlaneseq (!%p162_p3)  ;;  %v903_v1 = vmov (!%p162_p3), 1983009808   ;;  %vm315_vm0 = vcmask (!%p162_p3), 1040384   ;;  %vm316_vm1 = vcmask (!%p162_p3), 1042434   ;;  %v869_v5 = vld [vmem:[%s1195_s1] sm:$0xff] (!%p162_p3)  }
   0x7   : > { %165 = sbr.rel (%p162_p3) target bundleno = 394 (0x18a), region = 32  ;;  %v221_v2 = vunpack.c.l.s4 (!%p162_p3), %v903_v1  ;;  %v904_v6 = vmov (!%p162_p3), 0   ;;  %vm964_vm2 = vmor (!%p162_p3), %vm315_vm0, %vm316_vm1  ;;  %vm318_vm3 = vcmask (!%p162_p3), 1044484   ;;  %vm320_vm4 = vcmask (!%p162_p3), 1046534   ;;  %v870_v9 = vld [vmem:[%s1195_s1 + $0x8] sm:$0xff] (!%p162_p3)   ;;  %v871_v24 = vld [vmem:[%s1195_s1 + $0x10] sm:$0xff] (!%p162_p3)  }
   0x8   : > { %v224_v3 = vshrl.u32 (!%p162_p3), %v223_v0, 7  ;;  %652 = vmatprep.subr.bf16.mxu0 (!%p162_p3), %v904_v6  ;;  %vm252_vm5 = vsmask.f32 (!%p162_p3), 1280  ;;  %vm253_vm6 = vsmask.f32 (!%p162_p3), 3336  ;;  %vm1000_vm7 = vmor (!%p162_p3), %vm964_vm2, %vm318_vm3  ;;  %v872_v34 = vld [vmem:[%s1195_s1 + $0x18] sm:$0xff] (!%p162_p3)  }
   0x9   : > { %v222_v4 = vunpack.c.0.s8 (!%p162_p3), %v221_v2  ;;  %653 = vmatpush1.bf16.msra.mxu0 (!%p162_p3), %v869_v5  ;;  %vm255_vm8 = vsmask.f32 (!%p162_p3), 5392  ;;  %vm1032_vm9 = vmor (!%p162_p3), %vm1000_vm7, %vm320_vm4  ;;  %s905_s29 = smov (!%p162_p3), 51   ;;  %vm257_vm11 = vsmask.f32 (!%p162_p3), 7448  ;;  %v873_v58 = vld [vmem:[%s1195_s1 + $0x20] sm:$0xff] (!%p162_p3)  }
   0xa   : > { %654 = vmatprep.subr.bf16.mxu0 (!%p162_p3), %v904_v6  ;;  %vm1077_vm10 = vmor (!%p162_p3), %vm252_vm5, %vm253_vm6  ;;  %v874_v19 = vld [vmem:[%s1195_s1 + $0x28] sm:$0xff] (!%p162_p3)   ;;  %s906_s7 = smov (!%p162_p3), 34   ;;  %s907_s8 = smov (!%p162_p3), 102   ;;  %vm645_vm14 = vcmask (!%p162_p3), 1043456   ;;  %vm646_vm15 = vcmask (!%p162_p3), 1044480   ;;  %vm537_vm0 = vcmask (!%p162_p3), 138240  }
   0xb   : > { %v962_v7 = vsub.s32 (!%p162_p3), %v222_v4, %v224_v3  ;;  %vm1101_vm12 = vmor (!%p162_p3), %vm1077_vm10, %vm255_vm8  ;;  %s908_s20 = smov (!%p162_p3), 17   ;;  %s910_s21 = smov (!%p162_p3), 68   ;;  %vm541_vm1 = vcmask (!%p162_p3), 277504   ;;  %vm544_vm2 = vcmask (!%p162_p3), 416768   ;;  %vm547_vm3 = vcmask (!%p162_p3), 556032  }
   0xc   : > { %vm1119_vm13 = vmor (!%p162_p3), %vm1101_vm12, %vm257_vm11  ;;  %s912_s23 = smov (!%p162_p3), 8   ;;  %s913_s24 = smov (!%p162_p3), 119   ;;  %vm550_vm4 = vcmask (!%p162_p3), 695296   ;;  %vm553_vm5 = vcmask (!%p162_p3), 834560   ;;  %vm560_vm6 = vcmask (!%p162_p3), 64512   ;;  %vm556_vm7 = vcmask (!%p162_p3), 973824  }
   0xd   : > { %655 = vmatpush1.bf16.msra.mxu0 (!%p162_p3), %v870_v9  ;;  %vm642_vm8 = vcmask (!%p162_p3), 203776   ;;  %s693_s25 = sld [smem:[#allocation2]] (!%p162_p3)  ;;  %vm703_vm10 = vcmask (!%p162_p3), 130048  }
   0xe   : > { %s1215_s14 = smov (!%p192_p4, %s893_s14), 1  ;;  %656 = vmatprep.subr.bf16.mxu0 %v904_v6 }
   0xf   : > { %s828_s19 = smul.u32 24, %s1215_s14  ;;  %s827_s26 = sshll.u32 %s1215_s14, 4 }
  0x11   : > { %s971_s22 = scalar_lea.vmem %s1194_s0, %s828_s19  ;;  %657 = vmatpush1.bf16.msra.mxu0 %v871_v24 }
  0x12   : > { %v978_v10 = vld [vmem:[%s971_s22 + $0x4] sm:$0x7]  ;;  %v212_v11 = vld [vmem:[%s971_s22 + $0x8] sm:$0x7]  ;;  %v213_v12 = vld [vmem:[%s971_s22 + $0xc] sm:$0x7]  ;;  %658 = vmatprep.subr.bf16.mxu0 %v904_v6 }
  0x13   : > { %v214_v13 = vld [vmem:[%s971_s22 + $0x10] sm:$0x7]  ;;  %v984_v14 = vrot.slane %v212_v11, %v962_v7  ;;  %v987_v15 = vrot.slane %v213_v12, %v962_v7  ;;  %v447_v16 = vcombine.low %v978_v10, %v212_v11  ;;  %v991_v17 = vld [vmem:[%s971_s22] sm:$0x7]  ;;  %v995_v18 = vrot.slane %v978_v10, %v962_v7  ;;  %v1058_v45 = vld [vmem:[%s971_s22 + $0x14] sm:$0x7] }
  0x14   : > { %v1005_v20 = vrot.slane %v214_v13, %v962_v7  ;;  %v448_v21 = vcombine.low %v213_v12, %v214_v13  ;;  %v226_v22 = vrot.slane %v991_v17, %v962_v7  ;;  %v392_v23 = vcombine.low %v991_v17, %v978_v10  ;;  %v878_v17 = vld [vmem:[%s1195_s1 + $0x48] sm:$0x1f]   ;;  %s911_s22 = smov 85  }
  0x15   : > { %v455_v25 = vrot.slane %v447_v16, %v962_v7  ;;  %v1017_v26 = vcombine.high %v995_v18, %v995_v18  ;;  %v1021_v27 = vcombine.high %v984_v14, %v984_v14  ;;  %v1025_v28 = vcombine.high %v987_v15, %v987_v15  ;;  %659 = vmatpush1.bf16.msra.mxu0 %v872_v34 }
  0x16   : > { %v462_v29 = vrot.slane %v448_v21, %v962_v7  ;;  %v227_v30 = vcombine.high %v226_v22, %v226_v22  ;;  %v808_v32 = vrot.slane %v226_v22, 9  ;;  %v809_v33 = vrot.slane %v995_v18, 9  ;;  %660 = vmatprep.subr.bf16.mxu0 %v904_v6 }
  0x17   : > { %v328_v35 = vrot.slane %v1017_v26, 7  ;;  %v810_v36 = vrot.slane %v984_v14, 9  ;;  %v332_v37 = vrot.slane %v1021_v27, 7  ;;  %v811_v38 = vrot.slane %v987_v15, 9 }
  0x18   : > { %v463_v39 = vcombine.low %v455_v25, %v462_v29  ;;  %v324_v40 = vrot.slane %v227_v30, 7  ;;  %v336_v41 = vrot.slane %v1025_v28, 7  ;;  %v1047_v42 = vcombine.high %v1005_v20, %v1005_v20 }
  0x19   : > { %v1051_v43 = vsel %vm1032_vm9, %v809_v33, %v328_v35  ;;  %v1055_v44 = vsel %vm1032_vm9, %v810_v36, %v332_v37  ;;  %v812_v48 = vrot.slane %v1005_v20, 9  ;;  %v393_v52 = vcombine.low %v212_v11, %v213_v12  ;;  %661 = vmatpush1.bf16.msra.mxu0 %v873_v58 }
  0x1a   : > { %464 = vrot.lane.b32.xlu1 %v463_v39, %s905_s29  ;;  %v325_v46 = vsel %vm1032_vm9, %v808_v32, %v324_v40  ;;  %v1065_v47 = vsel %vm1032_vm9, %v811_v38, %v336_v41  ;;  %v363_v49 = vrot.slane %v1047_v42, 7  ;;  %v504_v53 = vcombine.low %v214_v13, %v1058_v45  ;;  %662 = vmatprep.subr.bf16.mxu0 %v904_v6  ;;  %v875_v39 = vld [vmem:[%s1195_s1 + $0x30] sm:$0xff]   ;;  %s208_s29 = scalar_lea.vmem %s1197_s3, %s827_s26 }
  0x1b   : > { %v428_v50 = vcombine.low %v325_v46, %v1051_v43  ;;  %v429_v51 = vcombine.low %v1055_v44, %v1065_v47  ;;  %v485_v54 = vcombine.low %v1051_v43, %v1055_v44  ;;  %v260_v56 = vshrl.u32 %v226_v22, 16 }
  0x1c   : > { %v263_v57 = vshll.u32 %v226_v22, 16  ;;  %v1089_v61 = vrot.slane %v393_v52, %v962_v7  ;;  %v269_v62 = vshll.u32 %v227_v30, 16  ;;  %v1094_v63 = vsel %vm1032_vm9, %v812_v48, %v363_v49 }
  0x1d   : > { %v436_v59 = vrot.slane %v428_v50, %v962_v7  ;;  %v1086_v60 = vrot.slane %v429_v51, %v962_v7  ;;  %v511_v0 = vrot.slane %v504_v53, %v962_v7  ;;  %v262_v1 = vrot.slane %v260_v56, 6  ;;  %663 = vmatpush1.bf16.msra.mxu0 %v874_v19 }
  0x1e   : > { %v265_v2 = vrot.slane %v263_v57, 7  ;;  %v274_v5 = vshrl.u32 %v995_v18, 16  ;;  %v277_v8 = vshll.u32 %v995_v18, 16  ;;  %v283_v9 = vshll.u32 %v1017_v26, 16  ;;  %664 = vmatprep.subr.bf16.mxu0 %v904_v6 }
  0x1f   : > { %v444_v3 = vcombine.low %v436_v59, %v1086_v60  ;;  %v512_v11 = vcombine.low %v1089_v61, %v511_v0  ;;  %v288_v13 = vshrl.u32 %v984_v14, 16  ;;  %v291_v16 = vshll.u32 %v984_v14, 16 }
  0x20   : > { %v266_v12 = vor.u32 %v265_v2, %v262_v1  ;;  %v271_v21 = vrot.slane %v269_v62, 7  ;;  %v276_v22 = vrot.slane %v274_v5, 6  ;;  %v279_v24 = vrot.slane %v277_v8, 7 }
  0x21   : > { %445 = vrot.lane.b32.xlu0 %v444_v3, %s906_s7  ;;  %v297_v18 = vshll.u32 %v1021_v27, 16  ;;  %513 = vrot.lane.b32.xlu1 %v512_v11, %s907_s8  ;;  %v290_v26 = vrot.slane %v288_v13, 6  ;;  %v293_v29 = vrot.slane %v291_v16, 7  ;;  %v302_v30 = vshrl.u32 %v987_v15, 16 }
  0x22   : > { %v267_v25 = vrot.slane %v266_v12, 2  ;;  %v280_v32 = vor.u32 %v279_v24, %v276_v22  ;;  %v285_v33 = vrot.slane %v283_v9, 7  ;;  %v305_v27 = vshll.u32 %v987_v15, 16  ;;  %665 = vmatpush1.bf16.msra.mxu0 %v875_v39  ;;  %v877_v12 = vld [vmem:[%s1195_s1 + $0x40] sm:$0xff]  }
  0x23   : > { %v311_v34 = vshll.u32 %v1025_v28, 16  ;;  %v294_v35 = vor.u32 %v293_v29, %v290_v26  ;;  %v299_v36 = vrot.slane %v297_v18, 7  ;;  %v304_v37 = vrot.slane %v302_v30, 6  ;;  %666 = vmatprep.subr.bf16.mxu0 %v904_v6 }
  0x24   : > { %v348_v38 = vshrl.u32 %v1005_v20, 16  ;;  %v272_v40 = vsel %vm1119_vm13, %v267_v25, %v271_v21  ;;  %v281_v41 = vrot.slane %v280_v32, 2  ;;  %v307_v46 = vrot.slane %v305_v27, 7 }
  0x25   : > { %v351_v48 = vshll.u32 %v1005_v20, 16  ;;  %v372_v15 = vrot.slane %v1058_v45, %v962_v7  ;;  %v295_v28 = vrot.slane %v294_v35, 2  ;;  %v357_v50 = vshll.u32 %v1047_v42, 16  ;;  %v876_v42 = vld [vmem:[%s1195_s1 + $0x38] sm:$0xff]  }
  0x26   : > { %v350_v49 = vrot.slane %v348_v38, 6  ;;  %v286_v51 = vsel %vm1119_vm13, %v281_v41, %v285_v33  ;;  %v308_v52 = vor.u32 %v307_v46, %v304_v37  ;;  %v313_v53 = vrot.slane %v311_v34, 7  ;;  %667 = vmatpush1.bf16.msra.mxu0 %v876_v42 }
  0x27   : > { %v353_v55 = vrot.slane %v351_v48, 7  ;;  %v486_v56 = vcombine.low %v1065_v47, %v1094_v63  ;;  %v409_v57 = vcombine.low %v272_v40, %v286_v51  ;;  %v493_v20 = vrot.slane %v485_v54, %v962_v7  ;;  %668 = vmatprep.subr.bf16.mxu0 %v904_v6 }
  0x28   : > { %v373_v45 = vcombine.high %v372_v15, %v372_v15  ;;  %v300_v58 = vsel %vm1119_vm13, %v295_v28, %v299_v36  ;;  %v309_v59 = vrot.slane %v308_v52, 2  ;;  %v359_v0 = vrot.slane %v357_v50, 7 }
  0x29   : > { %v354_v62 = vor.u32 %v353_v55, %v350_v49  ;;  %v466_v47 = vcombine.low %v286_v51, %v300_v58  ;;  %v813_v1 = vrot.slane %v372_v15, 9  ;;  %v375_v3 = vshrl.u32 %v372_v15, 16 }
  0x2a   : > { %v390_v2 = vrot.slane %v373_v45, 7  ;;  %v314_v43 = vsel %vm1119_vm13, %v309_v59, %v313_v53  ;;  %v417_v44 = vrot.slane %v409_v57, %v962_v7  ;;  %v378_v4 = vshll.u32 %v372_v15, 16  ;;  %669 = vmatpush1.bf16.msra.mxu0 %v877_v12 }
  0x2b   : > { %v355_v54 = vrot.slane %v354_v62, 2  ;;  %v410_v5 = vcombine.low %v300_v58, %v314_v43  ;;  %v377_v9 = vrot.slane %v375_v3, 6  ;;  %v384_v11 = vshll.u32 %v373_v45, 16  ;;  %670 = vmatprep.subr.bf16.mxu0 %v904_v6 }
  0x2c   : > { %v391_v8 = vsel %vm1032_vm9, %v813_v1, %v390_v2  ;;  %v380_v19 = vrot.slane %v378_v4, 7  ;;  %v400_v21 = vrot.slane %v392_v23, %v962_v7  ;;  %v474_v24 = vrot.slane %v466_v47, %v962_v7 }
  0x2d   : > { %v360_v13 = vsel %vm1119_vm13, %v355_v54, %v359_v0  ;;  %v526_v16 = vcombine.low %v1094_v63, %v391_v8  ;;  %v424_v31 = vrot.slane %v410_v5, %v962_v7  ;;  %v500_v18 = vrot.slane %v486_v56, %v962_v7 }
  0x2e   : > { %v467_v22 = vcombine.low %v314_v43, %v360_v13  ;;  %v381_v25 = vor.u32 %v380_v19, %v377_v9  ;;  %v386_v26 = vrot.slane %v384_v11, 7  ;;  %v408_v29 = vcombine.low %v400_v21, %v1089_v61 }
  0x2f   : > { %v425_v63 = vcombine.low %v417_v44, %v424_v31  ;;  %v533_v32 = vrot.slane %v526_v16, %v962_v7  ;;  %v501_v33 = vcombine.low %v493_v20, %v500_v18  ;;  %v909_v27 = vmov 65535  }
  0x30   : > { %v481_v30 = vrot.slane %v467_v22, %v962_v7  ;;  %v382_v10 = vrot.slane %v381_v25, 2  ;;  %v647_v34 = vsel %vm645_vm14, 4294967295, %v909_v27  ;;  %v694_v57 = vstv %s693_s25 }
  0x31   : > { %426 = vrot.lane.b32.xlu0 %v425_v63, %s908_s20  ;;  %v534_v35 = vcombine.low %v1086_v60, %v533_v32  ;;  %v648_v36 = vsel %vm646_vm15, %v647_v34, 0 }
  0x32   : > { %v482_v23 = vcombine.low %v474_v24, %v481_v30  ;;  %v387_v61 = vsel %vm1119_vm13, %v382_v10, %v386_v26  ;;  %v650_v37 = vand.u32 %v878_v17, %v648_v36 }
  0x33   : > { %v515_v6 = vcombine.low %v360_v13, %v387_v61 }
  0x34   : > { %483 = vrot.lane.b32.xlu1 %v482_v23, %s910_s21  ;;  %671 = vmatpush1.bf16.msra.mxu0 %v650_v37 }
  0x35   : > { %502 = vrot.lane.b32.xlu0 %v501_v33, %s911_s22  ;;  %v522_v38 = vrot.slane %v515_v6, %v962_v7 }
  0x37   : > { %v523_v39 = vcombine.low %v424_v31, %v522_v38 }
  0x38   : > { %535 = vrot.lane.b32.xlu1 %v534_v35, %s912_s23 }
  0x39   : > { %524 = vrot.lane.b32.xlu0 %v523_v39, %s913_s24 }
  0x8c   : > { %v465_v14 = vpop.permute.xlu1 %464 }
  0x93   : > { %v446_v40 = vpop.permute.xlu0 %445  ;;  %v514_v41 = vpop.permute.xlu1 %513 }
  0xa3   : > { %v427_v46 = vpop.permute.xlu0 %426 }
  0xa4   : > { %v540_v60 = vsel %vm537_vm0, %v408_v29, %v427_v46 }
  0xa5   : > { %v543_v48 = vsel %vm541_vm1, %v540_v60, %v446_v40 }
  0xa6   : > { %v484_v15 = vpop.permute.xlu1 %483  ;;  %v546_v28 = vsel %vm544_vm2, %v543_v48, %v465_v14 }
  0xa7   : > { %v549_v7 = vsel %vm547_vm3, %v546_v28, %v484_v15  ;;  %v503_v49 = vpop.permute.xlu0 %502 }
  0xa8   : > { %v552_v50 = vsel %vm550_vm4, %v549_v7, %v503_v49 }
  0xa9   : > { %v555_v53 = vsel %vm553_vm5, %v552_v50, %v514_v41 }
  0xaa   : > { %v536_v51 = vpop.permute.xlu1 %535 }
  0xab   : > { %v525_v52 = vpop.permute.xlu0 %524 }
  0xac   : > { %v562_v55 = vsel %vm560_vm6, %v525_v52, %v536_v51  ;;  %v558_v56 = vsel %vm556_vm7, %v555_v53, %v525_v52 }
  0xad   : > { %824 = vmatprep.mubr.msk.bf16.mxu0 %vm642_vm8, %v562_v55 }
  0xae   : > { %685 = vmatmul.mubr.bf16.vlgmr.msra.gmra.mrb[0].mxu0 %v558_v56 }
 0x181   : > { %v686_v20 = vpop.f32.mrb[0].mxu0 }
 0x182   : > { %v695_v45 = vmul.f32 %v694_v57, %v686_v20  ;;  %v688_v42 = vpop.f32.mrb[1].mxu0 }
 0x183   : > { %v689_v58 = vpop.f32.mrb[2].mxu0 }
 0x184   : > { %vm697_vm9 = vcmp.ge.f32.partialorder %v695_v45, 0.0  ;;  %v699_v59 = vmul.f32 0.2, %v695_v45  ;;  %v696_v62 = vmul.f32 %v694_v57, %v689_v58  ;;  %v691_v0 = vpop.f32.mrb[3].mxu0 }
 0x186   : > { %v701_v47 = vsel %vm697_vm9, %v695_v45, %v699_v59  ;;  %vm698_vm11 = vcmp.ge.f32.partialorder %v696_v62, 0.0  ;;  %v700_v1 = vmul.f32 0.2, %v696_v62 }
 0x187   : > { %704 = vst.msk [vmem:[%s208_s29] sm:$0xff] %vm703_vm10, %v701_v47 }
 0x188   : > { %v702_v2 = vsel %vm698_vm11, %v696_v62, %v700_v1 }
 0x189   : > { %705 = vst.msk [vmem:[%s208_s29 + $0x8] sm:$0xff] %vm703_vm10, %v702_v2 }
 0x18a PF: > { %s14_s16 = sadd.s32 1, %s901_s16   ;;  %s1210_s14 = smov %s897_s15 }
 0x18b   : > { %p11_p5 = scmp.ge.s32.totalorder %s14_s16, 4   ;;  %s1211_s15 = smov %s1213_s2 }
 0x18d   :  { %13 = sbr.rel (!%p11_p5) target bundleno = 2 (0x2), region = 65 }

</bundles_post_ra>
